<compile_context>
chip_gen: v5e
topology: v5e:2x2
jax: 0.10.0
libtpu: 0.0.40
codegen_flags: <defaults>
</compile_context>

<pallas_src>
import math
from functools import partial, reduce

import jax
import jax.numpy as jnp
from jax import lax
from jax.experimental import pallas as pl
from jax.experimental.pallas import tpu as pltpu

# ---------------- config (small, deterministic) ----------------
CFG = dict(image_size=16, patch_size=4, n_embd=32, dim_att=32,
           dim_ffn=64, n_layer=2, dropout=0.0)


# ---------------- fused encoder kernel ----------------

def _encoder_kernel(x_ref, pe_ref, ln0_ref, lnf_ref, ln_ref, att_tdf_ref,
                    att_w_ref, att_wo_ref, ffn_w_ref, ffn_wv_ref,
                    mlp_w1_ref, mlp_b1_ref, mlp_w2_ref, mlp_b2_ref,
                    o_ref, *, B, T, A, F, L):
    f32 = jnp.float32
    bf16 = jnp.bfloat16
    C = pe_ref.shape[1]
    N = B * T                                   # batch-major flat rows, row = b*T + t

    def layer_norm(h, gb, eps):
        mu = jnp.mean(h, axis=-1, keepdims=True)
        var = jnp.mean(jnp.square(h - mu), axis=-1, keepdims=True)
        return (h - mu) * lax.rsqrt(var + eps) * gb[0:1, :] + gb[1:2, :]

    def gelu(v):
        # TODO(synk): tanh-approx GELU; PyTorch nn.GELU() default is exact erf (~1e-3 diff).
        c = 0.7978845608028654                  # sqrt(2/pi)
        return 0.5 * v * (1.0 + jnp.tanh(c * (v + 0.044715 * v * v * v)))

    # ---- fused input path: token drop + positional embedding (batch-major rows) ----
    pe = pe_ref[...]                            # (T, C)
    h = jnp.concatenate([x_ref[b][1:, :] + pe for b in range(B)], axis=0)   # (N, C) f32

    # time-shift mask, hoisted out of the layer loop (rows with t == 0 -> zero).
    row = lax.broadcasted_iota(jnp.int32, (N, 1), 0)
    is_t0 = reduce(jnp.logical_or, [row == b * T for b in range(B)])

    def time_shift(v):
        # nn.ZeroPad2d((0,0,1,-1)) per batch: shift time by one, zero t==0 rows.
        return jnp.where(is_t0, 0.0, pltpu.roll(v, shift=1, axis=0))

    # ln0 (eps 1e-5); dropout p=0.0 -> identity.
    h = layer_norm(h, ln0_ref[...], 1e-5)

    for l in range(L):                          # static unroll over layers
        ln_l = ln_ref[l]                        # (6, C): ln1_g/b, ln2_g/b, ln3_g/b

        # ---------------- RWKV_TimeMix ----------------
        x1 = layer_norm(h, ln_l[0:2, :], 1e-6)
        # merged [x | shift(x)] matmul against the pre-folded (2C, 3A) weight
        xc = jnp.concatenate([x1, time_shift(x1)], axis=1).astype(bf16)     # (N, 2C)
        kvr = jnp.dot(xc, att_w_ref[l], preferred_element_type=f32)         # (N, 3A)
        k = kvr[:, 0:A]
        v = kvr[:, A:2 * A]
        sr = jax.nn.sigmoid(kvr[:, 2 * A:3 * A])

        # WKV recurrence (wkv_cuda bf16 mode: k/v/u/y rounded via bf16, math in f32).
        tdf = att_tdf_ref[l]                    # (2, A): time_decay, time_first
        w_dec = -jnp.exp(tdf[0:1, :])
        u = tdf[1:2, :].astype(bf16).astype(f32)
        kb = k.astype(bf16).astype(f32)
        vb = v.astype(bf16).astype(f32)

        # lane-stack the batch: (T, B*A) -> each time step is one static row slice.
        kc = jnp.concatenate([kb[b * T:(b + 1) * T, :] for b in range(B)], axis=1)
        vc = jnp.concatenate([vb[b * T:(b + 1) * T, :] for b in range(B)], axis=1)
        u_c = jnp.concatenate([u] * B, axis=1)
        w_c = jnp.concatenate([w_dec] * B, axis=1)

        aa = jnp.zeros((1, B * A), f32)
        bb = jnp.zeros((1, B * A), f32)
        pp = jnp.full((1, B * A), -1e38, f32)
        ys = []
        for t in range(T):                      # unrolled; outputs kept in registers
            kt = kc[t:t + 1, :]
            vt = vc[t:t + 1, :]
            ww = u_c + kt
            p = jnp.maximum(pp, ww)
            e1 = jnp.exp(pp - p)
            e2 = jnp.exp(ww - p)
            ys.append((e1 * aa + e2 * vt) * pl.reciprocal(e1 * bb + e2, approx=True))
            ww2 = w_c + pp
            p2 = jnp.maximum(ww2, kt)
            e1b = jnp.exp(ww2 - p2)
            e2b = jnp.exp(kt - p2)
            aa = e1b * aa + e2b * vt
            bb = e1b * bb + e2b
            pp = p2
        y_tm = jnp.concatenate(ys, axis=0)                                  # (T, B*A)
        y = jnp.concatenate([y_tm[:, b * A:(b + 1) * A] for b in range(B)], axis=0)
        y = y.astype(bf16).astype(f32)          # bf16-mode output rounding (once)
        h = h + jnp.dot((sr * y).astype(bf16), att_wo_ref[l],
                        preferred_element_type=f32)

        # ---------------- RWKV_ChannelMix ----------------
        x2 = layer_norm(h, ln_l[2:4, :], 1e-6)
        xc2 = jnp.concatenate([x2, time_shift(x2)], axis=1).astype(bf16)    # (N, 2C)
        kr = jnp.dot(xc2, ffn_w_ref[l], preferred_element_type=f32)         # (N, F+C)
        kk = jnp.square(jnp.maximum(kr[:, 0:F], 0.0))                       # relu(k)^2
        kv = jnp.dot(kk.astype(bf16), ffn_wv_ref[l], preferred_element_type=f32)
        h = h + jax.nn.sigmoid(kr[:, F:F + C]) * kv

        # ---------------- MLPBlock ----------------
        x3 = layer_norm(h, ln_l[4:6, :], 1e-6)
        hid = gelu(jnp.dot(x3.astype(bf16), mlp_w1_ref[l],
                           preferred_element_type=f32) + mlp_b1_ref[l])
        h = h + jnp.dot(hid.astype(bf16), mlp_w2_ref[l],
                        preferred_element_type=f32) + mlp_b2_ref[l]

    h = layer_norm(h, lnf_ref[...], 1e-6)       # final ln, eps=1e-6
    # fused output path: write directly in (B, T, C) layout.
    for b in range(B):
        o_ref[b] = h[b * T:(b + 1) * T, :]


# ---------------- one-time parameter packing (outside the jitted forward) ----------------

def pack_params(params):
    """Fold time-mix lerps into the projection weights, merge the x/shift weight
    pairs into (2C, out) blocks, stack per-layer params, cast matmul weights to
    bf16.  Call ONCE at init — not on the per-call path."""
    bf16 = jnp.bfloat16

    def fold(tm, w):                            # (C,), (C,out) -> (2C,out): [tm*W ; (1-tm)*W]
        tm = tm.reshape(-1, 1)
        return jnp.concatenate([tm * w, (1.0 - tm) * w], axis=0)

    ln, att_tdf, att_w, att_wo = [], [], [], []
    ffn_w, ffn_wv = [], []
    mlp_w1, mlp_b1, mlp_w2, mlp_b2 = [], [], [], []
    for lp in params['layers']:
        a, f, m = lp['att'], lp['ffn'], lp['mlp']
        ln.append(jnp.stack([lp['ln1_g'], lp['ln1_b'], lp['ln2_g'], lp['ln2_b'],
                             lp['ln3_g'], lp['ln3_b']]))
        att_tdf.append(jnp.stack([a['time_decay'], a['time_first']]))
        att_w.append(jnp.concatenate([fold(a['tm_k'], a['wk']),
                                      fold(a['tm_v'], a['wv']),
                                      fold(a['tm_r'], a['wr'])], axis=1))   # (2C, 3A)
        att_wo.append(a['wo'])
        ffn_w.append(jnp.concatenate([fold(f['tm_k'], f['wk']),
                                      fold(f['tm_r'], f['wr'])], axis=1))   # (2C, F+C)
        ffn_wv.append(f['wv'])
        mlp_w1.append(m['w1']); mlp_b1.append(m['b1'].reshape(1, -1))
        mlp_w2.append(m['w2']); mlp_b2.append(m['b2'].reshape(1, -1))

    stk = jnp.stack
    return dict(
        pos_emb=params['pos_emb'],
        ln0=jnp.stack([params['ln0_g'], params['ln0_b']]),
        lnf=jnp.stack([params['ln_g'], params['ln_b']]),
        ln=stk(ln), att_tdf=stk(att_tdf),
        att_w=stk(att_w).astype(bf16), att_wo=stk(att_wo).astype(bf16),
        ffn_w=stk(ffn_w).astype(bf16), ffn_wv=stk(ffn_wv).astype(bf16),
        mlp_w1=stk(mlp_w1).astype(bf16), mlp_b1=stk(mlp_b1),
        mlp_w2=stk(mlp_w2).astype(bf16), mlp_b2=stk(mlp_b2),
    )


def encoder_forward(x, p):
    """x: (B, T+1, C), p: output of pack_params.  One fused pallas_call; the
    kernel does the token-drop / pos-emb add and writes (B, T, C) directly."""
    B, _, C = x.shape
    T = p['pos_emb'].shape[0]
    L, _, A = p['att_tdf'].shape
    F = p['mlp_b1'].shape[-1]
    return pl.pallas_call(
        partial(_encoder_kernel, B=B, T=T, A=A, F=F, L=L),
        out_shape=jax.ShapeDtypeStruct((B, T, C), jnp.float32),
    )(x, p['pos_emb'], p['ln0'], p['lnf'], p['ln'], p['att_tdf'],
      p['att_w'], p['att_wo'], p['ffn_w'], p['ffn_wv'],
      p['mlp_w1'], p['mlp_b1'], p['mlp_w2'], p['mlp_b2'])


# ---------------- deterministic parameter init ----------------

def _xavier(key, fan_out, fan_in):
    a = math.sqrt(6.0 / (fan_in + fan_out))
    w = jax.random.uniform(key, (fan_out, fan_in), jnp.float32, -a, a)
    return w.T  # stored as (in, out) for direct x @ W


def init_params(key, cfg):
    C, A, F = cfg['n_embd'], cfg['dim_att'], cfg['dim_ffn']
    T = (cfg['image_size'] // cfg['patch_size']) ** 2
    keys = iter(jax.random.split(key, 512))
    nk = lambda: next(keys)
    params = dict(
        pos_emb=jax.random.normal(nk(), (T, C), jnp.float32) * 0.02,
        ln0_g=jnp.ones((C,), jnp.float32), ln0_b=jnp.zeros((C,), jnp.float32),
        ln_g=jnp.ones((C,), jnp.float32), ln_b=jnp.zeros((C,), jnp.float32),
        layers=[],
    )
    for _ in range(cfg['n_layer']):
        att = dict(
            time_decay=jax.random.normal(nk(), (A,), jnp.float32) * 0.02,
            time_first=jax.random.normal(nk(), (A,), jnp.float32) * 0.02,
            tm_k=jax.random.normal(nk(), (C,), jnp.float32) * 0.02,
            tm_v=jax.random.normal(nk(), (C,), jnp.float32) * 0.02,
            tm_r=jax.random.normal(nk(), (C,), jnp.float32) * 0.02,
            wk=_xavier(nk(), A, C), wv=_xavier(nk(), A, C),
            wr=_xavier(nk(), A, C), wo=_xavier(nk(), C, A),
        )
        ffn = dict(
            tm_k=jax.random.normal(nk(), (C,), jnp.float32) * 0.02,
            tm_r=jax.random.normal(nk(), (C,), jnp.float32) * 0.02,
            wk=_xavier(nk(), F, C), wr=_xavier(nk(), C, C), wv=_xavier(nk(), C, F),
        )
        mlp_p = dict(
            w1=_xavier(nk(), F, C), b1=jax.random.normal(nk(), (F,), jnp.float32) * 1e-6,
            w2=_xavier(nk(), C, F), b2=jax.random.normal(nk(), (C,), jnp.float32) * 1e-6,
        )
        params['layers'].append(dict(
            ln1_g=jnp.ones((C,), jnp.float32), ln1_b=jnp.zeros((C,), jnp.float32),
            ln2_g=jnp.ones((C,), jnp.float32), ln2_b=jnp.zeros((C,), jnp.float32),
            ln3_g=jnp.ones((C,), jnp.float32), ln3_b=jnp.zeros((C,), jnp.float32),
            att=att, ffn=ffn, mlp=mlp_p,
        ))
    return params


if __name__ == "__main__":
    key = jax.random.PRNGKey(0)
    pkey, xkey = jax.random.split(key)
    params = init_params(pkey, CFG)
    packed = pack_params(params)          # one-time packing, off the per-call path

    T = (CFG['image_size'] // CFG['patch_size']) ** 2   # 16 patches
    B, C = 2, CFG['n_embd']
    # Encoder drops token 0, so sequence length is T+1 on input.
    x = jax.random.normal(xkey, (B, T + 1, C), jnp.float32)

    fwd = jax.jit(encoder_forward)
    out = fwd(x, packed)
    jax.block_until_ready(out)
    assert out.shape == (B, T, C)
    assert bool(jnp.all(jnp.isfinite(out)))
    print("KERNEL_OK")
</pallas_src>

<mosaic_0001>
module attributes {stable_mosaic.version = 11 : i64} {
  func.func @_encoder_kernel(%arg0: memref<2x17x32xf32, #tpu.memory_space<vmem>>, %arg1: memref<16x32xf32, #tpu.memory_space<vmem>>, %arg2: memref<2x32xf32, #tpu.memory_space<vmem>>, %arg3: memref<2x32xf32, #tpu.memory_space<vmem>>, %arg4: memref<2x6x32xf32, #tpu.memory_space<vmem>>, %arg5: memref<2x2x32xf32, #tpu.memory_space<vmem>>, %arg6: memref<2x64x96xbf16, #tpu.memory_space<vmem>>, %arg7: memref<2x32x32xbf16, #tpu.memory_space<vmem>>, %arg8: memref<2x64x96xbf16, #tpu.memory_space<vmem>>, %arg9: memref<2x64x32xbf16, #tpu.memory_space<vmem>>, %arg10: memref<2x32x64xbf16, #tpu.memory_space<vmem>>, %arg11: memref<2x1x64xf32, #tpu.memory_space<vmem>>, %arg12: memref<2x64x32xbf16, #tpu.memory_space<vmem>>, %arg13: memref<2x1x32xf32, #tpu.memory_space<vmem>>, %arg14: memref<2x16x32xf32, #tpu.memory_space<vmem>>) attributes {dimension_semantics = [], scalar_prefetch = 0 : i64, scratch_operands = 0 : i64, tpu.core_type = #tpu.core_type<tc>} {
    %c0 = arith.constant 0 : index
    %c0_0 = arith.constant 0 : index
    %0 = vector.load %arg1[%c0, %c0_0] : memref<16x32xf32, #tpu.memory_space<vmem>>, vector<16x32xf32>
    %c0_1 = arith.constant 0 : index
    %c0_2 = arith.constant 0 : index
    %c0_3 = arith.constant 0 : index
    %1 = vector.load %arg0[%c0_1, %c0_2, %c0_3] : memref<2x17x32xf32, #tpu.memory_space<vmem>>, vector<1x17x32xf32>
    %2 = vector.shape_cast %1 : vector<1x17x32xf32> to vector<17x32xf32>
    %3 = vector.extract_strided_slice %2 {offsets = [1, 0], sizes = [16, 32], strides = [1, 1]} : vector<17x32xf32> to vector<16x32xf32>
    %4 = arith.addf %3, %0 : vector<16x32xf32>
    %c1 = arith.constant 1 : index
    %c0_4 = arith.constant 0 : index
    %c0_5 = arith.constant 0 : index
    %5 = vector.load %arg0[%c1, %c0_4, %c0_5] : memref<2x17x32xf32, #tpu.memory_space<vmem>>, vector<1x17x32xf32>
    %6 = vector.shape_cast %5 : vector<1x17x32xf32> to vector<17x32xf32>
    %7 = vector.extract_strided_slice %6 {offsets = [1, 0], sizes = [16, 32], strides = [1, 1]} : vector<17x32xf32> to vector<16x32xf32>
    %8 = arith.addf %7, %0 : vector<16x32xf32>
    %9 = tpu.concatenate %4, %8 in 0 : vector<16x32xf32>, vector<16x32xf32> -> vector<32x32xf32>
    %10 = tpu.iota {dimensions = array<i32: 0>} : vector<32x1xi32>
    %c0_i32 = arith.constant 0 : i32
    %11 = vector.broadcast %c0_i32 : i32 to vector<32x1xi32>
    %12 = arith.cmpi eq, %10, %11 : vector<32x1xi32>
    %c16_i32 = arith.constant 16 : i32
    %13 = vector.broadcast %c16_i32 : i32 to vector<32x1xi32>
    %14 = arith.cmpi eq, %10, %13 : vector<32x1xi32>
    %15 = arith.ori %12, %14 : vector<32x1xi1>
    %c0_6 = arith.constant 0 : index
    %c0_7 = arith.constant 0 : index
    %16 = vector.load %arg2[%c0_6, %c0_7] : memref<2x32xf32, #tpu.memory_space<vmem>>, vector<2x32xf32>
    %cst = arith.constant dense<0.000000e+00> : vector<32xf32>
    %17 = vector.multi_reduction <add>, %9, %cst [1] : vector<32x32xf32> to vector<32xf32>
    %18 = vector.shape_cast %17 : vector<32xf32> to vector<32x1xf32>
    %cst_8 = arith.constant 3.200000e+01 : f32
    %19 = vector.broadcast %cst_8 : f32 to vector<32x1xf32>
    %20 = arith.divf %18, %19 : vector<32x1xf32>
    %21 = vector.broadcast %20 : vector<32x1xf32> to vector<32x32xf32>
    %22 = arith.subf %9, %21 : vector<32x32xf32>
    %23 = arith.mulf %22, %22 : vector<32x32xf32>
    %cst_9 = arith.constant dense<0.000000e+00> : vector<32xf32>
    %24 = vector.multi_reduction <add>, %23, %cst_9 [1] : vector<32x32xf32> to vector<32xf32>
    %25 = vector.shape_cast %24 : vector<32xf32> to vector<32x1xf32>
    %cst_10 = arith.constant 3.200000e+01 : f32
    %26 = vector.broadcast %cst_10 : f32 to vector<32x1xf32>
    %27 = arith.divf %25, %26 : vector<32x1xf32>
    %28 = vector.broadcast %20 : vector<32x1xf32> to vector<32x32xf32>
    %29 = arith.subf %9, %28 : vector<32x32xf32>
    %cst_11 = arith.constant 9.99999974E-6 : f32
    %30 = vector.broadcast %cst_11 : f32 to vector<32x1xf32>
    %31 = arith.addf %27, %30 : vector<32x1xf32>
    %32 = math.rsqrt %31 : vector<32x1xf32>
    %33 = vector.broadcast %32 : vector<32x1xf32> to vector<32x32xf32>
    %34 = arith.mulf %29, %33 : vector<32x32xf32>
    %35 = vector.extract_strided_slice %16 {offsets = [0, 0], sizes = [1, 32], strides = [1, 1]} : vector<2x32xf32> to vector<1x32xf32>
    %36 = vector.broadcast %35 : vector<1x32xf32> to vector<32x32xf32>
    %37 = arith.mulf %34, %36 : vector<32x32xf32>
    %38 = vector.extract_strided_slice %16 {offsets = [1, 0], sizes = [1, 32], strides = [1, 1]} : vector<2x32xf32> to vector<1x32xf32>
    %39 = vector.broadcast %38 : vector<1x32xf32> to vector<32x32xf32>
    %40 = arith.addf %37, %39 : vector<32x32xf32>
    %c0_12 = arith.constant 0 : index
    %c0_13 = arith.constant 0 : index
    %c0_14 = arith.constant 0 : index
    %41 = vector.load %arg4[%c0_12, %c0_13, %c0_14] : memref<2x6x32xf32, #tpu.memory_space<vmem>>, vector<1x6x32xf32>
    %42 = vector.shape_cast %41 : vector<1x6x32xf32> to vector<6x32xf32>
    %43 = vector.extract_strided_slice %42 {offsets = [0, 0], sizes = [2, 32], strides = [1, 1]} : vector<6x32xf32> to vector<2x32xf32>
    %cst_15 = arith.constant dense<0.000000e+00> : vector<32xf32>
    %44 = vector.multi_reduction <add>, %40, %cst_15 [1] : vector<32x32xf32> to vector<32xf32>
    %45 = vector.shape_cast %44 : vector<32xf32> to vector<32x1xf32>
    %cst_16 = arith.constant 3.200000e+01 : f32
    %46 = vector.broadcast %cst_16 : f32 to vector<32x1xf32>
    %47 = arith.divf %45, %46 : vector<32x1xf32>
    %48 = vector.broadcast %47 : vector<32x1xf32> to vector<32x32xf32>
    %49 = arith.subf %40, %48 : vector<32x32xf32>
    %50 = arith.mulf %49, %49 : vector<32x32xf32>
    %cst_17 = arith.constant dense<0.000000e+00> : vector<32xf32>
    %51 = vector.multi_reduction <add>, %50, %cst_17 [1] : vector<32x32xf32> to vector<32xf32>
    %52 = vector.shape_cast %51 : vector<32xf32> to vector<32x1xf32>
    %cst_18 = arith.constant 3.200000e+01 : f32
    %53 = vector.broadcast %cst_18 : f32 to vector<32x1xf32>
    %54 = arith.divf %52, %53 : vector<32x1xf32>
    %55 = vector.broadcast %47 : vector<32x1xf32> to vector<32x32xf32>
    %56 = arith.subf %40, %55 : vector<32x32xf32>
    %cst_19 = arith.constant 9.99999997E-7 : f32
    %57 = vector.broadcast %cst_19 : f32 to vector<32x1xf32>
    %58 = arith.addf %54, %57 : vector<32x1xf32>
    %59 = math.rsqrt %58 : vector<32x1xf32>
    %60 = vector.broadcast %59 : vector<32x1xf32> to vector<32x32xf32>
    %61 = arith.mulf %56, %60 : vector<32x32xf32>
    %62 = vector.extract_strided_slice %43 {offsets = [0, 0], sizes = [1, 32], strides = [1, 1]} : vector<2x32xf32> to vector<1x32xf32>
    %63 = vector.broadcast %62 : vector<1x32xf32> to vector<32x32xf32>
    %64 = arith.mulf %61, %63 : vector<32x32xf32>
    %65 = vector.extract_strided_slice %43 {offsets = [1, 0], sizes = [1, 32], strides = [1, 1]} : vector<2x32xf32> to vector<1x32xf32>
    %66 = vector.broadcast %65 : vector<1x32xf32> to vector<32x32xf32>
    %67 = arith.addf %64, %66 : vector<32x32xf32>
    %c1_i32 = arith.constant 1 : i32
    %68 = tpu.dynamic_rotate %67 by %c1_i32 dim 0 : vector<32x32xf32>, i32 -> vector<32x32xf32>
    %cst_20 = arith.constant 0.000000e+00 : f32
    %69 = vector.shape_cast %15 : vector<32x1xi1> to vector<32x1xi1>
    %70 = vector.broadcast %69 : vector<32x1xi1> to vector<32x32xi1>
    %71 = vector.broadcast %cst_20 : f32 to vector<32x32xf32>
    %72 = arith.select %70, %71, %68 : vector<32x32xi1>, vector<32x32xf32>
    %73 = tpu.concatenate %67, %72 in 1 : vector<32x32xf32>, vector<32x32xf32> -> vector<32x64xf32>
    %74 = arith.truncf %73 : vector<32x64xf32> to vector<32x64xbf16>
    %c0_21 = arith.constant 0 : index
    %c0_22 = arith.constant 0 : index
    %c0_23 = arith.constant 0 : index
    %75 = vector.load %arg6[%c0_21, %c0_22, %c0_23] : memref<2x64x96xbf16, #tpu.memory_space<vmem>>, vector<1x64x96xbf16>
    %76 = vector.shape_cast %75 : vector<1x64x96xbf16> to vector<64x96xbf16>
    %cst_24 = arith.constant dense<0.000000e+00> : vector<32x96xf32>
    %77 = tpu.matmul %74, %76, %cst_24 {dimension_numbers = #tpu.dot_dimension_numbers<[1], [0], [0], [1], [0, 0, 1, 1], [], []>} : vector<32x64xbf16>, vector<64x96xbf16>, vector<32x96xf32> -> vector<32x96xf32>
    %78 = vector.extract_strided_slice %77 {offsets = [0, 0], sizes = [32, 32], strides = [1, 1]} : vector<32x96xf32> to vector<32x32xf32>
    %79 = vector.extract_strided_slice %77 {offsets = [0, 32], sizes = [32, 32], strides = [1, 1]} : vector<32x96xf32> to vector<32x32xf32>
    %80 = vector.extract_strided_slice %77 {offsets = [0, 64], sizes = [32, 32], strides = [1, 1]} : vector<32x96xf32> to vector<32x32xf32>
    %81 = arith.negf %80 : vector<32x32xf32>
    %82 = math.exp %81 : vector<32x32xf32>
    %cst_25 = arith.constant 1.000000e+00 : f32
    %83 = vector.broadcast %cst_25 : f32 to vector<32x32xf32>
    %84 = arith.addf %83, %82 : vector<32x32xf32>
    %85 = arith.divf %83, %84 : vector<32x32xf32>
    %c0_26 = arith.constant 0 : index
    %c0_27 = arith.constant 0 : index
    %c0_28 = arith.constant 0 : index
    %86 = vector.load %arg5[%c0_26, %c0_27, %c0_28] : memref<2x2x32xf32, #tpu.memory_space<vmem>>, vector<1x2x32xf32>
    %87 = vector.shape_cast %86 : vector<1x2x32xf32> to vector<2x32xf32>
    %88 = vector.extract_strided_slice %87 {offsets = [0, 0], sizes = [1, 32], strides = [1, 1]} : vector<2x32xf32> to vector<1x32xf32>
    %89 = math.exp %88 : vector<1x32xf32>
    %cst_29 = arith.constant 0.000000e+00 : f32
    %90 = vector.broadcast %cst_29 : f32 to vector<1x32xf32>
    %91 = arith.subf %90, %89 : vector<1x32xf32>
    %92 = vector.extract_strided_slice %87 {offsets = [1, 0], sizes = [1, 32], strides = [1, 1]} : vector<2x32xf32> to vector<1x32xf32>
    %93 = arith.truncf %92 : vector<1x32xf32> to vector<1x32xbf16>
    %94 = arith.extf %93 : vector<1x32xbf16> to vector<1x32xf32>
    %95 = arith.truncf %78 : vector<32x32xf32> to vector<32x32xbf16>
    %96 = arith.extf %95 : vector<32x32xbf16> to vector<32x32xf32>
    %97 = arith.truncf %79 : vector<32x32xf32> to vector<32x32xbf16>
    %98 = arith.extf %97 : vector<32x32xbf16> to vector<32x32xf32>
    %99 = vector.extract_strided_slice %96 {offsets = [0, 0], sizes = [16, 32], strides = [1, 1]} : vector<32x32xf32> to vector<16x32xf32>
    %100 = vector.extract_strided_slice %96 {offsets = [16, 0], sizes = [16, 32], strides = [1, 1]} : vector<32x32xf32> to vector<16x32xf32>
    %101 = tpu.concatenate %99, %100 in 1 : vector<16x32xf32>, vector<16x32xf32> -> vector<16x64xf32>
    %102 = vector.extract_strided_slice %98 {offsets = [0, 0], sizes = [16, 32], strides = [1, 1]} : vector<32x32xf32> to vector<16x32xf32>
    %103 = vector.extract_strided_slice %98 {offsets = [16, 0], sizes = [16, 32], strides = [1, 1]} : vector<32x32xf32> to vector<16x32xf32>
    %104 = tpu.concatenate %102, %103 in 1 : vector<16x32xf32>, vector<16x32xf32> -> vector<16x64xf32>
    %105 = tpu.concatenate %94, %94 in 1 : vector<1x32xf32>, vector<1x32xf32> -> vector<1x64xf32>
    %106 = tpu.concatenate %91, %91 in 1 : vector<1x32xf32>, vector<1x32xf32> -> vector<1x64xf32>
    %cst_30 = arith.constant 0.000000e+00 : f32
    %107 = vector.broadcast %cst_30 : f32 to vector<1x64xf32>
    %cst_31 = arith.constant 0.000000e+00 : f32
    %108 = vector.broadcast %cst_31 : f32 to vector<1x64xf32>
    %cst_32 = arith.constant -9.99999968E+37 : f32
    %109 = vector.broadcast %cst_32 : f32 to vector<1x64xf32>
    %110 = vector.extract_strided_slice %101 {offsets = [0, 0], sizes = [1, 64], strides = [1, 1]} : vector<16x64xf32> to vector<1x64xf32>
    %111 = vector.extract_strided_slice %104 {offsets = [0, 0], sizes = [1, 64], strides = [1, 1]} : vector<16x64xf32> to vector<1x64xf32>
    %112 = arith.addf %105, %110 : vector<1x64xf32>
    %113 = arith.maximumf %109, %112 : vector<1x64xf32>
    %114 = arith.subf %109, %113 : vector<1x64xf32>
    %115 = math.exp %114 : vector<1x64xf32>
    %116 = arith.subf %112, %113 : vector<1x64xf32>
    %117 = math.exp %116 : vector<1x64xf32>
    %118 = arith.mulf %115, %107 : vector<1x64xf32>
    %119 = arith.mulf %117, %111 : vector<1x64xf32>
    %120 = arith.addf %118, %119 : vector<1x64xf32>
    %121 = arith.mulf %115, %108 : vector<1x64xf32>
    %122 = arith.addf %121, %117 : vector<1x64xf32>
    %123 = tpu.reciprocal %122 {approx = true} : vector<1x64xf32> -> vector<1x64xf32>
    %124 = arith.mulf %120, %123 : vector<1x64xf32>
    %125 = arith.addf %106, %109 : vector<1x64xf32>
    %126 = arith.maximumf %125, %110 : vector<1x64xf32>
    %127 = arith.subf %125, %126 : vector<1x64xf32>
    %128 = math.exp %127 : vector<1x64xf32>
    %129 = arith.subf %110, %126 : vector<1x64xf32>
    %130 = math.exp %129 : vector<1x64xf32>
    %131 = arith.mulf %128, %107 : vector<1x64xf32>
    %132 = arith.mulf %130, %111 : vector<1x64xf32>
    %133 = arith.addf %131, %132 : vector<1x64xf32>
    %134 = arith.mulf %128, %108 : vector<1x64xf32>
    %135 = arith.addf %134, %130 : vector<1x64xf32>
    %136 = vector.extract_strided_slice %101 {offsets = [1, 0], sizes = [1, 64], strides = [1, 1]} : vector<16x64xf32> to vector<1x64xf32>
    %137 = vector.extract_strided_slice %104 {offsets = [1, 0], sizes = [1, 64], strides = [1, 1]} : vector<16x64xf32> to vector<1x64xf32>
    %138 = arith.addf %105, %136 : vector<1x64xf32>
    %139 = arith.maximumf %126, %138 : vector<1x64xf32>
    %140 = arith.subf %126, %139 : vector<1x64xf32>
    %141 = math.exp %140 : vector<1x64xf32>
    %142 = arith.subf %138, %139 : vector<1x64xf32>
    %143 = math.exp %142 : vector<1x64xf32>
    %144 = arith.mulf %141, %133 : vector<1x64xf32>
    %145 = arith.mulf %143, %137 : vector<1x64xf32>
    %146 = arith.addf %144, %145 : vector<1x64xf32>
    %147 = arith.mulf %141, %135 : vector<1x64xf32>
    %148 = arith.addf %147, %143 : vector<1x64xf32>
    %149 = tpu.reciprocal %148 {approx = true} : vector<1x64xf32> -> vector<1x64xf32>
    %150 = arith.mulf %146, %149 : vector<1x64xf32>
    %151 = arith.addf %106, %126 : vector<1x64xf32>
    %152 = arith.maximumf %151, %136 : vector<1x64xf32>
    %153 = arith.subf %151, %152 : vector<1x64xf32>
    %154 = math.exp %153 : vector<1x64xf32>
    %155 = arith.subf %136, %152 : vector<1x64xf32>
    %156 = math.exp %155 : vector<1x64xf32>
    %157 = arith.mulf %154, %133 : vector<1x64xf32>
    %158 = arith.mulf %156, %137 : vector<1x64xf32>
    %159 = arith.addf %157, %158 : vector<1x64xf32>
    %160 = arith.mulf %154, %135 : vector<1x64xf32>
    %161 = arith.addf %160, %156 : vector<1x64xf32>
    %162 = vector.extract_strided_slice %101 {offsets = [2, 0], sizes = [1, 64], strides = [1, 1]} : vector<16x64xf32> to vector<1x64xf32>
    %163 = vector.extract_strided_slice %104 {offsets = [2, 0], sizes = [1, 64], strides = [1, 1]} : vector<16x64xf32> to vector<1x64xf32>
    %164 = arith.addf %105, %162 : vector<1x64xf32>
    %165 = arith.maximumf %152, %164 : vector<1x64xf32>
    %166 = arith.subf %152, %165 : vector<1x64xf32>
    %167 = math.exp %166 : vector<1x64xf32>
    %168 = arith.subf %164, %165 : vector<1x64xf32>
    %169 = math.exp %168 : vector<1x64xf32>
    %170 = arith.mulf %167, %159 : vector<1x64xf32>
    %171 = arith.mulf %169, %163 : vector<1x64xf32>
    %172 = arith.addf %170, %171 : vector<1x64xf32>
    %173 = arith.mulf %167, %161 : vector<1x64xf32>
    %174 = arith.addf %173, %169 : vector<1x64xf32>
    %175 = tpu.reciprocal %174 {approx = true} : vector<1x64xf32> -> vector<1x64xf32>
    %176 = arith.mulf %172, %175 : vector<1x64xf32>
    %177 = arith.addf %106, %152 : vector<1x64xf32>
    %178 = arith.maximumf %177, %162 : vector<1x64xf32>
    %179 = arith.subf %177, %178 : vector<1x64xf32>
    %180 = math.exp %179 : vector<1x64xf32>
    %181 = arith.subf %162, %178 : vector<1x64xf32>
    %182 = math.exp %181 : vector<1x64xf32>
    %183 = arith.mulf %180, %159 : vector<1x64xf32>
    %184 = arith.mulf %182, %163 : vector<1x64xf32>
    %185 = arith.addf %183, %184 : vector<1x64xf32>
    %186 = arith.mulf %180, %161 : vector<1x64xf32>
    %187 = arith.addf %186, %182 : vector<1x64xf32>
    %188 = vector.extract_strided_slice %101 {offsets = [3, 0], sizes = [1, 64], strides = [1, 1]} : vector<16x64xf32> to vector<1x64xf32>
    %189 = vector.extract_strided_slice %104 {offsets = [3, 0], sizes = [1, 64], strides = [1, 1]} : vector<16x64xf32> to vector<1x64xf32>
    %190 = arith.addf %105, %188 : vector<1x64xf32>
    %191 = arith.maximumf %178, %190 : vector<1x64xf32>
    %192 = arith.subf %178, %191 : vector<1x64xf32>
    %193 = math.exp %192 : vector<1x64xf32>
    %194 = arith.subf %190, %191 : vector<1x64xf32>
    %195 = math.exp %194 : vector<1x64xf32>
    %196 = arith.mulf %193, %185 : vector<1x64xf32>
    %197 = arith.mulf %195, %189 : vector<1x64xf32>
    %198 = arith.addf %196, %197 : vector<1x64xf32>
    %199 = arith.mulf %193, %187 : vector<1x64xf32>
    %200 = arith.addf %199, %195 : vector<1x64xf32>
    %201 = tpu.reciprocal %200 {approx = true} : vector<1x64xf32> -> vector<1x64xf32>
    %202 = arith.mulf %198, %201 : vector<1x64xf32>
    %203 = arith.addf %106, %178 : vector<1x64xf32>
    %204 = arith.maximumf %203, %188 : vector<1x64xf32>
    %205 = arith.subf %203, %204 : vector<1x64xf32>
    %206 = math.exp %205 : vector<1x64xf32>
    %207 = arith.subf %188, %204 : vector<1x64xf32>
    %208 = math.exp %207 : vector<1x64xf32>
    %209 = arith.mulf %206, %185 : vector<1x64xf32>
    %210 = arith.mulf %208, %189 : vector<1x64xf32>
    %211 = arith.addf %209, %210 : vector<1x64xf32>
    %212 = arith.mulf %206, %187 : vector<1x64xf32>
    %213 = arith.addf %212, %208 : vector<1x64xf32>
    %214 = vector.extract_strided_slice %101 {offsets = [4, 0], sizes = [1, 64], strides = [1, 1]} : vector<16x64xf32> to vector<1x64xf32>
    %215 = vector.extract_strided_slice %104 {offsets = [4, 0], sizes = [1, 64], strides = [1, 1]} : vector<16x64xf32> to vector<1x64xf32>
    %216 = arith.addf %105, %214 : vector<1x64xf32>
    %217 = arith.maximumf %204, %216 : vector<1x64xf32>
    %218 = arith.subf %204, %217 : vector<1x64xf32>
    %219 = math.exp %218 : vector<1x64xf32>
    %220 = arith.subf %216, %217 : vector<1x64xf32>
    %221 = math.exp %220 : vector<1x64xf32>
    %222 = arith.mulf %219, %211 : vector<1x64xf32>
    %223 = arith.mulf %221, %215 : vector<1x64xf32>
    %224 = arith.addf %222, %223 : vector<1x64xf32>
    %225 = arith.mulf %219, %213 : vector<1x64xf32>
    %226 = arith.addf %225, %221 : vector<1x64xf32>
    %227 = tpu.reciprocal %226 {approx = true} : vector<1x64xf32> -> vector<1x64xf32>
    %228 = arith.mulf %224, %227 : vector<1x64xf32>
    %229 = arith.addf %106, %204 : vector<1x64xf32>
    %230 = arith.maximumf %229, %214 : vector<1x64xf32>
    %231 = arith.subf %229, %230 : vector<1x64xf32>
    %232 = math.exp %231 : vector<1x64xf32>
    %233 = arith.subf %214, %230 : vector<1x64xf32>
    %234 = math.exp %233 : vector<1x64xf32>
    %235 = arith.mulf %232, %211 : vector<1x64xf32>
    %236 = arith.mulf %234, %215 : vector<1x64xf32>
    %237 = arith.addf %235, %236 : vector<1x64xf32>
    %238 = arith.mulf %232, %213 : vector<1x64xf32>
    %239 = arith.addf %238, %234 : vector<1x64xf32>
    %240 = vector.extract_strided_slice %101 {offsets = [5, 0], sizes = [1, 64], strides = [1, 1]} : vector<16x64xf32> to vector<1x64xf32>
    %241 = vector.extract_strided_slice %104 {offsets = [5, 0], sizes = [1, 64], strides = [1, 1]} : vector<16x64xf32> to vector<1x64xf32>
    %242 = arith.addf %105, %240 : vector<1x64xf32>
    %243 = arith.maximumf %230, %242 : vector<1x64xf32>
    %244 = arith.subf %230, %243 : vector<1x64xf32>
    %245 = math.exp %244 : vector<1x64xf32>
    %246 = arith.subf %242, %243 : vector<1x64xf32>
    %247 = math.exp %246 : vector<1x64xf32>
    %248 = arith.mulf %245, %237 : vector<1x64xf32>
    %249 = arith.mulf %247, %241 : vector<1x64xf32>
    %250 = arith.addf %248, %249 : vector<1x64xf32>
    %251 = arith.mulf %245, %239 : vector<1x64xf32>
    %252 = arith.addf %251, %247 : vector<1x64xf32>
    %253 = tpu.reciprocal %252 {approx = true} : vector<1x64xf32> -> vector<1x64xf32>
    %254 = arith.mulf %250, %253 : vector<1x64xf32>
    %255 = arith.addf %106, %230 : vector<1x64xf32>
    %256 = arith.maximumf %255, %240 : vector<1x64xf32>
    %257 = arith.subf %255, %256 : vector<1x64xf32>
    %258 = math.exp %257 : vector<1x64xf32>
    %259 = arith.subf %240, %256 : vector<1x64xf32>
    %260 = math.exp %259 : vector<1x64xf32>
    %261 = arith.mulf %258, %237 : vector<1x64xf32>
    %262 = arith.mulf %260, %241 : vector<1x64xf32>
    %263 = arith.addf %261, %262 : vector<1x64xf32>
    %264 = arith.mulf %258, %239 : vector<1x64xf32>
    %265 = arith.addf %264, %260 : vector<1x64xf32>
    %266 = vector.extract_strided_slice %101 {offsets = [6, 0], sizes = [1, 64], strides = [1, 1]} : vector<16x64xf32> to vector<1x64xf32>
    %267 = vector.extract_strided_slice %104 {offsets = [6, 0], sizes = [1, 64], strides = [1, 1]} : vector<16x64xf32> to vector<1x64xf32>
    %268 = arith.addf %105, %266 : vector<1x64xf32>
    %269 = arith.maximumf %256, %268 : vector<1x64xf32>
    %270 = arith.subf %256, %269 : vector<1x64xf32>
    %271 = math.exp %270 : vector<1x64xf32>
    %272 = arith.subf %268, %269 : vector<1x64xf32>
    %273 = math.exp %272 : vector<1x64xf32>
    %274 = arith.mulf %271, %263 : vector<1x64xf32>
    %275 = arith.mulf %273, %267 : vector<1x64xf32>
    %276 = arith.addf %274, %275 : vector<1x64xf32>
    %277 = arith.mulf %271, %265 : vector<1x64xf32>
    %278 = arith.addf %277, %273 : vector<1x64xf32>
    %279 = tpu.reciprocal %278 {approx = true} : vector<1x64xf32> -> vector<1x64xf32>
    %280 = arith.mulf %276, %279 : vector<1x64xf32>
    %281 = arith.addf %106, %256 : vector<1x64xf32>
    %282 = arith.maximumf %281, %266 : vector<1x64xf32>
    %283 = arith.subf %281, %282 : vector<1x64xf32>
    %284 = math.exp %283 : vector<1x64xf32>
    %285 = arith.subf %266, %282 : vector<1x64xf32>
    %286 = math.exp %285 : vector<1x64xf32>
    %287 = arith.mulf %284, %263 : vector<1x64xf32>
    %288 = arith.mulf %286, %267 : vector<1x64xf32>
    %289 = arith.addf %287, %288 : vector<1x64xf32>
    %290 = arith.mulf %284, %265 : vector<1x64xf32>
    %291 = arith.addf %290, %286 : vector<1x64xf32>
    %292 = vector.extract_strided_slice %101 {offsets = [7, 0], sizes = [1, 64], strides = [1, 1]} : vector<16x64xf32> to vector<1x64xf32>
    %293 = vector.extract_strided_slice %104 {offsets = [7, 0], sizes = [1, 64], strides = [1, 1]} : vector<16x64xf32> to vector<1x64xf32>
    %294 = arith.addf %105, %292 : vector<1x64xf32>
    %295 = arith.maximumf %282, %294 : vector<1x64xf32>
    %296 = arith.subf %282, %295 : vector<1x64xf32>
    %297 = math.exp %296 : vector<1x64xf32>
    %298 = arith.subf %294, %295 : vector<1x64xf32>
    %299 = math.exp %298 : vector<1x64xf32>
    %300 = arith.mulf %297, %289 : vector<1x64xf32>
    %301 = arith.mulf %299, %293 : vector<1x64xf32>
    %302 = arith.addf %300, %301 : vector<1x64xf32>
    %303 = arith.mulf %297, %291 : vector<1x64xf32>
    %304 = arith.addf %303, %299 : vector<1x64xf32>
    %305 = tpu.reciprocal %304 {approx = true} : vector<1x64xf32> -> vector<1x64xf32>
    %306 = arith.mulf %302, %305 : vector<1x64xf32>
    %307 = arith.addf %106, %282 : vector<1x64xf32>
    %308 = arith.maximumf %307, %292 : vector<1x64xf32>
    %309 = arith.subf %307, %308 : vector<1x64xf32>
    %310 = math.exp %309 : vector<1x64xf32>
    %311 = arith.subf %292, %308 : vector<1x64xf32>
    %312 = math.exp %311 : vector<1x64xf32>
    %313 = arith.mulf %310, %289 : vector<1x64xf32>
    %314 = arith.mulf %312, %293 : vector<1x64xf32>
    %315 = arith.addf %313, %314 : vector<1x64xf32>
    %316 = arith.mulf %310, %291 : vector<1x64xf32>
    %317 = arith.addf %316, %312 : vector<1x64xf32>
    %318 = vector.extract_strided_slice %101 {offsets = [8, 0], sizes = [1, 64], strides = [1, 1]} : vector<16x64xf32> to vector<1x64xf32>
    %319 = vector.extract_strided_slice %104 {offsets = [8, 0], sizes = [1, 64], strides = [1, 1]} : vector<16x64xf32> to vector<1x64xf32>
    %320 = arith.addf %105, %318 : vector<1x64xf32>
    %321 = arith.maximumf %308, %320 : vector<1x64xf32>
    %322 = arith.subf %308, %321 : vector<1x64xf32>
    %323 = math.exp %322 : vector<1x64xf32>
    %324 = arith.subf %320, %321 : vector<1x64xf32>
    %325 = math.exp %324 : vector<1x64xf32>
    %326 = arith.mulf %323, %315 : vector<1x64xf32>
    %327 = arith.mulf %325, %319 : vector<1x64xf32>
    %328 = arith.addf %326, %327 : vector<1x64xf32>
    %329 = arith.mulf %323, %317 : vector<1x64xf32>
    %330 = arith.addf %329, %325 : vector<1x64xf32>
    %331 = tpu.reciprocal %330 {approx = true} : vector<1x64xf32> -> vector<1x64xf32>
    %332 = arith.mulf %328, %331 : vector<1x64xf32>
    %333 = arith.addf %106, %308 : vector<1x64xf32>
    %334 = arith.maximumf %333, %318 : vector<1x64xf32>
    %335 = arith.subf %333, %334 : vector<1x64xf32>
    %336 = math.exp %335 : vector<1x64xf32>
    %337 = arith.subf %318, %334 : vector<1x64xf32>
    %338 = math.exp %337 : vector<1x64xf32>
    %339 = arith.mulf %336, %315 : vector<1x64xf32>
    %340 = arith.mulf %338, %319 : vector<1x64xf32>
    %341 = arith.addf %339, %340 : vector<1x64xf32>
    %342 = arith.mulf %336, %317 : vector<1x64xf32>
    %343 = arith.addf %342, %338 : vector<1x64xf32>
    %344 = vector.extract_strided_slice %101 {offsets = [9, 0], sizes = [1, 64], strides = [1, 1]} : vector<16x64xf32> to vector<1x64xf32>
    %345 = vector.extract_strided_slice %104 {offsets = [9, 0], sizes = [1, 64], strides = [1, 1]} : vector<16x64xf32> to vector<1x64xf32>
    %346 = arith.addf %105, %344 : vector<1x64xf32>
    %347 = arith.maximumf %334, %346 : vector<1x64xf32>
    %348 = arith.subf %334, %347 : vector<1x64xf32>
    %349 = math.exp %348 : vector<1x64xf32>
    %350 = arith.subf %346, %347 : vector<1x64xf32>
    %351 = math.exp %350 : vector<1x64xf32>
    %352 = arith.mulf %349, %341 : vector<1x64xf32>
    %353 = arith.mulf %351, %345 : vector<1x64xf32>
    %354 = arith.addf %352, %353 : vector<1x64xf32>
    %355 = arith.mulf %349, %343 : vector<1x64xf32>
    %356 = arith.addf %355, %351 : vector<1x64xf32>
    %357 = tpu.reciprocal %356 {approx = true} : vector<1x64xf32> -> vector<1x64xf32>
    %358 = arith.mulf %354, %357 : vector<1x64xf32>
    %359 = arith.addf %106, %334 : vector<1x64xf32>
    %360 = arith.maximumf %359, %344 : vector<1x64xf32>
    %361 = arith.subf %359, %360 : vector<1x64xf32>
    %362 = math.exp %361 : vector<1x64xf32>
    %363 = arith.subf %344, %360 : vector<1x64xf32>
    %364 = math.exp %363 : vector<1x64xf32>
    %365 = arith.mulf %362, %341 : vector<1x64xf32>
    %366 = arith.mulf %364, %345 : vector<1x64xf32>
    %367 = arith.addf %365, %366 : vector<1x64xf32>
    %368 = arith.mulf %362, %343 : vector<1x64xf32>
    %369 = arith.addf %368, %364 : vector<1x64xf32>
    %370 = vector.extract_strided_slice %101 {offsets = [10, 0], sizes = [1, 64], strides = [1, 1]} : vector<16x64xf32> to vector<1x64xf32>
    %371 = vector.extract_strided_slice %104 {offsets = [10, 0], sizes = [1, 64], strides = [1, 1]} : vector<16x64xf32> to vector<1x64xf32>
    %372 = arith.addf %105, %370 : vector<1x64xf32>
    %373 = arith.maximumf %360, %372 : vector<1x64xf32>
    %374 = arith.subf %360, %373 : vector<1x64xf32>
    %375 = math.exp %374 : vector<1x64xf32>
    %376 = arith.subf %372, %373 : vector<1x64xf32>
    %377 = math.exp %376 : vector<1x64xf32>
    %378 = arith.mulf %375, %367 : vector<1x64xf32>
    %379 = arith.mulf %377, %371 : vector<1x64xf32>
    %380 = arith.addf %378, %379 : vector<1x64xf32>
    %381 = arith.mulf %375, %369 : vector<1x64xf32>
    %382 = arith.addf %381, %377 : vector<1x64xf32>
    %383 = tpu.reciprocal %382 {approx = true} : vector<1x64xf32> -> vector<1x64xf32>
    %384 = arith.mulf %380, %383 : vector<1x64xf32>
    %385 = arith.addf %106, %360 : vector<1x64xf32>
    %386 = arith.maximumf %385, %370 : vector<1x64xf32>
    %387 = arith.subf %385, %386 : vector<1x64xf32>
    %388 = math.exp %387 : vector<1x64xf32>
    %389 = arith.subf %370, %386 : vector<1x64xf32>
    %390 = math.exp %389 : vector<1x64xf32>
    %391 = arith.mulf %388, %367 : vector<1x64xf32>
    %392 = arith.mulf %390, %371 : vector<1x64xf32>
    %393 = arith.addf %391, %392 : vector<1x64xf32>
    %394 = arith.mulf %388, %369 : vector<1x64xf32>
    %395 = arith.addf %394, %390 : vector<1x64xf32>
    %396 = vector.extract_strided_slice %101 {offsets = [11, 0], sizes = [1, 64], strides = [1, 1]} : vector<16x64xf32> to vector<1x64xf32>
    %397 = vector.extract_strided_slice %104 {offsets = [11, 0], sizes = [1, 64], strides = [1, 1]} : vector<16x64xf32> to vector<1x64xf32>
    %398 = arith.addf %105, %396 : vector<1x64xf32>
    %399 = arith.maximumf %386, %398 : vector<1x64xf32>
    %400 = arith.subf %386, %399 : vector<1x64xf32>
    %401 = math.exp %400 : vector<1x64xf32>
    %402 = arith.subf %398, %399 : vector<1x64xf32>
    %403 = math.exp %402 : vector<1x64xf32>
    %404 = arith.mulf %401, %393 : vector<1x64xf32>
    %405 = arith.mulf %403, %397 : vector<1x64xf32>
    %406 = arith.addf %404, %405 : vector<1x64xf32>
    %407 = arith.mulf %401, %395 : vector<1x64xf32>
    %408 = arith.addf %407, %403 : vector<1x64xf32>
    %409 = tpu.reciprocal %408 {approx = true} : vector<1x64xf32> -> vector<1x64xf32>
    %410 = arith.mulf %406, %409 : vector<1x64xf32>
    %411 = arith.addf %106, %386 : vector<1x64xf32>
    %412 = arith.maximumf %411, %396 : vector<1x64xf32>
    %413 = arith.subf %411, %412 : vector<1x64xf32>
    %414 = math.exp %413 : vector<1x64xf32>
    %415 = arith.subf %396, %412 : vector<1x64xf32>
    %416 = math.exp %415 : vector<1x64xf32>
    %417 = arith.mulf %414, %393 : vector<1x64xf32>
    %418 = arith.mulf %416, %397 : vector<1x64xf32>
    %419 = arith.addf %417, %418 : vector<1x64xf32>
    %420 = arith.mulf %414, %395 : vector<1x64xf32>
    %421 = arith.addf %420, %416 : vector<1x64xf32>
    %422 = vector.extract_strided_slice %101 {offsets = [12, 0], sizes = [1, 64], strides = [1, 1]} : vector<16x64xf32> to vector<1x64xf32>
    %423 = vector.extract_strided_slice %104 {offsets = [12, 0], sizes = [1, 64], strides = [1, 1]} : vector<16x64xf32> to vector<1x64xf32>
    %424 = arith.addf %105, %422 : vector<1x64xf32>
    %425 = arith.maximumf %412, %424 : vector<1x64xf32>
    %426 = arith.subf %412, %425 : vector<1x64xf32>
    %427 = math.exp %426 : vector<1x64xf32>
    %428 = arith.subf %424, %425 : vector<1x64xf32>
    %429 = math.exp %428 : vector<1x64xf32>
    %430 = arith.mulf %427, %419 : vector<1x64xf32>
    %431 = arith.mulf %429, %423 : vector<1x64xf32>
    %432 = arith.addf %430, %431 : vector<1x64xf32>
    %433 = arith.mulf %427, %421 : vector<1x64xf32>
    %434 = arith.addf %433, %429 : vector<1x64xf32>
    %435 = tpu.reciprocal %434 {approx = true} : vector<1x64xf32> -> vector<1x64xf32>
    %436 = arith.mulf %432, %435 : vector<1x64xf32>
    %437 = arith.addf %106, %412 : vector<1x64xf32>
    %438 = arith.maximumf %437, %422 : vector<1x64xf32>
    %439 = arith.subf %437, %438 : vector<1x64xf32>
    %440 = math.exp %439 : vector<1x64xf32>
    %441 = arith.subf %422, %438 : vector<1x64xf32>
    %442 = math.exp %441 : vector<1x64xf32>
    %443 = arith.mulf %440, %419 : vector<1x64xf32>
    %444 = arith.mulf %442, %423 : vector<1x64xf32>
    %445 = arith.addf %443, %444 : vector<1x64xf32>
    %446 = arith.mulf %440, %421 : vector<1x64xf32>
    %447 = arith.addf %446, %442 : vector<1x64xf32>
    %448 = vector.extract_strided_slice %101 {offsets = [13, 0], sizes = [1, 64], strides = [1, 1]} : vector<16x64xf32> to vector<1x64xf32>
    %449 = vector.extract_strided_slice %104 {offsets = [13, 0], sizes = [1, 64], strides = [1, 1]} : vector<16x64xf32> to vector<1x64xf32>
    %450 = arith.addf %105, %448 : vector<1x64xf32>
    %451 = arith.maximumf %438, %450 : vector<1x64xf32>
    %452 = arith.subf %438, %451 : vector<1x64xf32>
    %453 = math.exp %452 : vector<1x64xf32>
    %454 = arith.subf %450, %451 : vector<1x64xf32>
    %455 = math.exp %454 : vector<1x64xf32>
    %456 = arith.mulf %453, %445 : vector<1x64xf32>
    %457 = arith.mulf %455, %449 : vector<1x64xf32>
    %458 = arith.addf %456, %457 : vector<1x64xf32>
    %459 = arith.mulf %453, %447 : vector<1x64xf32>
    %460 = arith.addf %459, %455 : vector<1x64xf32>
    %461 = tpu.reciprocal %460 {approx = true} : vector<1x64xf32> -> vector<1x64xf32>
    %462 = arith.mulf %458, %461 : vector<1x64xf32>
    %463 = arith.addf %106, %438 : vector<1x64xf32>
    %464 = arith.maximumf %463, %448 : vector<1x64xf32>
    %465 = arith.subf %463, %464 : vector<1x64xf32>
    %466 = math.exp %465 : vector<1x64xf32>
    %467 = arith.subf %448, %464 : vector<1x64xf32>
    %468 = math.exp %467 : vector<1x64xf32>
    %469 = arith.mulf %466, %445 : vector<1x64xf32>
    %470 = arith.mulf %468, %449 : vector<1x64xf32>
    %471 = arith.addf %469, %470 : vector<1x64xf32>
    %472 = arith.mulf %466, %447 : vector<1x64xf32>
    %473 = arith.addf %472, %468 : vector<1x64xf32>
    %474 = vector.extract_strided_slice %101 {offsets = [14, 0], sizes = [1, 64], strides = [1, 1]} : vector<16x64xf32> to vector<1x64xf32>
    %475 = vector.extract_strided_slice %104 {offsets = [14, 0], sizes = [1, 64], strides = [1, 1]} : vector<16x64xf32> to vector<1x64xf32>
    %476 = arith.addf %105, %474 : vector<1x64xf32>
    %477 = arith.maximumf %464, %476 : vector<1x64xf32>
    %478 = arith.subf %464, %477 : vector<1x64xf32>
    %479 = math.exp %478 : vector<1x64xf32>
    %480 = arith.subf %476, %477 : vector<1x64xf32>
    %481 = math.exp %480 : vector<1x64xf32>
    %482 = arith.mulf %479, %471 : vector<1x64xf32>
    %483 = arith.mulf %481, %475 : vector<1x64xf32>
    %484 = arith.addf %482, %483 : vector<1x64xf32>
    %485 = arith.mulf %479, %473 : vector<1x64xf32>
    %486 = arith.addf %485, %481 : vector<1x64xf32>
    %487 = tpu.reciprocal %486 {approx = true} : vector<1x64xf32> -> vector<1x64xf32>
    %488 = arith.mulf %484, %487 : vector<1x64xf32>
    %489 = arith.addf %106, %464 : vector<1x64xf32>
    %490 = arith.maximumf %489, %474 : vector<1x64xf32>
    %491 = arith.subf %489, %490 : vector<1x64xf32>
    %492 = math.exp %491 : vector<1x64xf32>
    %493 = arith.subf %474, %490 : vector<1x64xf32>
    %494 = math.exp %493 : vector<1x64xf32>
    %495 = arith.mulf %492, %471 : vector<1x64xf32>
    %496 = arith.mulf %494, %475 : vector<1x64xf32>
    %497 = arith.addf %495, %496 : vector<1x64xf32>
    %498 = arith.mulf %492, %473 : vector<1x64xf32>
    %499 = arith.addf %498, %494 : vector<1x64xf32>
    %500 = vector.extract_strided_slice %101 {offsets = [15, 0], sizes = [1, 64], strides = [1, 1]} : vector<16x64xf32> to vector<1x64xf32>
    %501 = vector.extract_strided_slice %104 {offsets = [15, 0], sizes = [1, 64], strides = [1, 1]} : vector<16x64xf32> to vector<1x64xf32>
    %502 = arith.addf %105, %500 : vector<1x64xf32>
    %503 = arith.maximumf %490, %502 : vector<1x64xf32>
    %504 = arith.subf %490, %503 : vector<1x64xf32>
    %505 = math.exp %504 : vector<1x64xf32>
    %506 = arith.subf %502, %503 : vector<1x64xf32>
    %507 = math.exp %506 : vector<1x64xf32>
    %508 = arith.mulf %505, %497 : vector<1x64xf32>
    %509 = arith.mulf %507, %501 : vector<1x64xf32>
    %510 = arith.addf %508, %509 : vector<1x64xf32>
    %511 = arith.mulf %505, %499 : vector<1x64xf32>
    %512 = arith.addf %511, %507 : vector<1x64xf32>
    %513 = tpu.reciprocal %512 {approx = true} : vector<1x64xf32> -> vector<1x64xf32>
    %514 = arith.mulf %510, %513 : vector<1x64xf32>
    %515 = tpu.concatenate %124, %150, %176, %202, %228, %254, %280, %306, %332, %358, %384, %410, %436, %462, %488, %514 in 0 : vector<1x64xf32>, vector<1x64xf32>, vector<1x64xf32>, vector<1x64xf32>, vector<1x64xf32>, vector<1x64xf32>, vector<1x64xf32>, vector<1x64xf32>, vector<1x64xf32>, vector<1x64xf32>, vector<1x64xf32>, vector<1x64xf32>, vector<1x64xf32>, vector<1x64xf32>, vector<1x64xf32>, vector<1x64xf32> -> vector<16x64xf32>
    %516 = vector.extract_strided_slice %515 {offsets = [0, 0], sizes = [16, 32], strides = [1, 1]} : vector<16x64xf32> to vector<16x32xf32>
    %517 = vector.extract_strided_slice %515 {offsets = [0, 32], sizes = [16, 32], strides = [1, 1]} : vector<16x64xf32> to vector<16x32xf32>
    %518 = tpu.concatenate %516, %517 in 0 : vector<16x32xf32>, vector<16x32xf32> -> vector<32x32xf32>
    %519 = arith.truncf %518 : vector<32x32xf32> to vector<32x32xbf16>
    %520 = arith.extf %519 : vector<32x32xbf16> to vector<32x32xf32>
    %521 = arith.mulf %85, %520 : vector<32x32xf32>
    %522 = arith.truncf %521 : vector<32x32xf32> to vector<32x32xbf16>
    %c0_33 = arith.constant 0 : index
    %c0_34 = arith.constant 0 : index
    %c0_35 = arith.constant 0 : index
    %523 = vector.load %arg7[%c0_33, %c0_34, %c0_35] : memref<2x32x32xbf16, #tpu.memory_space<vmem>>, vector<1x32x32xbf16>
    %524 = vector.shape_cast %523 : vector<1x32x32xbf16> to vector<32x32xbf16>
    %cst_36 = arith.constant dense<0.000000e+00> : vector<32x32xf32>
    %525 = tpu.matmul %522, %524, %cst_36 {dimension_numbers = #tpu.dot_dimension_numbers<[1], [0], [0], [1], [0, 0, 1, 1], [], []>} : vector<32x32xbf16>, vector<32x32xbf16>, vector<32x32xf32> -> vector<32x32xf32>
    %526 = arith.addf %40, %525 : vector<32x32xf32>
    %527 = vector.extract_strided_slice %42 {offsets = [2, 0], sizes = [2, 32], strides = [1, 1]} : vector<6x32xf32> to vector<2x32xf32>
    %cst_37 = arith.constant dense<0.000000e+00> : vector<32xf32>
    %528 = vector.multi_reduction <add>, %526, %cst_37 [1] : vector<32x32xf32> to vector<32xf32>
    %529 = vector.shape_cast %528 : vector<32xf32> to vector<32x1xf32>
    %cst_38 = arith.constant 3.200000e+01 : f32
    %530 = vector.broadcast %cst_38 : f32 to vector<32x1xf32>
    %531 = arith.divf %529, %530 : vector<32x1xf32>
    %532 = vector.broadcast %531 : vector<32x1xf32> to vector<32x32xf32>
    %533 = arith.subf %526, %532 : vector<32x32xf32>
    %534 = arith.mulf %533, %533 : vector<32x32xf32>
    %cst_39 = arith.constant dense<0.000000e+00> : vector<32xf32>
    %535 = vector.multi_reduction <add>, %534, %cst_39 [1] : vector<32x32xf32> to vector<32xf32>
    %536 = vector.shape_cast %535 : vector<32xf32> to vector<32x1xf32>
    %cst_40 = arith.constant 3.200000e+01 : f32
    %537 = vector.broadcast %cst_40 : f32 to vector<32x1xf32>
    %538 = arith.divf %536, %537 : vector<32x1xf32>
    %539 = vector.broadcast %531 : vector<32x1xf32> to vector<32x32xf32>
    %540 = arith.subf %526, %539 : vector<32x32xf32>
    %cst_41 = arith.constant 9.99999997E-7 : f32
    %541 = vector.broadcast %cst_41 : f32 to vector<32x1xf32>
    %542 = arith.addf %538, %541 : vector<32x1xf32>
    %543 = math.rsqrt %542 : vector<32x1xf32>
    %544 = vector.broadcast %543 : vector<32x1xf32> to vector<32x32xf32>
    %545 = arith.mulf %540, %544 : vector<32x32xf32>
    %546 = vector.extract_strided_slice %527 {offsets = [0, 0], sizes = [1, 32], strides = [1, 1]} : vector<2x32xf32> to vector<1x32xf32>
    %547 = vector.broadcast %546 : vector<1x32xf32> to vector<32x32xf32>
    %548 = arith.mulf %545, %547 : vector<32x32xf32>
    %549 = vector.extract_strided_slice %527 {offsets = [1, 0], sizes = [1, 32], strides = [1, 1]} : vector<2x32xf32> to vector<1x32xf32>
    %550 = vector.broadcast %549 : vector<1x32xf32> to vector<32x32xf32>
    %551 = arith.addf %548, %550 : vector<32x32xf32>
    %c1_i32_42 = arith.constant 1 : i32
    %552 = tpu.dynamic_rotate %551 by %c1_i32_42 dim 0 : vector<32x32xf32>, i32 -> vector<32x32xf32>
    %cst_43 = arith.constant 0.000000e+00 : f32
    %553 = vector.shape_cast %15 : vector<32x1xi1> to vector<32x1xi1>
    %554 = vector.broadcast %553 : vector<32x1xi1> to vector<32x32xi1>
    %555 = vector.broadcast %cst_43 : f32 to vector<32x32xf32>
    %556 = arith.select %554, %555, %552 : vector<32x32xi1>, vector<32x32xf32>
    %557 = tpu.concatenate %551, %556 in 1 : vector<32x32xf32>, vector<32x32xf32> -> vector<32x64xf32>
    %558 = arith.truncf %557 : vector<32x64xf32> to vector<32x64xbf16>
    %c0_44 = arith.constant 0 : index
    %c0_45 = arith.constant 0 : index
    %c0_46 = arith.constant 0 : index
    %559 = vector.load %arg8[%c0_44, %c0_45, %c0_46] : memref<2x64x96xbf16, #tpu.memory_space<vmem>>, vector<1x64x96xbf16>
    %560 = vector.shape_cast %559 : vector<1x64x96xbf16> to vector<64x96xbf16>
    %cst_47 = arith.constant dense<0.000000e+00> : vector<32x96xf32>
    %561 = tpu.matmul %558, %560, %cst_47 {dimension_numbers = #tpu.dot_dimension_numbers<[1], [0], [0], [1], [0, 0, 1, 1], [], []>} : vector<32x64xbf16>, vector<64x96xbf16>, vector<32x96xf32> -> vector<32x96xf32>
    %562 = vector.extract_strided_slice %561 {offsets = [0, 0], sizes = [32, 64], strides = [1, 1]} : vector<32x96xf32> to vector<32x64xf32>
    %cst_48 = arith.constant 0.000000e+00 : f32
    %563 = vector.broadcast %cst_48 : f32 to vector<32x64xf32>
    %564 = arith.maximumf %562, %563 : vector<32x64xf32>
    %565 = arith.mulf %564, %564 : vector<32x64xf32>
    %566 = arith.truncf %565 : vector<32x64xf32> to vector<32x64xbf16>
    %c0_49 = arith.constant 0 : index
    %c0_50 = arith.constant 0 : index
    %c0_51 = arith.constant 0 : index
    %567 = vector.load %arg9[%c0_49, %c0_50, %c0_51] : memref<2x64x32xbf16, #tpu.memory_space<vmem>>, vector<1x64x32xbf16>
    %568 = vector.shape_cast %567 : vector<1x64x32xbf16> to vector<64x32xbf16>
    %cst_52 = arith.constant dense<0.000000e+00> : vector<32x32xf32>
    %569 = tpu.matmul %566, %568, %cst_52 {dimension_numbers = #tpu.dot_dimension_numbers<[1], [0], [0], [1], [0, 0, 1, 1], [], []>} : vector<32x64xbf16>, vector<64x32xbf16>, vector<32x32xf32> -> vector<32x32xf32>
    %570 = vector.extract_strided_slice %561 {offsets = [0, 64], sizes = [32, 32], strides = [1, 1]} : vector<32x96xf32> to vector<32x32xf32>
    %571 = arith.negf %570 : vector<32x32xf32>
    %572 = math.exp %571 : vector<32x32xf32>
    %cst_53 = arith.constant 1.000000e+00 : f32
    %573 = vector.broadcast %cst_53 : f32 to vector<32x32xf32>
    %574 = arith.addf %573, %572 : vector<32x32xf32>
    %575 = arith.divf %573, %574 : vector<32x32xf32>
    %576 = arith.mulf %575, %569 : vector<32x32xf32>
    %577 = arith.addf %526, %576 : vector<32x32xf32>
    %578 = vector.extract_strided_slice %42 {offsets = [4, 0], sizes = [2, 32], strides = [1, 1]} : vector<6x32xf32> to vector<2x32xf32>
    %cst_54 = arith.constant dense<0.000000e+00> : vector<32xf32>
    %579 = vector.multi_reduction <add>, %577, %cst_54 [1] : vector<32x32xf32> to vector<32xf32>
    %580 = vector.shape_cast %579 : vector<32xf32> to vector<32x1xf32>
    %cst_55 = arith.constant 3.200000e+01 : f32
    %581 = vector.broadcast %cst_55 : f32 to vector<32x1xf32>
    %582 = arith.divf %580, %581 : vector<32x1xf32>
    %583 = vector.broadcast %582 : vector<32x1xf32> to vector<32x32xf32>
    %584 = arith.subf %577, %583 : vector<32x32xf32>
    %585 = arith.mulf %584, %584 : vector<32x32xf32>
    %cst_56 = arith.constant dense<0.000000e+00> : vector<32xf32>
    %586 = vector.multi_reduction <add>, %585, %cst_56 [1] : vector<32x32xf32> to vector<32xf32>
    %587 = vector.shape_cast %586 : vector<32xf32> to vector<32x1xf32>
    %cst_57 = arith.constant 3.200000e+01 : f32
    %588 = vector.broadcast %cst_57 : f32 to vector<32x1xf32>
    %589 = arith.divf %587, %588 : vector<32x1xf32>
    %590 = vector.broadcast %582 : vector<32x1xf32> to vector<32x32xf32>
    %591 = arith.subf %577, %590 : vector<32x32xf32>
    %cst_58 = arith.constant 9.99999997E-7 : f32
    %592 = vector.broadcast %cst_58 : f32 to vector<32x1xf32>
    %593 = arith.addf %589, %592 : vector<32x1xf32>
    %594 = math.rsqrt %593 : vector<32x1xf32>
    %595 = vector.broadcast %594 : vector<32x1xf32> to vector<32x32xf32>
    %596 = arith.mulf %591, %595 : vector<32x32xf32>
    %597 = vector.extract_strided_slice %578 {offsets = [0, 0], sizes = [1, 32], strides = [1, 1]} : vector<2x32xf32> to vector<1x32xf32>
    %598 = vector.broadcast %597 : vector<1x32xf32> to vector<32x32xf32>
    %599 = arith.mulf %596, %598 : vector<32x32xf32>
    %600 = vector.extract_strided_slice %578 {offsets = [1, 0], sizes = [1, 32], strides = [1, 1]} : vector<2x32xf32> to vector<1x32xf32>
    %601 = vector.broadcast %600 : vector<1x32xf32> to vector<32x32xf32>
    %602 = arith.addf %599, %601 : vector<32x32xf32>
    %603 = arith.truncf %602 : vector<32x32xf32> to vector<32x32xbf16>
    %c0_59 = arith.constant 0 : index
    %c0_60 = arith.constant 0 : index
    %c0_61 = arith.constant 0 : index
    %604 = vector.load %arg10[%c0_59, %c0_60, %c0_61] : memref<2x32x64xbf16, #tpu.memory_space<vmem>>, vector<1x32x64xbf16>
    %605 = vector.shape_cast %604 : vector<1x32x64xbf16> to vector<32x64xbf16>
    %cst_62 = arith.constant dense<0.000000e+00> : vector<32x64xf32>
    %606 = tpu.matmul %603, %605, %cst_62 {dimension_numbers = #tpu.dot_dimension_numbers<[1], [0], [0], [1], [0, 0, 1, 1], [], []>} : vector<32x32xbf16>, vector<32x64xbf16>, vector<32x64xf32> -> vector<32x64xf32>
    %c0_63 = arith.constant 0 : index
    %c0_64 = arith.constant 0 : index
    %c0_65 = arith.constant 0 : index
    %607 = vector.load %arg11[%c0_63, %c0_64, %c0_65] : memref<2x1x64xf32, #tpu.memory_space<vmem>>, vector<1x1x64xf32>
    %608 = vector.shape_cast %607 : vector<1x1x64xf32> to vector<1x64xf32>
    %609 = vector.broadcast %608 : vector<1x64xf32> to vector<32x64xf32>
    %610 = arith.addf %606, %609 : vector<32x64xf32>
    %cst_66 = arith.constant 5.000000e-01 : f32
    %611 = vector.broadcast %cst_66 : f32 to vector<32x64xf32>
    %612 = arith.mulf %611, %610 : vector<32x64xf32>
    %cst_67 = arith.constant 4.471500e-02 : f32
    %613 = vector.broadcast %cst_67 : f32 to vector<32x64xf32>
    %614 = arith.mulf %613, %610 : vector<32x64xf32>
    %615 = arith.mulf %614, %610 : vector<32x64xf32>
    %616 = arith.mulf %615, %610 : vector<32x64xf32>
    %617 = arith.addf %610, %616 : vector<32x64xf32>
    %cst_68 = arith.constant 0.797884583 : f32
    %618 = vector.broadcast %cst_68 : f32 to vector<32x64xf32>
    %619 = arith.mulf %618, %617 : vector<32x64xf32>
    %620 = math.tanh %619 : vector<32x64xf32>
    %cst_69 = arith.constant 1.000000e+00 : f32
    %621 = vector.broadcast %cst_69 : f32 to vector<32x64xf32>
    %622 = arith.addf %621, %620 : vector<32x64xf32>
    %623 = arith.mulf %612, %622 : vector<32x64xf32>
    %624 = arith.truncf %623 : vector<32x64xf32> to vector<32x64xbf16>
    %c0_70 = arith.constant 0 : index
    %c0_71 = arith.constant 0 : index
    %c0_72 = arith.constant 0 : index
    %625 = vector.load %arg12[%c0_70, %c0_71, %c0_72] : memref<2x64x32xbf16, #tpu.memory_space<vmem>>, vector<1x64x32xbf16>
    %626 = vector.shape_cast %625 : vector<1x64x32xbf16> to vector<64x32xbf16>
    %cst_73 = arith.constant dense<0.000000e+00> : vector<32x32xf32>
    %627 = tpu.matmul %624, %626, %cst_73 {dimension_numbers = #tpu.dot_dimension_numbers<[1], [0], [0], [1], [0, 0, 1, 1], [], []>} : vector<32x64xbf16>, vector<64x32xbf16>, vector<32x32xf32> -> vector<32x32xf32>
    %628 = arith.addf %577, %627 : vector<32x32xf32>
    %c0_74 = arith.constant 0 : index
    %c0_75 = arith.constant 0 : index
    %c0_76 = arith.constant 0 : index
    %629 = vector.load %arg13[%c0_74, %c0_75, %c0_76] : memref<2x1x32xf32, #tpu.memory_space<vmem>>, vector<1x1x32xf32>
    %630 = vector.shape_cast %629 : vector<1x1x32xf32> to vector<1x32xf32>
    %631 = vector.broadcast %630 : vector<1x32xf32> to vector<32x32xf32>
    %632 = arith.addf %628, %631 : vector<32x32xf32>
    %c1_77 = arith.constant 1 : index
    %c0_78 = arith.constant 0 : index
    %c0_79 = arith.constant 0 : index
    %633 = vector.load %arg4[%c1_77, %c0_78, %c0_79] : memref<2x6x32xf32, #tpu.memory_space<vmem>>, vector<1x6x32xf32>
    %634 = vector.shape_cast %633 : vector<1x6x32xf32> to vector<6x32xf32>
    %635 = vector.extract_strided_slice %634 {offsets = [0, 0], sizes = [2, 32], strides = [1, 1]} : vector<6x32xf32> to vector<2x32xf32>
    %cst_80 = arith.constant dense<0.000000e+00> : vector<32xf32>
    %636 = vector.multi_reduction <add>, %632, %cst_80 [1] : vector<32x32xf32> to vector<32xf32>
    %637 = vector.shape_cast %636 : vector<32xf32> to vector<32x1xf32>
    %cst_81 = arith.constant 3.200000e+01 : f32
    %638 = vector.broadcast %cst_81 : f32 to vector<32x1xf32>
    %639 = arith.divf %637, %638 : vector<32x1xf32>
    %640 = vector.broadcast %639 : vector<32x1xf32> to vector<32x32xf32>
    %641 = arith.subf %632, %640 : vector<32x32xf32>
    %642 = arith.mulf %641, %641 : vector<32x32xf32>
    %cst_82 = arith.constant dense<0.000000e+00> : vector<32xf32>
    %643 = vector.multi_reduction <add>, %642, %cst_82 [1] : vector<32x32xf32> to vector<32xf32>
    %644 = vector.shape_cast %643 : vector<32xf32> to vector<32x1xf32>
    %cst_83 = arith.constant 3.200000e+01 : f32
    %645 = vector.broadcast %cst_83 : f32 to vector<32x1xf32>
    %646 = arith.divf %644, %645 : vector<32x1xf32>
    %647 = vector.broadcast %639 : vector<32x1xf32> to vector<32x32xf32>
    %648 = arith.subf %632, %647 : vector<32x32xf32>
    %cst_84 = arith.constant 9.99999997E-7 : f32
    %649 = vector.broadcast %cst_84 : f32 to vector<32x1xf32>
    %650 = arith.addf %646, %649 : vector<32x1xf32>
    %651 = math.rsqrt %650 : vector<32x1xf32>
    %652 = vector.broadcast %651 : vector<32x1xf32> to vector<32x32xf32>
    %653 = arith.mulf %648, %652 : vector<32x32xf32>
    %654 = vector.extract_strided_slice %635 {offsets = [0, 0], sizes = [1, 32], strides = [1, 1]} : vector<2x32xf32> to vector<1x32xf32>
    %655 = vector.broadcast %654 : vector<1x32xf32> to vector<32x32xf32>
    %656 = arith.mulf %653, %655 : vector<32x32xf32>
    %657 = vector.extract_strided_slice %635 {offsets = [1, 0], sizes = [1, 32], strides = [1, 1]} : vector<2x32xf32> to vector<1x32xf32>
    %658 = vector.broadcast %657 : vector<1x32xf32> to vector<32x32xf32>
    %659 = arith.addf %656, %658 : vector<32x32xf32>
    %c1_i32_85 = arith.constant 1 : i32
    %660 = tpu.dynamic_rotate %659 by %c1_i32_85 dim 0 : vector<32x32xf32>, i32 -> vector<32x32xf32>
    %cst_86 = arith.constant 0.000000e+00 : f32
    %661 = vector.shape_cast %15 : vector<32x1xi1> to vector<32x1xi1>
    %662 = vector.broadcast %661 : vector<32x1xi1> to vector<32x32xi1>
    %663 = vector.broadcast %cst_86 : f32 to vector<32x32xf32>
    %664 = arith.select %662, %663, %660 : vector<32x32xi1>, vector<32x32xf32>
    %665 = tpu.concatenate %659, %664 in 1 : vector<32x32xf32>, vector<32x32xf32> -> vector<32x64xf32>
    %666 = arith.truncf %665 : vector<32x64xf32> to vector<32x64xbf16>
    %c1_87 = arith.constant 1 : index
    %c0_88 = arith.constant 0 : index
    %c0_89 = arith.constant 0 : index
    %667 = vector.load %arg6[%c1_87, %c0_88, %c0_89] : memref<2x64x96xbf16, #tpu.memory_space<vmem>>, vector<1x64x96xbf16>
    %668 = vector.shape_cast %667 : vector<1x64x96xbf16> to vector<64x96xbf16>
    %cst_90 = arith.constant dense<0.000000e+00> : vector<32x96xf32>
    %669 = tpu.matmul %666, %668, %cst_90 {dimension_numbers = #tpu.dot_dimension_numbers<[1], [0], [0], [1], [0, 0, 1, 1], [], []>} : vector<32x64xbf16>, vector<64x96xbf16>, vector<32x96xf32> -> vector<32x96xf32>
    %670 = vector.extract_strided_slice %669 {offsets = [0, 0], sizes = [32, 32], strides = [1, 1]} : vector<32x96xf32> to vector<32x32xf32>
    %671 = vector.extract_strided_slice %669 {offsets = [0, 32], sizes = [32, 32], strides = [1, 1]} : vector<32x96xf32> to vector<32x32xf32>
    %672 = vector.extract_strided_slice %669 {offsets = [0, 64], sizes = [32, 32], strides = [1, 1]} : vector<32x96xf32> to vector<32x32xf32>
    %673 = arith.negf %672 : vector<32x32xf32>
    %674 = math.exp %673 : vector<32x32xf32>
    %cst_91 = arith.constant 1.000000e+00 : f32
    %675 = vector.broadcast %cst_91 : f32 to vector<32x32xf32>
    %676 = arith.addf %675, %674 : vector<32x32xf32>
    %677 = arith.divf %675, %676 : vector<32x32xf32>
    %c1_92 = arith.constant 1 : index
    %c0_93 = arith.constant 0 : index
    %c0_94 = arith.constant 0 : index
    %678 = vector.load %arg5[%c1_92, %c0_93, %c0_94] : memref<2x2x32xf32, #tpu.memory_space<vmem>>, vector<1x2x32xf32>
    %679 = vector.shape_cast %678 : vector<1x2x32xf32> to vector<2x32xf32>
    %680 = vector.extract_strided_slice %679 {offsets = [0, 0], sizes = [1, 32], strides = [1, 1]} : vector<2x32xf32> to vector<1x32xf32>
    %681 = math.exp %680 : vector<1x32xf32>
    %cst_95 = arith.constant 0.000000e+00 : f32
    %682 = vector.broadcast %cst_95 : f32 to vector<1x32xf32>
    %683 = arith.subf %682, %681 : vector<1x32xf32>
    %684 = vector.extract_strided_slice %679 {offsets = [1, 0], sizes = [1, 32], strides = [1, 1]} : vector<2x32xf32> to vector<1x32xf32>
    %685 = arith.truncf %684 : vector<1x32xf32> to vector<1x32xbf16>
    %686 = arith.extf %685 : vector<1x32xbf16> to vector<1x32xf32>
    %687 = arith.truncf %670 : vector<32x32xf32> to vector<32x32xbf16>
    %688 = arith.extf %687 : vector<32x32xbf16> to vector<32x32xf32>
    %689 = arith.truncf %671 : vector<32x32xf32> to vector<32x32xbf16>
    %690 = arith.extf %689 : vector<32x32xbf16> to vector<32x32xf32>
    %691 = vector.extract_strided_slice %688 {offsets = [0, 0], sizes = [16, 32], strides = [1, 1]} : vector<32x32xf32> to vector<16x32xf32>
    %692 = vector.extract_strided_slice %688 {offsets = [16, 0], sizes = [16, 32], strides = [1, 1]} : vector<32x32xf32> to vector<16x32xf32>
    %693 = tpu.concatenate %691, %692 in 1 : vector<16x32xf32>, vector<16x32xf32> -> vector<16x64xf32>
    %694 = vector.extract_strided_slice %690 {offsets = [0, 0], sizes = [16, 32], strides = [1, 1]} : vector<32x32xf32> to vector<16x32xf32>
    %695 = vector.extract_strided_slice %690 {offsets = [16, 0], sizes = [16, 32], strides = [1, 1]} : vector<32x32xf32> to vector<16x32xf32>
    %696 = tpu.concatenate %694, %695 in 1 : vector<16x32xf32>, vector<16x32xf32> -> vector<16x64xf32>
    %697 = tpu.concatenate %686, %686 in 1 : vector<1x32xf32>, vector<1x32xf32> -> vector<1x64xf32>
    %698 = tpu.concatenate %683, %683 in 1 : vector<1x32xf32>, vector<1x32xf32> -> vector<1x64xf32>
    %cst_96 = arith.constant 0.000000e+00 : f32
    %699 = vector.broadcast %cst_96 : f32 to vector<1x64xf32>
    %cst_97 = arith.constant 0.000000e+00 : f32
    %700 = vector.broadcast %cst_97 : f32 to vector<1x64xf32>
    %cst_98 = arith.constant -9.99999968E+37 : f32
    %701 = vector.broadcast %cst_98 : f32 to vector<1x64xf32>
    %702 = vector.extract_strided_slice %693 {offsets = [0, 0], sizes = [1, 64], strides = [1, 1]} : vector<16x64xf32> to vector<1x64xf32>
    %703 = vector.extract_strided_slice %696 {offsets = [0, 0], sizes = [1, 64], strides = [1, 1]} : vector<16x64xf32> to vector<1x64xf32>
    %704 = arith.addf %697, %702 : vector<1x64xf32>
    %705 = arith.maximumf %701, %704 : vector<1x64xf32>
    %706 = arith.subf %701, %705 : vector<1x64xf32>
    %707 = math.exp %706 : vector<1x64xf32>
    %708 = arith.subf %704, %705 : vector<1x64xf32>
    %709 = math.exp %708 : vector<1x64xf32>
    %710 = arith.mulf %707, %699 : vector<1x64xf32>
    %711 = arith.mulf %709, %703 : vector<1x64xf32>
    %712 = arith.addf %710, %711 : vector<1x64xf32>
    %713 = arith.mulf %707, %700 : vector<1x64xf32>
    %714 = arith.addf %713, %709 : vector<1x64xf32>
    %715 = tpu.reciprocal %714 {approx = true} : vector<1x64xf32> -> vector<1x64xf32>
    %716 = arith.mulf %712, %715 : vector<1x64xf32>
    %717 = arith.addf %698, %701 : vector<1x64xf32>
    %718 = arith.maximumf %717, %702 : vector<1x64xf32>
    %719 = arith.subf %717, %718 : vector<1x64xf32>
    %720 = math.exp %719 : vector<1x64xf32>
    %721 = arith.subf %702, %718 : vector<1x64xf32>
    %722 = math.exp %721 : vector<1x64xf32>
    %723 = arith.mulf %720, %699 : vector<1x64xf32>
    %724 = arith.mulf %722, %703 : vector<1x64xf32>
    %725 = arith.addf %723, %724 : vector<1x64xf32>
    %726 = arith.mulf %720, %700 : vector<1x64xf32>
    %727 = arith.addf %726, %722 : vector<1x64xf32>
    %728 = vector.extract_strided_slice %693 {offsets = [1, 0], sizes = [1, 64], strides = [1, 1]} : vector<16x64xf32> to vector<1x64xf32>
    %729 = vector.extract_strided_slice %696 {offsets = [1, 0], sizes = [1, 64], strides = [1, 1]} : vector<16x64xf32> to vector<1x64xf32>
    %730 = arith.addf %697, %728 : vector<1x64xf32>
    %731 = arith.maximumf %718, %730 : vector<1x64xf32>
    %732 = arith.subf %718, %731 : vector<1x64xf32>
    %733 = math.exp %732 : vector<1x64xf32>
    %734 = arith.subf %730, %731 : vector<1x64xf32>
    %735 = math.exp %734 : vector<1x64xf32>
    %736 = arith.mulf %733, %725 : vector<1x64xf32>
    %737 = arith.mulf %735, %729 : vector<1x64xf32>
    %738 = arith.addf %736, %737 : vector<1x64xf32>
    %739 = arith.mulf %733, %727 : vector<1x64xf32>
    %740 = arith.addf %739, %735 : vector<1x64xf32>
    %741 = tpu.reciprocal %740 {approx = true} : vector<1x64xf32> -> vector<1x64xf32>
    %742 = arith.mulf %738, %741 : vector<1x64xf32>
    %743 = arith.addf %698, %718 : vector<1x64xf32>
    %744 = arith.maximumf %743, %728 : vector<1x64xf32>
    %745 = arith.subf %743, %744 : vector<1x64xf32>
    %746 = math.exp %745 : vector<1x64xf32>
    %747 = arith.subf %728, %744 : vector<1x64xf32>
    %748 = math.exp %747 : vector<1x64xf32>
    %749 = arith.mulf %746, %725 : vector<1x64xf32>
    %750 = arith.mulf %748, %729 : vector<1x64xf32>
    %751 = arith.addf %749, %750 : vector<1x64xf32>
    %752 = arith.mulf %746, %727 : vector<1x64xf32>
    %753 = arith.addf %752, %748 : vector<1x64xf32>
    %754 = vector.extract_strided_slice %693 {offsets = [2, 0], sizes = [1, 64], strides = [1, 1]} : vector<16x64xf32> to vector<1x64xf32>
    %755 = vector.extract_strided_slice %696 {offsets = [2, 0], sizes = [1, 64], strides = [1, 1]} : vector<16x64xf32> to vector<1x64xf32>
    %756 = arith.addf %697, %754 : vector<1x64xf32>
    %757 = arith.maximumf %744, %756 : vector<1x64xf32>
    %758 = arith.subf %744, %757 : vector<1x64xf32>
    %759 = math.exp %758 : vector<1x64xf32>
    %760 = arith.subf %756, %757 : vector<1x64xf32>
    %761 = math.exp %760 : vector<1x64xf32>
    %762 = arith.mulf %759, %751 : vector<1x64xf32>
    %763 = arith.mulf %761, %755 : vector<1x64xf32>
    %764 = arith.addf %762, %763 : vector<1x64xf32>
    %765 = arith.mulf %759, %753 : vector<1x64xf32>
    %766 = arith.addf %765, %761 : vector<1x64xf32>
    %767 = tpu.reciprocal %766 {approx = true} : vector<1x64xf32> -> vector<1x64xf32>
    %768 = arith.mulf %764, %767 : vector<1x64xf32>
    %769 = arith.addf %698, %744 : vector<1x64xf32>
    %770 = arith.maximumf %769, %754 : vector<1x64xf32>
    %771 = arith.subf %769, %770 : vector<1x64xf32>
    %772 = math.exp %771 : vector<1x64xf32>
    %773 = arith.subf %754, %770 : vector<1x64xf32>
    %774 = math.exp %773 : vector<1x64xf32>
    %775 = arith.mulf %772, %751 : vector<1x64xf32>
    %776 = arith.mulf %774, %755 : vector<1x64xf32>
    %777 = arith.addf %775, %776 : vector<1x64xf32>
    %778 = arith.mulf %772, %753 : vector<1x64xf32>
    %779 = arith.addf %778, %774 : vector<1x64xf32>
    %780 = vector.extract_strided_slice %693 {offsets = [3, 0], sizes = [1, 64], strides = [1, 1]} : vector<16x64xf32> to vector<1x64xf32>
    %781 = vector.extract_strided_slice %696 {offsets = [3, 0], sizes = [1, 64], strides = [1, 1]} : vector<16x64xf32> to vector<1x64xf32>
    %782 = arith.addf %697, %780 : vector<1x64xf32>
    %783 = arith.maximumf %770, %782 : vector<1x64xf32>
    %784 = arith.subf %770, %783 : vector<1x64xf32>
    %785 = math.exp %784 : vector<1x64xf32>
    %786 = arith.subf %782, %783 : vector<1x64xf32>
    %787 = math.exp %786 : vector<1x64xf32>
    %788 = arith.mulf %785, %777 : vector<1x64xf32>
    %789 = arith.mulf %787, %781 : vector<1x64xf32>
    %790 = arith.addf %788, %789 : vector<1x64xf32>
    %791 = arith.mulf %785, %779 : vector<1x64xf32>
    %792 = arith.addf %791, %787 : vector<1x64xf32>
    %793 = tpu.reciprocal %792 {approx = true} : vector<1x64xf32> -> vector<1x64xf32>
    %794 = arith.mulf %790, %793 : vector<1x64xf32>
    %795 = arith.addf %698, %770 : vector<1x64xf32>
    %796 = arith.maximumf %795, %780 : vector<1x64xf32>
    %797 = arith.subf %795, %796 : vector<1x64xf32>
    %798 = math.exp %797 : vector<1x64xf32>
    %799 = arith.subf %780, %796 : vector<1x64xf32>
    %800 = math.exp %799 : vector<1x64xf32>
    %801 = arith.mulf %798, %777 : vector<1x64xf32>
    %802 = arith.mulf %800, %781 : vector<1x64xf32>
    %803 = arith.addf %801, %802 : vector<1x64xf32>
    %804 = arith.mulf %798, %779 : vector<1x64xf32>
    %805 = arith.addf %804, %800 : vector<1x64xf32>
    %806 = vector.extract_strided_slice %693 {offsets = [4, 0], sizes = [1, 64], strides = [1, 1]} : vector<16x64xf32> to vector<1x64xf32>
    %807 = vector.extract_strided_slice %696 {offsets = [4, 0], sizes = [1, 64], strides = [1, 1]} : vector<16x64xf32> to vector<1x64xf32>
    %808 = arith.addf %697, %806 : vector<1x64xf32>
    %809 = arith.maximumf %796, %808 : vector<1x64xf32>
    %810 = arith.subf %796, %809 : vector<1x64xf32>
    %811 = math.exp %810 : vector<1x64xf32>
    %812 = arith.subf %808, %809 : vector<1x64xf32>
    %813 = math.exp %812 : vector<1x64xf32>
    %814 = arith.mulf %811, %803 : vector<1x64xf32>
    %815 = arith.mulf %813, %807 : vector<1x64xf32>
    %816 = arith.addf %814, %815 : vector<1x64xf32>
    %817 = arith.mulf %811, %805 : vector<1x64xf32>
    %818 = arith.addf %817, %813 : vector<1x64xf32>
    %819 = tpu.reciprocal %818 {approx = true} : vector<1x64xf32> -> vector<1x64xf32>
    %820 = arith.mulf %816, %819 : vector<1x64xf32>
    %821 = arith.addf %698, %796 : vector<1x64xf32>
    %822 = arith.maximumf %821, %806 : vector<1x64xf32>
    %823 = arith.subf %821, %822 : vector<1x64xf32>
    %824 = math.exp %823 : vector<1x64xf32>
    %825 = arith.subf %806, %822 : vector<1x64xf32>
    %826 = math.exp %825 : vector<1x64xf32>
    %827 = arith.mulf %824, %803 : vector<1x64xf32>
    %828 = arith.mulf %826, %807 : vector<1x64xf32>
    %829 = arith.addf %827, %828 : vector<1x64xf32>
    %830 = arith.mulf %824, %805 : vector<1x64xf32>
    %831 = arith.addf %830, %826 : vector<1x64xf32>
    %832 = vector.extract_strided_slice %693 {offsets = [5, 0], sizes = [1, 64], strides = [1, 1]} : vector<16x64xf32> to vector<1x64xf32>
    %833 = vector.extract_strided_slice %696 {offsets = [5, 0], sizes = [1, 64], strides = [1, 1]} : vector<16x64xf32> to vector<1x64xf32>
    %834 = arith.addf %697, %832 : vector<1x64xf32>
    %835 = arith.maximumf %822, %834 : vector<1x64xf32>
    %836 = arith.subf %822, %835 : vector<1x64xf32>
    %837 = math.exp %836 : vector<1x64xf32>
    %838 = arith.subf %834, %835 : vector<1x64xf32>
    %839 = math.exp %838 : vector<1x64xf32>
    %840 = arith.mulf %837, %829 : vector<1x64xf32>
    %841 = arith.mulf %839, %833 : vector<1x64xf32>
    %842 = arith.addf %840, %841 : vector<1x64xf32>
    %843 = arith.mulf %837, %831 : vector<1x64xf32>
    %844 = arith.addf %843, %839 : vector<1x64xf32>
    %845 = tpu.reciprocal %844 {approx = true} : vector<1x64xf32> -> vector<1x64xf32>
    %846 = arith.mulf %842, %845 : vector<1x64xf32>
    %847 = arith.addf %698, %822 : vector<1x64xf32>
    %848 = arith.maximumf %847, %832 : vector<1x64xf32>
    %849 = arith.subf %847, %848 : vector<1x64xf32>
    %850 = math.exp %849 : vector<1x64xf32>
    %851 = arith.subf %832, %848 : vector<1x64xf32>
    %852 = math.exp %851 : vector<1x64xf32>
    %853 = arith.mulf %850, %829 : vector<1x64xf32>
    %854 = arith.mulf %852, %833 : vector<1x64xf32>
    %855 = arith.addf %853, %854 : vector<1x64xf32>
    %856 = arith.mulf %850, %831 : vector<1x64xf32>
    %857 = arith.addf %856, %852 : vector<1x64xf32>
    %858 = vector.extract_strided_slice %693 {offsets = [6, 0], sizes = [1, 64], strides = [1, 1]} : vector<16x64xf32> to vector<1x64xf32>
    %859 = vector.extract_strided_slice %696 {offsets = [6, 0], sizes = [1, 64], strides = [1, 1]} : vector<16x64xf32> to vector<1x64xf32>
    %860 = arith.addf %697, %858 : vector<1x64xf32>
    %861 = arith.maximumf %848, %860 : vector<1x64xf32>
    %862 = arith.subf %848, %861 : vector<1x64xf32>
    %863 = math.exp %862 : vector<1x64xf32>
    %864 = arith.subf %860, %861 : vector<1x64xf32>
    %865 = math.exp %864 : vector<1x64xf32>
    %866 = arith.mulf %863, %855 : vector<1x64xf32>
    %867 = arith.mulf %865, %859 : vector<1x64xf32>
    %868 = arith.addf %866, %867 : vector<1x64xf32>
    %869 = arith.mulf %863, %857 : vector<1x64xf32>
    %870 = arith.addf %869, %865 : vector<1x64xf32>
    %871 = tpu.reciprocal %870 {approx = true} : vector<1x64xf32> -> vector<1x64xf32>
    %872 = arith.mulf %868, %871 : vector<1x64xf32>
    %873 = arith.addf %698, %848 : vector<1x64xf32>
    %874 = arith.maximumf %873, %858 : vector<1x64xf32>
    %875 = arith.subf %873, %874 : vector<1x64xf32>
    %876 = math.exp %875 : vector<1x64xf32>
    %877 = arith.subf %858, %874 : vector<1x64xf32>
    %878 = math.exp %877 : vector<1x64xf32>
    %879 = arith.mulf %876, %855 : vector<1x64xf32>
    %880 = arith.mulf %878, %859 : vector<1x64xf32>
    %881 = arith.addf %879, %880 : vector<1x64xf32>
    %882 = arith.mulf %876, %857 : vector<1x64xf32>
    %883 = arith.addf %882, %878 : vector<1x64xf32>
    %884 = vector.extract_strided_slice %693 {offsets = [7, 0], sizes = [1, 64], strides = [1, 1]} : vector<16x64xf32> to vector<1x64xf32>
    %885 = vector.extract_strided_slice %696 {offsets = [7, 0], sizes = [1, 64], strides = [1, 1]} : vector<16x64xf32> to vector<1x64xf32>
    %886 = arith.addf %697, %884 : vector<1x64xf32>
    %887 = arith.maximumf %874, %886 : vector<1x64xf32>
    %888 = arith.subf %874, %887 : vector<1x64xf32>
    %889 = math.exp %888 : vector<1x64xf32>
    %890 = arith.subf %886, %887 : vector<1x64xf32>
    %891 = math.exp %890 : vector<1x64xf32>
    %892 = arith.mulf %889, %881 : vector<1x64xf32>
    %893 = arith.mulf %891, %885 : vector<1x64xf32>
    %894 = arith.addf %892, %893 : vector<1x64xf32>
    %895 = arith.mulf %889, %883 : vector<1x64xf32>
    %896 = arith.addf %895, %891 : vector<1x64xf32>
    %897 = tpu.reciprocal %896 {approx = true} : vector<1x64xf32> -> vector<1x64xf32>
    %898 = arith.mulf %894, %897 : vector<1x64xf32>
    %899 = arith.addf %698, %874 : vector<1x64xf32>
    %900 = arith.maximumf %899, %884 : vector<1x64xf32>
    %901 = arith.subf %899, %900 : vector<1x64xf32>
    %902 = math.exp %901 : vector<1x64xf32>
    %903 = arith.subf %884, %900 : vector<1x64xf32>
    %904 = math.exp %903 : vector<1x64xf32>
    %905 = arith.mulf %902, %881 : vector<1x64xf32>
    %906 = arith.mulf %904, %885 : vector<1x64xf32>
    %907 = arith.addf %905, %906 : vector<1x64xf32>
    %908 = arith.mulf %902, %883 : vector<1x64xf32>
    %909 = arith.addf %908, %904 : vector<1x64xf32>
    %910 = vector.extract_strided_slice %693 {offsets = [8, 0], sizes = [1, 64], strides = [1, 1]} : vector<16x64xf32> to vector<1x64xf32>
    %911 = vector.extract_strided_slice %696 {offsets = [8, 0], sizes = [1, 64], strides = [1, 1]} : vector<16x64xf32> to vector<1x64xf32>
    %912 = arith.addf %697, %910 : vector<1x64xf32>
    %913 = arith.maximumf %900, %912 : vector<1x64xf32>
    %914 = arith.subf %900, %913 : vector<1x64xf32>
    %915 = math.exp %914 : vector<1x64xf32>
    %916 = arith.subf %912, %913 : vector<1x64xf32>
    %917 = math.exp %916 : vector<1x64xf32>
    %918 = arith.mulf %915, %907 : vector<1x64xf32>
    %919 = arith.mulf %917, %911 : vector<1x64xf32>
    %920 = arith.addf %918, %919 : vector<1x64xf32>
    %921 = arith.mulf %915, %909 : vector<1x64xf32>
    %922 = arith.addf %921, %917 : vector<1x64xf32>
    %923 = tpu.reciprocal %922 {approx = true} : vector<1x64xf32> -> vector<1x64xf32>
    %924 = arith.mulf %920, %923 : vector<1x64xf32>
    %925 = arith.addf %698, %900 : vector<1x64xf32>
    %926 = arith.maximumf %925, %910 : vector<1x64xf32>
    %927 = arith.subf %925, %926 : vector<1x64xf32>
    %928 = math.exp %927 : vector<1x64xf32>
    %929 = arith.subf %910, %926 : vector<1x64xf32>
    %930 = math.exp %929 : vector<1x64xf32>
    %931 = arith.mulf %928, %907 : vector<1x64xf32>
    %932 = arith.mulf %930, %911 : vector<1x64xf32>
    %933 = arith.addf %931, %932 : vector<1x64xf32>
    %934 = arith.mulf %928, %909 : vector<1x64xf32>
    %935 = arith.addf %934, %930 : vector<1x64xf32>
    %936 = vector.extract_strided_slice %693 {offsets = [9, 0], sizes = [1, 64], strides = [1, 1]} : vector<16x64xf32> to vector<1x64xf32>
    %937 = vector.extract_strided_slice %696 {offsets = [9, 0], sizes = [1, 64], strides = [1, 1]} : vector<16x64xf32> to vector<1x64xf32>
    %938 = arith.addf %697, %936 : vector<1x64xf32>
    %939 = arith.maximumf %926, %938 : vector<1x64xf32>
    %940 = arith.subf %926, %939 : vector<1x64xf32>
    %941 = math.exp %940 : vector<1x64xf32>
    %942 = arith.subf %938, %939 : vector<1x64xf32>
    %943 = math.exp %942 : vector<1x64xf32>
    %944 = arith.mulf %941, %933 : vector<1x64xf32>
    %945 = arith.mulf %943, %937 : vector<1x64xf32>
    %946 = arith.addf %944, %945 : vector<1x64xf32>
    %947 = arith.mulf %941, %935 : vector<1x64xf32>
    %948 = arith.addf %947, %943 : vector<1x64xf32>
    %949 = tpu.reciprocal %948 {approx = true} : vector<1x64xf32> -> vector<1x64xf32>
    %950 = arith.mulf %946, %949 : vector<1x64xf32>
    %951 = arith.addf %698, %926 : vector<1x64xf32>
    %952 = arith.maximumf %951, %936 : vector<1x64xf32>
    %953 = arith.subf %951, %952 : vector<1x64xf32>
    %954 = math.exp %953 : vector<1x64xf32>
    %955 = arith.subf %936, %952 : vector<1x64xf32>
    %956 = math.exp %955 : vector<1x64xf32>
    %957 = arith.mulf %954, %933 : vector<1x64xf32>
    %958 = arith.mulf %956, %937 : vector<1x64xf32>
    %959 = arith.addf %957, %958 : vector<1x64xf32>
    %960 = arith.mulf %954, %935 : vector<1x64xf32>
    %961 = arith.addf %960, %956 : vector<1x64xf32>
    %962 = vector.extract_strided_slice %693 {offsets = [10, 0], sizes = [1, 64], strides = [1, 1]} : vector<16x64xf32> to vector<1x64xf32>
    %963 = vector.extract_strided_slice %696 {offsets = [10, 0], sizes = [1, 64], strides = [1, 1]} : vector<16x64xf32> to vector<1x64xf32>
    %964 = arith.addf %697, %962 : vector<1x64xf32>
    %965 = arith.maximumf %952, %964 : vector<1x64xf32>
    %966 = arith.subf %952, %965 : vector<1x64xf32>
    %967 = math.exp %966 : vector<1x64xf32>
    %968 = arith.subf %964, %965 : vector<1x64xf32>
    %969 = math.exp %968 : vector<1x64xf32>
    %970 = arith.mulf %967, %959 : vector<1x64xf32>
    %971 = arith.mulf %969, %963 : vector<1x64xf32>
    %972 = arith.addf %970, %971 : vector<1x64xf32>
    %973 = arith.mulf %967, %961 : vector<1x64xf32>
    %974 = arith.addf %973, %969 : vector<1x64xf32>
    %975 = tpu.reciprocal %974 {approx = true} : vector<1x64xf32> -> vector<1x64xf32>
    %976 = arith.mulf %972, %975 : vector<1x64xf32>
    %977 = arith.addf %698, %952 : vector<1x64xf32>
    %978 = arith.maximumf %977, %962 : vector<1x64xf32>
    %979 = arith.subf %977, %978 : vector<1x64xf32>
    %980 = math.exp %979 : vector<1x64xf32>
    %981 = arith.subf %962, %978 : vector<1x64xf32>
    %982 = math.exp %981 : vector<1x64xf32>
    %983 = arith.mulf %980, %959 : vector<1x64xf32>
    %984 = arith.mulf %982, %963 : vector<1x64xf32>
    %985 = arith.addf %983, %984 : vector<1x64xf32>
    %986 = arith.mulf %980, %961 : vector<1x64xf32>
    %987 = arith.addf %986, %982 : vector<1x64xf32>
    %988 = vector.extract_strided_slice %693 {offsets = [11, 0], sizes = [1, 64], strides = [1, 1]} : vector<16x64xf32> to vector<1x64xf32>
    %989 = vector.extract_strided_slice %696 {offsets = [11, 0], sizes = [1, 64], strides = [1, 1]} : vector<16x64xf32> to vector<1x64xf32>
    %990 = arith.addf %697, %988 : vector<1x64xf32>
    %991 = arith.maximumf %978, %990 : vector<1x64xf32>
    %992 = arith.subf %978, %991 : vector<1x64xf32>
    %993 = math.exp %992 : vector<1x64xf32>
    %994 = arith.subf %990, %991 : vector<1x64xf32>
    %995 = math.exp %994 : vector<1x64xf32>
    %996 = arith.mulf %993, %985 : vector<1x64xf32>
    %997 = arith.mulf %995, %989 : vector<1x64xf32>
    %998 = arith.addf %996, %997 : vector<1x64xf32>
    %999 = arith.mulf %993, %987 : vector<1x64xf32>
    %1000 = arith.addf %999, %995 : vector<1x64xf32>
    %1001 = tpu.reciprocal %1000 {approx = true} : vector<1x64xf32> -> vector<1x64xf32>
    %1002 = arith.mulf %998, %1001 : vector<1x64xf32>
    %1003 = arith.addf %698, %978 : vector<1x64xf32>
    %1004 = arith.maximumf %1003, %988 : vector<1x64xf32>
    %1005 = arith.subf %1003, %1004 : vector<1x64xf32>
    %1006 = math.exp %1005 : vector<1x64xf32>
    %1007 = arith.subf %988, %1004 : vector<1x64xf32>
    %1008 = math.exp %1007 : vector<1x64xf32>
    %1009 = arith.mulf %1006, %985 : vector<1x64xf32>
    %1010 = arith.mulf %1008, %989 : vector<1x64xf32>
    %1011 = arith.addf %1009, %1010 : vector<1x64xf32>
    %1012 = arith.mulf %1006, %987 : vector<1x64xf32>
    %1013 = arith.addf %1012, %1008 : vector<1x64xf32>
    %1014 = vector.extract_strided_slice %693 {offsets = [12, 0], sizes = [1, 64], strides = [1, 1]} : vector<16x64xf32> to vector<1x64xf32>
    %1015 = vector.extract_strided_slice %696 {offsets = [12, 0], sizes = [1, 64], strides = [1, 1]} : vector<16x64xf32> to vector<1x64xf32>
    %1016 = arith.addf %697, %1014 : vector<1x64xf32>
    %1017 = arith.maximumf %1004, %1016 : vector<1x64xf32>
    %1018 = arith.subf %1004, %1017 : vector<1x64xf32>
    %1019 = math.exp %1018 : vector<1x64xf32>
    %1020 = arith.subf %1016, %1017 : vector<1x64xf32>
    %1021 = math.exp %1020 : vector<1x64xf32>
    %1022 = arith.mulf %1019, %1011 : vector<1x64xf32>
    %1023 = arith.mulf %1021, %1015 : vector<1x64xf32>
    %1024 = arith.addf %1022, %1023 : vector<1x64xf32>
    %1025 = arith.mulf %1019, %1013 : vector<1x64xf32>
    %1026 = arith.addf %1025, %1021 : vector<1x64xf32>
    %1027 = tpu.reciprocal %1026 {approx = true} : vector<1x64xf32> -> vector<1x64xf32>
    %1028 = arith.mulf %1024, %1027 : vector<1x64xf32>
    %1029 = arith.addf %698, %1004 : vector<1x64xf32>
    %1030 = arith.maximumf %1029, %1014 : vector<1x64xf32>
    %1031 = arith.subf %1029, %1030 : vector<1x64xf32>
    %1032 = math.exp %1031 : vector<1x64xf32>
    %1033 = arith.subf %1014, %1030 : vector<1x64xf32>
    %1034 = math.exp %1033 : vector<1x64xf32>
    %1035 = arith.mulf %1032, %1011 : vector<1x64xf32>
    %1036 = arith.mulf %1034, %1015 : vector<1x64xf32>
    %1037 = arith.addf %1035, %1036 : vector<1x64xf32>
    %1038 = arith.mulf %1032, %1013 : vector<1x64xf32>
    %1039 = arith.addf %1038, %1034 : vector<1x64xf32>
    %1040 = vector.extract_strided_slice %693 {offsets = [13, 0], sizes = [1, 64], strides = [1, 1]} : vector<16x64xf32> to vector<1x64xf32>
    %1041 = vector.extract_strided_slice %696 {offsets = [13, 0], sizes = [1, 64], strides = [1, 1]} : vector<16x64xf32> to vector<1x64xf32>
    %1042 = arith.addf %697, %1040 : vector<1x64xf32>
    %1043 = arith.maximumf %1030, %1042 : vector<1x64xf32>
    %1044 = arith.subf %1030, %1043 : vector<1x64xf32>
    %1045 = math.exp %1044 : vector<1x64xf32>
    %1046 = arith.subf %1042, %1043 : vector<1x64xf32>
    %1047 = math.exp %1046 : vector<1x64xf32>
    %1048 = arith.mulf %1045, %1037 : vector<1x64xf32>
    %1049 = arith.mulf %1047, %1041 : vector<1x64xf32>
    %1050 = arith.addf %1048, %1049 : vector<1x64xf32>
    %1051 = arith.mulf %1045, %1039 : vector<1x64xf32>
    %1052 = arith.addf %1051, %1047 : vector<1x64xf32>
    %1053 = tpu.reciprocal %1052 {approx = true} : vector<1x64xf32> -> vector<1x64xf32>
    %1054 = arith.mulf %1050, %1053 : vector<1x64xf32>
    %1055 = arith.addf %698, %1030 : vector<1x64xf32>
    %1056 = arith.maximumf %1055, %1040 : vector<1x64xf32>
    %1057 = arith.subf %1055, %1056 : vector<1x64xf32>
    %1058 = math.exp %1057 : vector<1x64xf32>
    %1059 = arith.subf %1040, %1056 : vector<1x64xf32>
    %1060 = math.exp %1059 : vector<1x64xf32>
    %1061 = arith.mulf %1058, %1037 : vector<1x64xf32>
    %1062 = arith.mulf %1060, %1041 : vector<1x64xf32>
    %1063 = arith.addf %1061, %1062 : vector<1x64xf32>
    %1064 = arith.mulf %1058, %1039 : vector<1x64xf32>
    %1065 = arith.addf %1064, %1060 : vector<1x64xf32>
    %1066 = vector.extract_strided_slice %693 {offsets = [14, 0], sizes = [1, 64], strides = [1, 1]} : vector<16x64xf32> to vector<1x64xf32>
    %1067 = vector.extract_strided_slice %696 {offsets = [14, 0], sizes = [1, 64], strides = [1, 1]} : vector<16x64xf32> to vector<1x64xf32>
    %1068 = arith.addf %697, %1066 : vector<1x64xf32>
    %1069 = arith.maximumf %1056, %1068 : vector<1x64xf32>
    %1070 = arith.subf %1056, %1069 : vector<1x64xf32>
    %1071 = math.exp %1070 : vector<1x64xf32>
    %1072 = arith.subf %1068, %1069 : vector<1x64xf32>
    %1073 = math.exp %1072 : vector<1x64xf32>
    %1074 = arith.mulf %1071, %1063 : vector<1x64xf32>
    %1075 = arith.mulf %1073, %1067 : vector<1x64xf32>
    %1076 = arith.addf %1074, %1075 : vector<1x64xf32>
    %1077 = arith.mulf %1071, %1065 : vector<1x64xf32>
    %1078 = arith.addf %1077, %1073 : vector<1x64xf32>
    %1079 = tpu.reciprocal %1078 {approx = true} : vector<1x64xf32> -> vector<1x64xf32>
    %1080 = arith.mulf %1076, %1079 : vector<1x64xf32>
    %1081 = arith.addf %698, %1056 : vector<1x64xf32>
    %1082 = arith.maximumf %1081, %1066 : vector<1x64xf32>
    %1083 = arith.subf %1081, %1082 : vector<1x64xf32>
    %1084 = math.exp %1083 : vector<1x64xf32>
    %1085 = arith.subf %1066, %1082 : vector<1x64xf32>
    %1086 = math.exp %1085 : vector<1x64xf32>
    %1087 = arith.mulf %1084, %1063 : vector<1x64xf32>
    %1088 = arith.mulf %1086, %1067 : vector<1x64xf32>
    %1089 = arith.addf %1087, %1088 : vector<1x64xf32>
    %1090 = arith.mulf %1084, %1065 : vector<1x64xf32>
    %1091 = arith.addf %1090, %1086 : vector<1x64xf32>
    %1092 = vector.extract_strided_slice %693 {offsets = [15, 0], sizes = [1, 64], strides = [1, 1]} : vector<16x64xf32> to vector<1x64xf32>
    %1093 = vector.extract_strided_slice %696 {offsets = [15, 0], sizes = [1, 64], strides = [1, 1]} : vector<16x64xf32> to vector<1x64xf32>
    %1094 = arith.addf %697, %1092 : vector<1x64xf32>
    %1095 = arith.maximumf %1082, %1094 : vector<1x64xf32>
    %1096 = arith.subf %1082, %1095 : vector<1x64xf32>
    %1097 = math.exp %1096 : vector<1x64xf32>
    %1098 = arith.subf %1094, %1095 : vector<1x64xf32>
    %1099 = math.exp %1098 : vector<1x64xf32>
    %1100 = arith.mulf %1097, %1089 : vector<1x64xf32>
    %1101 = arith.mulf %1099, %1093 : vector<1x64xf32>
    %1102 = arith.addf %1100, %1101 : vector<1x64xf32>
    %1103 = arith.mulf %1097, %1091 : vector<1x64xf32>
    %1104 = arith.addf %1103, %1099 : vector<1x64xf32>
    %1105 = tpu.reciprocal %1104 {approx = true} : vector<1x64xf32> -> vector<1x64xf32>
    %1106 = arith.mulf %1102, %1105 : vector<1x64xf32>
    %1107 = tpu.concatenate %716, %742, %768, %794, %820, %846, %872, %898, %924, %950, %976, %1002, %1028, %1054, %1080, %1106 in 0 : vector<1x64xf32>, vector<1x64xf32>, vector<1x64xf32>, vector<1x64xf32>, vector<1x64xf32>, vector<1x64xf32>, vector<1x64xf32>, vector<1x64xf32>, vector<1x64xf32>, vector<1x64xf32>, vector<1x64xf32>, vector<1x64xf32>, vector<1x64xf32>, vector<1x64xf32>, vector<1x64xf32>, vector<1x64xf32> -> vector<16x64xf32>
    %1108 = vector.extract_strided_slice %1107 {offsets = [0, 0], sizes = [16, 32], strides = [1, 1]} : vector<16x64xf32> to vector<16x32xf32>
    %1109 = vector.extract_strided_slice %1107 {offsets = [0, 32], sizes = [16, 32], strides = [1, 1]} : vector<16x64xf32> to vector<16x32xf32>
    %1110 = tpu.concatenate %1108, %1109 in 0 : vector<16x32xf32>, vector<16x32xf32> -> vector<32x32xf32>
    %1111 = arith.truncf %1110 : vector<32x32xf32> to vector<32x32xbf16>
    %1112 = arith.extf %1111 : vector<32x32xbf16> to vector<32x32xf32>
    %1113 = arith.mulf %677, %1112 : vector<32x32xf32>
    %1114 = arith.truncf %1113 : vector<32x32xf32> to vector<32x32xbf16>
    %c1_99 = arith.constant 1 : index
    %c0_100 = arith.constant 0 : index
    %c0_101 = arith.constant 0 : index
    %1115 = vector.load %arg7[%c1_99, %c0_100, %c0_101] : memref<2x32x32xbf16, #tpu.memory_space<vmem>>, vector<1x32x32xbf16>
    %1116 = vector.shape_cast %1115 : vector<1x32x32xbf16> to vector<32x32xbf16>
    %cst_102 = arith.constant dense<0.000000e+00> : vector<32x32xf32>
    %1117 = tpu.matmul %1114, %1116, %cst_102 {dimension_numbers = #tpu.dot_dimension_numbers<[1], [0], [0], [1], [0, 0, 1, 1], [], []>} : vector<32x32xbf16>, vector<32x32xbf16>, vector<32x32xf32> -> vector<32x32xf32>
    %1118 = arith.addf %632, %1117 : vector<32x32xf32>
    %1119 = vector.extract_strided_slice %634 {offsets = [2, 0], sizes = [2, 32], strides = [1, 1]} : vector<6x32xf32> to vector<2x32xf32>
    %cst_103 = arith.constant dense<0.000000e+00> : vector<32xf32>
    %1120 = vector.multi_reduction <add>, %1118, %cst_103 [1] : vector<32x32xf32> to vector<32xf32>
    %1121 = vector.shape_cast %1120 : vector<32xf32> to vector<32x1xf32>
    %cst_104 = arith.constant 3.200000e+01 : f32
    %1122 = vector.broadcast %cst_104 : f32 to vector<32x1xf32>
    %1123 = arith.divf %1121, %1122 : vector<32x1xf32>
    %1124 = vector.broadcast %1123 : vector<32x1xf32> to vector<32x32xf32>
    %1125 = arith.subf %1118, %1124 : vector<32x32xf32>
    %1126 = arith.mulf %1125, %1125 : vector<32x32xf32>
    %cst_105 = arith.constant dense<0.000000e+00> : vector<32xf32>
    %1127 = vector.multi_reduction <add>, %1126, %cst_105 [1] : vector<32x32xf32> to vector<32xf32>
    %1128 = vector.shape_cast %1127 : vector<32xf32> to vector<32x1xf32>
    %cst_106 = arith.constant 3.200000e+01 : f32
    %1129 = vector.broadcast %cst_106 : f32 to vector<32x1xf32>
    %1130 = arith.divf %1128, %1129 : vector<32x1xf32>
    %1131 = vector.broadcast %1123 : vector<32x1xf32> to vector<32x32xf32>
    %1132 = arith.subf %1118, %1131 : vector<32x32xf32>
    %cst_107 = arith.constant 9.99999997E-7 : f32
    %1133 = vector.broadcast %cst_107 : f32 to vector<32x1xf32>
    %1134 = arith.addf %1130, %1133 : vector<32x1xf32>
    %1135 = math.rsqrt %1134 : vector<32x1xf32>
    %1136 = vector.broadcast %1135 : vector<32x1xf32> to vector<32x32xf32>
    %1137 = arith.mulf %1132, %1136 : vector<32x32xf32>
    %1138 = vector.extract_strided_slice %1119 {offsets = [0, 0], sizes = [1, 32], strides = [1, 1]} : vector<2x32xf32> to vector<1x32xf32>
    %1139 = vector.broadcast %1138 : vector<1x32xf32> to vector<32x32xf32>
    %1140 = arith.mulf %1137, %1139 : vector<32x32xf32>
    %1141 = vector.extract_strided_slice %1119 {offsets = [1, 0], sizes = [1, 32], strides = [1, 1]} : vector<2x32xf32> to vector<1x32xf32>
    %1142 = vector.broadcast %1141 : vector<1x32xf32> to vector<32x32xf32>
    %1143 = arith.addf %1140, %1142 : vector<32x32xf32>
    %c1_i32_108 = arith.constant 1 : i32
    %1144 = tpu.dynamic_rotate %1143 by %c1_i32_108 dim 0 : vector<32x32xf32>, i32 -> vector<32x32xf32>
    %cst_109 = arith.constant 0.000000e+00 : f32
    %1145 = vector.shape_cast %15 : vector<32x1xi1> to vector<32x1xi1>
    %1146 = vector.broadcast %1145 : vector<32x1xi1> to vector<32x32xi1>
    %1147 = vector.broadcast %cst_109 : f32 to vector<32x32xf32>
    %1148 = arith.select %1146, %1147, %1144 : vector<32x32xi1>, vector<32x32xf32>
    %1149 = tpu.concatenate %1143, %1148 in 1 : vector<32x32xf32>, vector<32x32xf32> -> vector<32x64xf32>
    %1150 = arith.truncf %1149 : vector<32x64xf32> to vector<32x64xbf16>
    %c1_110 = arith.constant 1 : index
    %c0_111 = arith.constant 0 : index
    %c0_112 = arith.constant 0 : index
    %1151 = vector.load %arg8[%c1_110, %c0_111, %c0_112] : memref<2x64x96xbf16, #tpu.memory_space<vmem>>, vector<1x64x96xbf16>
    %1152 = vector.shape_cast %1151 : vector<1x64x96xbf16> to vector<64x96xbf16>
    %cst_113 = arith.constant dense<0.000000e+00> : vector<32x96xf32>
    %1153 = tpu.matmul %1150, %1152, %cst_113 {dimension_numbers = #tpu.dot_dimension_numbers<[1], [0], [0], [1], [0, 0, 1, 1], [], []>} : vector<32x64xbf16>, vector<64x96xbf16>, vector<32x96xf32> -> vector<32x96xf32>
    %1154 = vector.extract_strided_slice %1153 {offsets = [0, 0], sizes = [32, 64], strides = [1, 1]} : vector<32x96xf32> to vector<32x64xf32>
    %cst_114 = arith.constant 0.000000e+00 : f32
    %1155 = vector.broadcast %cst_114 : f32 to vector<32x64xf32>
    %1156 = arith.maximumf %1154, %1155 : vector<32x64xf32>
    %1157 = arith.mulf %1156, %1156 : vector<32x64xf32>
    %1158 = arith.truncf %1157 : vector<32x64xf32> to vector<32x64xbf16>
    %c1_115 = arith.constant 1 : index
    %c0_116 = arith.constant 0 : index
    %c0_117 = arith.constant 0 : index
    %1159 = vector.load %arg9[%c1_115, %c0_116, %c0_117] : memref<2x64x32xbf16, #tpu.memory_space<vmem>>, vector<1x64x32xbf16>
    %1160 = vector.shape_cast %1159 : vector<1x64x32xbf16> to vector<64x32xbf16>
    %cst_118 = arith.constant dense<0.000000e+00> : vector<32x32xf32>
    %1161 = tpu.matmul %1158, %1160, %cst_118 {dimension_numbers = #tpu.dot_dimension_numbers<[1], [0], [0], [1], [0, 0, 1, 1], [], []>} : vector<32x64xbf16>, vector<64x32xbf16>, vector<32x32xf32> -> vector<32x32xf32>
    %1162 = vector.extract_strided_slice %1153 {offsets = [0, 64], sizes = [32, 32], strides = [1, 1]} : vector<32x96xf32> to vector<32x32xf32>
    %1163 = arith.negf %1162 : vector<32x32xf32>
    %1164 = math.exp %1163 : vector<32x32xf32>
    %cst_119 = arith.constant 1.000000e+00 : f32
    %1165 = vector.broadcast %cst_119 : f32 to vector<32x32xf32>
    %1166 = arith.addf %1165, %1164 : vector<32x32xf32>
    %1167 = arith.divf %1165, %1166 : vector<32x32xf32>
    %1168 = arith.mulf %1167, %1161 : vector<32x32xf32>
    %1169 = arith.addf %1118, %1168 : vector<32x32xf32>
    %1170 = vector.extract_strided_slice %634 {offsets = [4, 0], sizes = [2, 32], strides = [1, 1]} : vector<6x32xf32> to vector<2x32xf32>
    %cst_120 = arith.constant dense<0.000000e+00> : vector<32xf32>
    %1171 = vector.multi_reduction <add>, %1169, %cst_120 [1] : vector<32x32xf32> to vector<32xf32>
    %1172 = vector.shape_cast %1171 : vector<32xf32> to vector<32x1xf32>
    %cst_121 = arith.constant 3.200000e+01 : f32
    %1173 = vector.broadcast %cst_121 : f32 to vector<32x1xf32>
    %1174 = arith.divf %1172, %1173 : vector<32x1xf32>
    %1175 = vector.broadcast %1174 : vector<32x1xf32> to vector<32x32xf32>
    %1176 = arith.subf %1169, %1175 : vector<32x32xf32>
    %1177 = arith.mulf %1176, %1176 : vector<32x32xf32>
    %cst_122 = arith.constant dense<0.000000e+00> : vector<32xf32>
    %1178 = vector.multi_reduction <add>, %1177, %cst_122 [1] : vector<32x32xf32> to vector<32xf32>
    %1179 = vector.shape_cast %1178 : vector<32xf32> to vector<32x1xf32>
    %cst_123 = arith.constant 3.200000e+01 : f32
    %1180 = vector.broadcast %cst_123 : f32 to vector<32x1xf32>
    %1181 = arith.divf %1179, %1180 : vector<32x1xf32>
    %1182 = vector.broadcast %1174 : vector<32x1xf32> to vector<32x32xf32>
    %1183 = arith.subf %1169, %1182 : vector<32x32xf32>
    %cst_124 = arith.constant 9.99999997E-7 : f32
    %1184 = vector.broadcast %cst_124 : f32 to vector<32x1xf32>
    %1185 = arith.addf %1181, %1184 : vector<32x1xf32>
    %1186 = math.rsqrt %1185 : vector<32x1xf32>
    %1187 = vector.broadcast %1186 : vector<32x1xf32> to vector<32x32xf32>
    %1188 = arith.mulf %1183, %1187 : vector<32x32xf32>
    %1189 = vector.extract_strided_slice %1170 {offsets = [0, 0], sizes = [1, 32], strides = [1, 1]} : vector<2x32xf32> to vector<1x32xf32>
    %1190 = vector.broadcast %1189 : vector<1x32xf32> to vector<32x32xf32>
    %1191 = arith.mulf %1188, %1190 : vector<32x32xf32>
    %1192 = vector.extract_strided_slice %1170 {offsets = [1, 0], sizes = [1, 32], strides = [1, 1]} : vector<2x32xf32> to vector<1x32xf32>
    %1193 = vector.broadcast %1192 : vector<1x32xf32> to vector<32x32xf32>
    %1194 = arith.addf %1191, %1193 : vector<32x32xf32>
    %1195 = arith.truncf %1194 : vector<32x32xf32> to vector<32x32xbf16>
    %c1_125 = arith.constant 1 : index
    %c0_126 = arith.constant 0 : index
    %c0_127 = arith.constant 0 : index
    %1196 = vector.load %arg10[%c1_125, %c0_126, %c0_127] : memref<2x32x64xbf16, #tpu.memory_space<vmem>>, vector<1x32x64xbf16>
    %1197 = vector.shape_cast %1196 : vector<1x32x64xbf16> to vector<32x64xbf16>
    %cst_128 = arith.constant dense<0.000000e+00> : vector<32x64xf32>
    %1198 = tpu.matmul %1195, %1197, %cst_128 {dimension_numbers = #tpu.dot_dimension_numbers<[1], [0], [0], [1], [0, 0, 1, 1], [], []>} : vector<32x32xbf16>, vector<32x64xbf16>, vector<32x64xf32> -> vector<32x64xf32>
    %c1_129 = arith.constant 1 : index
    %c0_130 = arith.constant 0 : index
    %c0_131 = arith.constant 0 : index
    %1199 = vector.load %arg11[%c1_129, %c0_130, %c0_131] : memref<2x1x64xf32, #tpu.memory_space<vmem>>, vector<1x1x64xf32>
    %1200 = vector.shape_cast %1199 : vector<1x1x64xf32> to vector<1x64xf32>
    %1201 = vector.broadcast %1200 : vector<1x64xf32> to vector<32x64xf32>
    %1202 = arith.addf %1198, %1201 : vector<32x64xf32>
    %cst_132 = arith.constant 5.000000e-01 : f32
    %1203 = vector.broadcast %cst_132 : f32 to vector<32x64xf32>
    %1204 = arith.mulf %1203, %1202 : vector<32x64xf32>
    %cst_133 = arith.constant 4.471500e-02 : f32
    %1205 = vector.broadcast %cst_133 : f32 to vector<32x64xf32>
    %1206 = arith.mulf %1205, %1202 : vector<32x64xf32>
    %1207 = arith.mulf %1206, %1202 : vector<32x64xf32>
    %1208 = arith.mulf %1207, %1202 : vector<32x64xf32>
    %1209 = arith.addf %1202, %1208 : vector<32x64xf32>
    %cst_134 = arith.constant 0.797884583 : f32
    %1210 = vector.broadcast %cst_134 : f32 to vector<32x64xf32>
    %1211 = arith.mulf %1210, %1209 : vector<32x64xf32>
    %1212 = math.tanh %1211 : vector<32x64xf32>
    %cst_135 = arith.constant 1.000000e+00 : f32
    %1213 = vector.broadcast %cst_135 : f32 to vector<32x64xf32>
    %1214 = arith.addf %1213, %1212 : vector<32x64xf32>
    %1215 = arith.mulf %1204, %1214 : vector<32x64xf32>
    %1216 = arith.truncf %1215 : vector<32x64xf32> to vector<32x64xbf16>
    %c1_136 = arith.constant 1 : index
    %c0_137 = arith.constant 0 : index
    %c0_138 = arith.constant 0 : index
    %1217 = vector.load %arg12[%c1_136, %c0_137, %c0_138] : memref<2x64x32xbf16, #tpu.memory_space<vmem>>, vector<1x64x32xbf16>
    %1218 = vector.shape_cast %1217 : vector<1x64x32xbf16> to vector<64x32xbf16>
    %cst_139 = arith.constant dense<0.000000e+00> : vector<32x32xf32>
    %1219 = tpu.matmul %1216, %1218, %cst_139 {dimension_numbers = #tpu.dot_dimension_numbers<[1], [0], [0], [1], [0, 0, 1, 1], [], []>} : vector<32x64xbf16>, vector<64x32xbf16>, vector<32x32xf32> -> vector<32x32xf32>
    %1220 = arith.addf %1169, %1219 : vector<32x32xf32>
    %c1_140 = arith.constant 1 : index
    %c0_141 = arith.constant 0 : index
    %c0_142 = arith.constant 0 : index
    %1221 = vector.load %arg13[%c1_140, %c0_141, %c0_142] : memref<2x1x32xf32, #tpu.memory_space<vmem>>, vector<1x1x32xf32>
    %1222 = vector.shape_cast %1221 : vector<1x1x32xf32> to vector<1x32xf32>
    %1223 = vector.broadcast %1222 : vector<1x32xf32> to vector<32x32xf32>
    %1224 = arith.addf %1220, %1223 : vector<32x32xf32>
    %c0_143 = arith.constant 0 : index
    %c0_144 = arith.constant 0 : index
    %1225 = vector.load %arg3[%c0_143, %c0_144] : memref<2x32xf32, #tpu.memory_space<vmem>>, vector<2x32xf32>
    %cst_145 = arith.constant dense<0.000000e+00> : vector<32xf32>
    %1226 = vector.multi_reduction <add>, %1224, %cst_145 [1] : vector<32x32xf32> to vector<32xf32>
    %1227 = vector.shape_cast %1226 : vector<32xf32> to vector<32x1xf32>
    %cst_146 = arith.constant 3.200000e+01 : f32
    %1228 = vector.broadcast %cst_146 : f32 to vector<32x1xf32>
    %1229 = arith.divf %1227, %1228 : vector<32x1xf32>
    %1230 = vector.broadcast %1229 : vector<32x1xf32> to vector<32x32xf32>
    %1231 = arith.subf %1224, %1230 : vector<32x32xf32>
    %1232 = arith.mulf %1231, %1231 : vector<32x32xf32>
    %cst_147 = arith.constant dense<0.000000e+00> : vector<32xf32>
    %1233 = vector.multi_reduction <add>, %1232, %cst_147 [1] : vector<32x32xf32> to vector<32xf32>
    %1234 = vector.shape_cast %1233 : vector<32xf32> to vector<32x1xf32>
    %cst_148 = arith.constant 3.200000e+01 : f32
    %1235 = vector.broadcast %cst_148 : f32 to vector<32x1xf32>
    %1236 = arith.divf %1234, %1235 : vector<32x1xf32>
    %1237 = vector.broadcast %1229 : vector<32x1xf32> to vector<32x32xf32>
    %1238 = arith.subf %1224, %1237 : vector<32x32xf32>
    %cst_149 = arith.constant 9.99999997E-7 : f32
    %1239 = vector.broadcast %cst_149 : f32 to vector<32x1xf32>
    %1240 = arith.addf %1236, %1239 : vector<32x1xf32>
    %1241 = math.rsqrt %1240 : vector<32x1xf32>
    %1242 = vector.broadcast %1241 : vector<32x1xf32> to vector<32x32xf32>
    %1243 = arith.mulf %1238, %1242 : vector<32x32xf32>
    %1244 = vector.extract_strided_slice %1225 {offsets = [0, 0], sizes = [1, 32], strides = [1, 1]} : vector<2x32xf32> to vector<1x32xf32>
    %1245 = vector.broadcast %1244 : vector<1x32xf32> to vector<32x32xf32>
    %1246 = arith.mulf %1243, %1245 : vector<32x32xf32>
    %1247 = vector.extract_strided_slice %1225 {offsets = [1, 0], sizes = [1, 32], strides = [1, 1]} : vector<2x32xf32> to vector<1x32xf32>
    %1248 = vector.broadcast %1247 : vector<1x32xf32> to vector<32x32xf32>
    %1249 = arith.addf %1246, %1248 : vector<32x32xf32>
    %1250 = vector.extract_strided_slice %1249 {offsets = [0, 0], sizes = [16, 32], strides = [1, 1]} : vector<32x32xf32> to vector<16x32xf32>
    %c0_150 = arith.constant 0 : index
    %c0_151 = arith.constant 0 : index
    %c0_152 = arith.constant 0 : index
    %1251 = vector.load %arg14[%c0_150, %c0_151, %c0_152] : memref<2x16x32xf32, #tpu.memory_space<vmem>>, vector<1x16x32xf32>
    %1252 = vector.shape_cast %1251 : vector<1x16x32xf32> to vector<16x32xf32>
    %1253 = vector.shape_cast %1250 : vector<16x32xf32> to vector<1x16x32xf32>
    tpu.vector_store %arg14[%c0_150, %c0_151, %c0_152], %1253 {strides = array<i32>} : memref<2x16x32xf32, #tpu.memory_space<vmem>>, vector<1x16x32xf32>,
    %1254 = vector.extract_strided_slice %1249 {offsets = [16, 0], sizes = [16, 32], strides = [1, 1]} : vector<32x32xf32> to vector<16x32xf32>
    %c1_153 = arith.constant 1 : index
    %c0_154 = arith.constant 0 : index
    %c0_155 = arith.constant 0 : index
    %1255 = vector.load %arg14[%c1_153, %c0_154, %c0_155] : memref<2x16x32xf32, #tpu.memory_space<vmem>>, vector<1x16x32xf32>
    %1256 = vector.shape_cast %1255 : vector<1x16x32xf32> to vector<16x32xf32>
    %1257 = vector.shape_cast %1254 : vector<16x32xf32> to vector<1x16x32xf32>
    tpu.vector_store %arg14[%c1_153, %c0_154, %c0_155], %1257 {strides = array<i32>} : memref<2x16x32xf32, #tpu.memory_space<vmem>>, vector<1x16x32xf32>,
    return
  }
}

</mosaic_0001>

<bundles_post_ra>
// kernel: encoder_forward.1
= control target key start
LH: loop header
LB: loop body
LE: loop exit
PB: predicated region body
PF: predicated region fallthrough
CT: control target
= control target key end

     0   :  { %vm56_vm0 = vcmask 1040384   ;;  %s6639_s0 = inlined_call_operand.vmem [shape: f32[2,17,32], index: 0, kind: input, shape index: {}]   ;;  %s6640_s1 = inlined_call_operand.vmem [shape: f32[16,32], index: 1, kind: input, shape index: {}]   ;;  %s6641_s2 = inlined_call_operand.vmem [shape: f32[2,32], index: 2, kind: input, shape index: {}]   ;;  %s6642_s3 = inlined_call_operand.vmem [shape: f32[2,32], index: 3, kind: input, shape index: {}]   ;;  %s6643_s4 = inlined_call_operand.vmem [shape: f32[2,6,32], index: 4, kind: input, shape index: {}]   ;;  %s6644_s5 = inlined_call_operand.vmem [shape: f32[2,2,32], index: 5, kind: input, shape index: {}]   ;;  %s6645_s6 = inlined_call_operand.vmem [shape: bf16[2,64,96], index: 6, kind: input, shape index: {}]   ;;  %s6646_s7 = inlined_call_operand.vmem [shape: bf16[2,32,32], index: 7, kind: input, shape index: {}]   ;;  %s6647_s8 = inlined_call_operand.vmem [shape: bf16[2,64,96], index: 8, kind: input, shape index: {}]   ;;  %s6648_s9 = inlined_call_operand.vmem [shape: bf16[2,64,32], index: 9, kind: input, shape index: {}]   ;;  %s6649_s10 = inlined_call_operand.vmem [shape: bf16[2,32,64], index: 10, kind: input, shape index: {}]   ;;  %s6650_s11 = inlined_call_operand.vmem [shape: f32[2,1,64], index: 11, kind: input, shape index: {}]   ;;  %s6651_s12 = inlined_call_operand.vmem [shape: bf16[2,64,32], index: 12, kind: input, shape index: {}]   ;;  %s6652_s13 = inlined_call_operand.vmem [shape: f32[2,1,32], index: 13, kind: input, shape index: {}]   ;;  %s6653_s14 = inlined_call_operand.hbm [shape: f32[2,16,32], index: 14, kind: output, shape index: {}]  }
   0x1   :  { %v49_v0 = vld [vmem:[%s6640_s1] sm:$0xff]  ;;  %v50_v1 = vld [vmem:[%s6640_s1 + $0x8] sm:$0xff]  ;;  %v53_v3 = vld [vmem:[%s6639_s0 + $0x10] sm:$0x1] }
   0x2   :  { %v52_v2 = vld [vmem:[%s6639_s0 + $0x8] sm:$0xff]  ;;  %v57_v4 = vrot.slane %v49_v0, 7  ;;  %v58_v5 = vrot.slane %v50_v1, 7  ;;  %v51_v6 = vld [vmem:[%s6639_s0] sm:$0xff]  ;;  %v4109_v7 = vld [vmem:[%s6639_s0 + $0x18] sm:$0xff] }
   0x3   :  { %v4110_v8 = vld [vmem:[%s6639_s0 + $0x20] sm:$0xff]  ;;  %v4111_v9 = vld [vmem:[%s6639_s0 + $0x28] sm:$0x1] }
   0x4   :  { %v59_v10 = vsel %vm56_vm0, %v57_v4, %v58_v5  ;;  %v65_v11 = vadd.f32 %v58_v5, %v53_v3  ;;  %v63_v12 = vadd.f32 %v57_v4, %v51_v6  ;;  %v70_v13 = vadd.f32 %v4109_v7, %v57_v4 }
   0x5   :  { %v64_v14 = vadd.f32 %v59_v10, %v52_v2  ;;  %v71_v15 = vadd.f32 %v4110_v8, %v59_v10  ;;  %v72_v16 = vadd.f32 %v4111_v9, %v58_v5 }
   0x6   :  { %19 = vsyncpa [#allocation3], 0  ;;  %vm6654_vm1 = vcmask 1046528   ;;  %v80_v17 = vrot.slane %v65_v11, 1  ;;  %v77_v18 = vrot.slane %v63_v12, 1  ;;  %vm112_vm2 = vcmask 261120  }
   0x7   :  { %v78_v19 = vrot.slane %v64_v14, 1  ;;  %v87_v20 = vrot.slane %v70_v13, 1  ;;  %v88_v23 = vrot.slane %v71_v15, 1  ;;  %v90_v24 = vrot.slane %v72_v16, 1  ;;  %v111_v15 = vld [vmem:[%s6641_s2] sm:$0x3] }
   0x8   :  { %v4967_v31 = vmov 32.0   ;;  %s4968_s30 = smov 32   ;;  %s4969_s1 = smov 96  }
   0x9   :  { %v81_v21 = vsel %vm6654_vm1, %v78_v19, %v80_v17  ;;  %v79_v22 = vsel %vm6654_vm1, %v77_v18, %v78_v19  ;;  %v89_v27 = vsel %vm6654_vm1, %v87_v20, %v88_v23  ;;  %v91_v28 = vsel %vm6654_vm1, %v88_v23, %v90_v24  ;;  %s4970_s25 = smov 64   ;;  %s4973_s21 = smov 8  }
   0xa   :  { %v116_v25 = vsel %vm112_vm2, %v81_v21, 0.0  ;;  %v113_v26 = vsel %vm112_vm2, %v79_v22, 0.0  ;;  %v119_v29 = vsel %vm112_vm2, %v89_v27, 0.0  ;;  %v122_v30 = vsel %vm112_vm2, %v91_v28, 0.0 }
   0xb   :  { %117 = vadd.xlane.f32.xlu1 %v116_v25  ;;  %114 = vadd.xlane.f32.xlu0 %v113_v26  ;;  %4477 = vrcp.f32 %v4967_v31  ;;  %v208_v23 = vperm.slane %v111_v15, 0 }
  0x11   :  { %v4478_v32 = vpop.eup %4477 }
  0x12   :  { %v126_v33 = vmul.f32 32.0, %v4478_v32  ;;  %vm130_vm3 = vweird.f32 %v4478_v32 }
  0x13   :  { %120 = vadd.xlane.f32.xlu1 %v119_v29  ;;  %123 = vadd.xlane.f32.xlu0 %v122_v30  ;;  %v213_v29 = vperm.slane %v111_v15, 1 }
  0x14   :  { %v127_v34 = vsub.f32 1.0, %v126_v33 }
  0x16   :  { %v128_v35 = vmul.f32 %v4478_v32, %v127_v34 }
  0x18   :  { %v129_v36 = vadd.f32 %v4478_v32, %v128_v35 }
  0x1a   :  { %v5082_v37 = vsel %vm130_vm3, %v4478_v32, %v129_v36 }
  0x7e   :  { %v118_v38 = vpop.xlane.xlu1 %117  ;;  %v115_v39 = vpop.xlane.xlu0 %114 }
  0x7f   :  { %v133_v40 = vmul.f32 %v5082_v37, %v118_v38  ;;  %v132_v41 = vmul.f32 %v5082_v37, %v115_v39 }
  0x81   :  { %v5086_v42 = vsub.f32 %v81_v21, %v133_v40  ;;  %v5088_v43 = vsub.f32 %v79_v22, %v132_v41 }
  0x83   :  { %v141_v44 = vmul.f32 %v5086_v42, %v5086_v42  ;;  %v140_v45 = vmul.f32 %v5088_v43, %v5088_v43 }
  0x85   :  { %v147_v46 = vsel %vm112_vm2, %v141_v44, 0.0  ;;  %v144_v47 = vsel %vm112_vm2, %v140_v45, 0.0 }
  0x86   :  { %v121_v48 = vpop.xlane.xlu1 %120  ;;  %148 = vadd.xlane.f32.xlu0 %v147_v46  ;;  %145 = vadd.xlane.f32.xlu2 %v144_v47  ;;  %v124_v49 = vpop.xlane.xlu0 %123 }
  0x87   :  { %v134_v50 = vmul.f32 %v5082_v37, %v121_v48  ;;  %v135_v51 = vmul.f32 %v5082_v37, %v124_v49 }
  0x89   :  { %v5098_v52 = vsub.f32 %v89_v27, %v134_v50  ;;  %v5100_v53 = vsub.f32 %v91_v28, %v135_v51 }
  0x8b   :  { %v142_v54 = vmul.f32 %v5098_v52, %v5098_v52  ;;  %v143_v55 = vmul.f32 %v5100_v53, %v5100_v53 }
  0x8d   :  { %v150_v56 = vsel %vm112_vm2, %v142_v54, 0.0  ;;  %v153_v57 = vsel %vm112_vm2, %v143_v55, 0.0 }
  0x8e   :  { %151 = vadd.xlane.f32.xlu1 %v150_v56  ;;  %154 = vadd.xlane.f32.xlu2 %v153_v57 }
  0xf9   :  { %v146_v58 = vpop.xlane.xlu2 %145  ;;  %v149_v59 = vpop.xlane.xlu0 %148 }
  0xfa   :  { %v156_v60 = vmul.f32 %v146_v58, %v5082_v37  ;;  %v157_v61 = vmul.f32 %v149_v59, %v5082_v37 }
  0xfc   :  { %v160_v62 = vadd.f32 1e-05, %v156_v60  ;;  %v161_v63 = vadd.f32 1e-05, %v157_v61 }
  0xfe   :  { %4479 = vrsqrt.f32 %v160_v62  ;;  %vm180_vm5 = vweird.f32 %v161_v63  ;;  %vm170_vm7 = vweird.f32 %v160_v62 }
  0xff   :  { %4481 = vrsqrt.f32 %v161_v63 }
 0x101   :  { %v152_v0 = vpop.xlane.xlu1 %151  ;;  %v155_v1 = vpop.xlane.xlu2 %154 }
 0x102   :  { %v158_v2 = vmul.f32 %v152_v0, %v5082_v37  ;;  %v159_v3 = vmul.f32 %v155_v1, %v5082_v37 }
 0x104   :  { %v4480_v4 = vpop.eup %4479  ;;  %v162_v5 = vadd.f32 1e-05, %v158_v2  ;;  %v163_v6 = vadd.f32 1e-05, %v159_v3 }
 0x105   :  { %v4482_v7 = vpop.eup %4481  ;;  %v165_v8 = vmul.f32 %v4480_v4, %v160_v62  ;;  %vm171_vm4 = vweird.f32 %v4480_v4 }
 0x106   :  { %v175_v9 = vmul.f32 %v4482_v7, %v161_v63  ;;  %4483 = vrsqrt.f32 %v162_v5  ;;  %vm181_vm6 = vweird.f32 %v4482_v7  ;;  %vm172_vm8 = vmor %vm170_vm7, %vm171_vm4  ;;  %vm190_vm10 = vweird.f32 %v162_v5 }
 0x107   :  { %v166_v10 = vmul.f32 %v4480_v4, %v165_v8  ;;  %4485 = vrsqrt.f32 %v163_v6  ;;  %vm182_vm9 = vmor %vm180_vm5, %vm181_vm6  ;;  %vm200_vm14 = vweird.f32 %v163_v6 }
 0x108   :  { %v176_v11 = vmul.f32 %v4482_v7, %v175_v9 }
 0x109   :  { %v167_v12 = vmul.f32 0.5, %v166_v10 }
 0x10a   :  { %v177_v13 = vmul.f32 0.5, %v176_v11 }
 0x10b   :  { %v168_v14 = vsub.f32 1.5, %v167_v12 }
 0x10c   :  { %v4484_v16 = vpop.eup %4483  ;;  %v178_v17 = vsub.f32 1.5, %v177_v13 }
 0x10d   :  { %v4486_v18 = vpop.eup %4485  ;;  %v169_v19 = vmul.f32 %v4480_v4, %v168_v14  ;;  %v185_v20 = vmul.f32 %v4484_v16, %v162_v5  ;;  %vm191_vm11 = vweird.f32 %v4484_v16 }
 0x10e   :  { %v179_v21 = vmul.f32 %v4482_v7, %v178_v17  ;;  %v195_v22 = vmul.f32 %v4486_v18, %v163_v6  ;;  %vm192_vm12 = vmor %vm190_vm10, %vm191_vm11  ;;  %vm201_vm13 = vweird.f32 %v4486_v18 }
 0x10f   :  { %v173_v24 = vsel %vm172_vm8, %v4480_v4, %v169_v19  ;;  %v186_v25 = vmul.f32 %v4484_v16, %v185_v20  ;;  %vm202_vm15 = vmor %vm200_vm14, %vm201_vm13 }
 0x110   :  { %v183_v26 = vsel %vm182_vm9, %v4482_v7, %v179_v21  ;;  %v196_v27 = vmul.f32 %v4486_v18, %v195_v22  ;;  %v204_v28 = vmul.f32 %v173_v24, %v5088_v43 }
 0x111   :  { %v187_v30 = vmul.f32 0.5, %v186_v25  ;;  %v205_v31 = vmul.f32 %v183_v26, %v5086_v42 }
 0x112   :  { %v197_v32 = vmul.f32 0.5, %v196_v27  ;;  %v209_v33 = vmul.f32 %v208_v23, %v204_v28 }
 0x113   :  { %v188_v34 = vsub.f32 1.5, %v187_v30  ;;  %v210_v35 = vmul.f32 %v208_v23, %v205_v31 }
 0x114   :  { %v198_v36 = vsub.f32 1.5, %v197_v32  ;;  %v5117_v38 = vadd.f32 %v213_v29, %v209_v33 }
 0x115   :  { %v189_v39 = vmul.f32 %v4484_v16, %v188_v34  ;;  %v5119_v40 = vadd.f32 %v213_v29, %v210_v35 }
 0x116   :  { %v199_v41 = vmul.f32 %v4486_v18, %v198_v36  ;;  %v219_v43 = vsel %vm112_vm2, %v5117_v38, 0.0 }
 0x117   :  { %v193_v44 = vsel %vm192_vm12, %v4484_v16, %v189_v39  ;;  %220 = vadd.xlane.f32.xlu2 %v219_v43  ;;  %v222_v42 = vsel %vm112_vm2, %v5119_v40, 0.0 }
 0x118   :  { %v203_v45 = vsel %vm202_vm15, %v4486_v18, %v199_v41  ;;  %223 = vadd.xlane.f32.xlu1 %v222_v42  ;;  %v206_v46 = vmul.f32 %v193_v44, %v5098_v52  ;;  %v218_v41 = vld [vmem:[%s6643_s4] sm:$0x3f] }
 0x119   :  { %v207_v47 = vmul.f32 %v203_v45, %v5100_v53 }
 0x11a   :  { %v211_v48 = vmul.f32 %v208_v23, %v206_v46 }
 0x11b   :  { %v212_v49 = vmul.f32 %v208_v23, %v207_v47  ;;  %v307_v47 = vperm.slane %v218_v41, 0 }
 0x11c   :  { %v5127_v50 = vadd.f32 %v213_v29, %v211_v48 }
 0x11d   :  { %v5129_v51 = vadd.f32 %v213_v29, %v212_v49 }
 0x11e   :  { %v225_v54 = vsel %vm112_vm2, %v5127_v50, 0.0 }
 0x11f   :  { %226 = vadd.xlane.f32.xlu2 %v225_v54  ;;  %v228_v55 = vsel %vm112_vm2, %v5129_v51, 0.0 }
 0x120   :  { %229 = vadd.xlane.f32.xlu0 %v228_v55 }
 0x18a   :  { %v221_v56 = vpop.xlane.xlu2 %220 }
 0x18b   :  { %v231_v57 = vmul.f32 %v221_v56, %v5082_v37  ;;  %v224_v52 = vpop.xlane.xlu1 %223 }
 0x18c   :  { %v232_v53 = vmul.f32 %v224_v52, %v5082_v37 }
 0x18d   :  { %v5138_v58 = vsub.f32 %v5117_v38, %v231_v57  ;;  %v94_v57 = vlaneseq }
 0x18e   :  { %v5141_v59 = vsub.f32 %v5119_v40, %v232_v53  ;;  %v312_v53 = vperm.slane %v218_v41, 1 }
 0x18f   :  { %v239_v60 = vmul.f32 %v5138_v58, %v5138_v58 }
 0x190   :  { %v240_v61 = vmul.f32 %v5141_v59, %v5141_v59 }
 0x191   :  { %v243_v62 = vsel %vm112_vm2, %v239_v60, 0.0 }
 0x192   :  { %244 = vadd.xlane.f32.xlu0 %v243_v62  ;;  %v227_v63 = vpop.xlane.xlu2 %226  ;;  %v246_v0 = vsel %vm112_vm2, %v240_v61, 0.0 }
 0x193   :  { %v233_v1 = vmul.f32 %v227_v63, %v5082_v37  ;;  %247 = vadd.xlane.f32.xlu2 %v246_v0  ;;  %v230_v2 = vpop.xlane.xlu0 %229 }
 0x194   :  { %v234_v3 = vmul.f32 %v230_v2, %v5082_v37 }
 0x195   :  { %v5152_v4 = vsub.f32 %v5127_v50, %v233_v1 }
 0x196   :  { %v5155_v5 = vsub.f32 %v5129_v51, %v234_v3 }
 0x197   :  { %v241_v6 = vmul.f32 %v5152_v4, %v5152_v4 }
 0x198   :  { %v242_v7 = vmul.f32 %v5155_v5, %v5155_v5 }
 0x199   :  { %v249_v8 = vsel %vm112_vm2, %v241_v6, 0.0 }
 0x19a   :  { %250 = vadd.xlane.f32.xlu0 %v249_v8  ;;  %v252_v9 = vsel %vm112_vm2, %v242_v7, 0.0 }
 0x19b   :  { %253 = vadd.xlane.f32.xlu1 %v252_v9 }
 0x205   :  { %v245_v10 = vpop.xlane.xlu0 %244 }
 0x206   :  { %v248_v11 = vpop.xlane.xlu2 %247  ;;  %v255_v12 = vmul.f32 %v245_v10, %v5082_v37 }
 0x207   :  { %v256_v13 = vmul.f32 %v248_v11, %v5082_v37 }
 0x208   :  { %v259_v14 = vadd.f32 1e-06, %v255_v12 }
 0x209   :  { %v260_v15 = vadd.f32 1e-06, %v256_v13 }
 0x20a   :  { %4487 = vrsqrt.f32 %v259_v14  ;;  %vm269_vm5 = vweird.f32 %v259_v14 }
 0x20b   :  { %4489 = vrsqrt.f32 %v260_v15  ;;  %vm279_vm6 = vweird.f32 %v260_v15 }
 0x20d   :  { %v251_v16 = vpop.xlane.xlu0 %250 }
 0x20e   :  { %v254_v17 = vpop.xlane.xlu1 %253  ;;  %v257_v18 = vmul.f32 %v251_v16, %v5082_v37 }
 0x20f   :  { %v258_v19 = vmul.f32 %v254_v17, %v5082_v37 }
 0x210   :  { %v4488_v20 = vpop.eup %4487  ;;  %v261_v21 = vadd.f32 1e-06, %v257_v18 }
 0x211   :  { %v4490_v22 = vpop.eup %4489  ;;  %v264_v23 = vmul.f32 %v4488_v20, %v259_v14  ;;  %v262_v24 = vadd.f32 1e-06, %v258_v19  ;;  %vm270_vm3 = vweird.f32 %v4488_v20 }
 0x212   :  { %v274_v25 = vmul.f32 %v4490_v22, %v260_v15  ;;  %4491 = vrsqrt.f32 %v261_v21  ;;  %vm280_vm4 = vweird.f32 %v4490_v22  ;;  %vm271_vm7 = vmor %vm269_vm5, %vm270_vm3  ;;  %vm289_vm11 = vweird.f32 %v261_v21 }
 0x213   :  { %v265_v26 = vmul.f32 %v4488_v20, %v264_v23  ;;  %4493 = vrsqrt.f32 %v262_v24  ;;  %vm281_vm8 = vmor %vm279_vm6, %vm280_vm4  ;;  %vm299_vm12 = vweird.f32 %v262_v24  ;;  %v4357_v23 = vld [vmem:[%s6645_s6 + $0x8] sm:$0xff]  ;;  %vm392_vm5 = vcmask 523264  }
 0x214   :  { %v275_v27 = vmul.f32 %v4490_v22, %v274_v25  ;;  %v494_v25 = vld [vmem:[%s6644_s5] sm:$0x3]  ;;  %vm1374_vm6 = vcmask 1041408  }
 0x215   :  { %v266_v28 = vmul.f32 0.5, %v265_v26  ;;  %v495_v26 = vmul.f32 1.442695, %v494_v25 }
 0x216   :  { %v276_v29 = vmul.f32 0.5, %v275_v27 }
 0x217   :  { %v267_v30 = vsub.f32 1.5, %v266_v28  ;;  %4495 = vpow2.f32 %v495_v26 }
 0x218   :  { %v4492_v31 = vpop.eup %4491  ;;  %v277_v32 = vsub.f32 1.5, %v276_v29 }
 0x219   :  { %v4494_v33 = vpop.eup %4493  ;;  %v268_v34 = vmul.f32 %v4488_v20, %v267_v30  ;;  %v284_v35 = vmul.f32 %v4492_v31, %v261_v21  ;;  %vm290_vm9 = vweird.f32 %v4492_v31  ;;  %v4359_v21 = vld [vmem:[%s6645_s6 + $0x18] sm:$0xff] }
 0x21a   :  { %v278_v36 = vmul.f32 %v4490_v22, %v277_v32  ;;  %v294_v39 = vmul.f32 %v4494_v33, %v262_v24  ;;  %vm300_vm10 = vweird.f32 %v4494_v33  ;;  %vm291_vm13 = vmor %vm289_vm11, %vm290_vm9  ;;  %403 = vmatpush.bf16.msra.mxu0 %v4359_v21  ;;  %v4356_v24 = vld [vmem:[%s6645_s6] sm:$0xff]  ;;  %vm6656_vm9 = vcmask 1044480  }
 0x21b   :  { %v272_v43 = vsel %vm271_vm7, %v4488_v20, %v268_v34  ;;  %v285_v44 = vmul.f32 %v4492_v31, %v284_v35  ;;  %vm301_vm14 = vmor %vm299_vm12, %vm300_vm10  ;;  %vm6658_vm7 = vcmask 1042432   ;;  %vm6655_vm10 = vcmask 1045504  }
 0x21c   :  { %v282_v42 = vsel %vm281_vm8, %v4490_v22, %v278_v36  ;;  %v295_v45 = vmul.f32 %v4494_v33, %v294_v39  ;;  %v303_v49 = vmul.f32 %v272_v43, %v5138_v58  ;;  %v5173_v58 = vshrl.u32 %v94_v57, 7  ;;  %v4358_v22 = vld [vmem:[%s6645_s6 + $0x10] sm:$0xff] }
 0x21d   :  { %v286_v46 = vmul.f32 0.5, %v285_v44  ;;  %v304_v48 = vmul.f32 %v282_v42, %v5141_v59  ;;  %v4496_v27 = vpop.eup %4495  ;;  %v498_v57 = vpack.c.bf16 %v494_v25, %v494_v25  ;;  %vm6657_vm8 = vcmask 1043456  }
 0x21e   :  { %v296_v54 = vmul.f32 0.5, %v295_v45  ;;  %v308_v61 = vmul.f32 %v307_v47, %v303_v49  ;;  %v5177_v7 = vadd.s32 16, %v5173_v58  ;;  %vm99_vm3 = vcmp.eq.s32.totalorder %v5173_v58, 0  ;;  %404 = vmatpush.bf16.msra.mxu0 %v4358_v22 }
 0x21f   :  { %v287_v55 = vsub.f32 1.5, %v286_v46  ;;  %v309_v60 = vmul.f32 %v307_v47, %v304_v48  ;;  %vm321_vm4 = vcmp.lt.s32.totalorder %v5173_v58, 1  ;;  %v497_v29 = vsub.f32 0.0, %v4496_v27  ;;  %v4387_v58 = vld [vmem:[%s6648_s9 + $0x28] sm:$0xff] }
 0x220   :  { %v297_v56 = vsub.f32 1.5, %v296_v54  ;;  %v313_v3 = vadd.f32 %v312_v53, %v308_v61  ;;  %6660 = vst [vmem:[#allocation5_spill] sm:$0xff] %v5177_v7  ;;  %vm105_vm15 = vcmp.eq.s32.totalorder %v5177_v7, 16 }
 0x221   :  { %v288_v52 = vmul.f32 %v4492_v31, %v287_v55  ;;  %v314_v6 = vadd.f32 %v312_v53, %v309_v60  ;;  %534 = vrot.lane.b32.xlu0 %v497_v29, %s4968_s30  ;;  %v499_v60 = vunpack.c.l.bf16 %v498_v57 }
 0x222   :  { %v298_v62 = vmul.f32 %v4494_v33, %v297_v56  ;;  %v317_v11 = vrot.slane %v313_v3, 7  ;;  %405 = vmatpush.bf16.msra.mxu0 %v4357_v23 }
 0x223   :  { %v292_v63 = vsel %vm291_vm13, %v4492_v31, %v288_v52  ;;  %v318_v12 = vrot.slane %v314_v6, 7 }
 0x224   :  { %v302_v0 = vsel %vm301_vm14, %v4494_v33, %v298_v62  ;;  %v305_v59 = vmul.f32 %v292_v63, %v5152_v4 }
 0x225   :  { %v306_v1 = vmul.f32 %v302_v0, %v5155_v5  ;;  %v324_v17 = vsel %vm321_vm4, %v317_v11, %v318_v12 }
 0x226   :  { %v310_v2 = vmul.f32 %v307_v47, %v305_v59  ;;  %406 = vmatpush.bf16.msra.mxu0 %v4356_v24 }
 0x227   :  { %v311_v8 = vmul.f32 %v307_v47, %v306_v1 }
 0x228   :  { %v315_v9 = vadd.f32 %v312_v53, %v310_v2 }
 0x229   :  { %v316_v10 = vadd.f32 %v312_v53, %v311_v8 }
 0x22a   :  { %v319_v13 = vrot.slane %v315_v9, 7 }
 0x22b   :  { %v320_v4 = vrot.slane %v316_v10, 7 }
 0x22c   :  { %v323_v5 = vsel %vm321_vm4, %v318_v12, %v319_v13 }
 0x22d   :  { %v325_v14 = vsel %vm321_vm4, %v320_v4, %v317_v11  ;;  %v322_v15 = vsel %vm321_vm4, %v319_v13, %v320_v4  ;;  %v336_v16 = vsel %vm105_vm15, 0.0, %v323_v5 }
 0x22e   :  { %v334_v18 = vsel %vm99_vm3, 0.0, %v325_v14  ;;  %v4408_v19 = vpack.i.bf16 %v322_v15, %v336_v16 }
 0x22f   :  { %v4403_v20 = vpack.i.bf16 %v324_v17, %v334_v18 }
 0x230   :  { %4409 = vrot.lane.b32.xlu2 %v4408_v19, %s4968_s30 }
 0x231   :  { %4404 = vrot.lane.b32.xlu1 %v4403_v20, %s4968_s30 }
 0x28a   :  { %v4410_v35 = vpop.permute.xlu2 %4409 }
 0x28b   :  { %v4412_v36 = vunpack.i.h.bf16 %v4410_v35  ;;  %v4411_v39 = vunpack.i.l.bf16 %v4410_v35 }
 0x28d   :  { %v356_v41 = vsel %vm112_vm2, %v315_v9, %v4411_v39  ;;  %v357_v43 = vsel %vm112_vm2, %v316_v10, %v4412_v36 }
 0x28e   :  { %v359_v44 = vpack.c.bf16 %v357_v43, %v356_v41 }
 0x293   :  { %v535_v62 = vpop.permute.xlu0 %534 }
 0x294   :  { %v5249_v63 = vsel %vm112_vm2, %v497_v29, %v535_v62 }
 0x295   :  { %v558_v0 = vadd.f32 -1e+38, %v5249_v63 }
 0x2a3   :  { %v4405_v28 = vpop.permute.xlu1 %4404 }
 0x2a4   :  { %v4407_v30 = vunpack.i.h.bf16 %v4405_v28  ;;  %v4406_v31 = vunpack.i.l.bf16 %v4405_v28 }
 0x2a6   :  { %v354_v32 = vsel %vm112_vm2, %v313_v3, %v4406_v31  ;;  %v355_v33 = vsel %vm112_vm2, %v314_v6, %v4407_v30 }
 0x2a7   :  { %v358_v34 = vpack.c.bf16 %v355_v33, %v354_v32 }
 0x2a9   :  { %4128 = vmatmul.msk.bf16.vlgmr.msra.gmra.mxu0 %vm392_vm5, %v358_v34 }
 0x2b9   :  { %4129 = vmatmul.msk.bf16.gmra.mxu0 %vm392_vm5, %v359_v44 }
 0x326   :  { %v5218_v42 = vpop.f32.mrf.mxu0 }
 0x327   :  { %v500_v45 = vpack.c.bf16 %v5218_v42, %v5218_v42 }
 0x329   :  { %v504_v46 = vunpack.c.l.bf16 %v500_v45 }
 0x32b   :  { %520 = vrot.lane.b32.xlu1 %v504_v46, %s4969_s1 }
 0x32e   :  { %v5223_v47 = vpop.f32.mrf.mxu0 }
 0x32f   :  { %v501_v48 = vpack.c.bf16 %v5223_v47, %v5223_v47 }
 0x331   :  { %v5227_v49 = vunpack.c.l.bf16 %v501_v48 }
 0x333   :  { %522 = vrot.lane.b32.xlu1 %v5227_v49, %s4969_s1 }
 0x336   :  { %v5231_v54 = vpop.f32.mrf.mxu0 }
 0x337   :  { %v502_v55 = vpack.c.bf16 %v5231_v54, %v5231_v54 }
 0x339   :  { %v5235_v56 = vunpack.c.l.bf16 %v502_v55 }
 0x33b   :  { %510 = vrot.lane.b32.xlu2 %v5235_v56, %s4968_s30 }
 0x33e   :  { %v5239_v52 = vpop.f32.mrf.mxu0 }
 0x33f   :  { %v503_v53 = vpack.c.bf16 %v5239_v52, %v5239_v52 }
 0x341   :  { %v5243_v61 = vunpack.c.l.bf16 %v503_v53 }
 0x343   :  { %529 = vrot.lane.b32.xlu2 %v499_v60, %s4968_s30  ;;  %512 = vrot.lane.b32.xlu0 %v5243_v61, %s4968_s30 }
 0x395   :  { %v511_v59 = vpop.permute.xlu2 %510 }
 0x396   :  { %v5253_v1 = vsel %vm112_vm2, %v504_v46, %v511_v59 }
 0x397   :  { %v559_v2 = vmax.f32 %v558_v0, %v5253_v1  ;;  %v598_v6 = vrot.slane %v5253_v1, 1  ;;  %v539_v10 = vrot.slane %v5253_v1, 7  ;;  %v651_v23 = vrot.slane %v5253_v1, 2 }
 0x398   :  { %v704_v62 = vrot.slane %v5253_v1, 3 }
 0x399   :  { %v597_v3 = vadd.f32 %v559_v2, %v5249_v63  ;;  %v560_v12 = vsub.f32 %v558_v0, %v559_v2  ;;  %v563_v14 = vsub.f32 %v5253_v1, %v559_v2 }
 0x39b   :  { %v600_v8 = vmax.f32 %v597_v3, %v598_v6  ;;  %v561_v17 = vmul.f32 1.442695, %v560_v12  ;;  %v564_v21 = vmul.f32 1.442695, %v563_v14 }
 0x39d   :  { %v530_v9 = vpop.permute.xlu2 %529  ;;  %v605_v5 = vrot.slane %v600_v8, 7  ;;  %v650_v18 = vadd.f32 %v600_v8, %v5249_v63  ;;  %4497 = vpow2.f32 %v561_v17  ;;  %v601_v25 = vsub.f32 %v597_v3, %v600_v8  ;;  %v521_v44 = vpop.permute.xlu1 %520 }
 0x39e   :  { %v5260_v11 = vsel %vm112_vm2, %v499_v60, %v530_v9  ;;  %4499 = vpow2.f32 %v564_v21  ;;  %v5286_v3 = vsel %vm112_vm2, %v521_v44, %v5235_v56  ;;  %v757_v56 = vrot.slane %v5253_v1, 4 }
 0x39f   :  { %v541_v13 = vadd.f32 %v539_v10, %v5260_v11  ;;  %v570_v4 = vadd.f32 %v5260_v11, %v5253_v1  ;;  %v621_v15 = vadd.f32 %v598_v6, %v5260_v11  ;;  %v607_v20 = vsub.f32 %v5253_v1, %v605_v5 }
 0x3a0   :  { %v5272_v26 = vmax.f32 %v650_v18, %v651_v23  ;;  %v674_v27 = vadd.f32 %v651_v23, %v5260_v11  ;;  %v602_v33 = vmul.f32 1.442695, %v601_v25 }
 0x3a1   :  { %v572_v16 = vrot.slane %v570_v4, 1  ;;  %v542_v19 = vmax.f32 %v541_v13, -1e+38  ;;  %v623_v22 = vrot.slane %v621_v15, 1  ;;  %v608_v29 = vmul.f32 1.442695, %v607_v20 }
 0x3a2   :  { %v658_v34 = vrot.slane %v5272_v26, 6  ;;  %v676_v35 = vrot.slane %v674_v27, 1  ;;  %v5278_v55 = vadd.f32 %v5272_v26, %v5249_v63 }
 0x3a3   :  { %v574_v24 = vmax.f32 %v559_v2, %v572_v16  ;;  %v543_v28 = vsub.f32 -1e+38, %v542_v19  ;;  %v625_v30 = vmax.f32 %v600_v8, %v623_v22  ;;  %v546_v31 = vsub.f32 %v541_v13, %v542_v19  ;;  %v4498_v41 = vpop.eup %4497 }
 0x3a4   :  { %4501 = vpow2.f32 %v608_v29  ;;  %v4500_v57 = vpop.eup %4499  ;;  %v660_v53 = vsub.f32 %v5253_v1, %v658_v34  ;;  %v678_v60 = vmax.f32 %v5272_v26, %v676_v35  ;;  %v566_v0 = vmul.f32 0.0, %v4498_v41 }
 0x3a5   :  { %v579_v32 = vrot.slane %v574_v24, 7  ;;  %v544_v36 = vmul.f32 1.442695, %v543_v28  ;;  %v575_v39 = vsub.f32 %v559_v2, %v574_v24  ;;  %v626_v43 = vsub.f32 %v600_v8, %v625_v30  ;;  %v523_v35 = vpop.permute.xlu1 %522 }
 0x3a6   :  { %v547_v45 = vmul.f32 1.442695, %v546_v31  ;;  %v630_v48 = vrot.slane %v625_v30, 7  ;;  %4503 = vpow2.f32 %v602_v33  ;;  %v654_v2 = vsub.f32 %v650_v18, %v5272_v26 }
 0x3a7   :  { %v581_v46 = vsub.f32 %v570_v4, %v579_v32  ;;  %4505 = vpow2.f32 %v544_v36  ;;  %v576_v59 = vmul.f32 1.442695, %v575_v39  ;;  %v627_v6 = vmul.f32 1.442695, %v626_v43 }
 0x3a8   :  { %v5289_v8 = vmax.f32 %v5278_v55, %v704_v62  ;;  %4507 = vpow2.f32 %v547_v45  ;;  %v567_v12 = vmul.f32 %v4500_v57, %v5286_v3  ;;  %v632_v4 = vsub.f32 %v621_v15, %v630_v48 }
 0x3a9   :  { %v582_v13 = vmul.f32 1.442695, %v581_v46  ;;  %v661_v5 = vmul.f32 1.442695, %v660_v53  ;;  %v683_v14 = vrot.slane %v678_v60, 7  ;;  %v5293_v16 = vadd.f32 %v704_v62, %v5260_v11 }
 0x3aa   :  { %v4502_v9 = vpop.eup %4501  ;;  %v569_v17 = vadd.f32 %v4500_v57, %v566_v0  ;;  %4509 = vpow2.f32 %v576_v59  ;;  %v655_v18 = vmul.f32 1.442695, %v654_v2  ;;  %v711_v21 = vrot.slane %v5289_v8, 5 }
 0x3ab   :  { %v611_v20 = vmul.f32 %v4502_v9, %v5286_v3  ;;  %4511 = vpow2.f32 %v627_v6  ;;  %v810_v22 = vrot.slane %v5253_v1, 5  ;;  %v568_v15 = vadd.f32 %v567_v12, %v566_v0 }
 0x3ac   :  { %v4504_v19 = vpop.eup %4503  ;;  %4513 = vpow2.f32 %v582_v13  ;;  %v633_v24 = vmul.f32 1.442695, %v632_v4  ;;  %v679_v25 = vsub.f32 %v5272_v26, %v678_v60  ;;  %v618_v28 = vrot.slane %v4502_v9, 1 }
 0x3ad   :  { %v4506_v23 = vpop.eup %4505  ;;  %4515 = vpow2.f32 %v661_v5  ;;  %v685_v29 = vsub.f32 %v674_v27, %v683_v14  ;;  %v729_v30 = vrot.slane %v5293_v16, 1  ;;  %v551_v32 = vrot.slane %v5286_v3, 7 }
 0x3ae   :  { %v4508_v31 = vpop.eup %4507  ;;  %v616_v33 = vmul.f32 %v4504_v19, %v569_v17  ;;  %4517 = vpow2.f32 %v655_v18  ;;  %v863_v34 = vrot.slane %v5253_v1, 6  ;;  %v549_v36 = vmul.f32 0.0, %v4506_v23 }
 0x3af   :  { %v613_v39 = vrot.slane %v611_v20, 1  ;;  %v713_v41 = vsub.f32 %v5253_v1, %v711_v21  ;;  %v731_v43 = vmax.f32 %v5289_v8, %v729_v30  ;;  %4519 = vpow2.f32 %v633_v24 }
 0x3b0   :  { %v4510_v26 = vpop.eup %4509  ;;  %v636_v27 = vrot.slane %v5286_v3, 1  ;;  %v680_v44 = vmul.f32 1.442695, %v679_v25  ;;  %v707_v45 = vsub.f32 %v5278_v55, %v5289_v8  ;;  %v553_v48 = vmul.f32 %v4508_v31, %v551_v32 }
 0x3b1   :  { %v4512_v46 = vpop.eup %4511  ;;  %v610_v57 = vmul.f32 %v4504_v19, %v568_v15  ;;  %v620_v53 = vadd.f32 %v618_v28, %v616_v33  ;;  %v686_v60 = vmul.f32 1.442695, %v685_v29  ;;  %v5310_v0 = vsel %vm112_vm2, %v523_v35, %v5243_v61 }
 0x3b2   :  { %v4514_v62 = vpop.eup %4513  ;;  %v689_v59 = vrot.slane %v5286_v3, 2  ;;  %v714_v2 = vmul.f32 1.442695, %v713_v41  ;;  %v756_v6 = vadd.f32 %v5289_v8, %v5249_v63  ;;  %v555_v12 = vadd.f32 %v4508_v31, %v549_v36 }
 0x3b3   :  { %v4516_v9 = vpop.eup %4515  ;;  %v584_v13 = vmul.f32 %v4510_v26, %v568_v15  ;;  %v615_v55 = vadd.f32 %v613_v39, %v610_v57  ;;  %v736_v4 = vrot.slane %v731_v43, 7  ;;  %v590_v14 = vmul.f32 %v4510_v26, %v569_v17 }
 0x3b4   :  { %v4518_v5 = vpop.eup %4517  ;;  %4521 = vpow2.f32 %v680_v44  ;;  %v708_v18 = vmul.f32 1.442695, %v707_v45  ;;  %v5315_v19 = vmax.f32 %v756_v6, %v757_v56  ;;  %v5317_v20 = vadd.f32 %v553_v48, %v549_v36 }
 0x3b5   :  { %v592_v61 = vrot.slane %v4514_v62, 1  ;;  %v669_v21 = vmul.f32 %v4518_v5, %v620_v53  ;;  %4523 = vpow2.f32 %v686_v60  ;;  %v4520_v23 = vpop.eup %4519  ;;  %v664_v24 = vmul.f32 %v4516_v9, %v5286_v3  ;;  %v513_v39 = vpop.permute.xlu0 %512 }
 0x3b6   :  { %v671_v25 = vrot.slane %v4516_v9, 2  ;;  %4525 = vpow2.f32 %v714_v2  ;;  %v732_v15 = vsub.f32 %v5289_v8, %v731_v43  ;;  %v738_v28 = vsub.f32 %v5293_v16, %v736_v4 }
 0x3b7   :  { %v764_v17 = vrot.slane %v5315_v19, 4  ;;  %v5324_v29 = vadd.f32 %v757_v56, %v5260_v11  ;;  %v5328_v30 = vadd.f32 %v5315_v19, %v5249_v63  ;;  %v585_v31 = vmul.f32 %v4514_v62, %v5286_v3 }
 0x3b8   :  { %v635_v32 = vmul.f32 %v4512_v46, %v615_v55  ;;  %v643_v33 = vmul.f32 %v4512_v46, %v620_v53  ;;  %4527 = vpow2.f32 %v708_v18  ;;  %v594_v35 = vadd.f32 %v592_v61, %v590_v14 }
 0x3b9   :  { %v645_v36 = vrot.slane %v4520_v23, 1  ;;  %v766_v8 = vsub.f32 %v5253_v1, %v764_v17  ;;  %v5335_v16 = vmax.f32 %v5328_v30, %v810_v22  ;;  %v663_v41 = vmul.f32 %v4518_v5, %v615_v55 }
 0x3ba   :  { %v4522_v56 = vpop.eup %4521  ;;  %v666_v43 = vrot.slane %v664_v24, 2  ;;  %v733_v26 = vmul.f32 1.442695, %v732_v15  ;;  %v760_v44 = vsub.f32 %v756_v6, %v5315_v19  ;;  %4529 = vrcp.f32 %v555_v12 }
 0x3bb   :  { %v4524_v45 = vpop.eup %4523  ;;  %v673_v46 = vadd.f32 %v671_v25, %v669_v21  ;;  %v739_v48 = vmul.f32 1.442695, %v738_v28  ;;  %v782_v57 = vrot.slane %v5324_v29, 1  ;;  %v587_v60 = vrot.slane %v585_v31, 1 }
 0x3bc   :  { %v4526_v53 = vpop.eup %4525  ;;  %v638_v62 = vmul.f32 %v4520_v23, %v636_v27  ;;  %v767_v2 = vmul.f32 1.442695, %v766_v8  ;;  %v817_v9 = vrot.slane %v5335_v16, 3  ;;  %v5342_v4 = vsel %vm112_vm2, %v5227_v49, %v513_v39 }
 0x3bd   :  { %4531 = vrcp.f32 %v594_v35  ;;  %v647_v55 = vadd.f32 %v645_v36, %v643_v33  ;;  %v784_v6 = vmax.f32 %v5315_v19, %v782_v57  ;;  %v668_v12 = vadd.f32 %v666_v43, %v663_v41 }
 0x3be   :  { %v4528_v5 = vpop.eup %4527  ;;  %v691_v14 = vmul.f32 %v4524_v45, %v689_v59  ;;  %4533 = vpow2.f32 %v733_v26  ;;  %v761_v18 = vmul.f32 1.442695, %v760_v44  ;;  %v724_v21 = vrot.slane %v4526_v53, 3 }
 0x3bf   :  { %v722_v61 = vmul.f32 %v4528_v5, %v673_v46  ;;  %4535 = vpow2.f32 %v739_v48  ;;  %v833_v27 = vadd.f32 %v810_v22, %v5260_v11  ;;  %v589_v23 = vadd.f32 %v587_v60, %v584_v13 }
 0x3c0   :  { %v640_v24 = vrot.slane %v638_v62, 1  ;;  %4537 = vpow2.f32 %v767_v2  ;;  %v819_v49 = vsub.f32 %v5253_v1, %v817_v9  ;;  %v4530_v25 = vpop.eup %4529  ;;  %v696_v15 = vmul.f32 %v4522_v56, %v673_v46 }
 0x3c1   :  { %4539 = vrcp.f32 %v647_v55  ;;  %v698_v28 = vrot.slane %v4524_v45, 1  ;;  %v789_v17 = vrot.slane %v784_v6, 7  ;;  %v717_v59 = vmul.f32 %v4526_v53, %v5286_v3 }
 0x3c2   :  { %4541 = vpow2.f32 %v761_v18  ;;  %v813_v31 = vsub.f32 %v5328_v30, %v5335_v16  ;;  %v862_v33 = vadd.f32 %v5335_v16, %v5249_v63  ;;  %v688_v13 = vmul.f32 %v4522_v56, %v668_v12 }
 0x3c3   :  { %v4532_v22 = vpop.eup %4531  ;;  %v693_v35 = vrot.slane %v691_v14, 1  ;;  %v726_v36 = vadd.f32 %v724_v21, %v722_v61  ;;  %v835_v8 = vrot.slane %v833_v27, 1  ;;  %v5355_v41 = vmul.f32 %v4530_v25, %v5317_v20 }
 0x3c4   :  { %v4534_v39 = vpop.eup %4533  ;;  %v642_v43 = vadd.f32 %v640_v24, %v635_v32  ;;  %v785_v26 = vsub.f32 %v5315_v19, %v784_v6  ;;  %v820_v44 = vmul.f32 1.442695, %v819_v49  ;;  %v700_v46 = vadd.f32 %v698_v28, %v696_v15 }
 0x3c5   :  { %v4536_v45 = vpop.eup %4535  ;;  %v742_v30 = vrot.slane %v5286_v3, 3  ;;  %v837_v48 = vmax.f32 %v5335_v16, %v835_v8  ;;  %v5362_v56 = vmax.f32 %v862_v33, %v863_v34  ;;  %v716_v53 = vmul.f32 %v4528_v5, %v668_v12 }
 0x3c6   :  { %v4538_v57 = vpop.eup %4537  ;;  %v719_v60 = vrot.slane %v717_v59, 3  ;;  %v791_v20 = vsub.f32 %v5324_v29, %v789_v17  ;;  %v814_v62 = vmul.f32 1.442695, %v813_v31  ;;  %v5365_v2 = vmul.f32 %v4532_v22, %v589_v23 }
 0x3c7   :  { %v4540_v32 = vpop.eup %4539  ;;  %v695_v19 = vadd.f32 %v693_v35, %v688_v13  ;;  %v749_v9 = vmul.f32 %v4534_v39, %v726_v36  ;;  %v870_v55 = vrot.slane %v5362_v56, 2  ;;  %v751_v14 = vrot.slane %v4536_v45, 1 }
 0x3c8   :  { %v4542_v6 = vpop.eup %4541  ;;  %v786_v18 = vmul.f32 1.442695, %v785_v26  ;;  %4543 = vpow2.f32 %v820_v44  ;;  %v886_v61 = vadd.f32 %v863_v34, %v5260_v11  ;;  %v777_v12 = vrot.slane %v4538_v57, 4 }
 0x3c9   :  { %v775_v5 = vmul.f32 %v4542_v6, %v726_v36  ;;  %v842_v21 = vrot.slane %v837_v48, 7  ;;  %v872_v29 = vsub.f32 %v5253_v1, %v870_v55  ;;  %v721_v24 = vadd.f32 %v719_v60, %v716_v53 }
 0x3ca   :  { %v792_v23 = vmul.f32 1.442695, %v791_v20  ;;  %4545 = vpow2.f32 %v814_v62  ;;  %v866_v49 = vsub.f32 %v862_v33, %v5362_v56  ;;  %v5373_v25 = vmul.f32 %v4540_v32, %v642_v43 }
 0x3cb   :  { %4547 = vrcp.f32 %v700_v46  ;;  %v753_v15 = vadd.f32 %v751_v14, %v749_v9  ;;  %v770_v28 = vmul.f32 %v4538_v57, %v5286_v3  ;;  %v795_v17 = vrot.slane %v5286_v3, 4 }
 0x3cc   :  { %v838_v34 = vsub.f32 %v5335_v16, %v837_v48  ;;  %v873_v59 = vmul.f32 1.442695, %v872_v29  ;;  %v888_v31 = vrot.slane %v886_v61, 1  ;;  %v779_v22 = vadd.f32 %v777_v12, %v775_v5 }
 0x3cd   :  { %4549 = vpow2.f32 %v786_v18  ;;  %v844_v13 = vsub.f32 %v833_v27, %v842_v21  ;;  %v915_v35 = vadd.f32 %v5362_v56, %v5249_v63  ;;  %v769_v33 = vmul.f32 %v4542_v6, %v721_v24 }
 0x3ce   :  { %v4544_v36 = vpop.eup %4543  ;;  %4551 = vpow2.f32 %v792_v23  ;;  %v867_v8 = vmul.f32 1.442695, %v866_v49  ;;  %v890_v43 = vmax.f32 %v5362_v56, %v888_v31  ;;  %v772_v26 = vrot.slane %v770_v28, 4 }
 0x3cf   :  { %4553 = vrcp.f32 %v753_v15  ;;  %v5383_v44 = vmax.f32 %v915_v35, %v539_v10  ;;  %v938_v16 = vrot.slane %v5342_v4, 7  ;;  %v741_v48 = vmul.f32 %v4534_v39, %v721_v24 }
 0x3d0   :  { %v4546_v46 = vpop.eup %4545  ;;  %v744_v27 = vmul.f32 %v4536_v45, %v742_v30  ;;  %v839_v57 = vmul.f32 1.442695, %v838_v34  ;;  %4555 = vpow2.f32 %v873_v59  ;;  %v830_v20 = vrot.slane %v4544_v36, 5 }
 0x3d1   :  { %v4548_v53 = vpop.eup %4547  ;;  %v828_v60 = vmul.f32 %v4546_v46, %v779_v22  ;;  %v845_v62 = vmul.f32 1.442695, %v844_v13  ;;  %v921_v32 = vrot.slane %v5383_v44, 1  ;;  %4557 = vpow2.f32 %v867_v8 }
 0x3d2   :  { %v895_v9 = vrot.slane %v890_v43, 7  ;;  %v917_v55 = vsub.f32 %v915_v35, %v5383_v44  ;;  %v970_v10 = vadd.f32 %v5383_v44, %v5249_v63  ;;  %v5392_v14 = vadd.f32 %v772_v26, %v769_v33 }
 0x3d3   :  { %v5390_v6 = vpop.eup %4549  ;;  %v823_v39 = vmul.f32 %v4544_v36, %v5286_v3  ;;  %v923_v45 = vsub.f32 %v5253_v1, %v921_v32  ;;  %v5397_v30 = vadd.f32 %v938_v16, %v5260_v11  ;;  %v5399_v5 = vmul.f32 %v4548_v53, %v695_v19 }
 0x3d4   :  { %v4552_v18 = vpop.eup %4551  ;;  %v746_v12 = vrot.slane %v744_v27, 1  ;;  %4559 = vpow2.f32 %v839_v57  ;;  %v848_v21 = vrot.slane %v5286_v3, 5  ;;  %v832_v24 = vadd.f32 %v830_v20, %v828_v60 }
 0x3d5   :  { %v4554_v29 = vpop.eup %4553  ;;  %4561 = vpow2.f32 %v845_v62  ;;  %v891_v23 = vsub.f32 %v5362_v56, %v890_v43  ;;  %v924_v49 = vmul.f32 1.442695, %v923_v45  ;;  %v897_v34 = vsub.f32 %v886_v61, %v895_v9 }
 0x3d6   :  { %v4556_v15 = vpop.eup %4555  ;;  %v748_v28 = vadd.f32 %v746_v12, %v741_v48  ;;  %v918_v1 = vmul.f32 1.442695, %v917_v55  ;;  %v5404_v59 = vmax.f32 %v970_v10, %v5342_v4  ;;  %v5406_v31 = vmul.f32 %v4552_v18, %v795_v17 }
 0x3d7   :  { %v822_v19 = vmul.f32 %v4546_v46, %v5392_v14  ;;  %v825_v13 = vrot.slane %v823_v39, 5  ;;  %v942_v35 = vrot.slane %v5397_v30, 1  ;;  %v4558_v36 = vpop.eup %4557  ;;  %v802_v33 = vmul.f32 %v5390_v6, %v779_v22 }
 0x3d8   :  { %v901_v56 = vrot.slane %v5286_v3, 6  ;;  %4563 = vpow2.f32 %v924_v49  ;;  %v5414_v61 = vadd.f32 %v5260_v11, %v5342_v4  ;;  %v881_v8 = vmul.f32 %v4558_v36, %v832_v24 }
 0x3d9   :  { %v883_v43 = vrot.slane %v4556_v15, 6  ;;  %v892_v26 = vmul.f32 1.442695, %v891_v23  ;;  %v956_v17 = vrot.slane %v5310_v0, 7  ;;  %v804_v46 = vrot.slane %v4552_v18, 1 }
 0x3da   :  { %v4560_v16 = vpop.eup %4559  ;;  %v898_v48 = vmul.f32 1.442695, %v897_v34  ;;  %4565 = vpow2.f32 %v918_v1  ;;  %v972_v27 = vsub.f32 %v970_v10, %v5404_v59  ;;  %v799_v22 = vrot.slane %v5406_v31, 1 }
 0x3db   :  { %v4562_v57 = vpop.eup %4561  ;;  %v827_v53 = vadd.f32 %v825_v13, %v822_v19  ;;  %v876_v60 = vmul.f32 %v4556_v15, %v5286_v3  ;;  %v944_v20 = vmax.f32 %v5383_v44, %v942_v35  ;;  %v5421_v62 = vmul.f32 %v4554_v29, %v748_v28 }
 0x3dc   :  { %v806_v32 = vadd.f32 %v804_v46, %v802_v33  ;;  %v855_v9 = vmul.f32 %v4560_v16, %v832_v24  ;;  %v985_v55 = vrot.slane %v5414_v61, 1  ;;  %v885_v39 = vadd.f32 %v883_v43, %v881_v8 }
 0x3dd   :  { %4567 = vpow2.f32 %v892_v26  ;;  %v1010_v45 = vadd.f32 %v5404_v59, %v5249_v63  ;;  %v1011_v10 = vrot.slane %v5342_v4, 1  ;;  %v857_v12 = vrot.slane %v4562_v57, 1 }
 0x3de   :  { %v4564_v18 = vpop.eup %4563  ;;  %4569 = vpow2.f32 %v898_v48  ;;  %v973_v23 = vmul.f32 1.442695, %v972_v27  ;;  %v975_v49 = vsub.f32 %v5342_v4, %v5404_v59  ;;  %v875_v29 = vmul.f32 %v4558_v36, %v827_v53 }
 0x3df   :  { %v878_v15 = vrot.slane %v876_v60, 6  ;;  %v949_v28 = vrot.slane %v944_v20, 7  ;;  %v5429_v24 = vmax.f32 %v1010_v45, %v1011_v10  ;;  %4571 = vrcp.f32 %v806_v32 }
 0x3e0   :  { %v4566_v34 = vpop.eup %4565  ;;  %v850_v1 = vmul.f32 %v4562_v57, %v848_v21  ;;  %v859_v31 = vadd.f32 %v857_v12, %v855_v9  ;;  %v987_v19 = vmax.f32 %v5404_v59, %v985_v55  ;;  %v934_v35 = vrot.slane %v4564_v18, 7 }
 0x3e1   :  { %v932_v13 = vmul.f32 %v4566_v34, %v885_v39  ;;  %v945_v33 = vsub.f32 %v5383_v44, %v944_v20  ;;  %v1018_v8 = vrot.slane %v5429_v24, 7  ;;  %v794_v43 = vmul.f32 %v5390_v6, %v5392_v14 }
 0x3e2   :  { %4573 = vpow2.f32 %v973_v23  ;;  %v976_v36 = vmul.f32 1.442695, %v975_v49  ;;  %v1014_v26 = vsub.f32 %v1010_v45, %v5429_v24  ;;  %v847_v48 = vmul.f32 %v4560_v16, %v827_v53 }
 0x3e3   :  { %v4568_v46 = vpop.eup %4567  ;;  %v880_v27 = vadd.f32 %v878_v15, %v875_v29  ;;  %v951_v21 = vsub.f32 %v5397_v30, %v949_v28  ;;  %v1020_v57 = vsub.f32 %v5342_v4, %v1018_v8  ;;  %v852_v32 = vrot.slane %v850_v1, 1 }
 0x3e4   :  { %v4570_v60 = vpop.eup %4569  ;;  %4575 = vrcp.f32 %v859_v31  ;;  %v927_v44 = vmul.f32 %v4564_v18, %v5286_v3  ;;  %v992_v20 = vrot.slane %v987_v19, 7  ;;  %v908_v9 = vmul.f32 %v4568_v46, %v885_v39 }
 0x3e5   :  { %v5440_v55 = vadd.f32 %v934_v35, %v932_v13  ;;  %v946_v6 = vmul.f32 1.442695, %v945_v33  ;;  %v1021_v14 = vmul.f32 1.442695, %v1020_v57  ;;  %v4572_v12 = vpop.eup %4571  ;;  %4577 = vpow2.f32 %v976_v36 }
 0x3e6   :  { %v988_v16 = vsub.f32 %v5404_v59, %v987_v19  ;;  %v1015_v53 = vmul.f32 1.442695, %v1014_v26  ;;  %v1063_v30 = vadd.f32 %v5429_v24, %v5249_v63  ;;  %v910_v45 = vrot.slane %v4570_v60, 1 }
 0x3e7   :  { %v926_v23 = vmul.f32 %v4566_v34, %v880_v27  ;;  %v952_v49 = vmul.f32 1.442695, %v951_v21  ;;  %v5446_v29 = vadd.f32 %v1011_v10, %v5260_v11  ;;  %v929_v39 = vrot.slane %v927_v44, 7 }
 0x3e8   :  { %v4574_v18 = vpop.eup %4573  ;;  %v994_v15 = vsub.f32 %v5414_v61, %v992_v20  ;;  %4579 = vpow2.f32 %v1021_v14  ;;  %v1064_v28 = vrot.slane %v5342_v4, 2  ;;  %v801_v1 = vadd.f32 %v799_v22, %v794_v43 }
 0x3e9   :  { %v854_v31 = vadd.f32 %v852_v32, %v847_v48  ;;  %4581 = vpow2.f32 %v946_v6  ;;  %v981_v59 = vmul.f32 %v4574_v18, %v5440_v55  ;;  %v903_v34 = vmul.f32 %v4570_v60, %v901_v56 }
 0x3ea   :  { %v4576_v19 = vpop.eup %4575  ;;  %v912_v13 = vadd.f32 %v910_v45, %v908_v9  ;;  %4583 = vpow2.f32 %v1015_v53  ;;  %v5453_v10 = vmax.f32 %v1063_v30, %v1064_v28  ;;  %v5455_v35 = vmul.f32 %v4572_v12, %v801_v1 }
 0x3eb   :  { %v900_v33 = vmul.f32 %v4568_v46, %v880_v27  ;;  %v989_v61 = vmul.f32 1.442695, %v988_v16  ;;  %v1036_v8 = vrot.slane %v5446_v29, 1  ;;  %v4578_v36 = vpop.eup %4577  ;;  %v931_v22 = vadd.f32 %v929_v39, %v926_v23 }
 0x3ec   :  { %4585 = vpow2.f32 %v952_v49  ;;  %v995_v43 = vmul.f32 1.442695, %v994_v15  ;;  %v1067_v26 = vsub.f32 %v1063_v30, %v5453_v10  ;;  %v5459_v48 = vadd.f32 %v4578_v36, %v981_v59 }
 0x3ed   :  { %v1071_v3 = vrot.slane %v5453_v10, 6  ;;  %v1116_v56 = vadd.f32 %v5453_v10, %v5249_v63  ;;  %v1117_v21 = vrot.slane %v5342_v4, 3  ;;  %v5465_v46 = vmul.f32 %v4576_v19, %v854_v31 }
 0x3ee   :  { %v4580_v57 = vpop.eup %4579  ;;  %v905_v27 = vrot.slane %v903_v34, 1  ;;  %4587 = vrcp.f32 %v912_v13  ;;  %v1068_v60 = vmul.f32 1.442695, %v1067_v26  ;;  %v1038_v44 = vmax.f32 %v5429_v24, %v1036_v8 }
 0x3ef   :  { %v4582_v32 = vpop.eup %4581  ;;  %v1073_v20 = vsub.f32 %v5342_v4, %v1071_v3  ;;  %v5470_v9 = vadd.f32 %v1064_v28, %v5260_v11  ;;  %v5472_v6 = vmax.f32 %v1116_v56, %v1117_v21  ;;  %v978_v16 = vmul.f32 %v4574_v18, %v931_v22 }
 0x3f0   :  { %v4584_v14 = vpop.eup %4583  ;;  %v907_v12 = vadd.f32 %v905_v27, %v900_v33  ;;  %4589 = vpow2.f32 %v989_v61  ;;  %v1049_v53 = vrot.slane %v5310_v0, 1  ;;  %v1031_v45 = vrot.slane %v4580_v57, 1 }
 0x3f1   :  { %4591 = vpow2.f32 %v995_v43  ;;  %v1029_v30 = vmul.f32 %v4584_v14, %v5459_v48  ;;  %v1074_v23 = vmul.f32 1.442695, %v1073_v20  ;;  %v979_v39 = vmul.f32 %v4578_v36, %v5310_v0 }
 0x3f2   :  { %v4586_v49 = vpop.eup %4585  ;;  %4593 = vpow2.f32 %v1068_v60  ;;  %v1120_v15 = vsub.f32 %v1116_v56, %v5472_v6  ;;  %v1140_v28 = vadd.f32 %v1117_v21, %v5260_v11  ;;  %v963_v1 = vmul.f32 %v4582_v32, %v5440_v55 }
 0x3f3   :  { %v1039_v18 = vsub.f32 %v5429_v24, %v1038_v44  ;;  %4595 = vpow2.f32 %v1074_v23  ;;  %v1089_v31 = vrot.slane %v5470_v9, 1  ;;  %v954_v19 = vmul.f32 %v4582_v32, %v931_v22 }
 0x3f4   :  { %v4588_v59 = vpop.eup %4587  ;;  %v5482_v34 = vadd.f32 %v979_v39, %v978_v16  ;;  %v1024_v13 = vmul.f32 %v4580_v57, %v5310_v0  ;;  %v1043_v33 = vrot.slane %v1038_v44, 7  ;;  %v958_v61 = vmul.f32 %v4586_v49, %v956_v17 }
 0x3f5   :  { %v5487_v8 = vadd.f32 %v1031_v45, %v1029_v30  ;;  %v1091_v36 = vmax.f32 %v5453_v10, %v1089_v31  ;;  %v1124_v55 = vrot.slane %v5472_v6, 5  ;;  %v1121_v43 = vmul.f32 1.442695, %v1120_v15 }
 0x3f6   :  { %v5491_v24 = vpop.eup %4589  ;;  %v1142_v26 = vrot.slane %v1140_v28, 1  ;;  %v1169_v22 = vadd.f32 %v5472_v6, %v5249_v63  ;;  %v1170_v3 = vrot.slane %v5342_v4, 4  ;;  %v5498_v21 = vmul.f32 %v4588_v59, %v907_v12 }
 0x3f7   :  { %v5496_v56 = vpop.eup %4591  ;;  %v965_v17 = vrot.slane %v4586_v49, 1  ;;  %v1040_v57 = vmul.f32 1.442695, %v1039_v18  ;;  %v1126_v27 = vsub.f32 %v5342_v4, %v1124_v55  ;;  %v1023_v32 = vmul.f32 %v4584_v14, %v5482_v34 }
 0x3f8   :  { %v4594_v60 = vpop.eup %4593  ;;  %v1026_v44 = vrot.slane %v1024_v13, 1  ;;  %v1144_v20 = vmax.f32 %v5472_v6, %v1142_v26  ;;  %v5503_v16 = vmax.f32 %v1169_v22, %v1170_v3  ;;  %v960_v45 = vrot.slane %v958_v61, 1 }
 0x3f9   :  { %v4596_v30 = vpop.eup %4595  ;;  %v1045_v23 = vsub.f32 %v5446_v29, %v1043_v33  ;;  %v1082_v39 = vmul.f32 %v4594_v60, %v5487_v8  ;;  %v1127_v12 = vmul.f32 1.442695, %v1126_v27  ;;  %v1096_v49 = vrot.slane %v1091_v36, 7 }
 0x3fa   :  { %v1084_v15 = vrot.slane %v4596_v30, 2  ;;  %4597 = vpow2.f32 %v1121_v43  ;;  %v1193_v18 = vadd.f32 %v1170_v3, %v5260_v11  ;;  %v5508_v31 = vadd.f32 %v965_v17, %v963_v1 }
 0x3fb   :  { %4599 = vpow2.f32 %v1127_v12  ;;  %v1173_v14 = vsub.f32 %v1169_v22, %v5503_v16  ;;  %v1177_v59 = vrot.slane %v5503_v16, 4  ;;  %v5512_v13 = vadd.f32 %v1026_v44, %v1023_v32 }
 0x3fc   :  { %v1077_v61 = vmul.f32 %v4596_v30, %v5310_v0  ;;  %v1149_v33 = vrot.slane %v1144_v20, 7  ;;  %v5516_v55 = vadd.f32 %v960_v45, %v954_v19  ;;  %v1046_v26 = vmul.f32 1.442695, %v1045_v23 }
 0x3fd   :  { %v5518_v43 = vadd.f32 %v1084_v15, %v1082_v39  ;;  %v1179_v1 = vsub.f32 %v5342_v4, %v1177_v59  ;;  %v1092_v3 = vsub.f32 %v5453_v10, %v1091_v36  ;;  %v1098_v22 = vsub.f32 %v5470_v9, %v1096_v49 }
 0x3fe   :  { %v1174_v17 = vmul.f32 1.442695, %v1173_v14  ;;  %v1195_v27 = vrot.slane %v1193_v18, 1  ;;  %4601 = vpow2.f32 %v1040_v57  ;;  %v1145_v32 = vsub.f32 %v5472_v6, %v1144_v20 }
 0x3ff   :  { %v1180_v44 = vmul.f32 1.442695, %v1179_v1  ;;  %v1223_v30 = vrot.slane %v5342_v4, 5  ;;  %v1076_v19 = vmul.f32 %v4594_v60, %v5512_v13  ;;  %v1079_v45 = vrot.slane %v1077_v61, 2 }
 0x400   :  { %v4598_v12 = vpop.eup %4597  ;;  %v1151_v23 = vsub.f32 %v1140_v28, %v1149_v33  ;;  %v1197_v39 = vmax.f32 %v5503_v16, %v1195_v27  ;;  %v5529_v10 = vmul.f32 %v5496_v56, %v5310_v0  ;;  %4603 = vpow2.f32 %v1046_v26 }
 0x401   :  { %v4600_v15 = vpop.eup %4599  ;;  %v1135_v9 = vmul.f32 %v4598_v12, %v5518_v43  ;;  %v1222_v6 = vadd.f32 %v5503_v16, %v5249_v63  ;;  %v1093_v36 = vmul.f32 1.442695, %v1092_v3  ;;  %v1099_v57 = vmul.f32 1.442695, %v1098_v22 }
 0x402   :  { %v1137_v20 = vrot.slane %v4600_v15, 3  ;;  %4605 = vpow2.f32 %v1174_v17  ;;  %v1146_v60 = vmul.f32 1.442695, %v1145_v32  ;;  %v1246_v49 = vadd.f32 %v1223_v30, %v5260_v11 }
 0x403   :  { %4607 = vpow2.f32 %v1180_v44  ;;  %v1225_v28 = vmax.f32 %v1222_v6, %v1223_v30  ;;  %v5535_v14 = vadd.f32 %v1079_v45, %v1076_v19  ;;  %v1130_v59 = vmul.f32 %v4600_v15, %v5310_v0 }
 0x404   :  { %v1152_v61 = vmul.f32 1.442695, %v1151_v23  ;;  %v1202_v33 = vrot.slane %v1197_v39, 7  ;;  %v5538_v26 = vpop.eup %4601  ;;  %v1139_v1 = vadd.f32 %v1137_v20, %v1135_v9  ;;  %v1248_v3 = vrot.slane %v1246_v49, 1 }
 0x405   :  { %v1226_v27 = vsub.f32 %v1222_v6, %v1225_v28  ;;  %v1230_v29 = vrot.slane %v1225_v28, 3  ;;  %v1003_v22 = vmul.f32 %v5491_v24, %v5459_v48  ;;  %v1005_v17 = vrot.slane %v5496_v56, 1 }
 0x406   :  { %4609 = vpow2.f32 %v1093_v36  ;;  %v1198_v32 = vsub.f32 %v5503_v16, %v1197_v39  ;;  %v5544_v44 = vpop.eup %4603  ;;  %v1250_v45 = vmax.f32 %v1225_v28, %v1248_v3  ;;  %v1129_v15 = vmul.f32 %v4598_v12, %v5535_v14 }
 0x407   :  { %4611 = vpow2.f32 %v1099_v57  ;;  %v1227_v30 = vmul.f32 1.442695, %v1226_v27  ;;  %v1232_v19 = vsub.f32 %v5342_v4, %v1230_v29  ;;  %v1132_v9 = vrot.slane %v1130_v59, 3 }
 0x408   :  { %v4606_v23 = vpop.eup %4605  ;;  %4613 = vpow2.f32 %v1146_v60  ;;  %v1204_v6 = vsub.f32 %v1193_v18, %v1202_v33  ;;  %v997_v48 = vmul.f32 %v5491_v24, %v5482_v34  ;;  %v1000_v39 = vrot.slane %v5529_v10, 1 }
 0x409   :  { %v4608_v20 = vpop.eup %4607  ;;  %4615 = vpow2.f32 %v1152_v61  ;;  %v1188_v56 = vmul.f32 %v4606_v23, %v1139_v1  ;;  %v1233_v16 = vmul.f32 1.442695, %v1232_v19  ;;  %v1199_v57 = vmul.f32 1.442695, %v1198_v32 }
 0x40a   :  { %v1190_v36 = vrot.slane %v4608_v20, 4  ;;  %4617 = vpow2.f32 %v1227_v30  ;;  %v1251_v29 = vsub.f32 %v1225_v28, %v1250_v45  ;;  %v1255_v27 = vrot.slane %v1250_v45, 7 }
 0x40b   :  { %4619 = vpow2.f32 %v1233_v16  ;;  %v1275_v12 = vadd.f32 %v1225_v28, %v5249_v63  ;;  %v5554_v18 = vadd.f32 %v1132_v9, %v1129_v15  ;;  %v1183_v60 = vmul.f32 %v4608_v20, %v5310_v0 }
 0x40c   :  { %v5552_v59 = vpop.eup %4609  ;;  %v1205_v34 = vmul.f32 1.442695, %v1204_v6  ;;  %v1276_v24 = vrot.slane %v5342_v4, 6  ;;  %v1056_v10 = vmul.f32 %v5538_v26, %v5487_v8  ;;  %v1192_v33 = vadd.f32 %v1190_v36, %v1188_v56 }
 0x40d   :  { %v4612_v61 = vpop.eup %4611  ;;  %v1252_v3 = vmul.f32 1.442695, %v1251_v29  ;;  %v1257_v32 = vsub.f32 %v1246_v49, %v1255_v27  ;;  %4621 = vrcp.f32 %v5508_v31  ;;  %v1007_v63 = vadd.f32 %v1005_v17, %v1003_v22 }
 0x40e   :  { %v5560_v30 = vpop.eup %4613  ;;  %v1058_v28 = vrot.slane %v5544_v44, 1  ;;  %v1155_v19 = vrot.slane %v5310_v0, 3  ;;  %4623 = vpow2.f32 %v1199_v57  ;;  %v1278_v9 = vmax.f32 %v1275_v12, %v1276_v24 }
 0x40f   :  { %v5565_v45 = vpop.eup %4615  ;;  %v1258_v15 = vmul.f32 1.442695, %v1257_v32  ;;  %v1299_v6 = vadd.f32 %v1276_v24, %v5260_v11  ;;  %v5568_v20 = vadd.f32 %v1000_v39, %v997_v48  ;;  %v1182_v49 = vmul.f32 %v4606_v23, %v5554_v18 }
 0x410   :  { %v4618_v8 = vpop.eup %4617  ;;  %v1185_v56 = vrot.slane %v1183_v60, 4  ;;  %4625 = vpow2.f32 %v1205_v34  ;;  %v1060_v22 = vadd.f32 %v1058_v28, %v1056_v10  ;;  %v1279_v16 = vsub.f32 %v1275_v12, %v1278_v9 }
 0x411   :  { %v4620_v31 = vpop.eup %4619  ;;  %v1241_v17 = vmul.f32 %v4618_v8, %v1192_v33  ;;  %4627 = vpow2.f32 %v1252_v3  ;;  %v1109_v36 = vmul.f32 %v5552_v59, %v5518_v43  ;;  %v1162_v57 = vmul.f32 %v5560_v30, %v1139_v1 }
 0x412   :  { %v1243_v29 = vrot.slane %v4620_v31, 5  ;;  %4629 = vpow2.f32 %v1258_v15  ;;  %v1280_v11 = vmul.f32 1.442695, %v1279_v16  ;;  %v1283_v48 = vrot.slane %v1278_v9, 2 }
 0x413   :  { %4631 = vrcp.f32 %v1007_v63  ;;  %v1301_v39 = vrot.slane %v1299_v6, 1  ;;  %v4622_v27 = vpop.eup %4621  ;;  %v1111_v23 = vrot.slane %v4612_v61, 1  ;;  %v1164_v60 = vrot.slane %v5565_v45, 1 }
 0x414   :  { %v5575_v34 = vadd.f32 %v1185_v56, %v1182_v49  ;;  %v1236_v24 = vmul.f32 %v4620_v31, %v5310_v0  ;;  %v5578_v12 = vpop.eup %4623  ;;  %4633 = vrcp.f32 %v1060_v22  ;;  %v1245_v43 = vadd.f32 %v1243_v29, %v1241_v17 }
 0x415   :  { %v1285_v1 = vsub.f32 %v5342_v4, %v1283_v48  ;;  %v1303_v10 = vmax.f32 %v1278_v9, %v1301_v39  ;;  %v1048_v32 = vmul.f32 %v5538_v26, %v5512_v13  ;;  %v1051_v63 = vmul.f32 %v5544_v44, %v1049_v53 }
 0x416   :  { %v4626_v3 = vpop.eup %4625  ;;  %v1113_v28 = vadd.f32 %v1111_v23, %v1109_v36  ;;  %v1166_v15 = vadd.f32 %v1164_v60, %v1162_v57  ;;  %4635 = vpow2.f32 %v1280_v11  ;;  %v6661_v4 = vrot.slane %v5310_v0, 2 }
 0x417   :  { %v5586_v49 = vpop.eup %4627  ;;  %v1286_v56 = vmul.f32 1.442695, %v1285_v1  ;;  %v1304_v31 = vsub.f32 %v1278_v9, %v1303_v10  ;;  %v1308_v22 = vrot.slane %v1303_v10, 7  ;;  %v1215_v29 = vmul.f32 %v5578_v12, %v1192_v33 }
 0x418   :  { %v4630_v17 = vpop.eup %4629  ;;  %v1104_v16 = vmul.f32 %v4612_v61, %v6661_v4  ;;  %v1235_v13 = vmul.f32 %v4618_v8, %v5575_v34  ;;  %v1238_v26 = vrot.slane %v1236_v24, 5  ;;  %v1268_v53 = vmul.f32 %v5586_v49, %v1245_v43 }
 0x419   :  { %v4632_v48 = vpop.eup %4631  ;;  %4637 = vpow2.f32 %v1286_v56  ;;  %v1305_v44 = vmul.f32 1.442695, %v1304_v31  ;;  %v1310_v36 = vsub.f32 %v1299_v6, %v1308_v22  ;;  %v5594_v57 = vmul.f32 %v4622_v27, %v5516_v55 }
 0x41a   :  { %v1053_v9 = vrot.slane %v1051_v63, 1  ;;  %4639 = vrcp.f32 %v1113_v28  ;;  %v1217_v11 = vrot.slane %v4626_v3, 1  ;;  %v4634_v39 = vpop.eup %4633  ;;  %v1101_v61 = vmul.f32 %v5552_v59, %v5535_v14 }
 0x41b   :  { %4641 = vrcp.f32 %v1166_v15  ;;  %v1270_v33 = vrot.slane %v4630_v17, 1  ;;  %v1311_v8 = vmul.f32 1.442695, %v1310_v36  ;;  %v1157_v60 = vmul.f32 %v5565_v45, %v1155_v19 }
 0x41c   :  { %v1055_v23 = vadd.f32 %v1053_v9, %v1048_v32  ;;  %v1219_v24 = vadd.f32 %v1217_v11, %v1215_v29  ;;  %4643 = vpow2.f32 %v1305_v44  ;;  %v4636_v6 = vpop.eup %4635  ;;  %v1106_v55 = vrot.slane %v1104_v16, 1 }
 0x41d   :  { %v1240_v27 = vadd.f32 %v1238_v26, %v1235_v13  ;;  %v1272_v1 = vadd.f32 %v1270_v33, %v1268_v53  ;;  %4645 = vpow2.f32 %v1311_v8  ;;  %v5602_v10 = vmul.f32 %v4632_v48, %v5568_v20 }
 0x41e   :  { %v5604_v63 = vmul.f32 %v4634_v39, %v1055_v23  ;;  %v1208_v14 = vrot.slane %v5310_v0, 4  ;;  %v1294_v59 = vmul.f32 %v4636_v6, %v1245_v43  ;;  %v1108_v28 = vadd.f32 %v1106_v55, %v1101_v61 }
 0x41f   :  { %v4638_v32 = vpop.eup %4637  ;;  %v1154_v19 = vmul.f32 %v5560_v30, %v5554_v18  ;;  %v1261_v45 = vrot.slane %v5310_v0, 5  ;;  %v1332_v15 = vrot.slane %v5365_v2, 7  ;;  %v1159_v31 = vrot.slane %v1157_v60, 1 }
 0x420   :  { %v4640_v56 = vpop.eup %4639  ;;  %4647 = vrcp.f32 %v1219_v24  ;;  %v1289_v20 = vmul.f32 %v4638_v32, %v5310_v0  ;;  %v1296_v22 = vrot.slane %v4638_v32, 6  ;;  %v1210_v16 = vmul.f32 %v4626_v3, %v1208_v14 }
 0x421   :  { %v4642_v4 = vpop.eup %4641  ;;  %4649 = vrcp.f32 %v1272_v1  ;;  %v1288_v29 = vmul.f32 %v4636_v6, %v1240_v27  ;;  %v1329_v43 = vrot.slane %v5355_v41, 1  ;;  %v1263_v26 = vmul.f32 %v4630_v17, %v1261_v45 }
 0x422   :  { %v4644_v13 = vpop.eup %4643  ;;  %v1291_v48 = vrot.slane %v1289_v20, 6  ;;  %v1298_v18 = vadd.f32 %v1296_v22, %v1294_v59  ;;  %v1335_v30 = vrot.slane %v5373_v25, 6  ;;  %v1161_v2 = vadd.f32 %v1159_v31, %v1154_v19 }
 0x423   :  { %v4646_v53 = vpop.eup %4645  ;;  %v1207_v44 = vmul.f32 %v5578_v12, %v5575_v34  ;;  %v1373_v36 = vsel %vm56_vm0, %v1329_v43, %v1332_v15  ;;  %v1115_v9 = vmul.f32 %v4640_v56, %v1108_v28  ;;  %v1260_v3 = vmul.f32 %v5586_v49, %v1240_v27 }
 0x424   :  { %v1321_v11 = vmul.f32 %v4644_v13, %v1298_v18  ;;  %v1323_v39 = vrot.slane %v4646_v53, 1  ;;  %v1168_v41 = vmul.f32 %v4642_v4, %v1161_v2  ;;  %v1212_v61 = vrot.slane %v1210_v16, 1 }
 0x425   :  { %v1293_v17 = vadd.f32 %v1291_v48, %v1288_v29  ;;  %v1314_v33 = vrot.slane %v5310_v0, 6  ;;  %v1265_v25 = vrot.slane %v1263_v26, 1  ;;  %v1375_v60 = vsel %vm1374_vm6, %v1373_v36, %v1335_v30 }
 0x426   :  { %v4648_v8 = vpop.eup %4647  ;;  %v1325_v23 = vadd.f32 %v1323_v39, %v1321_v11  ;;  %v1214_v12 = vadd.f32 %v1212_v61, %v1207_v44  ;;  %v1338_v6 = vrot.slane %v5399_v5, 5  ;;  %v1341_v49 = vrot.slane %v5421_v62, 4 }
 0x427   :  { %v4650_v34 = vpop.eup %4649  ;;  %v1316_v24 = vmul.f32 %v4646_v53, %v1314_v33  ;;  %v1267_v55 = vadd.f32 %v1265_v25, %v1260_v3  ;;  %v1344_v27 = vrot.slane %v5455_v35, 3  ;;  %v1353_v1 = vrot.slane %v5602_v10, 7 }
 0x428   :  { %4651 = vrcp.f32 %v1325_v23  ;;  %v1221_v0 = vmul.f32 %v4648_v8, %v1214_v12  ;;  %v1313_v14 = vmul.f32 %v4644_v13, %v1293_v17  ;;  %v1377_v59 = vsel %vm6658_vm7, %v1375_v60, %v1338_v6 }
 0x429   :  { %v1274_v32 = vmul.f32 %v4650_v34, %v1267_v55  ;;  %v1347_v28 = vrot.slane %v5465_v46, 2  ;;  %v1356_v19 = vrot.slane %v5604_v63, 6  ;;  %v1318_v5 = vrot.slane %v1316_v24, 1  ;;  %v4361_v24 = vld [vmem:[%s6646_s7 + $0x8] sm:$0xff]  ;;  %v4360_v55 = vld [vmem:[%s6646_s7] sm:$0xff] }
 0x42a   :  { %v1350_v62 = vrot.slane %v5498_v21, 1  ;;  %v1359_v45 = vrot.slane %v1115_v9, 5  ;;  %v1362_v15 = vrot.slane %v1168_v41, 4  ;;  %v1379_v35 = vsel %vm6657_vm8, %v1377_v59, %v1341_v49  ;;  %1464 = vmatpush.bf16.msra.mxu1 %v4361_v24 }
 0x42b   :  { %v1320_v10 = vadd.f32 %v1318_v5, %v1313_v14  ;;  %v1365_v56 = vrot.slane %v1221_v0, 3  ;;  %v1381_v31 = vsel %vm6656_vm9, %v1379_v35, %v1344_v27  ;;  %v1385_v20 = vsel %vm56_vm0, %v5594_v57, %v1353_v1 }
 0x42c   :  { %v1368_v46 = vrot.slane %v1274_v32, 2  ;;  %v1383_v63 = vsel %vm6655_vm10, %v1381_v31, %v1347_v28  ;;  %v1386_v4 = vsel %vm1374_vm6, %v1385_v20, %v1356_v19  ;;  %v4130_v30 = vmul.f32 -1.442695, %v5218_v42 }
 0x42d   :  { %v1384_v21 = vsel %vm6654_vm1, %v1383_v63, %v1350_v62  ;;  %v1387_v29 = vsel %vm6658_vm7, %v1386_v4, %v1359_v45  ;;  %v4131_v53 = vmul.f32 -1.442695, %v5223_v47  ;;  %v4133_v35 = vmul.f32 -1.442695, %v5239_v52 }
 0x42e   :  { %v4652_v22 = vpop.eup %4651  ;;  %v1388_v43 = vsel %vm6657_vm8, %v1387_v29, %v1362_v15  ;;  %4653 = vpow2.f32 %v4130_v30  ;;  %1465 = vmatpush.bf16.msra.mxu1 %v4360_v55  ;;  %v4132_v15 = vmul.f32 -1.442695, %v5231_v54 }
 0x42f   :  { %v1327_v16 = vmul.f32 %v4652_v22, %v1320_v10  ;;  %v1389_v26 = vsel %vm6656_vm9, %v1388_v43, %v1365_v56  ;;  %4655 = vpow2.f32 %v4131_v53 }
 0x430   :  { %v1390_v48 = vsel %vm6655_vm10, %v1389_v26, %v1368_v46 }
 0x431   :  { %v1371_v13 = vrot.slane %v1327_v16, 1 }
 0x433   :  { %v1391_v57 = vsel %vm6654_vm1, %v1390_v48, %v1371_v13 }
 0x434   :  { %v4413_v18 = vpack.i.bf16 %v1391_v57, %v1384_v21  ;;  %v4654_v2 = vpop.eup %4653 }
 0x435   :  { %v4656_v44 = vpop.eup %4655  ;;  %v430_v36 = vadd.f32 1.0, %v4654_v2 }
 0x436   :  { %4414 = vrot.lane.b32.xlu0 %v4413_v18, %s4969_s1  ;;  %4419 = vrot.lane.b32.xlu2 %v4413_v18, %s4970_s25  ;;  %v431_v9 = vadd.f32 1.0, %v4656_v44 }
 0x437   :  { %4657 = vrcp.f32 %v430_v36  ;;  %vm439_vm13 = vweird.f32 %v430_v36  ;;  %v445_v47 = vand.u32 2147483648, %v430_v36  ;;  %v443_v34 = vand.u32 2147483647, %v430_v36 }
 0x438   :  { %4659 = vrcp.f32 %v431_v9  ;;  %v460_v23 = vand.u32 2147483648, %v431_v9  ;;  %vm454_vm1 = vweird.f32 %v431_v9  ;;  %v458_v12 = vand.u32 2147483647, %v431_v9 }
 0x439   :  { %v446_v27 = vor.u32 1.1754944e-38, %v445_v47  ;;  %4661 = vpow2.f32 %v4132_v15 }
 0x43a   :  { %v461_v1 = vor.u32 1.1754944e-38, %v460_v23  ;;  %4663 = vpow2.f32 %v4133_v35 }
 0x43d   :  { %v4658_v3 = vpop.eup %4657 }
 0x43e   :  { %v4660_v11 = vpop.eup %4659  ;;  %v435_v39 = vmul.f32 %v4658_v3, %v430_v36  ;;  %vm440_vm11 = vweird.f32 %v4658_v3 }
 0x43f   :  { %v450_v41 = vmul.f32 %v4660_v11, %v431_v9  ;;  %vm455_vm12 = vweird.f32 %v4660_v11  ;;  %vm5644_vm14 = vmor %vm439_vm13, %vm440_vm11  ;;  %vm444_vm11 = vcmp.eq.f32.partialorder %v443_v34, 8.507059e+37  ;;  %vm459_vm13 = vcmp.eq.f32.partialorder %v458_v12, 8.507059e+37  ;;  %v4662_v10 = vpop.eup %4661 }
 0x440   :  { %v436_v61 = vsub.f32 1.0, %v435_v39  ;;  %vm456_vm10 = vmor %vm454_vm1, %vm455_vm12  ;;  %v4664_v56 = vpop.eup %4663  ;;  %v432_v31 = vadd.f32 1.0, %v4662_v10 }
 0x441   :  { %v451_v17 = vsub.f32 1.0, %v450_v41  ;;  %v433_v20 = vadd.f32 1.0, %v4664_v56 }
 0x442   :  { %v437_v33 = vmul.f32 %v4658_v3, %v436_v61  ;;  %4665 = vrcp.f32 %v432_v31  ;;  %vm469_vm12 = vweird.f32 %v432_v31  ;;  %v475_v26 = vand.u32 2147483648, %v432_v31 }
 0x443   :  { %v452_v8 = vmul.f32 %v4660_v11, %v451_v17  ;;  %4667 = vrcp.f32 %v433_v20  ;;  %v490_v48 = vand.u32 2147483648, %v433_v20  ;;  %v473_v57 = vand.u32 2147483647, %v432_v31 }
 0x444   :  { %v438_v42 = vadd.f32 %v4658_v3, %v437_v33  ;;  %v488_v18 = vand.u32 2147483647, %v433_v20  ;;  %v476_v2 = vor.u32 1.1754944e-38, %v475_v26 }
 0x445   :  { %v453_v25 = vadd.f32 %v4660_v11, %v452_v8  ;;  %v491_v44 = vor.u32 1.1754944e-38, %v490_v48  ;;  %vm474_vm9 = vcmp.eq.f32.partialorder %v473_v57, 8.507059e+37 }
 0x446   :  { %v442_v6 = vsel %vm5644_vm14, %v4658_v3, %v438_v42  ;;  %vm489_vm8 = vcmp.eq.f32.partialorder %v488_v18, 8.507059e+37 }
 0x447   :  { %v457_v49 = vsel %vm456_vm10, %v4660_v11, %v453_v25  ;;  %v447_v32 = vsel %vm444_vm11, %v446_v27, %v442_v6  ;;  %vm484_vm11 = vweird.f32 %v433_v20 }
 0x448   :  { %v462_v28 = vsel %vm459_vm13, %v461_v1, %v457_v49  ;;  %v4666_v46 = vpop.eup %4665 }
 0x449   :  { %v4668_v63 = vpop.eup %4667  ;;  %v465_v4 = vmul.f32 %v4666_v46, %v432_v31  ;;  %vm470_vm1 = vweird.f32 %v4666_v46 }
 0x44a   :  { %v480_v16 = vmul.f32 %v4668_v63, %v433_v20  ;;  %vm485_vm10 = vweird.f32 %v4668_v63  ;;  %vm471_vm14 = vmor %vm469_vm12, %vm470_vm1 }
 0x44b   :  { %v466_v21 = vsub.f32 1.0, %v465_v4  ;;  %vm486_vm13 = vmor %vm484_vm11, %vm485_vm10 }
 0x44c   :  { %v481_v29 = vsub.f32 1.0, %v480_v16 }
 0x44d   :  { %v467_v54 = vmul.f32 %v4666_v46, %v466_v21 }
 0x44e   :  { %v482_v43 = vmul.f32 %v4668_v63, %v481_v29 }
 0x44f   :  { %v468_v52 = vadd.f32 %v4666_v46, %v467_v54 }
 0x450   :  { %v483_v13 = vadd.f32 %v4668_v63, %v482_v43 }
 0x451   :  { %v472_v30 = vsel %vm471_vm14, %v4666_v46, %v468_v52 }
 0x452   :  { %v487_v53 = vsel %vm486_vm13, %v4668_v63, %v483_v13  ;;  %v477_v11 = vsel %vm474_vm9, %v476_v2, %v472_v30 }
 0x453   :  { %v492_v39 = vsel %vm489_vm8, %v491_v44, %v487_v53 }
 0x490   :  { %v4420_v0 = vpop.permute.xlu2 %4419 }
 0x491   :  { %v4422_v14 = vunpack.i.h.bf16 %v4420_v0  ;;  %v4421_v59 = vunpack.i.l.bf16 %v4420_v0 }
 0x493   :  { %v1425_v19 = vmul.f32 %v4422_v14, %v462_v28  ;;  %v1424_v5 = vmul.f32 %v4421_v59, %v447_v32 }
 0x495   :  { %v1428_v62 = vpack.c.bf16 %v1425_v19, %v1424_v5 }
 0x497   :  { %1436 = vrot.lane.b32.xlu0 %v1428_v62, %s4970_s25 }
 0x4a8   :  { %v4415_v45 = vpop.permute.xlu0 %4414 }
 0x4a9   :  { %4424 = vrot.lane.b32.xlu1 %v4415_v45, %s4970_s25 }
 0x509   :  { %v1437_v22 = vpop.permute.xlu0 %1436 }
 0x50a   :  { %4142 = vmatmul.msk.bf16.vlgmr.msra.gmra.mxu1 %vm112_vm2, %v1437_v22 }
 0x51b   :  { %v4425_v36 = vpop.permute.xlu1 %4424 }
 0x51c   :  { %v4427_v9 = vunpack.i.h.bf16 %v4425_v36  ;;  %v4426_v3 = vunpack.i.l.bf16 %v4425_v36 }
 0x51e   :  { %v1427_v41 = vmul.f32 %v4427_v9, %v492_v39  ;;  %v1426_v61 = vmul.f32 %v4426_v3, %v477_v11  ;;  %v4365_v3 = vld [vmem:[%s6647_s8 + $0x18] sm:$0xff] }
 0x51f   :  { %1655 = vmatpush.bf16.msra.mxu2 %v4365_v3 }
 0x520   :  { %v1429_v17 = vpack.c.bf16 %v1427_v41, %v1426_v61  ;;  %v4364_v41 = vld [vmem:[%s6647_s8 + $0x10] sm:$0xff] }
 0x522   :  { %1438 = vrot.lane.b32.xlu2 %v1429_v17, %s4970_s25 }
 0x523   :  { %1656 = vmatpush.bf16.msra.mxu2 %v4364_v41 }
 0x57c   :  { %v1439_v33 = vpop.permute.xlu2 %1438 }
 0x57d   :  { %4143 = vmatmul.msk.bf16.gmra.mxu1 %vm112_vm2, %v1439_v33 }
 0x587   :  { %v1467_v8 = vpop.f32.mrf.mxu1 }
 0x588   :  { %v5664_v42 = vadd.f32 %v1467_v8, %v5117_v38 }
 0x58a   :  { %v1481_v25 = vsel %vm112_vm2, %v5664_v42, 0.0 }
 0x58b   :  { %1482 = vadd.xlane.f32.xlu1 %v1481_v25  ;;  %v4363_v25 = vld [vmem:[%s6647_s8 + $0x8] sm:$0xff] }
 0x58c   :  { %1657 = vmatpush.bf16.msra.mxu2 %v4363_v25 }
 0x58f   :  { %v1469_v47 = vpop.f32.mrf.mxu1 }
 0x590   :  { %v5669_v23 = vadd.f32 %v1469_v47, %v5119_v40 }
 0x592   :  { %v1484_v60 = vsel %vm112_vm2, %v5669_v23, 0.0 }
 0x593   :  { %1485 = vadd.xlane.f32.xlu2 %v1484_v60 }
 0x5fa   :  { %v1472_v34 = vpop.f32.mrf.mxu1 }
 0x5fb   :  { %v5674_v12 = vadd.f32 %v1472_v34, %v5127_v50 }
 0x5fd   :  { %v1487_v38 = vsel %vm112_vm2, %v5674_v12, 0.0 }
 0x5fe   :  { %v1483_v24 = vpop.xlane.xlu1 %1482  ;;  %1488 = vadd.xlane.f32.xlu1 %v1487_v38 }
 0x5ff   :  { %v1493_v6 = vmul.f32 %v1483_v24, %v5082_v37 }
 0x601   :  { %v5684_v1 = vsub.f32 %v5664_v42, %v1493_v6 }
 0x602   :  { %v1474_v55 = vpop.f32.mrf.mxu1 }
 0x603   :  { %v5681_v27 = vadd.f32 %v1474_v55, %v5129_v51  ;;  %v1501_v32 = vmul.f32 %v5684_v1, %v5684_v1 }
 0x605   :  { %v1490_v0 = vsel %vm112_vm2, %v5681_v27, 0.0  ;;  %v1505_v51 = vsel %vm112_vm2, %v1501_v32, 0.0 }
 0x606   :  { %v1486_v49 = vpop.xlane.xlu2 %1485  ;;  %1491 = vadd.xlane.f32.xlu0 %v1490_v0 }
 0x607   :  { %v1494_v40 = vmul.f32 %v1486_v49, %v5082_v37  ;;  %v5727_v49 = vld [vmem:[%s6643_s4] sm:$0x3f] }
 0x608   :  { %v1569_v55 = vperm.slane %v5727_v49, 2 }
 0x609   :  { %v5687_v50 = vsub.f32 %v5669_v23, %v1494_v40 }
 0x60b   :  { %v1502_v14 = vmul.f32 %v5687_v50, %v5687_v50 }
 0x60d   :  { %v1508_v59 = vsel %vm112_vm2, %v1502_v14, 0.0 }
 0x60e   :  { %1509 = vadd.xlane.f32.xlu1 %v1508_v59  ;;  %1506 = vadd.xlane.f32.xlu0 %v1505_v51 }
 0x671   :  { %v1489_v28 = vpop.xlane.xlu1 %1488 }
 0x672   :  { %v1495_v19 = vmul.f32 %v1489_v28, %v5082_v37 }
 0x674   :  { %v5699_v5 = vsub.f32 %v5674_v12, %v1495_v19 }
 0x676   :  { %v1503_v62 = vmul.f32 %v5699_v5, %v5699_v5 }
 0x678   :  { %v1511_v45 = vsel %vm112_vm2, %v1503_v62, 0.0 }
 0x679   :  { %1512 = vadd.xlane.f32.xlu0 %v1511_v45  ;;  %v1492_v15 = vpop.xlane.xlu0 %1491  ;;  %v1574_v45 = vperm.slane %v5727_v49, 3 }
 0x67a   :  { %v1496_v35 = vmul.f32 %v1492_v15, %v5082_v37 }
 0x67c   :  { %v5706_v10 = vsub.f32 %v5681_v27, %v1496_v35 }
 0x67e   :  { %v1504_v56 = vmul.f32 %v5706_v10, %v5706_v10 }
 0x680   :  { %v1514_v31 = vsel %vm112_vm2, %v1504_v56, 0.0 }
 0x681   :  { %1515 = vadd.xlane.f32.xlu2 %v1514_v31  ;;  %v1510_v20 = vpop.xlane.xlu1 %1509  ;;  %v1507_v22 = vpop.xlane.xlu0 %1506 }
 0x682   :  { %v1518_v46 = vmul.f32 %v1510_v20, %v5082_v37  ;;  %v1517_v63 = vmul.f32 %v1507_v22, %v5082_v37 }
 0x684   :  { %v1522_v4 = vadd.f32 1e-06, %v1518_v46  ;;  %v1521_v16 = vadd.f32 1e-06, %v1517_v63 }
 0x686   :  { %4669 = vrsqrt.f32 %v1522_v4  ;;  %vm1541_vm9 = vweird.f32 %v1522_v4  ;;  %vm1531_vm14 = vweird.f32 %v1521_v16 }
 0x687   :  { %4671 = vrsqrt.f32 %v1521_v16 }
 0x68c   :  { %v4670_v21 = vpop.eup %4669 }
 0x68d   :  { %v4672_v29 = vpop.eup %4671  ;;  %v1536_v54 = vmul.f32 %v4670_v21, %v1522_v4  ;;  %vm1542_vm8 = vweird.f32 %v4670_v21 }
 0x68e   :  { %v1526_v52 = vmul.f32 %v4672_v29, %v1521_v16  ;;  %vm1532_vm1 = vweird.f32 %v4672_v29  ;;  %vm1543_vm10 = vmor %vm1541_vm9, %vm1542_vm8 }
 0x68f   :  { %v1537_v26 = vmul.f32 %v4670_v21, %v1536_v54  ;;  %vm1533_vm11 = vmor %vm1531_vm14, %vm1532_vm1 }
 0x690   :  { %v1527_v57 = vmul.f32 %v4672_v29, %v1526_v52 }
 0x691   :  { %v1538_v18 = vmul.f32 0.5, %v1537_v26 }
 0x692   :  { %v1528_v53 = vmul.f32 0.5, %v1527_v57 }
 0x693   :  { %v1539_v36 = vsub.f32 1.5, %v1538_v18 }
 0x694   :  { %v1529_v39 = vsub.f32 1.5, %v1528_v53 }
 0x695   :  { %v1540_v17 = vmul.f32 %v4670_v21, %v1539_v36 }
 0x696   :  { %v1530_v8 = vmul.f32 %v4672_v29, %v1529_v39 }
 0x697   :  { %v1544_v34 = vsel %vm1543_vm10, %v4670_v21, %v1540_v17  ;;  %v4368_v17 = vld [vmem:[%s6648_s9 + $0x10] sm:$0xff] }
 0x698   :  { %v1534_v6 = vsel %vm1533_vm11, %v4672_v29, %v1530_v8  ;;  %v1566_v40 = vmul.f32 %v1544_v34, %v5687_v50  ;;  %v4366_v8 = vld [vmem:[%s6648_s9] sm:$0xff] }
 0x699   :  { %v1565_v32 = vmul.f32 %v1534_v6, %v5684_v1 }
 0x69a   :  { %v1571_v19 = vmul.f32 %v1569_v55, %v1566_v40 }
 0x69b   :  { %v1570_v15 = vmul.f32 %v1569_v55, %v1565_v32 }
 0x69c   :  { %v1576_v50 = vadd.f32 %v1574_v45, %v1571_v19 }
 0x69e   :  { %v1580_v1 = vrot.slane %v1576_v50, 7 }
 0x6ec   :  { %v1513_v43 = vpop.xlane.xlu0 %1512 }
 0x6ed   :  { %v1519_v13 = vmul.f32 %v1513_v43, %v5082_v37 }
 0x6ef   :  { %v1523_v48 = vadd.f32 1e-06, %v1519_v13 }
 0x6f1   :  { %4673 = vrsqrt.f32 %v1523_v48  ;;  %vm1551_vm13 = vweird.f32 %v1523_v48 }
 0x6f4   :  { %v1516_v30 = vpop.xlane.xlu2 %1515 }
 0x6f5   :  { %v1520_v2 = vmul.f32 %v1516_v30, %v5082_v37 }
 0x6f7   :  { %v4674_v44 = vpop.eup %4673  ;;  %v1524_v9 = vadd.f32 1e-06, %v1520_v2 }
 0x6f8   :  { %v1546_v11 = vmul.f32 %v4674_v44, %v1523_v48  ;;  %vm1552_vm12 = vweird.f32 %v4674_v44  ;;  %v4362_v48 = vld [vmem:[%s6647_s8] sm:$0xff] }
 0x6f9   :  { %4675 = vrsqrt.f32 %v1524_v9  ;;  %vm1553_vm7 = vmor %vm1551_vm13, %vm1552_vm12  ;;  %vm1561_vm9 = vweird.f32 %v1524_v9  ;;  %1658 = vmatpush.bf16.msra.mxu2 %v4362_v48 }
 0x6fa   :  { %v1547_v61 = vmul.f32 %v4674_v44, %v1546_v11 }
 0x6fc   :  { %v1548_v33 = vmul.f32 0.5, %v1547_v61  ;;  %v4369_v61 = vld [vmem:[%s6648_s9 + $0x18] sm:$0xff] }
 0x6fd   :  { %1722 = vmatpush.bf16.msra.mxu3 %v4369_v61 }
 0x6fe   :  { %v1549_v47 = vsub.f32 1.5, %v1548_v33  ;;  %v4367_v33 = vld [vmem:[%s6648_s9 + $0x8] sm:$0xff] }
 0x6ff   :  { %v4676_v60 = vpop.eup %4675 }
 0x700   :  { %v1550_v38 = vmul.f32 %v4674_v44, %v1549_v47  ;;  %v1556_v24 = vmul.f32 %v4676_v60, %v1524_v9  ;;  %vm1562_vm8 = vweird.f32 %v4676_v60 }
 0x701   :  { %vm1563_vm1 = vmor %vm1561_vm9, %vm1562_vm8  ;;  %1723 = vmatpush.bf16.msra.mxu3 %v4368_v17 }
 0x702   :  { %v1554_v0 = vsel %vm1553_vm7, %v4674_v44, %v1550_v38  ;;  %v1557_v14 = vmul.f32 %v4676_v60, %v1556_v24 }
 0x703   :  { %v1567_v59 = vmul.f32 %v1554_v0, %v5699_v5  ;;  %v1575_v5 = vadd.f32 %v1574_v45, %v1570_v15 }
 0x704   :  { %v1558_v51 = vmul.f32 0.5, %v1557_v14 }
 0x705   :  { %v1572_v28 = vmul.f32 %v1569_v55, %v1567_v59  ;;  %v1579_v16 = vrot.slane %v1575_v5, 7  ;;  %1724 = vmatpush.bf16.msra.mxu3 %v4367_v33 }
 0x706   :  { %v1559_v62 = vsub.f32 1.5, %v1558_v51 }
 0x707   :  { %v1577_v56 = vadd.f32 %v1574_v45, %v1572_v28  ;;  %v1585_v52 = vsel %vm321_vm4, %v1579_v16, %v1580_v1 }
 0x708   :  { %v1560_v35 = vmul.f32 %v4676_v60, %v1559_v62 }
 0x709   :  { %v1581_v22 = vrot.slane %v1577_v56, 7  ;;  %1725 = vmatpush.bf16.msra.mxu3 %v4366_v8 }
 0x70a   :  { %v1564_v31 = vsel %vm1563_vm1, %v4676_v60, %v1560_v35 }
 0x70b   :  { %v1568_v20 = vmul.f32 %v1564_v31, %v5706_v10  ;;  %v1584_v4 = vsel %vm321_vm4, %v1580_v1, %v1581_v22 }
 0x70c   :  { %v1589_v54 = vsel %vm105_vm15, 0.0, %v1584_v4 }
 0x70d   :  { %v1573_v46 = vmul.f32 %v1569_v55, %v1568_v20 }
 0x70f   :  { %v1578_v63 = vadd.f32 %v1574_v45, %v1573_v46 }
 0x711   :  { %v1582_v21 = vrot.slane %v1578_v63, 7 }
 0x713   :  { %v1583_v29 = vsel %vm321_vm4, %v1581_v22, %v1582_v21  ;;  %v1586_v43 = vsel %vm321_vm4, %v1582_v21, %v1579_v16 }
 0x714   :  { %v4433_v10 = vpack.i.bf16 %v1583_v29, %v1589_v54  ;;  %v1587_v13 = vsel %vm99_vm3, 0.0, %v1586_v43 }
 0x715   :  { %v4428_v26 = vpack.i.bf16 %v1585_v52, %v1587_v13 }
 0x716   :  { %4434 = vrot.lane.b32.xlu1 %v4433_v10, %s4968_s30 }
 0x717   :  { %4429 = vrot.lane.b32.xlu2 %v4428_v26, %s4968_s30 }
 0x771   :  { %v4430_v57 = vpop.permute.xlu2 %4429 }
 0x772   :  { %v4432_v18 = vunpack.i.h.bf16 %v4430_v57  ;;  %v4431_v30 = vunpack.i.l.bf16 %v4430_v57 }
 0x774   :  { %v1607_v53 = vsel %vm112_vm2, %v1575_v5, %v4431_v30  ;;  %v1608_v2 = vsel %vm112_vm2, %v1576_v50, %v4432_v18 }
 0x775   :  { %v1611_v44 = vpack.c.bf16 %v1608_v2, %v1607_v53 }
 0x777   :  { %4160 = vmatmul.msk.bf16.vlgmr.msra.gmra.mxu2 %vm392_vm5, %v1611_v44 }
 0x788   :  { %v4435_v36 = vpop.permute.xlu1 %4434 }
 0x789   :  { %v4437_v9 = vunpack.i.h.bf16 %v4435_v36  ;;  %v4436_v3 = vunpack.i.l.bf16 %v4435_v36 }
 0x78b   :  { %v1609_v11 = vsel %vm112_vm2, %v1577_v56, %v4436_v3  ;;  %v1610_v39 = vsel %vm112_vm2, %v1578_v63, %v4437_v9 }
 0x78c   :  { %v1612_v41 = vpack.c.bf16 %v1610_v39, %v1609_v11 }
 0x78e   :  { %4161 = vmatmul.msk.bf16.gmra.mxu2 %vm392_vm5, %v1612_v41 }
 0x7fa   :  { %v1660_v25 = vpop.f32.mrf.mxu2 }
 0x7fb   :  { %v1670_v47 = vmax.f32 %v1660_v25, 0.0  ;;  %v4180_v31 = vmul.f32 -1.442695, %v1660_v25 }
 0x7fd   :  { %v1674_v38 = vmul.f32 %v1670_v47, %v1670_v47 }
 0x802   :  { %v1662_v60 = vpop.f32.mrf.mxu2 }
 0x803   :  { %v1671_v34 = vmax.f32 %v1662_v60, 0.0  ;;  %v4181_v15 = vmul.f32 -1.442695, %v1662_v60 }
 0x805   :  { %v1675_v24 = vmul.f32 %v1671_v34, %v1671_v34  ;;  %4677 = vpow2.f32 %v4181_v15 }
 0x807   :  { %v1678_v6 = vpack.c.bf16 %v1675_v24, %v1674_v38 }
 0x809   :  { %4178 = vmatmul.msk.bf16.vlgmr.msra.gmra.mxu3 %vm392_vm5, %v1678_v6 }
 0x80b   :  { %v4678_v35 = vpop.eup %4677 }
 0x80c   :  { %v1750_v56 = vadd.f32 1.0, %v4678_v35 }
 0x80e   :  { %4679 = vrcp.f32 %v1750_v56  ;;  %v1779_v21 = vand.u32 2147483648, %v1750_v56  ;;  %vm1773_vm10 = vweird.f32 %v1750_v56  ;;  %v1777_v29 = vand.u32 2147483647, %v1750_v56 }
 0x80f   :  { %4681 = vpow2.f32 %v4180_v31 }
 0x810   :  { %v1780_v10 = vor.u32 1.1754944e-38, %v1779_v21  ;;  %vm1778_vm14 = vcmp.eq.f32.partialorder %v1777_v29, 8.507059e+37 }
 0x811   :  { %v1665_v55 = vpop.f32.mrf.mxu2 }
 0x812   :  { %v1672_v40 = vmax.f32 %v1665_v55, 0.0  ;;  %v4182_v16 = vmul.f32 -1.442695, %v1665_v55 }
 0x814   :  { %v1676_v59 = vmul.f32 %v1672_v40, %v1672_v40  ;;  %v4680_v50 = vpop.eup %4679 }
 0x815   :  { %v4682_v20 = vpop.eup %4681  ;;  %v1769_v22 = vmul.f32 %v4680_v50, %v1750_v56  ;;  %vm1774_vm7 = vweird.f32 %v4680_v50 }
 0x816   :  { %v1749_v5 = vadd.f32 1.0, %v4682_v20  ;;  %vm1775_vm12 = vmor %vm1773_vm10, %vm1774_vm7 }
 0x817   :  { %v1770_v46 = vsub.f32 1.0, %v1769_v22 }
 0x818   :  { %4683 = vrcp.f32 %v1749_v5  ;;  %v1764_v44 = vand.u32 2147483648, %v1749_v5  ;;  %vm1758_vm13 = vweird.f32 %v1749_v5  ;;  %v1762_v36 = vand.u32 2147483647, %v1749_v5 }
 0x819   :  { %v1667_v0 = vpop.f32.mrf.mxu2  ;;  %v1771_v1 = vmul.f32 %v4680_v50, %v1770_v46  ;;  %4685 = vpow2.f32 %v4182_v16 }
 0x81a   :  { %v1673_v14 = vmax.f32 %v1667_v0, 0.0  ;;  %v4183_v57 = vmul.f32 -1.442695, %v1667_v0  ;;  %v1765_v11 = vor.u32 1.1754944e-38, %v1764_v44  ;;  %vm1763_vm9 = vcmp.eq.f32.partialorder %v1762_v36, 8.507059e+37 }
 0x81b   :  { %v1772_v63 = vadd.f32 %v4680_v50, %v1771_v1 }
 0x81c   :  { %v1677_v32 = vmul.f32 %v1673_v14, %v1673_v14  ;;  %4687 = vpow2.f32 %v4183_v57 }
 0x81d   :  { %v1776_v54 = vsel %vm1775_vm12, %v4680_v50, %v1772_v63 }
 0x81e   :  { %v1679_v51 = vpack.c.bf16 %v1677_v32, %v1676_v59  ;;  %v4684_v4 = vpop.eup %4683  ;;  %v1781_v52 = vsel %vm1778_vm14, %v1780_v10, %v1776_v54 }
 0x81f   :  { %v1754_v43 = vmul.f32 %v4684_v4, %v1749_v5  ;;  %v4686_v18 = vpop.eup %4685  ;;  %vm1759_vm11 = vweird.f32 %v4684_v4 }
 0x820   :  { %4179 = vmatmul.msk.bf16.gmra.mxu3 %vm392_vm5, %v1679_v51  ;;  %v1751_v53 = vadd.f32 1.0, %v4686_v18  ;;  %vm1760_vm8 = vmor %vm1758_vm13, %vm1759_vm11 }
 0x821   :  { %v1755_v48 = vsub.f32 1.0, %v1754_v43 }
 0x822   :  { %4689 = vrcp.f32 %v1751_v53  ;;  %v4688_v9 = vpop.eup %4687  ;;  %v1794_v6 = vand.u32 2147483648, %v1751_v53  ;;  %vm1788_vm7 = vweird.f32 %v1751_v53  ;;  %v1792_v55 = vand.u32 2147483647, %v1751_v53 }
 0x823   :  { %v1756_v30 = vmul.f32 %v4684_v4, %v1755_v48  ;;  %v1752_v39 = vadd.f32 1.0, %v4688_v9 }
 0x824   :  { %v1795_v14 = vor.u32 1.1754944e-38, %v1794_v6  ;;  %vm1793_vm12 = vcmp.eq.f32.partialorder %v1792_v55, 8.507059e+37 }
 0x825   :  { %v1757_v2 = vadd.f32 %v4684_v4, %v1756_v30  ;;  %4691 = vrcp.f32 %v1752_v39  ;;  %vm1803_vm11 = vweird.f32 %v1752_v39 }
 0x827   :  { %v1761_v3 = vsel %vm1760_vm8, %v4684_v4, %v1757_v2 }
 0x828   :  { %v1766_v41 = vsel %vm1763_vm9, %v1765_v11, %v1761_v3  ;;  %v4690_v17 = vpop.eup %4689 }
 0x829   :  { %v1784_v8 = vmul.f32 %v4690_v17, %v1751_v53  ;;  %vm1789_vm1 = vweird.f32 %v4690_v17 }
 0x82a   :  { %vm1790_vm10 = vmor %vm1788_vm7, %vm1789_vm1 }
 0x82b   :  { %v1785_v25 = vsub.f32 1.0, %v1784_v8  ;;  %v4692_v47 = vpop.eup %4691 }
 0x82c   :  { %v1799_v34 = vmul.f32 %v4692_v47, %v1752_v39  ;;  %vm1804_vm14 = vweird.f32 %v4692_v47 }
 0x82d   :  { %v1786_v60 = vmul.f32 %v4690_v17, %v1785_v25  ;;  %vm1805_vm13 = vmor %vm1803_vm11, %vm1804_vm14 }
 0x82e   :  { %v1800_v24 = vsub.f32 1.0, %v1799_v34 }
 0x82f   :  { %v1787_v38 = vadd.f32 %v4690_v17, %v1786_v60 }
 0x830   :  { %v1801_v0 = vmul.f32 %v4692_v47, %v1800_v24 }
 0x831   :  { %v1791_v40 = vsel %vm1790_vm10, %v4690_v17, %v1787_v38 }
 0x832   :  { %v1796_v59 = vsel %vm1793_vm12, %v1795_v14, %v1791_v40  ;;  %v4370_v14 = vld [vmem:[%s6649_s10] sm:$0xff] }
 0x88c   :  { %v1727_v28 = vpop.f32.mrf.mxu3 }
 0x88d   :  { %1817 = vrot.lane.b32.xlu0 %v1727_v28, %s4970_s25  ;;  %v1802_v28 = vadd.f32 %v4692_v47, %v1801_v0 }
 0x894   :  { %v1729_v19 = vpop.f32.mrf.mxu3 }
 0x895   :  { %1819 = vrot.lane.b32.xlu2 %v1729_v19, %s4970_s25  ;;  %v1809_v19 = vand.u32 2147483648, %v1752_v39 }
 0x897   :  { %v1810_v15 = vor.u32 1.1754944e-38, %v1809_v19  ;;  %v1941_v19 = vperm.slane %v5727_v49, 4 }
 0x8a3   :  { %v1732_v62 = vpop.f32.mrf.mxu3 }
 0x8a4   :  { %1821 = vrot.lane.b32.xlu0 %v1732_v62, %s4970_s25  ;;  %v1807_v62 = vand.u32 2147483647, %v1752_v39  ;;  %v4371_v39 = vld [vmem:[%s6649_s10 + $0x8] sm:$0xff] }
 0x8a5   :  { %1985 = vmatpush.bf16.msrb.mxu1 %v4371_v39 }
 0x8a6   :  { %vm1808_vm8 = vcmp.eq.f32.partialorder %v1807_v62, 8.507059e+37 }
 0x8a9   :  { %1986 = vmatpush.bf16.msrb.mxu1 %v4370_v14 }
 0x8ab   :  { %v1734_v45 = vpop.f32.mrf.mxu3 }
 0x8ac   :  { %1823 = vrot.lane.b32.xlu1 %v1734_v45, %s4970_s25  ;;  %v1806_v45 = vsel %vm1805_vm13, %v4692_v47, %v1802_v28 }
 0x8ad   :  { %v1811_v35 = vsel %vm1808_vm8, %v1810_v15, %v1806_v45 }
 0x8ef   :  { %v1820_v13 = vpop.permute.xlu2 %1819 }
 0x8f0   :  { %v1830_v26 = vmul.f32 %v1820_v13, %v1781_v52 }
 0x8f2   :  { %1839 = vrot.lane.b32.xlu0 %v1830_v26, %s4970_s25 }
 0x8ff   :  { %v1818_v61 = vpop.permute.xlu0 %1817 }
 0x900   :  { %v1829_v33 = vmul.f32 %v1818_v61, %v1766_v41 }
 0x902   :  { %1837 = vrot.lane.b32.xlu2 %v1829_v33, %s4970_s25 }
 0x916   :  { %v1822_v32 = vpop.permute.xlu0 %1821 }
 0x917   :  { %v1831_v51 = vmul.f32 %v1822_v32, %v1796_v59 }
 0x919   :  { %1841 = vrot.lane.b32.xlu1 %v1831_v51, %s4970_s25 }
 0x91e   :  { %v1824_v56 = vpop.permute.xlu1 %1823 }
 0x91f   :  { %v1832_v31 = vmul.f32 %v1824_v56, %v1811_v35 }
 0x921   :  { %1843 = vrot.lane.b32.xlu2 %v1832_v31, %s4970_s25  ;;  %v1946_v31 = vperm.slane %v5727_v49, 5 }
 0x95c   :  { %v1838_v50 = vpop.permute.xlu2 %1837 }
 0x95d   :  { %v5781_v20 = vadd.f32 %v1838_v50, %v5664_v42 }
 0x95f   :  { %v1853_v22 = vsel %vm112_vm2, %v5781_v20, 0.0 }
 0x960   :  { %1854 = vadd.xlane.f32.xlu0 %v1853_v22 }
 0x964   :  { %v1840_v5 = vpop.permute.xlu0 %1839 }
 0x965   :  { %v5786_v46 = vadd.f32 %v1840_v5, %v5669_v23 }
 0x967   :  { %v1856_v1 = vsel %vm112_vm2, %v5786_v46, 0.0 }
 0x968   :  { %1857 = vadd.xlane.f32.xlu1 %v1856_v1 }
 0x97b   :  { %v1844_v63 = vpop.permute.xlu2 %1843 }
 0x97c   :  { %v5791_v4 = vadd.f32 %v1844_v63, %v5681_v27 }
 0x97e   :  { %v1862_v42 = vsel %vm112_vm2, %v5791_v4, 0.0 }
 0x97f   :  { %1863 = vadd.xlane.f32.xlu0 %v1862_v42 }
 0x98b   :  { %v1842_v16 = vpop.permute.xlu1 %1841 }
 0x98c   :  { %v5796_v21 = vadd.f32 %v1842_v16, %v5674_v12 }
 0x98e   :  { %v1859_v23 = vsel %vm112_vm2, %v5796_v21, 0.0 }
 0x98f   :  { %1860 = vadd.xlane.f32.xlu2 %v1859_v23 }
 0x9d3   :  { %v1855_v29 = vpop.xlane.xlu0 %1854 }
 0x9d4   :  { %v1865_v54 = vmul.f32 %v1855_v29, %v5082_v37 }
 0x9d6   :  { %v1869_v43 = vsub.f32 %v5781_v20, %v1865_v54 }
 0x9d8   :  { %v1873_v10 = vmul.f32 %v1869_v43, %v1869_v43 }
 0x9da   :  { %v1877_v27 = vsel %vm112_vm2, %v1873_v10, 0.0 }
 0x9db   :  { %v1858_v52 = vpop.xlane.xlu1 %1857  ;;  %1878 = vadd.xlane.f32.xlu1 %v1877_v27 }
 0x9dc   :  { %v1866_v13 = vmul.f32 %v1858_v52, %v5082_v37 }
 0x9de   :  { %v1870_v26 = vsub.f32 %v5786_v46, %v1866_v13 }
 0x9e0   :  { %v1874_v12 = vmul.f32 %v1870_v26, %v1870_v26 }
 0x9e2   :  { %v1880_v48 = vsel %vm112_vm2, %v1874_v12, 0.0 }
 0x9e3   :  { %1881 = vadd.xlane.f32.xlu2 %v1880_v48 }
 0x9f2   :  { %v1864_v57 = vpop.xlane.xlu0 %1863 }
 0x9f3   :  { %v1868_v18 = vmul.f32 %v1864_v57, %v5082_v37 }
 0x9f5   :  { %v5808_v30 = vsub.f32 %v5791_v4, %v1868_v18 }
 0x9f7   :  { %v1876_v53 = vmul.f32 %v5808_v30, %v5808_v30 }
 0x9f9   :  { %v1886_v2 = vsel %vm112_vm2, %v1876_v53, 0.0 }
 0x9fa   :  { %1887 = vadd.xlane.f32.xlu1 %v1886_v2 }
 0xa02   :  { %v1861_v44 = vpop.xlane.xlu2 %1860 }
 0xa03   :  { %v1867_v36 = vmul.f32 %v1861_v44, %v5082_v37 }
 0xa05   :  { %v5815_v9 = vsub.f32 %v5796_v21, %v1867_v36 }
 0xa07   :  { %v1875_v3 = vmul.f32 %v5815_v9, %v5815_v9 }
 0xa09   :  { %v1883_v11 = vsel %vm112_vm2, %v1875_v3, 0.0 }
 0xa0a   :  { %1884 = vadd.xlane.f32.xlu0 %v1883_v11 }
 0xa4e   :  { %v1879_v41 = vpop.xlane.xlu1 %1878 }
 0xa4f   :  { %v1889_v61 = vmul.f32 %v1879_v41, %v5082_v37 }
 0xa51   :  { %v1893_v17 = vadd.f32 1e-06, %v1889_v61 }
 0xa53   :  { %4693 = vrsqrt.f32 %v1893_v17  ;;  %vm1903_vm1 = vweird.f32 %v1893_v17 }
 0xa56   :  { %v1882_v33 = vpop.xlane.xlu2 %1881 }
 0xa57   :  { %v1890_v8 = vmul.f32 %v1882_v33, %v5082_v37  ;;  %v4473_v33 = vld [vmem:[%s6650_s11] ss:$0 sm:$0xff] }
 0xa59   :  { %v4694_v25 = vpop.eup %4693  ;;  %v1894_v47 = vadd.f32 1e-06, %v1890_v8  ;;  %v4372_v8 = vld [vmem:[%s6651_s12] sm:$0xff] }
 0xa5a   :  { %v1898_v60 = vmul.f32 %v4694_v25, %v1893_v17  ;;  %vm1904_vm9 = vweird.f32 %v4694_v25  ;;  %v4375_v17 = vld [vmem:[%s6651_s12 + $0x18] sm:$0xff] }
 0xa5b   :  { %4695 = vrsqrt.f32 %v1894_v47  ;;  %vm1905_vm7 = vmor %vm1903_vm1, %vm1904_vm9  ;;  %vm1913_vm12 = vweird.f32 %v1894_v47  ;;  %2078 = vmatpush.bf16.msrb.mxu0 %v4375_v17 }
 0xa5c   :  { %v1899_v34 = vmul.f32 %v4694_v25, %v1898_v60 }
 0xa5e   :  { %v1900_v38 = vmul.f32 0.5, %v1899_v34 }
 0xa60   :  { %v1901_v24 = vsub.f32 1.5, %v1900_v38 }
 0xa61   :  { %v4696_v6 = vpop.eup %4695 }
 0xa62   :  { %v1902_v55 = vmul.f32 %v4694_v25, %v1901_v24  ;;  %v1908_v40 = vmul.f32 %v4696_v6, %v1894_v47  ;;  %vm1914_vm10 = vweird.f32 %v4696_v6 }
 0xa63   :  { %vm1915_vm14 = vmor %vm1913_vm12, %vm1914_vm10 }
 0xa64   :  { %v1909_v0 = vmul.f32 %v4696_v6, %v1908_v40  ;;  %v1906_v59 = vsel %vm1905_vm7, %v4694_v25, %v1902_v55 }
 0xa65   :  { %v1937_v28 = vmul.f32 %v1906_v59, %v1869_v43 }
 0xa66   :  { %v1910_v32 = vmul.f32 0.5, %v1909_v0 }
 0xa67   :  { %v1942_v56 = vmul.f32 %v1941_v19, %v1937_v28 }
 0xa68   :  { %v1911_v51 = vsub.f32 1.5, %v1910_v32 }
 0xa69   :  { %v1947_v1 = vadd.f32 %v1946_v31, %v1942_v56 }
 0xa6a   :  { %v1912_v62 = vmul.f32 %v4696_v6, %v1911_v51 }
 0xa6c   :  { %v1916_v45 = vsel %vm1915_vm14, %v4696_v6, %v1912_v62 }
 0xa6d   :  { %v1938_v15 = vmul.f32 %v1916_v45, %v1870_v26  ;;  %v1888_v35 = vpop.xlane.xlu1 %1887 }
 0xa6e   :  { %v1892_v50 = vmul.f32 %v1888_v35, %v5082_v37 }
 0xa6f   :  { %v1943_v22 = vmul.f32 %v1941_v19, %v1938_v15 }
 0xa70   :  { %v1896_v5 = vadd.f32 1e-06, %v1892_v50 }
 0xa71   :  { %v1948_v63 = vadd.f32 %v1946_v31, %v1943_v22 }
 0xa72   :  { %4697 = vrsqrt.f32 %v1896_v5  ;;  %vm1933_vm13 = vweird.f32 %v1896_v5 }
 0xa73   :  { %v1951_v42 = vpack.c.bf16 %v1948_v63, %v1947_v1 }
 0xa75   :  { %4192 = vmatmul.msk.bf16.vlgmr.msrb.gmra.mxu1 %vm112_vm2, %v1951_v42 }
 0xa78   :  { %v4698_v16 = vpop.eup %4697 }
 0xa79   :  { %v1928_v23 = vmul.f32 %v4698_v16, %v1896_v5  ;;  %vm1934_vm11 = vweird.f32 %v4698_v16 }
 0xa7a   :  { %vm1935_vm8 = vmor %vm1933_vm13, %vm1934_vm11 }
 0xa7b   :  { %v1929_v29 = vmul.f32 %v4698_v16, %v1928_v23 }
 0xa7d   :  { %v1885_v54 = vpop.xlane.xlu0 %1884  ;;  %v1930_v27 = vmul.f32 0.5, %v1929_v29 }
 0xa7e   :  { %v1891_v43 = vmul.f32 %v1885_v54, %v5082_v37 }
 0xa7f   :  { %v1931_v49 = vsub.f32 1.5, %v1930_v27 }
 0xa80   :  { %v1895_v10 = vadd.f32 1e-06, %v1891_v43 }
 0xa81   :  { %v1932_v13 = vmul.f32 %v4698_v16, %v1931_v49 }
 0xa82   :  { %4699 = vrsqrt.f32 %v1895_v10  ;;  %vm1923_vm1 = vweird.f32 %v1895_v10 }
 0xa83   :  { %v1936_v48 = vsel %vm1935_vm8, %v4698_v16, %v1932_v13 }
 0xa84   :  { %v1940_v53 = vmul.f32 %v1936_v48, %v5808_v30  ;;  %v4374_v30 = vld [vmem:[%s6651_s12 + $0x10] sm:$0xff] }
 0xa85   :  { %2079 = vmatpush.bf16.msrb.mxu0 %v4374_v30 }
 0xa86   :  { %v1945_v3 = vmul.f32 %v1941_v19, %v1940_v53 }
 0xa88   :  { %v4700_v52 = vpop.eup %4699  ;;  %v1950_v41 = vadd.f32 %v1946_v31, %v1945_v3 }
 0xa89   :  { %v1918_v26 = vmul.f32 %v4700_v52, %v1895_v10  ;;  %vm1924_vm9 = vweird.f32 %v4700_v52 }
 0xa8a   :  { %vm1925_vm7 = vmor %vm1923_vm1, %vm1924_vm9 }
 0xa8b   :  { %v1919_v12 = vmul.f32 %v4700_v52, %v1918_v26 }
 0xa8d   :  { %v1920_v57 = vmul.f32 0.5, %v1919_v12 }
 0xa8f   :  { %v1921_v18 = vsub.f32 1.5, %v1920_v57 }
 0xa91   :  { %v1922_v2 = vmul.f32 %v4700_v52, %v1921_v18 }
 0xa93   :  { %v1926_v44 = vsel %vm1925_vm7, %v4700_v52, %v1922_v2 }
 0xa94   :  { %v1939_v36 = vmul.f32 %v1926_v44, %v5815_v9  ;;  %v4373_v9 = vld [vmem:[%s6651_s12 + $0x8] sm:$0xff] }
 0xa95   :  { %2080 = vmatpush.bf16.msrb.mxu0 %v4373_v9 }
 0xa96   :  { %v1944_v11 = vmul.f32 %v1941_v19, %v1939_v36  ;;  %v4474_v36 = vld [vmem:[%s6652_s13] ss:$0 sm:$0xff] }
 0xa98   :  { %v1949_v39 = vadd.f32 %v1946_v31, %v1944_v11 }
 0xa99   :  { %2081 = vmatpush.bf16.msrb.mxu0 %v4372_v8 }
 0xa9a   :  { %v1952_v61 = vpack.c.bf16 %v1950_v41, %v1949_v39 }
 0xa9c   :  { %4193 = vmatmul.msk.bf16.gmra.mxu1 %vm112_vm2, %v1952_v61 }
 0xaf2   :  { %v1988_v25 = vpop.f32.mrf.mxu1 }
 0xaf3   :  { %v1989_v47 = vadd.f32 %v4473_v33, %v1988_v25 }
 0xaf5   :  { %v2002_v60 = vmul.f32 0.044715, %v1989_v47  ;;  %v1998_v45 = vmul.f32 0.5, %v1989_v47 }
 0xaf7   :  { %v2006_v34 = vmul.f32 %v2002_v60, %v1989_v47 }
 0xaf9   :  { %v2010_v38 = vmul.f32 %v2006_v34, %v1989_v47 }
 0xafa   :  { %v1990_v24 = vpop.f32.mrf.mxu1 }
 0xafb   :  { %v2014_v6 = vadd.f32 %v2010_v38, %v1989_v47  ;;  %v1991_v55 = vadd.f32 %v4473_v33, %v1990_v24 }
 0xafd   :  { %v2003_v40 = vmul.f32 0.044715, %v1991_v55  ;;  %v2018_v0 = vmul.f32 0.7978846, %v2014_v6  ;;  %v1999_v15 = vmul.f32 0.5, %v1991_v55 }
 0xaff   :  { %v2007_v14 = vmul.f32 %v2003_v40, %v1991_v55  ;;  %4701 = vtanh.f32 %v2018_v0 }
 0xb01   :  { %v2011_v59 = vmul.f32 %v2007_v14, %v1991_v55 }
 0xb03   :  { %v2015_v32 = vadd.f32 %v2011_v59, %v1991_v55 }
 0xb05   :  { %v2019_v51 = vmul.f32 0.7978846, %v2015_v32  ;;  %v4702_v28 = vpop.eup %4701 }
 0xb06   :  { %v2026_v19 = vadd.f32 1.0, %v4702_v28 }
 0xb07   :  { %4703 = vtanh.f32 %v2019_v51 }
 0xb08   :  { %v2030_v56 = vmul.f32 %v2026_v19, %v1998_v45 }
 0xb0d   :  { %v4704_v62 = vpop.eup %4703 }
 0xb0e   :  { %v2027_v35 = vadd.f32 1.0, %v4704_v62 }
 0xb10   :  { %v2031_v31 = vmul.f32 %v2027_v35, %v1999_v15 }
 0xb12   :  { %v2034_v50 = vpack.c.bf16 %v2031_v31, %v2030_v56 }
 0xb14   :  { %4210 = vmatmul.msk.bf16.vlgmr.msrb.gmra.mxu0 %vm392_vm5, %v2034_v50 }
 0xb19   :  { %v1993_v22 = vpop.f32.mrf.mxu1 }
 0xb1a   :  { %v1994_v5 = vadd.f32 %v4473_v33, %v1993_v22 }
 0xb1c   :  { %v2004_v1 = vmul.f32 0.044715, %v1994_v5  ;;  %v2000_v48 = vmul.f32 0.5, %v1994_v5 }
 0xb1e   :  { %v2008_v63 = vmul.f32 %v2004_v1, %v1994_v5 }
 0xb20   :  { %v2012_v42 = vmul.f32 %v2008_v63, %v1994_v5 }
 0xb21   :  { %v1995_v16 = vpop.f32.mrf.mxu1 }
 0xb22   :  { %v1996_v23 = vadd.f32 %v4473_v33, %v1995_v16  ;;  %v2016_v29 = vadd.f32 %v2012_v42, %v1994_v5 }
 0xb24   :  { %v2005_v54 = vmul.f32 0.044715, %v1996_v23  ;;  %v2020_v10 = vmul.f32 0.7978846, %v2016_v29  ;;  %v2001_v57 = vmul.f32 0.5, %v1996_v23 }
 0xb26   :  { %v2009_v43 = vmul.f32 %v2005_v54, %v1996_v23  ;;  %4705 = vtanh.f32 %v2020_v10 }
 0xb28   :  { %v2013_v27 = vmul.f32 %v2009_v43, %v1996_v23 }
 0xb2a   :  { %v2017_v49 = vadd.f32 %v2013_v27, %v1996_v23 }
 0xb2c   :  { %v2021_v52 = vmul.f32 0.7978846, %v2017_v49  ;;  %v4706_v13 = vpop.eup %4705 }
 0xb2d   :  { %v2028_v26 = vadd.f32 1.0, %v4706_v13 }
 0xb2e   :  { %4707 = vtanh.f32 %v2021_v52 }
 0xb2f   :  { %v2032_v53 = vmul.f32 %v2028_v26, %v2000_v48 }
 0xb34   :  { %v4708_v12 = vpop.eup %4707 }
 0xb35   :  { %v2029_v18 = vadd.f32 1.0, %v4708_v12 }
 0xb37   :  { %v2033_v2 = vmul.f32 %v2029_v18, %v2001_v57 }
 0xb39   :  { %v2035_v44 = vpack.c.bf16 %v2033_v2, %v2032_v53  ;;  %v4379_v2 = vld [vmem:[%s6645_s6 + $0x38] sm:$0xff] }
 0xb3a   :  { %2282 = vmatpush.bf16.msrb.mxu2 %v4379_v2 }
 0xb3b   :  { %4211 = vmatmul.msk.bf16.gmra.mxu0 %vm392_vm5, %v2035_v44 }
 0xb91   :  { %v2083_v3 = vpop.f32.mrf.mxu0 }
 0xb92   :  { %v2093_v11 = vadd.f32 %v2083_v3, %v5781_v20 }
 0xb94   :  { %v5857_v39 = vadd.f32 %v4474_v36, %v2093_v11 }
 0xb96   :  { %v2107_v41 = vsel %vm112_vm2, %v5857_v39, 0.0 }
 0xb97   :  { %2108 = vadd.xlane.f32.xlu2 %v2107_v41 }
 0xb99   :  { %v2085_v61 = vpop.f32.mrf.mxu0 }
 0xb9a   :  { %v2094_v17 = vadd.f32 %v2085_v61, %v5786_v46 }
 0xb9c   :  { %v5862_v30 = vadd.f32 %v4474_v36, %v2094_v17 }
 0xb9e   :  { %v2110_v9 = vsel %vm112_vm2, %v5862_v30, 0.0 }
 0xb9f   :  { %2111 = vadd.xlane.f32.xlu1 %v2110_v9 }
 0xbb8   :  { %v2088_v33 = vpop.f32.mrf.mxu0 }
 0xbb9   :  { %v2095_v8 = vadd.f32 %v2088_v33, %v5796_v21 }
 0xbbb   :  { %v5867_v25 = vadd.f32 %v4474_v36, %v2095_v8  ;;  %v4212_v8 = vld [vmem:[%s6643_s4 + $0x8] sm:$0x3f] }
 0xbbd   :  { %v2113_v20 = vsel %vm112_vm2, %v5867_v25, 0.0 }
 0xbbe   :  { %2114 = vadd.xlane.f32.xlu2 %v2113_v20 }
 0xbc0   :  { %v2090_v47 = vpop.f32.mrf.mxu0 }
 0xbc1   :  { %v2096_v60 = vadd.f32 %v2090_v47, %v5791_v4 }
 0xbc3   :  { %v5872_v34 = vadd.f32 %v4474_v36, %v2096_v60 }
 0xbc5   :  { %v2116_v46 = vsel %vm112_vm2, %v5872_v34, 0.0 }
 0xbc6   :  { %2117 = vadd.xlane.f32.xlu0 %v2116_v46 }
 0xc0a   :  { %v2109_v38 = vpop.xlane.xlu2 %2108 }
 0xc0b   :  { %v2119_v24 = vmul.f32 %v2109_v38, %v5082_v37 }
 0xc0d   :  { %v5878_v21 = vsub.f32 %v5857_v39, %v2119_v24 }
 0xc0f   :  { %v2127_v6 = vmul.f32 %v5878_v21, %v5878_v21 }
 0xc11   :  { %v2131_v55 = vsel %vm112_vm2, %v2127_v6, 0.0  ;;  %v2195_v6 = vperm.slane %v4212_v8, 0 }
 0xc12   :  { %v2112_v40 = vpop.xlane.xlu1 %2111  ;;  %2132 = vadd.xlane.f32.xlu0 %v2131_v55 }
 0xc13   :  { %v2120_v4 = vmul.f32 %v2112_v40, %v5082_v37 }
 0xc15   :  { %v5885_v0 = vsub.f32 %v5862_v30, %v2120_v4 }
 0xc17   :  { %v2128_v14 = vmul.f32 %v5885_v0, %v5885_v0 }
 0xc19   :  { %v2134_v59 = vsel %vm112_vm2, %v2128_v14, 0.0 }
 0xc1a   :  { %2135 = vadd.xlane.f32.xlu2 %v2134_v59 }
 0xc31   :  { %v2115_v32 = vpop.xlane.xlu2 %2114 }
 0xc32   :  { %v2121_v51 = vmul.f32 %v2115_v32, %v5082_v37 }
 0xc34   :  { %v5892_v28 = vsub.f32 %v5867_v25, %v2121_v51  ;;  %v2200_v51 = vperm.slane %v4212_v8, 1 }
 0xc36   :  { %v2129_v19 = vmul.f32 %v5892_v28, %v5892_v28 }
 0xc38   :  { %v2137_v62 = vsel %vm112_vm2, %v2129_v19, 0.0 }
 0xc39   :  { %2138 = vadd.xlane.f32.xlu0 %v2137_v62  ;;  %v2118_v45 = vpop.xlane.xlu0 %2117 }
 0xc3a   :  { %v2122_v15 = vmul.f32 %v2118_v45, %v5082_v37 }
 0xc3c   :  { %v5899_v35 = vsub.f32 %v5872_v34, %v2122_v15 }
 0xc3e   :  { %v2130_v56 = vmul.f32 %v5899_v35, %v5899_v35 }
 0xc40   :  { %v2140_v31 = vsel %vm112_vm2, %v2130_v56, 0.0 }
 0xc41   :  { %2141 = vadd.xlane.f32.xlu1 %v2140_v31 }
 0xc85   :  { %v2133_v22 = vpop.xlane.xlu0 %2132 }
 0xc86   :  { %v2143_v1 = vmul.f32 %v2133_v22, %v5082_v37 }
 0xc88   :  { %v2147_v42 = vadd.f32 1e-06, %v2143_v1 }
 0xc8a   :  { %vm2157_vm8 = vweird.f32 %v2147_v42 }
 0xc8d   :  { %v2136_v50 = vpop.xlane.xlu2 %2135 }
 0xc8e   :  { %v2144_v5 = vmul.f32 %v2136_v50, %v5082_v37 }
 0xc90   :  { %v2148_v63 = vadd.f32 1e-06, %v2144_v5 }
 0xc92   :  { %4709 = vrsqrt.f32 %v2148_v63  ;;  %vm2167_vm14 = vweird.f32 %v2148_v63 }
 0xc93   :  { %4711 = vrsqrt.f32 %v2147_v42 }
 0xc98   :  { %v4710_v16 = vpop.eup %4709 }
 0xc99   :  { %v4712_v23 = vpop.eup %4711  ;;  %v2162_v29 = vmul.f32 %v4710_v16, %v2148_v63  ;;  %vm2168_vm10 = vweird.f32 %v4710_v16 }
 0xc9a   :  { %v2152_v10 = vmul.f32 %v4712_v23, %v2147_v42  ;;  %vm2158_vm12 = vweird.f32 %v4712_v23  ;;  %vm2169_vm11 = vmor %vm2167_vm14, %vm2168_vm10 }
 0xc9b   :  { %v2163_v27 = vmul.f32 %v4710_v16, %v2162_v29  ;;  %vm2159_vm9 = vmor %vm2157_vm8, %vm2158_vm12  ;;  %vm6668_vm8 = vcmask 1044480  }
 0xc9c   :  { %v2153_v52 = vmul.f32 %v4712_v23, %v2152_v10  ;;  %v4378_v10 = vld [vmem:[%s6645_s6 + $0x30] sm:$0xff] }
 0xc9d   :  { %v2164_v13 = vmul.f32 0.5, %v2163_v27  ;;  %2283 = vmatpush.bf16.msrb.mxu2 %v4378_v10  ;;  %v4377_v27 = vld [vmem:[%s6645_s6 + $0x28] sm:$0xff] }
 0xc9e   :  { %v2154_v48 = vmul.f32 0.5, %v2153_v52  ;;  %v4243_v52 = vld [vmem:[%s6644_s5 + $0x2] sm:$0x3] }
 0xc9f   :  { %v2165_v18 = vsub.f32 1.5, %v2164_v13  ;;  %v2375_v13 = vmul.f32 1.442695, %v4243_v52 }
 0xca0   :  { %v2155_v36 = vsub.f32 1.5, %v2154_v48 }
 0xca1   :  { %v2166_v11 = vmul.f32 %v4710_v16, %v2165_v18  ;;  %2284 = vmatpush.bf16.msrb.mxu2 %v4377_v27 }
 0xca2   :  { %v2156_v61 = vmul.f32 %v4712_v23, %v2155_v36 }
 0xca3   :  { %v2170_v33 = vsel %vm2169_vm11, %v4710_v16, %v2166_v11  ;;  %vm6666_vm11 = vcmask 1042432  }
 0xca4   :  { %v2160_v60 = vsel %vm2159_vm9, %v4712_v23, %v2156_v61  ;;  %v2192_v46 = vmul.f32 %v2170_v33, %v5885_v0  ;;  %vm6669_vm9 = vcmask 1045504  }
 0xca5   :  { %v2191_v4 = vmul.f32 %v2160_v60, %v5878_v21 }
 0xca6   :  { %v2197_v59 = vmul.f32 %v2195_v6, %v2192_v46 }
 0xca7   :  { %v2196_v45 = vmul.f32 %v2195_v6, %v2191_v4 }
 0xca8   :  { %v2202_v0 = vadd.f32 %v2200_v51, %v2197_v59 }
 0xcaa   :  { %v2206_v22 = vrot.slane %v2202_v0, 7 }
 0xcac   :  { %v2139_v54 = vpop.xlane.xlu0 %2138 }
 0xcad   :  { %v2145_v43 = vmul.f32 %v2139_v54, %v5082_v37 }
 0xcaf   :  { %v2149_v49 = vadd.f32 1e-06, %v2145_v43 }
 0xcb1   :  { %4713 = vrsqrt.f32 %v2149_v49  ;;  %vm2177_vm1 = vweird.f32 %v2149_v49 }
 0xcb4   :  { %v2142_v26 = vpop.xlane.xlu1 %2141 }
 0xcb5   :  { %v2146_v12 = vmul.f32 %v2142_v26, %v5082_v37 }
 0xcb7   :  { %v4714_v57 = vpop.eup %4713  ;;  %v2150_v53 = vadd.f32 1e-06, %v2146_v12 }
 0xcb8   :  { %v2172_v44 = vmul.f32 %v4714_v57, %v2149_v49  ;;  %vm2178_vm13 = vweird.f32 %v4714_v57  ;;  %v4376_v49 = vld [vmem:[%s6645_s6 + $0x20] sm:$0xff] }
 0xcb9   :  { %4715 = vrsqrt.f32 %v2150_v53  ;;  %vm2179_vm7 = vmor %vm2177_vm1, %vm2178_vm13  ;;  %vm2187_vm12 = vweird.f32 %v2150_v53  ;;  %2285 = vmatpush.bf16.msrb.mxu2 %v4376_v49  ;;  %vm6667_vm13 = vcmask 1043456   ;;  %vm6670_vm1 = vcmask 1046528  }
 0xcba   :  { %v2173_v3 = vmul.f32 %v4714_v57, %v2172_v44  ;;  %4717 = vpow2.f32 %v2375_v13 }
 0xcbc   :  { %v2174_v41 = vmul.f32 0.5, %v2173_v3 }
 0xcbe   :  { %v2175_v17 = vsub.f32 1.5, %v2174_v41 }
 0xcbf   :  { %v4716_v9 = vpop.eup %4715 }
 0xcc0   :  { %v2176_v20 = vmul.f32 %v4714_v57, %v2175_v17  ;;  %v2182_v47 = vmul.f32 %v4716_v9, %v2150_v53  ;;  %vm2188_vm10 = vweird.f32 %v4716_v9  ;;  %v4718_v26 = vpop.eup %4717 }
 0xcc1   :  { %vm2189_vm14 = vmor %vm2187_vm12, %vm2188_vm10  ;;  %v2377_v48 = vsub.f32 0.0, %v4718_v26 }
 0xcc2   :  { %v2180_v38 = vsel %vm2179_vm7, %v4714_v57, %v2176_v20  ;;  %v2183_v24 = vmul.f32 %v4716_v9, %v2182_v47  ;;  %vm6671_vm7 = vmmov %vm6666_vm11 }
 0xcc3   :  { %v2193_v55 = vmul.f32 %v2180_v38, %v5892_v28  ;;  %v2201_v28 = vadd.f32 %v2200_v51, %v2196_v45  ;;  %2414 = vrot.lane.b32.xlu0 %v2377_v48, %s4968_s30  ;;  %vm6672_vm10 = vmmov %vm6667_vm13 }
 0xcc4   :  { %v2184_v40 = vmul.f32 0.5, %v2183_v24  ;;  %vm6673_vm12 = vmmov %vm6668_vm8 }
 0xcc5   :  { %v2198_v14 = vmul.f32 %v2195_v6, %v2193_v55  ;;  %v2205_v63 = vrot.slane %v2201_v28, 7 }
 0xcc6   :  { %v2185_v32 = vsub.f32 1.5, %v2184_v40 }
 0xcc7   :  { %v2203_v62 = vadd.f32 %v2200_v51, %v2198_v14  ;;  %v2211_v29 = vsel %vm321_vm4, %v2205_v63, %v2206_v22 }
 0xcc8   :  { %v2186_v19 = vmul.f32 %v4716_v9, %v2185_v32 }
 0xcc9   :  { %v2207_v31 = vrot.slane %v2203_v62, 7 }
 0xcca   :  { %v2190_v15 = vsel %vm2189_vm14, %v4716_v9, %v2186_v19  ;;  %vm6674_vm14 = vmmov %vm6669_vm9 }
 0xccb   :  { %v2194_v56 = vmul.f32 %v2190_v15, %v5899_v35  ;;  %v2210_v21 = vsel %vm321_vm4, %v2206_v22, %v2207_v31 }
 0xccc   :  { %v2215_v16 = vsel %vm105_vm15, 0.0, %v2210_v21 }
 0xccd   :  { %v2199_v50 = vmul.f32 %v2195_v6, %v2194_v56  ;;  %v2378_v6 = vpack.c.bf16 %v4243_v52, %v4243_v52 }
 0xccf   :  { %v2204_v5 = vadd.f32 %v2200_v51, %v2199_v50  ;;  %v2379_v4 = vunpack.c.l.bf16 %v2378_v6 }
 0xcd1   :  { %v2208_v1 = vrot.slane %v2204_v5, 7 }
 0xcd3   :  { %v2209_v42 = vsel %vm321_vm4, %v2207_v31, %v2208_v1  ;;  %v2212_v23 = vsel %vm321_vm4, %v2208_v1, %v2205_v63 }
 0xcd4   :  { %v4443_v35 = vpack.i.bf16 %v2209_v42, %v2215_v16  ;;  %v2213_v54 = vsel %vm99_vm3, 0.0, %v2212_v23 }
 0xcd5   :  { %v4438_v43 = vpack.i.bf16 %v2211_v29, %v2213_v54 }
 0xcd6   :  { %4444 = vrot.lane.b32.xlu2 %v4443_v35, %s4968_s30 }
 0xcd7   :  { %4439 = vrot.lane.b32.xlu1 %v4438_v43, %s4968_s30 }
 0xd30   :  { %v4445_v36 = vpop.permute.xlu2 %4444 }
 0xd31   :  { %v4447_v3 = vunpack.i.h.bf16 %v4445_v36  ;;  %v4446_v11 = vunpack.i.l.bf16 %v4445_v36 }
 0xd33   :  { %v2235_v41 = vsel %vm112_vm2, %v2203_v62, %v4446_v11  ;;  %v2236_v61 = vsel %vm112_vm2, %v2204_v5, %v4447_v3 }
 0xd34   :  { %v2238_v17 = vpack.c.bf16 %v2236_v61, %v2235_v41 }
 0xd35   :  { %v2415_v59 = vpop.permute.xlu0 %2414 }
 0xd36   :  { %v5979_v51 = vsel %vm112_vm2, %v2377_v48, %v2415_v59 }
 0xd37   :  { %v2438_v62 = vadd.f32 -1e+38, %v5979_v51 }
 0xd49   :  { %v4440_v12 = vpop.permute.xlu1 %4439 }
 0xd4a   :  { %v4442_v57 = vunpack.i.h.bf16 %v4440_v12  ;;  %v4441_v18 = vunpack.i.l.bf16 %v4440_v12 }
 0xd4c   :  { %v2234_v53 = vsel %vm112_vm2, %v2202_v0, %v4442_v57  ;;  %v2233_v2 = vsel %vm112_vm2, %v2201_v28, %v4441_v18 }
 0xd4d   :  { %v2237_v44 = vpack.c.bf16 %v2234_v53, %v2233_v2 }
 0xd4f   :  { %4237 = vmatmul.msk.bf16.vlgmr.msrb.gmra.mxu2 %vm392_vm5, %v2237_v44 }
 0xd5f   :  { %4238 = vmatmul.msk.bf16.gmra.mxu2 %vm392_vm5, %v2238_v17 }
 0xdd2   :  { %v5951_v9 = vpop.f32.mrf.mxu2 }
 0xdd3   :  { %v2380_v33 = vpack.c.bf16 %v5951_v9, %v5951_v9 }
 0xdd5   :  { %v2384_v8 = vunpack.c.l.bf16 %v2380_v33 }
 0xdd7   :  { %2400 = vrot.lane.b32.xlu0 %v2384_v8, %s4969_s1 }
 0xdda   :  { %v5956_v20 = vpop.f32.mrf.mxu2 }
 0xddb   :  { %v2381_v47 = vpack.c.bf16 %v5956_v20, %v5956_v20 }
 0xddd   :  { %v5960_v60 = vunpack.c.l.bf16 %v2381_v47 }
 0xddf   :  { %2402 = vrot.lane.b32.xlu0 %v5960_v60, %s4969_s1 }
 0xde2   :  { %v5964_v46 = vpop.f32.mrf.mxu2 }
 0xde3   :  { %v2382_v38 = vpack.c.bf16 %v5964_v46, %v5964_v46 }
 0xde5   :  { %v2386_v24 = vunpack.c.l.bf16 %v2382_v38 }
 0xde7   :  { %2390 = vrot.lane.b32.xlu1 %v2386_v24, %s4968_s30 }
 0xdea   :  { %v5969_v55 = vpop.f32.mrf.mxu2 }
 0xdeb   :  { %v2383_v40 = vpack.c.bf16 %v5969_v55, %v5969_v55 }
 0xded   :  { %v5973_v14 = vunpack.c.l.bf16 %v2383_v40 }
 0xdef   :  { %2409 = vrot.lane.b32.xlu1 %v2379_v4, %s4968_s30  ;;  %2392 = vrot.lane.b32.xlu2 %v5973_v14, %s4968_s30 }
 0xe49   :  { %v2401_v18 = vpop.permute.xlu0 %2400 }
 0xe4a   :  { %v6009_v38 = vsel %vm112_vm2, %v2401_v18, %v2386_v24 }
 0xe4b   :  { %v2516_v18 = vrot.slane %v6009_v38, 1 }
 0xe59   :  { %v2391_v32 = vpop.permute.xlu1 %2390 }
 0xe5a   :  { %v5982_v19 = vsel %vm112_vm2, %v2384_v8, %v2391_v32 }
 0xe5b   :  { %v2439_v45 = vmax.f32 %v2438_v62, %v5982_v19  ;;  %v2419_v0 = vrot.slane %v5982_v19, 7  ;;  %v2478_v50 = vrot.slane %v5982_v19, 1  ;;  %v2531_v49 = vrot.slane %v5982_v19, 2 }
 0xe5d   :  { %v2477_v56 = vadd.f32 %v2439_v45, %v5979_v51  ;;  %v2440_v22 = vsub.f32 %v2438_v62, %v2439_v45  ;;  %v2443_v21 = vsub.f32 %v5982_v19, %v2439_v45 }
 0xe5f   :  { %v2480_v1 = vmax.f32 %v2477_v56, %v2478_v50  ;;  %v2441_v23 = vmul.f32 1.442695, %v2440_v22  ;;  %v2444_v54 = vmul.f32 1.442695, %v2443_v21  ;;  %v2403_v21 = vpop.permute.xlu0 %2402 }
 0xe61   :  { %v2410_v15 = vpop.permute.xlu1 %2409  ;;  %v2485_v43 = vrot.slane %v2480_v1, 7  ;;  %v2530_v10 = vadd.f32 %v2480_v1, %v5979_v51  ;;  %v2481_v27 = vsub.f32 %v2477_v56, %v2480_v1  ;;  %4719 = vpow2.f32 %v2441_v23 }
 0xe62   :  { %v5989_v31 = vsel %vm112_vm2, %v2379_v4, %v2410_v15  ;;  %4721 = vpow2.f32 %v2444_v54 }
 0xe63   :  { %v2421_v28 = vadd.f32 %v2419_v0, %v5989_v31  ;;  %v2450_v5 = vadd.f32 %v5989_v31, %v5982_v19  ;;  %v2501_v63 = vadd.f32 %v2478_v50, %v5989_v31  ;;  %v2487_v12 = vsub.f32 %v5982_v19, %v2485_v43 }
 0xe64   :  { %v6002_v57 = vmax.f32 %v2530_v10, %v2531_v49  ;;  %v2482_v53 = vmul.f32 1.442695, %v2481_v27  ;;  %v6006_v47 = vadd.f32 %v2531_v49, %v5989_v31  ;;  %v2584_v50 = vrot.slane %v5982_v19, 3 }
 0xe65   :  { %v2452_v42 = vrot.slane %v2450_v5, 1  ;;  %v2422_v16 = vmax.f32 %v2421_v28, -1e+38  ;;  %v2503_v29 = vrot.slane %v2501_v63, 1  ;;  %v2488_v11 = vmul.f32 1.442695, %v2487_v12 }
 0xe66   :  { %v2538_v17 = vrot.slane %v6002_v57, 6  ;;  %4723 = vpow2.f32 %v2482_v53  ;;  %v2534_v59 = vsub.f32 %v2530_v10, %v6002_v57  ;;  %v6014_v32 = vadd.f32 %v6002_v57, %v5979_v51 }
 0xe67   :  { %v2454_v35 = vmax.f32 %v2439_v45, %v2452_v42  ;;  %v2423_v52 = vsub.f32 -1e+38, %v2422_v16  ;;  %v2505_v26 = vmax.f32 %v2480_v1, %v2503_v29  ;;  %v2426_v48 = vsub.f32 %v2421_v28, %v2422_v16  ;;  %v4720_v41 = vpop.eup %4719 }
 0xe68   :  { %v4722_v33 = vpop.eup %4721  ;;  %v2446_v62 = vmul.f32 0.0, %v4720_v41  ;;  %v2540_v15 = vsub.f32 %v5982_v19, %v2538_v17  ;;  %v2556_v24 = vrot.slane %v6006_v47, 1  ;;  %v6030_v10 = vsel %vm112_vm2, %v2403_v21, %v5973_v14 }
 0xe69   :  { %v2459_v13 = vrot.slane %v2454_v35, 7  ;;  %v2424_v2 = vmul.f32 1.442695, %v2423_v52  ;;  %v2510_v36 = vrot.slane %v2505_v26, 7  ;;  %v2455_v3 = vsub.f32 %v2439_v45, %v2454_v35 }
 0xe6a   :  { %v2427_v61 = vmul.f32 1.442695, %v2426_v48  ;;  %v2506_v8 = vsub.f32 %v2480_v1, %v2505_v26  ;;  %v2447_v45 = vmul.f32 %v4722_v33, %v6009_v38  ;;  %v2535_v1 = vmul.f32 1.442695, %v2534_v59 }
 0xe6b   :  { %v2461_v44 = vsub.f32 %v2450_v5, %v2459_v13  ;;  %4725 = vpow2.f32 %v2424_v2  ;;  %v2512_v40 = vsub.f32 %v2501_v63, %v2510_v36  ;;  %v2456_v4 = vmul.f32 1.442695, %v2455_v3  ;;  %v2393_v5 = vpop.permute.xlu2 %2392 }
 0xe6c   :  { %4727 = vpow2.f32 %v2488_v11  ;;  %v2507_v56 = vmul.f32 1.442695, %v2506_v8  ;;  %v4724_v22 = vpop.eup %4723  ;;  %v6021_v63 = vmax.f32 %v6014_v32, %v2584_v50  ;;  %v2448_v16 = vadd.f32 %v2447_v45, %v2446_v62 }
 0xe6d   :  { %v2462_v6 = vmul.f32 1.442695, %v2461_v44  ;;  %4729 = vpow2.f32 %v2427_v61  ;;  %v2513_v28 = vmul.f32 1.442695, %v2512_v40  ;;  %v2541_v23 = vmul.f32 1.442695, %v2540_v15 }
 0xe6e   :  { %v2558_v29 = vmax.f32 %v6002_v57, %v2556_v24  ;;  %v6026_v43 = vsel %vm112_vm2, %v5960_v60, %v2393_v5  ;;  %v2431_v27 = vrot.slane %v6009_v38, 7  ;;  %v2449_v52 = vadd.f32 %v4722_v33, %v2446_v62 }
 0xe6f   :  { %4731 = vpow2.f32 %v2462_v6  ;;  %v2591_v13 = vrot.slane %v6021_v63, 5  ;;  %v2490_v12 = vmul.f32 %v4724_v22, %v2448_v16  ;;  %v2607_v44 = vadd.f32 %v2584_v50, %v5989_v31 }
 0xe70   :  { %4733 = vpow2.f32 %v2456_v4  ;;  %v2563_v14 = vrot.slane %v2558_v29, 7  ;;  %v2559_v36 = vsub.f32 %v6002_v57, %v2558_v29  ;;  %v6041_v11 = vadd.f32 %v6021_v63, %v5979_v51 }
 0xe71   :  { %v4726_v42 = vpop.eup %4725  ;;  %4735 = vpow2.f32 %v2507_v56  ;;  %v2593_v3 = vsub.f32 %v5982_v19, %v2591_v13  ;;  %v2637_v41 = vrot.slane %v5982_v19, 4  ;;  %v2496_v6 = vmul.f32 %v4724_v22, %v2449_v52 }
 0xe72   :  { %v4728_v35 = vpop.eup %4727  ;;  %4737 = vpow2.f32 %v2513_v28  ;;  %v2429_v49 = vmul.f32 0.0, %v4726_v42  ;;  %v2587_v57 = vsub.f32 %v6014_v32, %v6021_v63  ;;  %v2565_v24 = vsub.f32 %v6006_v47, %v2563_v14 }
 0xe73   :  { %v4730_v54 = vpop.eup %4729  ;;  %4739 = vpow2.f32 %v2535_v1  ;;  %v2491_v48 = vmul.f32 %v4728_v35, %v6009_v38  ;;  %v2498_v2 = vrot.slane %v4728_v35, 1  ;;  %v6048_v62 = vmax.f32 %v6041_v11, %v2637_v41 }
 0xe74   :  { %4741 = vpow2.f32 %v2541_v23  ;;  %v2433_v53 = vmul.f32 %v4730_v54, %v2431_v27  ;;  %v2435_v17 = vadd.f32 %v4730_v54, %v2429_v49  ;;  %v2609_v50 = vrot.slane %v2607_v44, 1 }
 0xe75   :  { %v4732_v26 = vpop.eup %4731  ;;  %v2493_v59 = vrot.slane %v2491_v48, 1  ;;  %v2500_v56 = vadd.f32 %v2498_v2, %v2496_v6  ;;  %v2560_v21 = vmul.f32 1.442695, %v2559_v36  ;;  %v2594_v1 = vmul.f32 1.442695, %v2593_v3 }
 0xe76   :  { %v4734_v60 = vpop.eup %4733  ;;  %v2465_v33 = vmul.f32 %v4732_v26, %v6009_v38  ;;  %v2472_v8 = vrot.slane %v4732_v26, 1  ;;  %v2434_v5 = vadd.f32 %v2433_v53, %v2429_v49  ;;  %v2644_v22 = vrot.slane %v6048_v62, 4 }
 0xe77   :  { %v4736_v61 = vpop.eup %4735  ;;  %v2464_v4 = vmul.f32 %v4734_v60, %v2448_v16  ;;  %v2470_v15 = vmul.f32 %v4734_v60, %v2449_v52  ;;  %4743 = vrcp.f32 %v2435_v17  ;;  %v6053_v32 = vmax.f32 %v6021_v63, %v2609_v50 }
 0xe78   :  { %v4738_v40 = vpop.eup %4737  ;;  %v2467_v42 = vrot.slane %v2465_v33, 1  ;;  %v2495_v23 = vadd.f32 %v2493_v59, %v2490_v12  ;;  %v2588_v54 = vmul.f32 1.442695, %v2587_v57  ;;  %v2523_v27 = vmul.f32 %v4736_v61, %v2500_v56 }
 0xe79   :  { %v4740_v45 = vpop.eup %4739  ;;  %v2474_v16 = vadd.f32 %v2472_v8, %v2470_v15  ;;  %v2518_v35 = vmul.f32 %v4738_v40, %v2516_v18  ;;  %v2525_v29 = vrot.slane %v4738_v40, 1  ;;  %v2566_v13 = vmul.f32 1.442695, %v2565_v24 }
 0xe7a   :  { %v4742_v28 = vpop.eup %4741  ;;  %v2549_v52 = vmul.f32 %v4740_v45, %v2500_v56  ;;  %4745 = vpow2.f32 %v2594_v1  ;;  %v2646_v49 = vsub.f32 %v5982_v19, %v2644_v22  ;;  %v6059_v26 = vadd.f32 %v6048_v62, %v5979_v51 }
 0xe7b   :  { %v2544_v47 = vmul.f32 %v4742_v28, %v6009_v38  ;;  %v2690_v48 = vrot.slane %v5982_v19, 5  ;;  %4747 = vrcp.f32 %v2474_v16  ;;  %v2551_v60 = vrot.slane %v4742_v28, 2 }
 0xe7c   :  { %v2616_v12 = vrot.slane %v6053_v32, 7  ;;  %v2660_v18 = vadd.f32 %v2637_v41, %v5989_v31  ;;  %v2520_v53 = vrot.slane %v2518_v35, 1  ;;  %4749 = vpow2.f32 %v2588_v54 }
 0xe7d   :  { %v2640_v2 = vsub.f32 %v6041_v11, %v6048_v62  ;;  %v6067_v14 = vmax.f32 %v6059_v26, %v2690_v48  ;;  %v4744_v36 = vpop.eup %4743  ;;  %v2527_v3 = vadd.f32 %v2525_v29, %v2523_v27  ;;  %v2543_v17 = vmul.f32 %v4740_v45, %v2495_v23 }
 0xe7e   :  { %v2546_v33 = vrot.slane %v2544_v47, 2  ;;  %4751 = vpow2.f32 %v2566_v13  ;;  %v2647_v8 = vmul.f32 1.442695, %v2646_v49  ;;  %v6071_v40 = vadd.f32 %v2690_v48, %v5989_v31 }
 0xe7f   :  { %4753 = vpow2.f32 %v2560_v21  ;;  %v2697_v6 = vrot.slane %v6067_v14, 3  ;;  %v2515_v41 = vmul.f32 %v4736_v61, %v2495_v23  ;;  %v2553_v59 = vadd.f32 %v2551_v60, %v2549_v52 }
 0xe80   :  { %v2618_v57 = vsub.f32 %v2607_v44, %v2616_v12  ;;  %v2662_v15 = vrot.slane %v2660_v18, 1  ;;  %v4746_v11 = vpop.eup %4745  ;;  %v6073_v56 = vmul.f32 %v4744_v36, %v2434_v5  ;;  %v2469_v24 = vadd.f32 %v2467_v42, %v2464_v4 }
 0xe81   :  { %v2569_v50 = vrot.slane %v6009_v38, 2  ;;  %v2641_v45 = vmul.f32 1.442695, %v2640_v2  ;;  %v4748_v28 = vpop.eup %4747  ;;  %v2522_v1 = vadd.f32 %v2520_v53, %v2515_v41  ;;  %4755 = vrcp.f32 %v2527_v3 }
 0xe82   :  { %v2548_v21 = vadd.f32 %v2546_v33, %v2543_v17  ;;  %v2664_v22 = vmax.f32 %v6048_v62, %v2662_v15  ;;  %v4750_v16 = vpop.eup %4749  ;;  %v2612_v61 = vsub.f32 %v6021_v63, %v6053_v32  ;;  %4757 = vpow2.f32 %v2647_v8 }
 0xe83   :  { %v2699_v44 = vsub.f32 %v5982_v19, %v2697_v6  ;;  %v2715_v5 = vrot.slane %v6071_v40, 1  ;;  %v2602_v4 = vmul.f32 %v4750_v16, %v2553_v59  ;;  %v2604_v42 = vrot.slane %v4746_v11, 3 }
 0xe84   :  { %v4752_v23 = vpop.eup %4751  ;;  %v2619_v35 = vmul.f32 1.442695, %v2618_v57  ;;  %v6083_v29 = vadd.f32 %v6067_v14, %v5979_v51  ;;  %v2597_v27 = vmul.f32 %v4746_v11, %v6009_v38  ;;  %4759 = vpow2.f32 %v2641_v45 }
 0xe85   :  { %v4754_v54 = vpop.eup %4753  ;;  %v2693_v63 = vsub.f32 %v6059_v26, %v6067_v14  ;;  %v2717_v32 = vmax.f32 %v6067_v14, %v2715_v5  ;;  %v2622_v52 = vrot.slane %v6009_v38, 3  ;;  %v2669_v13 = vrot.slane %v2664_v22, 7 }
 0xe86   :  { %v2576_v47 = vmul.f32 %v4754_v54, %v2553_v59  ;;  %v2743_v49 = vrot.slane %v5982_v19, 6  ;;  %v6091_v48 = vmul.f32 %v4748_v28, %v2469_v24  ;;  %v2578_v60 = vrot.slane %v4752_v23, 1 }
 0xe87   :  { %v2613_v12 = vmul.f32 1.442695, %v2612_v61  ;;  %v2700_v53 = vmul.f32 1.442695, %v2699_v44  ;;  %v4756_v2 = vpop.eup %4755  ;;  %v2596_v36 = vmul.f32 %v4750_v16, %v2548_v21  ;;  %v2606_v3 = vadd.f32 %v2604_v42, %v2602_v4 }
 0xe88   :  { %v2665_v17 = vsub.f32 %v6048_v62, %v2664_v22  ;;  %v6095_v26 = vmax.f32 %v6083_v29, %v2743_v49  ;;  %v4758_v33 = vpop.eup %4757  ;;  %v2599_v8 = vrot.slane %v2597_v27, 3  ;;  %4761 = vpow2.f32 %v2619_v35 }
 0xe89   :  { %v2694_v6 = vmul.f32 1.442695, %v2693_v63  ;;  %v2722_v41 = vrot.slane %v2717_v32, 7  ;;  %v2568_v59 = vmul.f32 %v4754_v54, %v2548_v21  ;;  %v2671_v57 = vsub.f32 %v2660_v18, %v2669_v13 }
 0xe8a   :  { %v2675_v15 = vrot.slane %v6009_v38, 4  ;;  %v2750_v11 = vrot.slane %v6095_v26, 2  ;;  %v4760_v24 = vpop.eup %4759  ;;  %v2571_v45 = vmul.f32 %v4752_v23, %v2569_v50  ;;  %v2580_v28 = vadd.f32 %v2578_v60, %v2576_v47 }
 0xe8b   :  { %4763 = vpow2.f32 %v2700_v53  ;;  %v2718_v62 = vsub.f32 %v6067_v14, %v2717_v32  ;;  %v2655_v22 = vmul.f32 %v4760_v24, %v2606_v3  ;;  %v2657_v16 = vrot.slane %v4758_v33, 4 }
 0xe8c   :  { %4765 = vpow2.f32 %v2613_v12  ;;  %v2666_v61 = vmul.f32 1.442695, %v2665_v17  ;;  %v2601_v44 = vadd.f32 %v2599_v8, %v2596_v36  ;;  %v2650_v5 = vmul.f32 %v4758_v33, %v6009_v38 }
 0xe8d   :  { %4767 = vpow2.f32 %v2694_v6  ;;  %v2724_v18 = vsub.f32 %v6071_v40, %v2722_v41  ;;  %v6102_v21 = vmul.f32 %v4756_v2, %v2522_v1  ;;  %v2672_v4 = vmul.f32 1.442695, %v2671_v57 }
 0xe8e   :  { %v2752_v42 = vsub.f32 %v5982_v19, %v2750_v11  ;;  %v2795_v50 = vadd.f32 %v6095_v26, %v5979_v51  ;;  %v4762_v23 = vpop.eup %4761  ;;  %4769 = vrcp.f32 %v2580_v28  ;;  %v2719_v14 = vmul.f32 1.442695, %v2718_v62 }
 0xe8f   :  { %v2746_v35 = vsub.f32 %v6083_v29, %v6095_v26  ;;  %v6110_v54 = vadd.f32 %v2743_v49, %v5989_v31  ;;  %v2659_v27 = vadd.f32 %v2657_v16, %v2655_v22  ;;  %v2818_v1 = vrot.slane %v6026_v43, 7 }
 0xe90   :  { %v2753_v63 = vmul.f32 1.442695, %v2752_v42  ;;  %v6114_v40 = vmax.f32 %v2795_v50, %v2419_v0  ;;  %v2649_v47 = vmul.f32 %v4760_v24, %v2601_v44  ;;  %v2652_v13 = vrot.slane %v2650_v5, 4 }
 0xe91   :  { %v4764_v32 = vpop.eup %4763  ;;  %4771 = vpow2.f32 %v2666_v61  ;;  %v2725_v60 = vmul.f32 1.442695, %v2724_v18  ;;  %v2573_v53 = vrot.slane %v2571_v45, 1  ;;  %v2624_v2 = vmul.f32 %v4762_v23, %v2622_v52 }
 0xe92   :  { %v4766_v12 = vpop.eup %4765  ;;  %4773 = vpow2.f32 %v2672_v4  ;;  %v2820_v29 = vadd.f32 %v2818_v1, %v5989_v31  ;;  %v2747_v36 = vmul.f32 1.442695, %v2746_v35  ;;  %v2768_v17 = vrot.slane %v6110_v54, 1 }
 0xe93   :  { %v4768_v49 = vpop.eup %4767  ;;  %4775 = vpow2.f32 %v2719_v14  ;;  %v2801_v0 = vrot.slane %v6114_v40, 1  ;;  %v2629_v33 = vmul.f32 %v4766_v12, %v2606_v3  ;;  %v2710_v6 = vrot.slane %v4764_v32, 5 }
 0xe94   :  { %v2708_v8 = vmul.f32 %v4768_v49, %v2659_v27  ;;  %4777 = vpow2.f32 %v2753_v63  ;;  %v4770_v41 = vpop.eup %4769  ;;  %v6120_v57 = vadd.f32 %v2652_v13, %v2649_v47  ;;  %v2703_v11 = vmul.f32 %v4764_v32, %v6009_v38 }
 0xe95   :  { %4779 = vpow2.f32 %v2725_v60  ;;  %v2770_v52 = vmax.f32 %v6095_v26, %v2768_v17  ;;  %v2575_v24 = vadd.f32 %v2573_v53, %v2568_v59  ;;  %v2621_v45 = vmul.f32 %v4766_v12, %v2601_v44 }
 0xe96   :  { %v2803_v28 = vsub.f32 %v5982_v19, %v2801_v0  ;;  %v2822_v62 = vrot.slane %v2820_v29, 1  ;;  %v2631_v16 = vrot.slane %v4762_v23, 1  ;;  %4781 = vpow2.f32 %v2747_v36 }
 0xe97   :  { %v4772_v22 = vpop.eup %4771  ;;  %v2797_v3 = vsub.f32 %v2795_v50, %v6114_v40  ;;  %v2850_v61 = vadd.f32 %v6114_v40, %v5979_v51  ;;  %v2626_v18 = vrot.slane %v2624_v2, 1  ;;  %v2712_v4 = vadd.f32 %v2710_v6, %v2708_v8 }
 0xe98   :  { %v4774_v5 = vpop.eup %4773  ;;  %v2804_v42 = vmul.f32 1.442695, %v2803_v28  ;;  %v6129_v14 = vmax.f32 %v6114_v40, %v2822_v62  ;;  %v2633_v44 = vadd.f32 %v2631_v16, %v2629_v33  ;;  %v2702_v19 = vmul.f32 %v4768_v49, %v6120_v57 }
 0xe99   :  { %v6131_v59 = vpop.eup %4775  ;;  %v2705_v35 = vrot.slane %v2703_v11, 5  ;;  %v2775_v23 = vrot.slane %v2770_v52, 7  ;;  %v6134_v1 = vmul.f32 %v4770_v41, %v2575_v24  ;;  %v6136_v50 = vadd.f32 %v2626_v18, %v2621_v45 }
 0xe9a   :  { %v4778_v63 = vpop.eup %4777  ;;  %v2682_v32 = vmul.f32 %v4772_v22, %v2659_v27  ;;  %v2728_v47 = vrot.slane %v6009_v38, 5  ;;  %v2684_v60 = vrot.slane %v4774_v5, 1  ;;  %v2771_v12 = vsub.f32 %v6095_v26, %v2770_v52 }
 0xe9b   :  { %v4780_v13 = vpop.eup %4779  ;;  %v2798_v53 = vmul.f32 1.442695, %v2797_v3  ;;  %v6141_v2 = vmax.f32 %v2850_v61, %v6026_v43  ;;  %v2735_v49 = vmul.f32 %v6131_v59, %v2712_v4  ;;  %4783 = vpow2.f32 %v2804_v42 }
 0xe9c   :  { %v2829_v36 = vrot.slane %v6129_v14, 7  ;;  %v2863_v17 = vadd.f32 %v5989_v31, %v6026_v43  ;;  %v4782_v0 = vpop.eup %4781  ;;  %4785 = vrcp.f32 %v2633_v44  ;;  %v2707_v27 = vadd.f32 %v2705_v35, %v2702_v19 }
 0xe9d   :  { %v2756_v33 = vmul.f32 %v4778_v63, %v6009_v38  ;;  %v2777_v8 = vsub.f32 %v6110_v54, %v2775_v23  ;;  %v2686_v26 = vadd.f32 %v2684_v60, %v2682_v32  ;;  %v2737_v6 = vrot.slane %v4780_v13, 1 }
 0xe9e   :  { %v2761_v41 = vmul.f32 %v4782_v0, %v2712_v4  ;;  %v2763_v11 = vrot.slane %v4778_v63, 6  ;;  %v2772_v52 = vmul.f32 1.442695, %v2771_v12  ;;  %v2781_v24 = vrot.slane %v6009_v38, 6 }
 0xe9f   :  { %4787 = vpow2.f32 %v2798_v53  ;;  %v2852_v45 = vsub.f32 %v2850_v61, %v6141_v2  ;;  %v2739_v28 = vadd.f32 %v2737_v6, %v2735_v49  ;;  %v2831_v62 = vsub.f32 %v2820_v29, %v2829_v36 }
 0xea0   :  { %v2865_v16 = vrot.slane %v2863_v17, 1  ;;  %v2890_v3 = vadd.f32 %v6141_v2, %v5979_v51  ;;  %v2755_v18 = vmul.f32 %v4782_v0, %v2707_v27  ;;  %v2758_v42 = vrot.slane %v2756_v33, 6 }
 0xea1   :  { %v2778_v44 = vmul.f32 1.442695, %v2777_v8  ;;  %v2855_v54 = vsub.f32 %v6026_v43, %v6141_v2  ;;  %v4784_v4 = vpop.eup %4783  ;;  %4789 = vrcp.f32 %v2686_v26  ;;  %v2765_v19 = vadd.f32 %v2763_v11, %v2761_v41 }
 0xea2   :  { %v2867_v35 = vmax.f32 %v6141_v2, %v2865_v16  ;;  %v2891_v23 = vrot.slane %v6026_v43, 1  ;;  %v4786_v61 = vpop.eup %4785  ;;  %v2677_v29 = vmul.f32 %v4774_v5, %v2675_v15  ;;  %4791 = vpow2.f32 %v2772_v52 }
 0xea3   :  { %v2825_v63 = vsub.f32 %v6114_v40, %v6129_v14  ;;  %v2853_v32 = vmul.f32 1.442695, %v2852_v45  ;;  %v2674_v60 = vmul.f32 %v4772_v22, %v6120_v57  ;;  %4793 = vrcp.f32 %v2739_v28 }
 0xea4   :  { %v2832_v12 = vmul.f32 1.442695, %v2831_v62  ;;  %v6162_v53 = vmax.f32 %v2890_v3, %v2891_v23  ;;  %v6164_v36 = vadd.f32 %v2758_v42, %v2755_v18  ;;  %4795 = vpow2.f32 %v2778_v44 }
 0xea5   :  { %v4788_v49 = vpop.eup %4787  ;;  %v2807_v0 = vmul.f32 %v4784_v4, %v6009_v38  ;;  %v2856_v33 = vmul.f32 1.442695, %v2855_v54  ;;  %v2814_v15 = vrot.slane %v4784_v4, 7  ;;  %v2872_v5 = vrot.slane %v2867_v35, 7 }
 0xea6   :  { %v2812_v8 = vmul.f32 %v4788_v49, %v2765_v19  ;;  %v2898_v26 = vrot.slane %v6162_v53, 7  ;;  %v2730_v40 = vmul.f32 %v4780_v13, %v2728_v47  ;;  %v2826_v14 = vmul.f32 1.442695, %v2825_v63 }
 0xea7   :  { %4797 = vpow2.f32 %v2853_v32  ;;  %v2894_v57 = vsub.f32 %v2890_v3, %v6162_v53  ;;  %v4790_v22 = vpop.eup %4789  ;;  %v2679_v6 = vrot.slane %v2677_v29, 1  ;;  %v2727_v41 = vmul.f32 %v6131_v59, %v2707_v27 }
 0xea8   :  { %4799 = vpow2.f32 %v2832_v12  ;;  %v2900_v11 = vsub.f32 %v6026_v43, %v2898_v26  ;;  %v6171_v52 = vpop.eup %4791  ;;  %v2806_v45 = vmul.f32 %v4788_v49, %v6164_v36  ;;  %v2809_v28 = vrot.slane %v2807_v0, 7 }
 0xea9   :  { %4801 = vpow2.f32 %v2856_v33  ;;  %v2868_v62 = vsub.f32 %v6141_v2, %v2867_v35  ;;  %v4794_v47 = vpop.eup %4793  ;;  %v2816_v13 = vadd.f32 %v2814_v15, %v2812_v8  ;;  %v2874_v16 = vsub.f32 %v2863_v17, %v2872_v5 }
 0xeaa   :  { %v2901_v18 = vmul.f32 1.442695, %v2900_v11  ;;  %v6176_v3 = vadd.f32 %v2891_v23, %v5989_v31  ;;  %v4796_v42 = vpop.eup %4795  ;;  %v6179_v59 = vmul.f32 %v4786_v61, %v6136_v50  ;;  %v2732_v27 = vrot.slane %v2730_v40, 1 }
 0xeab   :  { %4803 = vpow2.f32 %v2826_v14  ;;  %v2895_v44 = vmul.f32 1.442695, %v2894_v57  ;;  %v2681_v54 = vadd.f32 %v2679_v6, %v2674_v60  ;;  %v2943_v4 = vadd.f32 %v6162_v53, %v5979_v51 }
 0xeac   :  { %4805 = vpow2.f32 %v2901_v18  ;;  %v2944_v2 = vrot.slane %v6026_v43, 2  ;;  %v2734_v17 = vadd.f32 %v2732_v27, %v2727_v41  ;;  %v2788_v29 = vmul.f32 %v6171_v52, %v2765_v19 }
 0xead   :  { %v4798_v35 = vpop.eup %4797  ;;  %v6185_v23 = vadd.f32 %v2809_v28, %v2806_v45  ;;  %v2869_v63 = vmul.f32 1.442695, %v2868_v62  ;;  %v2875_v61 = vmul.f32 1.442695, %v2874_v16  ;;  %v2916_v12 = vrot.slane %v6176_v3, 1 }
 0xeae   :  { %v6187_v32 = vpop.eup %4799  ;;  %v2861_v50 = vmul.f32 %v4798_v35, %v2816_v13  ;;  %v6190_v60 = vmax.f32 %v2943_v4, %v2944_v2  ;;  %v6192_v0 = vmul.f32 %v4790_v22, %v2681_v54  ;;  %v6194_v33 = vmul.f32 %v4794_v47, %v2734_v17 }
 0xeaf   :  { %v4802_v49 = vpop.eup %4801  ;;  %v2836_v8 = vrot.slane %v6030_v10, 7  ;;  %4807 = vpow2.f32 %v2895_v44  ;;  %v2790_v19 = vrot.slane %v4796_v42, 1  ;;  %v2918_v15 = vmax.f32 %v6162_v53, %v2916_v12 }
 0xeb0   :  { %v2947_v5 = vsub.f32 %v2943_v4, %v6190_v60  ;;  %v2951_v26 = vrot.slane %v6190_v60, 6  ;;  %v6204_v14 = vmul.f32 %v4796_v42, %v2781_v24  ;;  %v2858_v57 = vmul.f32 %v4798_v35, %v6185_v23 }
 0xeb1   :  { %v6200_v40 = vpop.eup %4803  ;;  %4809 = vpow2.f32 %v2869_v63  ;;  %v6208_v22 = vadd.f32 %v2944_v2, %v5989_v31  ;;  %v2792_v41 = vadd.f32 %v2790_v19, %v2788_v29  ;;  %v2862_v11 = vadd.f32 %v4802_v49, %v2861_v50 }
 0xeb2   :  { %v4806_v6 = vpop.eup %4805  ;;  %4811 = vpow2.f32 %v2875_v61  ;;  %v2953_v45 = vsub.f32 %v6026_v43, %v2951_v26  ;;  %v2843_v28 = vmul.f32 %v6200_v40, %v2816_v13  ;;  %v2845_v62 = vrot.slane %v6187_v32, 1 }
 0xeb3   :  { %v2859_v38 = vmul.f32 %v4802_v49, %v6030_v10  ;;  %v2948_v24 = vmul.f32 1.442695, %v2947_v5  ;;  %v2919_v47 = vsub.f32 %v6162_v53, %v2918_v15  ;;  %v2996_v18 = vadd.f32 %v6190_v60, %v5979_v51 }
 0xeb4   :  { %v2954_v16 = vmul.f32 1.442695, %v2953_v45  ;;  %v2997_v42 = vrot.slane %v6026_v43, 3  ;;  %v2904_v54 = vmul.f32 %v4806_v6, %v6030_v10  ;;  %v2923_v4 = vrot.slane %v2918_v15, 7 }
 0xeb5   :  { %v4808_v27 = vpop.eup %4807  ;;  %v6218_v44 = vadd.f32 %v2859_v38, %v2858_v57  ;;  %v2969_v13 = vrot.slane %v6208_v22, 1  ;;  %v2911_v35 = vrot.slane %v4806_v6, 1  ;;  %v2780_v29 = vmul.f32 %v6171_v52, %v6164_v36 }
 0xeb6   :  { %v2909_v2 = vmul.f32 %v4808_v27, %v2862_v11  ;;  %4813 = vpow2.f32 %v2954_v16  ;;  %v6222_v17 = vmax.f32 %v2996_v18, %v2997_v42  ;;  %v2847_v63 = vadd.f32 %v2845_v62, %v2843_v28 }
 0xeb7   :  { %v6224_v53 = vpop.eup %4809  ;;  %4815 = vpow2.f32 %v2948_v24  ;;  %v3020_v50 = vadd.f32 %v2997_v42, %v5989_v31  ;;  %v2920_v12 = vmul.f32 1.442695, %v2919_v47  ;;  %v2971_v49 = vmax.f32 %v6190_v60, %v2969_v13 }
 0xeb8   :  { %v6229_v61 = vpop.eup %4811  ;;  %v3000_v19 = vsub.f32 %v2996_v18, %v6222_v17  ;;  %v3004_v15 = vrot.slane %v6222_v17, 5  ;;  %v2785_v5 = vrot.slane %v6204_v14, 1  ;;  %v2903_v26 = vmul.f32 %v4808_v27, %v6218_v44 }
 0xeb9   :  { %v2906_v57 = vrot.slane %v2904_v54, 1  ;;  %4817 = vrcp.f32 %v2792_v41  ;;  %v2883_v52 = vmul.f32 %v6224_v53, %v2862_v11  ;;  %v6238_v6 = vadd.f32 %v2911_v35, %v2909_v2 }
 0xeba   :  { %v2925_v45 = vsub.f32 %v6176_v3, %v2923_v4  ;;  %4819 = vrcp.f32 %v2847_v63  ;;  %v2885_v28 = vrot.slane %v6229_v61, 1  ;;  %v3001_v62 = vmul.f32 1.442695, %v3000_v19 }
 0xebb   :  { %v3022_v38 = vrot.slane %v3020_v50, 1  ;;  %4821 = vpow2.f32 %v2920_v12  ;;  %v2972_v14 = vsub.f32 %v6190_v60, %v2971_v49  ;;  %v2976_v47 = vrot.slane %v2971_v49, 7 }
 0xebc   :  { %v4814_v24 = vpop.eup %4813  ;;  %v3006_v16 = vsub.f32 %v6026_v43, %v3004_v15  ;;  %v6244_v41 = vadd.f32 %v2906_v57, %v2903_v26  ;;  %v3050_v3 = vrot.slane %v6026_v43, 4  ;;  %v2887_v27 = vadd.f32 %v2885_v28, %v2883_v52 }
 0xebd   :  { %v4816_v18 = vpop.eup %4815  ;;  %v2957_v11 = vmul.f32 %v4814_v24, %v6030_v10  ;;  %v3024_v42 = vmax.f32 %v6222_v17, %v3022_v38  ;;  %v2926_v54 = vmul.f32 1.442695, %v2925_v45  ;;  %v2964_v2 = vrot.slane %v4814_v24, 2 }
 0xebe   :  { %v2962_v4 = vmul.f32 %v4816_v18, %v6238_v6  ;;  %v3007_v13 = vmul.f32 1.442695, %v3006_v16  ;;  %4823 = vpow2.f32 %v3001_v62  ;;  %v3049_v60 = vadd.f32 %v6222_v17, %v5979_v51 }
 0xebf   :  { %v3073_v35 = vadd.f32 %v3050_v3, %v5989_v31  ;;  %v4818_v63 = vpop.eup %4817  ;;  %v2787_v12 = vadd.f32 %v2785_v5, %v2780_v29  ;;  %v2973_v49 = vmul.f32 1.442695, %v2972_v14  ;;  %v2978_v19 = vsub.f32 %v6208_v22, %v2976_v47 }
 0xec0   :  { %4825 = vpow2.f32 %v3007_v13  ;;  %v6254_v15 = vpop.eup %4819  ;;  %v2956_v26 = vmul.f32 %v4816_v18, %v6244_v41  ;;  %v2959_v57 = vrot.slane %v2957_v11, 2  ;;  %v3029_v52 = vrot.slane %v3024_v42, 7 }
 0xec1   :  { %v3052_v45 = vmax.f32 %v3049_v60, %v3050_v3  ;;  %v6257_v28 = vpop.eup %4821  ;;  %v2838_v62 = vmul.f32 %v6187_v32, %v2836_v8  ;;  %4827 = vpow2.f32 %v2926_v54  ;;  %v3075_v5 = vrot.slane %v3073_v35, 1 }
 0xec2   :  { %4829 = vrcp.f32 %v2887_v27  ;;  %v6263_v22 = vadd.f32 %v2964_v2, %v2962_v4  ;;  %v3103_v24 = vrot.slane %v6026_v43, 5  ;;  %v3025_v14 = vsub.f32 %v6222_v17, %v3024_v42 }
 0xec3   :  { %v3053_v38 = vsub.f32 %v3049_v60, %v3052_v45  ;;  %4831 = vpow2.f32 %v2973_v49  ;;  %v3057_v47 = vrot.slane %v3052_v45, 4  ;;  %v3077_v16 = vmax.f32 %v3052_v45, %v3075_v5 }
 0xec4   :  { %v4824_v18 = vpop.eup %4823  ;;  %v6267_v11 = vadd.f32 %v2959_v57, %v2956_v26  ;;  %v2979_v3 = vmul.f32 1.442695, %v2978_v19  ;;  %v3031_v32 = vsub.f32 %v3020_v50, %v3029_v52  ;;  %v3126_v8 = vadd.f32 %v3103_v24, %v5989_v31 }
 0xec5   :  { %v3054_v13 = vmul.f32 1.442695, %v3053_v38  ;;  %v3059_v27 = vsub.f32 %v6026_v43, %v3057_v47  ;;  %v3082_v4 = vrot.slane %v3077_v16, 7  ;;  %v3102_v2 = vadd.f32 %v3052_v45, %v5979_v51 }
 0xec6   :  { %v4826_v54 = vpop.eup %4825  ;;  %v3015_v17 = vmul.f32 %v4824_v18, %v6263_v22  ;;  %v3078_v49 = vsub.f32 %v3052_v45, %v3077_v16  ;;  %v2834_v50 = vmul.f32 %v6200_v40, %v6185_v23  ;;  %v3026_v19 = vmul.f32 1.442695, %v3025_v14 }
 0xec7   :  { %v3010_v60 = vmul.f32 %v4826_v54, %v6030_v10  ;;  %v3017_v42 = vrot.slane %v4826_v54, 3  ;;  %v6274_v5 = vpop.eup %4827  ;;  %4833 = vpow2.f32 %v3054_v13  ;;  %v3060_v26 = vmul.f32 1.442695, %v3059_v27 }
 0xec8   :  { %v6278_v57 = vpop.eup %4829  ;;  %v6280_v52 = vmul.f32 %v4818_v63, %v2787_v12  ;;  %v2840_v38 = vrot.slane %v2838_v62, 1  ;;  %4835 = vpow2.f32 %v2979_v3  ;;  %v3032_v47 = vmul.f32 1.442695, %v3031_v32 }
 0xec9   :  { %v6282_v29 = vpop.eup %4831  ;;  %4837 = vpow2.f32 %v3060_v26  ;;  %v3084_v54 = vsub.f32 %v3073_v35, %v3082_v4  ;;  %v3105_v45 = vmax.f32 %v3102_v2, %v3103_v24  ;;  %v3128_v16 = vrot.slane %v3126_v8, 1 }
 0xeca   :  { %v3009_v36 = vmul.f32 %v4824_v18, %v6267_v11  ;;  %v3012_v7 = vrot.slane %v3010_v60, 3  ;;  %v6285_v23 = vadd.f32 %v3017_v42, %v3015_v17  ;;  %v3079_v40 = vmul.f32 1.442695, %v3078_v49 }
 0xecb   :  { %4839 = vpow2.f32 %v3026_v19  ;;  %v3106_v14 = vsub.f32 %v3102_v2, %v3105_v45  ;;  %v3110_v13 = vrot.slane %v3105_v45, 3  ;;  %v3130_v63 = vmax.f32 %v3105_v45, %v3128_v16 }
 0xecc   :  { %v6287_v12 = vadd.f32 %v2840_v38, %v2834_v50  ;;  %v6291_v62 = vmul.f32 %v6224_v53, %v6218_v44  ;;  %4841 = vpow2.f32 %v3032_v47  ;;  %v3155_v35 = vadd.f32 %v3105_v45, %v5979_v51 }
 0xecd   :  { %v4834_v24 = vpop.eup %4833  ;;  %v3085_v3 = vmul.f32 1.442695, %v3084_v54  ;;  %v3107_v18 = vmul.f32 1.442695, %v3106_v14  ;;  %v3112_v32 = vsub.f32 %v6026_v43, %v3110_v13  ;;  %v3131_v27 = vsub.f32 %v3105_v45, %v3130_v63 }
 0xece   :  { %v6295_v4 = vpop.eup %4835  ;;  %v6297_v2 = vadd.f32 %v3012_v7, %v3009_v36  ;;  %v3068_v60 = vmul.f32 %v4834_v24, %v6285_v23  ;;  %4843 = vpow2.f32 %v3079_v40  ;;  %v3156_v17 = vrot.slane %v6026_v43, 6 }
 0xecf   :  { %v4838_v44 = vpop.eup %4837  ;;  %v6303_v53 = vmul.f32 %v6229_v61, %v6030_v10  ;;  %4845 = vpow2.f32 %v3107_v18  ;;  %v3113_v51 = vmul.f32 1.442695, %v3112_v32  ;;  %v3135_v42 = vrot.slane %v3130_v63, 7 }
 0xed0   :  { %v3063_v49 = vmul.f32 %v4838_v44, %v6030_v10  ;;  %v3070_v50 = vrot.slane %v4838_v44, 4  ;;  %v3132_v19 = vmul.f32 1.442695, %v3131_v27  ;;  %v3158_v26 = vmax.f32 %v3155_v35, %v3156_v17 }
 0xed1   :  { %v6306_v7 = vpop.eup %4839  ;;  %v3035_v36 = vrot.slane %v6030_v10, 3  ;;  %4847 = vpow2.f32 %v3113_v51  ;;  %v3137_v38 = vsub.f32 %v3126_v8, %v3135_v42  ;;  %v3179_v47 = vadd.f32 %v3156_v17, %v5989_v31 }
 0xed2   :  { %v6310_v54 = vpop.eup %4841  ;;  %v2936_v61 = vmul.f32 %v6257_v28, %v6238_v6  ;;  %v3062_v45 = vmul.f32 %v4834_v24, %v6297_v2  ;;  %v3072_v16 = vadd.f32 %v3070_v50, %v3068_v60  ;;  %4849 = vpow2.f32 %v3085_v3 }
 0xed3   :  { %v3065_v40 = vrot.slane %v3063_v49, 4  ;;  %v3138_v14 = vmul.f32 1.442695, %v3137_v38  ;;  %v3159_v13 = vsub.f32 %v3155_v35, %v3158_v26  ;;  %v3163_v63 = vrot.slane %v3158_v26, 2 }
 0xed4   :  { %v6315_v18 = vpop.eup %4843  ;;  %v2880_v32 = vrot.slane %v6303_v53, 1  ;;  %v6664_v8 = vrot.slane %v6030_v10, 1  ;;  %v2938_v27 = vrot.slane %v6274_v5, 1  ;;  %4851 = vpow2.f32 %v3132_v19 }
 0xed5   :  { %v4846_v6 = vpop.eup %4845  ;;  %4853 = vpow2.f32 %v3138_v14  ;;  %v3160_v24 = vmul.f32 1.442695, %v3159_v13  ;;  %v3165_v3 = vsub.f32 %v6026_v43, %v3163_v63  ;;  %v3181_v60 = vrot.slane %v3179_v47, 1 }
 0xed6   :  { %v2931_v31 = vmul.f32 %v6274_v5, %v6664_v8  ;;  %v2928_v35 = vmul.f32 %v6257_v28, %v6244_v41  ;;  %v2940_v17 = vadd.f32 %v2938_v27, %v2936_v61  ;;  %v2989_v44 = vmul.f32 %v6282_v29, %v6263_v22 }
 0xed7   :  { %v3121_v53 = vmul.f32 %v4846_v6, %v3072_v16  ;;  %v4848_v51 = vpop.eup %4847  ;;  %v2991_v42 = vrot.slane %v6295_v4, 1  ;;  %v6328_v49 = vadd.f32 %v3065_v40, %v3062_v45  ;;  %v3166_v5 = vmul.f32 1.442695, %v3165_v3 }
 0xed8   :  { %v3183_v50 = vmax.f32 %v3158_v26, %v3181_v60  ;;  %v4850_v19 = vpop.eup %4849  ;;  %v3042_v43 = vmul.f32 %v6306_v7, %v6285_v23  ;;  %v3116_v38 = vmul.f32 %v4848_v51, %v6030_v10  ;;  %v3123_v14 = vrot.slane %v4848_v51, 5 }
 0xed9   :  { %4855 = vpow2.f32 %v3160_v24  ;;  %v2933_v41 = vrot.slane %v2931_v31, 1  ;;  %v2993_v13 = vadd.f32 %v2991_v42, %v2989_v44  ;;  %v3044_v63 = vrot.slane %v6310_v54, 1 }
 0xeda   :  { %4857 = vpow2.f32 %v3166_v5  ;;  %v3184_v28 = vsub.f32 %v3158_v26, %v3183_v50  ;;  %v3188_v22 = vrot.slane %v3183_v50, 7  ;;  %v4852_v61 = vpop.eup %4851  ;;  %v3095_v45 = vmul.f32 %v6315_v18, %v3072_v16 }
 0xedb   :  { %v3125_v40 = vadd.f32 %v3123_v14, %v3121_v53  ;;  %v4854_v8 = vpop.eup %4853  ;;  %v3115_v27 = vmul.f32 %v4846_v6, %v6328_v49  ;;  %v3118_v3 = vrot.slane %v3116_v38, 5  ;;  %4859 = vrcp.f32 %v2940_v17 }
 0xedc   :  { %v3185_v23 = vmul.f32 1.442695, %v3184_v28  ;;  %v3190_v60 = vsub.f32 %v3179_v47, %v3188_v22  ;;  %v3046_v51 = vadd.f32 %v3044_v63, %v3042_v43  ;;  %v3097_v24 = vrot.slane %v4850_v19, 1 }
 0xedd   :  { %v3148_v31 = vmul.f32 %v4852_v61, %v3125_v40  ;;  %v2882_v26 = vadd.f32 %v2880_v32, %v6291_v62  ;;  %v3150_v5 = vrot.slane %v4854_v8, 1  ;;  %v2935_v50 = vadd.f32 %v2933_v41, %v2928_v35 }
 0xede   :  { %4861 = vpow2.f32 %v3185_v23  ;;  %v3191_v44 = vmul.f32 1.442695, %v3190_v60  ;;  %v3088_v16 = vrot.slane %v6030_v10, 4  ;;  %v3099_v53 = vadd.f32 %v3097_v24, %v3095_v45 }
 0xedf   :  { %v4856_v42 = vpop.eup %4855  ;;  %4863 = vrcp.f32 %v2993_v13  ;;  %v3120_v6 = vadd.f32 %v3118_v3, %v3115_v27  ;;  %v3152_v38 = vadd.f32 %v3150_v5, %v3148_v31  ;;  %v6665_v47 = vrot.slane %v6030_v10, 2 }
 0xee0   :  { %v4858_v14 = vpop.eup %4857  ;;  %v3174_v28 = vmul.f32 %v4856_v42, %v3125_v40  ;;  %4865 = vpow2.f32 %v3191_v44  ;;  %v2981_v35 = vmul.f32 %v6282_v29, %v6267_v11  ;;  %v3037_v43 = vmul.f32 %v6310_v54, %v3035_v36 }
 0xee1   :  { %v2984_v17 = vmul.f32 %v6295_v4, %v6665_v47  ;;  %4867 = vrcp.f32 %v3046_v51  ;;  %v3169_v62 = vmul.f32 %v4858_v14, %v6030_v10  ;;  %v3176_v32 = vrot.slane %v4858_v14, 6  ;;  %v4860_v13 = vpop.eup %4859 }
 0xee2   :  { %v3141_v41 = vrot.slane %v6030_v10, 5  ;;  %v3212_v22 = vrot.slane %v6091_v48, 7  ;;  %v3034_v63 = vmul.f32 %v6306_v7, %v6297_v2  ;;  %4869 = vrcp.f32 %v3099_v53 }
 0xee3   :  { %v3178_v4 = vadd.f32 %v3176_v32, %v3174_v28  ;;  %v3209_v45 = vrot.slane %v6073_v56, 1  ;;  %v3090_v27 = vmul.f32 %v4850_v19, %v3088_v16  ;;  %4871 = vrcp.f32 %v3152_v38 }
 0xee4   :  { %v4862_v40 = vpop.eup %4861  ;;  %v3168_v29 = vmul.f32 %v4856_v42, %v3120_v6  ;;  %v3171_v11 = vrot.slane %v3169_v62, 6  ;;  %v2986_v23 = vrot.slane %v2984_v17, 1  ;;  %v3143_v36 = vmul.f32 %v4854_v8, %v3141_v41 }
 0xee5   :  { %v4864_v3 = vpop.eup %4863  ;;  %v3201_v54 = vmul.f32 %v4862_v40, %v3178_v4  ;;  %v3215_v60 = vrot.slane %v6102_v21, 6  ;;  %v2889_v51 = vmul.f32 %v6278_v57, %v2882_v26  ;;  %v3039_v24 = vrot.slane %v3037_v43, 1 }
 0xee6   :  { %v4866_v48 = vpop.eup %4865  ;;  %v3087_v2 = vmul.f32 %v6315_v18, %v6328_v49  ;;  %v3253_v56 = vsel %vm56_vm0, %v3209_v45, %v3212_v22  ;;  %v2942_v19 = vmul.f32 %v4860_v13, %v2935_v50  ;;  %v2988_v31 = vadd.f32 %v2986_v23, %v2981_v35 }
 0xee7   :  { %v4868_v7 = vpop.eup %4867  ;;  %v3140_v5 = vmul.f32 %v4852_v61, %v3120_v6  ;;  %v3203_v44 = vrot.slane %v4866_v48, 1  ;;  %v3041_v42 = vadd.f32 %v3039_v24, %v3034_v63  ;;  %v3092_v16 = vrot.slane %v3090_v27, 1 }
 0xee8   :  { %v3173_v8 = vadd.f32 %v3171_v11, %v3168_v29  ;;  %v3194_v53 = vrot.slane %v6030_v10, 6  ;;  %v4870_v21 = vpop.eup %4869  ;;  %v2995_v14 = vmul.f32 %v4864_v3, %v2988_v31  ;;  %v3145_v38 = vrot.slane %v3143_v36, 1 }
 0xee9   :  { %v3205_v57 = vadd.f32 %v3203_v44, %v3201_v54  ;;  %v3254_v26 = vsel %vm1374_vm6, %v3253_v56, %v3215_v60  ;;  %v4872_v28 = vpop.eup %4871  ;;  %v3048_v18 = vmul.f32 %v4868_v7, %v3041_v42  ;;  %v3094_v49 = vadd.f32 %v3092_v16, %v3087_v2  ;;  %v4381_v42 = vld [vmem:[%s6646_s7 + $0x18] sm:$0xff] }
 0xeea   :  { %v3196_v47 = vmul.f32 %v4866_v48, %v3194_v53  ;;  %v3218_v50 = vrot.slane %v6134_v1, 5  ;;  %v3147_v17 = vadd.f32 %v3145_v38, %v3140_v5  ;;  %v3221_v61 = vrot.slane %v6179_v59, 4  ;;  %3340 = vmatpush.bf16.msrb.mxu3 %v4381_v42 }
 0xeeb   :  { %4873 = vrcp.f32 %v3205_v57  ;;  %v3224_v6 = vrot.slane %v6192_v0, 3  ;;  %v3101_v62 = vmul.f32 %v4870_v21, %v3094_v49  ;;  %v3193_v10 = vmul.f32 %v4862_v40, %v3173_v8 }
 0xeec   :  { %v3233_v32 = vrot.slane %v2889_v51, 7  ;;  %v3255_v35 = vsel %vm6666_vm11, %v3254_v26, %v3218_v50  ;;  %v3154_v43 = vmul.f32 %v4872_v28, %v3147_v17  ;;  %v3227_v41 = vrot.slane %v6194_v33, 2  ;;  %vm6675_vm11 = vmmov %vm6670_vm1 }
 0xeed   :  { %v3236_v22 = vrot.slane %v2942_v19, 6  ;;  %v2849_v13 = vmul.f32 %v6254_v15, %v6287_v12  ;;  %v3198_v63 = vrot.slane %v3196_v47, 1  ;;  %v3230_v1 = vrot.slane %v6280_v52, 1 }
 0xeee   :  { %v3239_v4 = vrot.slane %v2995_v14, 5  ;;  %v3242_v45 = vrot.slane %v3048_v18, 4  ;;  %v3256_v59 = vsel %vm6667_vm13, %v3255_v35, %v3221_v61  ;;  %v3245_v27 = vrot.slane %v3101_v62, 3 }
 0xeef   :  { %v3200_v0 = vadd.f32 %v3198_v63, %v3193_v10  ;;  %v3257_v40 = vsel %vm6668_vm8, %v3256_v59, %v3224_v6  ;;  %v3260_v29 = vsel %vm56_vm0, %v2849_v13, %v3233_v32  ;;  %v3248_v3 = vrot.slane %v3154_v43, 2 }
 0xef0   :  { %v3258_v33 = vsel %vm6669_vm9, %v3257_v40, %v3227_v41  ;;  %v3261_v23 = vsel %vm1374_vm6, %v3260_v29, %v3236_v22  ;;  %v4239_v2 = vmul.f32 -1.442695, %v5951_v9  ;;  %v4240_v56 = vmul.f32 -1.442695, %v5956_v20  ;;  %v4380_v9 = vld [vmem:[%s6646_s7 + $0x10] sm:$0xff] }
 0xef1   :  { %v4874_v11 = vpop.eup %4873  ;;  %v3259_v12 = vsel %vm6670_vm1, %v3258_v33, %v3230_v1  ;;  %v3262_v52 = vsel %vm6671_vm7, %v3261_v23, %v3239_v4  ;;  %3341 = vmatpush.bf16.msrb.mxu3 %v4380_v9  ;;  %v4241_v1 = vmul.f32 -1.442695, %v5964_v46  ;;  %v4242_v4 = vmul.f32 -1.442695, %v5969_v55 }
 0xef2   :  { %v3207_v15 = vmul.f32 %v4874_v11, %v3200_v0  ;;  %v3263_v36 = vsel %vm6672_vm10, %v3262_v52, %v3242_v45  ;;  %4875 = vpow2.f32 %v4239_v2 }
 0xef3   :  { %v3264_v60 = vsel %vm6673_vm12, %v3263_v36, %v3245_v27  ;;  %4877 = vpow2.f32 %v4240_v56 }
 0xef4   :  { %v3251_v54 = vrot.slane %v3207_v15, 1  ;;  %v3265_v48 = vsel %vm6674_vm14, %v3264_v60, %v3248_v3 }
 0xef6   :  { %v3266_v51 = vsel %vm6675_vm11, %v3265_v48, %v3251_v54 }
 0xef7   :  { %v4448_v24 = vpack.i.bf16 %v3266_v51, %v3259_v12 }
 0xef8   :  { %v4876_v7 = vpop.eup %4875 }
 0xef9   :  { %4449 = vrot.lane.b32.xlu2 %v4448_v24, %s4969_s1  ;;  %4454 = vrot.lane.b32.xlu1 %v4448_v24, %s4970_s25  ;;  %v4878_v19 = vpop.eup %4877  ;;  %v2309_v31 = vadd.f32 1.0, %v4876_v7 }
 0xefa   :  { %v2310_v5 = vadd.f32 1.0, %v4878_v19 }
 0xefb   :  { %4879 = vrcp.f32 %v2309_v31  ;;  %vm2318_vm13 = vweird.f32 %v2309_v31  ;;  %v2324_v18 = vand.u32 2147483648, %v2309_v31  ;;  %v2322_v47 = vand.u32 2147483647, %v2309_v31 }
 0xefc   :  { %4881 = vrcp.f32 %v2310_v5  ;;  %v2339_v49 = vand.u32 2147483648, %v2310_v5  ;;  %vm2333_vm9 = vweird.f32 %v2310_v5  ;;  %v2337_v50 = vand.u32 2147483647, %v2310_v5 }
 0xefd   :  { %v2325_v6 = vor.u32 1.1754944e-38, %v2324_v18  ;;  %vm2323_vm7 = vcmp.eq.f32.partialorder %v2322_v47, 8.507059e+37  ;;  %4883 = vpow2.f32 %v4241_v1 }
 0xefe   :  { %v2340_v62 = vor.u32 1.1754944e-38, %v2339_v49  ;;  %vm2338_vm10 = vcmp.eq.f32.partialorder %v2337_v50, 8.507059e+37  ;;  %4885 = vpow2.f32 %v4242_v4 }
 0xf01   :  { %v4880_v16 = vpop.eup %4879 }
 0xf02   :  { %v4882_v20 = vpop.eup %4881  ;;  %v2314_v8 = vmul.f32 %v4880_v16, %v2309_v31  ;;  %vm2319_vm0 = vweird.f32 %v4880_v16 }
 0xf03   :  { %v2329_v53 = vmul.f32 %v4882_v20, %v2310_v5  ;;  %vm2334_vm6 = vweird.f32 %v4882_v20  ;;  %vm2320_vm8 = vmor %vm2318_vm13, %vm2319_vm0  ;;  %v4884_v45 = vpop.eup %4883 }
 0xf04   :  { %v2315_v21 = vsub.f32 1.0, %v2314_v8  ;;  %vm2335_vm1 = vmor %vm2333_vm9, %vm2334_vm6  ;;  %v4886_v59 = vpop.eup %4885  ;;  %v2311_v0 = vadd.f32 1.0, %v4884_v45 }
 0xf05   :  { %v2330_v14 = vsub.f32 1.0, %v2329_v53  ;;  %v2312_v27 = vadd.f32 1.0, %v4886_v59 }
 0xf06   :  { %v2316_v38 = vmul.f32 %v4880_v16, %v2315_v21  ;;  %4887 = vrcp.f32 %v2311_v0  ;;  %vm2348_vm11 = vweird.f32 %v2311_v0  ;;  %v2354_v55 = vand.u32 2147483648, %v2311_v0 }
 0xf07   :  { %v2331_v57 = vmul.f32 %v4882_v20, %v2330_v14  ;;  %4889 = vrcp.f32 %v2312_v27  ;;  %v2369_v36 = vand.u32 2147483648, %v2312_v27  ;;  %v2352_v54 = vand.u32 2147483647, %v2311_v0 }
 0xf08   :  { %v2317_v26 = vadd.f32 %v4880_v16, %v2316_v38  ;;  %vm2363_vm6 = vweird.f32 %v2312_v27  ;;  %v2367_v60 = vand.u32 2147483647, %v2312_v27  ;;  %v2355_v24 = vor.u32 1.1754944e-38, %v2354_v55 }
 0xf09   :  { %v2332_v28 = vadd.f32 %v4882_v20, %v2331_v57  ;;  %v2370_v2 = vor.u32 1.1754944e-38, %v2369_v36 }
 0xf0a   :  { %v2321_v17 = vsel %vm2320_vm8, %v4880_v16, %v2317_v26  ;;  %vm2353_vm8 = vcmp.eq.f32.partialorder %v2352_v54, 8.507059e+37  ;;  %vm2368_vm9 = vcmp.eq.f32.partialorder %v2367_v60, 8.507059e+37 }
 0xf0b   :  { %v2336_v61 = vsel %vm2335_vm1, %v4882_v20, %v2332_v28  ;;  %v2326_v43 = vsel %vm2323_vm7, %v2325_v6, %v2321_v17 }
 0xf0c   :  { %v2341_v41 = vsel %vm2338_vm10, %v2340_v62, %v2336_v61  ;;  %v4888_v40 = vpop.eup %4887 }
 0xf0d   :  { %v4890_v29 = vpop.eup %4889  ;;  %v2344_v11 = vmul.f32 %v4888_v40, %v2311_v0  ;;  %vm2349_vm12 = vweird.f32 %v4888_v40 }
 0xf0e   :  { %v2359_v3 = vmul.f32 %v4890_v29, %v2312_v27  ;;  %vm2364_vm14 = vweird.f32 %v4890_v29  ;;  %vm2350_vm0 = vmor %vm2348_vm11, %vm2349_vm12 }
 0xf0f   :  { %v2345_v33 = vsub.f32 1.0, %v2344_v11  ;;  %vm2365_vm13 = vmor %vm2363_vm6, %vm2364_vm14 }
 0xf10   :  { %v2360_v23 = vsub.f32 1.0, %v2359_v3 }
 0xf11   :  { %v2346_v15 = vmul.f32 %v4888_v40, %v2345_v33 }
 0xf12   :  { %v2361_v12 = vmul.f32 %v4890_v29, %v2360_v23 }
 0xf13   :  { %v2347_v46 = vadd.f32 %v4888_v40, %v2346_v15 }
 0xf14   :  { %v2362_v52 = vadd.f32 %v4890_v29, %v2361_v12 }
 0xf15   :  { %v2351_v48 = vsel %vm2350_vm0, %v4888_v40, %v2347_v46 }
 0xf16   :  { %v2366_v51 = vsel %vm2365_vm13, %v4890_v29, %v2362_v52  ;;  %v2356_v31 = vsel %vm2353_vm8, %v2355_v24, %v2351_v48 }
 0xf17   :  { %v2371_v5 = vsel %vm2368_vm9, %v2370_v2, %v2366_v51 }
 0xf53   :  { %v4450_v44 = vpop.permute.xlu2 %4449 }
 0xf54   :  { %4459 = vrot.lane.b32.xlu0 %v4450_v44, %s4970_s25 }
 0xf6b   :  { %v4455_v10 = vpop.permute.xlu1 %4454 }
 0xf6c   :  { %v4457_v32 = vunpack.i.h.bf16 %v4455_v10  ;;  %v4456_v35 = vunpack.i.l.bf16 %v4455_v10 }
 0xf6e   :  { %v3300_v22 = vmul.f32 %v4457_v32, %v2341_v41  ;;  %v3299_v13 = vmul.f32 %v4456_v35, %v2326_v43 }
 0xf70   :  { %v3303_v63 = vpack.c.bf16 %v3300_v22, %v3299_v13 }
 0xf72   :  { %3312 = vrot.lane.b32.xlu2 %v3303_v63, %s4970_s25 }
 0xfc6   :  { %v4460_v56 = vpop.permute.xlu0 %4459 }
 0xfc7   :  { %v4462_v7 = vunpack.i.h.bf16 %v4460_v56  ;;  %v4461_v19 = vunpack.i.l.bf16 %v4460_v56 }
 0xfc9   :  { %v3302_v42 = vmul.f32 %v4462_v7, %v2371_v5  ;;  %v3301_v9 = vmul.f32 %v4461_v19, %v2356_v31  ;;  %v4385_v19 = vld [vmem:[%s6647_s8 + $0x38] sm:$0xff] }
 0xfca   :  { %3532 = vmatpush.bf16.msra.mxu1 %v4385_v19 }
 0xfcb   :  { %v3304_v16 = vpack.c.bf16 %v3302_v42, %v3301_v9 }
 0xfcc   :  { %v3313_v44 = vpop.permute.xlu2 %3312 }
 0xfcd   :  { %4256 = vmatmul.msk.bf16.vlgmr.msrb.gmra.mxu3 %vm112_vm2, %v3313_v44  ;;  %3314 = vrot.lane.b32.xlu1 %v3304_v16, %s4970_s25  ;;  %v4384_v44 = vld [vmem:[%s6647_s8 + $0x30] sm:$0xff] }
 0xfce   :  { %3533 = vmatpush.bf16.msra.mxu1 %v4384_v44 }
0x103f   :  { %v3315_v20 = vpop.permute.xlu1 %3314 }
0x1040   :  { %4257 = vmatmul.msk.bf16.gmra.mxu3 %vm112_vm2, %v3315_v20 }
0x1050   :  { %v3343_v8 = vpop.f32.mrf.mxu3 }
0x1051   :  { %v6396_v53 = vadd.f32 %v3343_v8, %v5857_v39  ;;  %v4383_v8 = vld [vmem:[%s6647_s8 + $0x28] sm:$0xff] }
0x1052   :  { %3534 = vmatpush.bf16.msra.mxu1 %v4383_v8 }
0x1053   :  { %v3357_v21 = vsel %vm112_vm2, %v6396_v53, 0.0 }
0x1054   :  { %3358 = vadd.xlane.f32.xlu0 %v3357_v21 }
0x1058   :  { %v3345_v14 = vpop.f32.mrf.mxu3 }
0x1059   :  { %v6401_v38 = vadd.f32 %v3345_v14, %v5862_v30 }
0x105b   :  { %v3360_v57 = vsel %vm112_vm2, %v6401_v38, 0.0 }
0x105c   :  { %3361 = vadd.xlane.f32.xlu1 %v3360_v57 }
0x10c3   :  { %v3348_v26 = vpop.f32.mrf.mxu3 }
0x10c4   :  { %v6406_v28 = vadd.f32 %v3348_v26, %v5867_v25 }
0x10c6   :  { %v3363_v39 = vsel %vm112_vm2, %v6406_v28, 0.0 }
0x10c7   :  { %v3359_v18 = vpop.xlane.xlu0 %3358  ;;  %3364 = vadd.xlane.f32.xlu0 %v3363_v39 }
0x10c8   :  { %v3369_v49 = vmul.f32 %v3359_v18, %v5082_v37 }
0x10ca   :  { %v6416_v61 = vsub.f32 %v6396_v53, %v3369_v49 }
0x10cb   :  { %v3350_v50 = vpop.f32.mrf.mxu3 }
0x10cc   :  { %v6413_v17 = vadd.f32 %v3350_v50, %v5872_v34  ;;  %v3377_v32 = vmul.f32 %v6416_v61, %v6416_v61  ;;  %v6468_v50 = vld [vmem:[%s6643_s4 + $0x8] sm:$0x3f]  ;;  %s4097_s4 = sshll.u32 %s6653_s14, 4  ;;  %s4098_s4 = int_to_ptr.hbm [resolvable:$true] %s4097_s4 }
0x10ce   :  { %v3366_v6 = vsel %vm112_vm2, %v6413_v17, 0.0  ;;  %v3381_v34 = vsel %vm112_vm2, %v3377_v32, 0.0 }
0x10cf   :  { %v3362_v47 = vpop.xlane.xlu1 %3361  ;;  %3367 = vadd.xlane.f32.xlu2 %v3366_v6 }
0x10d0   :  { %v3370_v30 = vmul.f32 %v3362_v47, %v5082_v37  ;;  %v4382_v47 = vld [vmem:[%s6647_s8 + $0x20] sm:$0xff]  ;;  %s4972_s8 = smov 128  }
0x10d1   :  { %3535 = vmatpush.bf16.msra.mxu1 %v4382_v47 }
0x10d2   :  { %v6419_v25 = vsub.f32 %v6401_v38, %v3370_v30  ;;  %v3445_v30 = vperm.slane %v6468_v50, 2 }
0x10d4   :  { %v3378_v62 = vmul.f32 %v6419_v25, %v6419_v25 }
0x10d6   :  { %v3384_v10 = vsel %vm112_vm2, %v3378_v62, 0.0 }
0x10d7   :  { %3385 = vadd.xlane.f32.xlu0 %v3384_v10  ;;  %3382 = vadd.xlane.f32.xlu2 %v3381_v34 }
0x113a   :  { %v3365_v35 = vpop.xlane.xlu0 %3364 }
0x113b   :  { %v3371_v43 = vmul.f32 %v3365_v35, %v5082_v37 }
0x113d   :  { %v6431_v41 = vsub.f32 %v6406_v28, %v3371_v43 }
0x113f   :  { %v3379_v22 = vmul.f32 %v6431_v41, %v6431_v41 }
0x1141   :  { %v3387_v13 = vsel %vm112_vm2, %v3379_v22, 0.0 }
0x1142   :  { %3388 = vadd.xlane.f32.xlu2 %v3387_v13  ;;  %v3368_v63 = vpop.xlane.xlu2 %3367 }
0x1143   :  { %v3372_v1 = vmul.f32 %v3368_v63, %v5082_v37  ;;  %v3450_v63 = vperm.slane %v6468_v50, 3 }
0x1145   :  { %v6438_v4 = vsub.f32 %v6413_v17, %v3372_v1 }
0x1147   :  { %v3380_v45 = vmul.f32 %v6438_v4, %v6438_v4 }
0x1149   :  { %v3390_v59 = vsel %vm112_vm2, %v3380_v45, 0.0 }
0x114a   :  { %3391 = vadd.xlane.f32.xlu1 %v3390_v59  ;;  %v3386_v0 = vpop.xlane.xlu0 %3385  ;;  %v3383_v27 = vpop.xlane.xlu2 %3382 }
0x114b   :  { %v3394_v40 = vmul.f32 %v3386_v0, %v5082_v37  ;;  %v3393_v29 = vmul.f32 %v3383_v27, %v5082_v37 }
0x114d   :  { %v3398_v11 = vadd.f32 1e-06, %v3394_v40  ;;  %v3397_v3 = vadd.f32 1e-06, %v3393_v29 }
0x114f   :  { %4891 = vrsqrt.f32 %v3398_v11  ;;  %vm3417_vm7 = vweird.f32 %v3398_v11  ;;  %vm3407_vm11 = vweird.f32 %v3397_v3 }
0x1150   :  { %4893 = vrsqrt.f32 %v3397_v3 }
0x1155   :  { %v4892_v33 = vpop.eup %4891 }
0x1156   :  { %v4894_v23 = vpop.eup %4893  ;;  %v3412_v15 = vmul.f32 %v4892_v33, %v3398_v11  ;;  %vm3418_vm1 = vweird.f32 %v4892_v33 }
0x1157   :  { %v3402_v46 = vmul.f32 %v4894_v23, %v3397_v3  ;;  %vm3408_vm10 = vweird.f32 %v4894_v23  ;;  %vm6456_vm12 = vmor %vm3417_vm7, %vm3418_vm1 }
0x1158   :  { %v3413_v55 = vmul.f32 %v4892_v33, %v3412_v15  ;;  %vm3409_vm0 = vmor %vm3407_vm11, %vm3408_vm10 }
0x1159   :  { %v3403_v54 = vmul.f32 %v4894_v23, %v3402_v46 }
0x115a   :  { %v3414_v60 = vmul.f32 0.5, %v3413_v55 }
0x115b   :  { %v3404_v51 = vmul.f32 0.5, %v3403_v54 }
0x115c   :  { %v3415_v56 = vsub.f32 1.5, %v3414_v60  ;;  %v4389_v60 = vld [vmem:[%s6648_s9 + $0x38] sm:$0xff] }
0x115d   :  { %v3405_v5 = vsub.f32 1.5, %v3404_v51  ;;  %3600 = vmatpush.bf16.msra.mxu0 %v4389_v60 }
0x115e   :  { %v3416_v9 = vmul.f32 %v4892_v33, %v3415_v56 }
0x115f   :  { %v3406_v20 = vmul.f32 %v4894_v23, %v3405_v5 }
0x1160   :  { %v3420_v26 = vsel %vm6456_vm12, %v4892_v33, %v3416_v9 }
0x1161   :  { %v3410_v49 = vsel %vm3409_vm0, %v4894_v23, %v3406_v20  ;;  %v3442_v6 = vmul.f32 %v3420_v26, %v6419_v25  ;;  %v4386_v20 = vld [vmem:[%s6648_s9 + $0x20] sm:$0xff] }
0x1162   :  { %v3441_v34 = vmul.f32 %v3410_v49, %v6416_v61 }
0x1163   :  { %v3447_v22 = vmul.f32 %v3445_v30, %v3442_v6 }
0x1164   :  { %v3446_v1 = vmul.f32 %v3445_v30, %v3441_v34 }
0x1165   :  { %v3452_v0 = vadd.f32 %v3450_v63, %v3447_v22 }
0x1166   :  { %v3451_v40 = vadd.f32 %v3450_v63, %v3446_v1 }
0x1167   :  { %v3456_v29 = vrot.slane %v3452_v0, 7 }
0x1168   :  { %v3455_v33 = vrot.slane %v3451_v40, 7 }
0x116a   :  { %v3461_v55 = vsel %vm321_vm4, %v3455_v33, %v3456_v29 }
0x11b5   :  { %v3389_v12 = vpop.xlane.xlu2 %3388 }
0x11b6   :  { %v3395_v52 = vmul.f32 %v3389_v12, %v5082_v37 }
0x11b8   :  { %v3399_v36 = vadd.f32 1e-06, %v3395_v52 }
0x11ba   :  { %4895 = vrsqrt.f32 %v3399_v36  ;;  %vm3427_vm6 = vweird.f32 %v3399_v36 }
0x11bd   :  { %v3392_v48 = vpop.xlane.xlu1 %3391 }
0x11be   :  { %v3396_v24 = vmul.f32 %v3392_v48, %v5082_v37  ;;  %v4388_v48 = vld [vmem:[%s6648_s9 + $0x30] sm:$0xff] }
0x11bf   :  { %3601 = vmatpush.bf16.msra.mxu0 %v4388_v48 }
0x11c0   :  { %v4896_v2 = vpop.eup %4895  ;;  %v3400_v7 = vadd.f32 1e-06, %v3396_v24 }
0x11c1   :  { %v3422_v31 = vmul.f32 %v4896_v2, %v3399_v36  ;;  %vm3428_vm14 = vweird.f32 %v4896_v2 }
0x11c2   :  { %4897 = vrsqrt.f32 %v3400_v7  ;;  %vm3429_vm13 = vmor %vm3427_vm6, %vm3428_vm14  ;;  %vm3437_vm9 = vweird.f32 %v3400_v7 }
0x11c3   :  { %v3423_v42 = vmul.f32 %v4896_v2, %v3422_v31  ;;  %3602 = vmatpush.bf16.msra.mxu0 %v4387_v58 }
0x11c5   :  { %v3424_v16 = vmul.f32 0.5, %v3423_v42 }
0x11c7   :  { %v3425_v14 = vsub.f32 1.5, %v3424_v16  ;;  %3603 = vmatpush.bf16.msra.mxu0 %v4386_v20 }
0x11c8   :  { %v4898_v57 = vpop.eup %4897 }
0x11c9   :  { %v3426_v39 = vmul.f32 %v4896_v2, %v3425_v14  ;;  %v3432_v18 = vmul.f32 %v4898_v57, %v3400_v7  ;;  %vm3438_vm8 = vweird.f32 %v4898_v57 }
0x11ca   :  { %vm3439_vm1 = vmor %vm3437_vm9, %vm3438_vm8 }
0x11cb   :  { %v3430_v62 = vsel %vm3429_vm13, %v4896_v2, %v3426_v39  ;;  %v3433_v10 = vmul.f32 %v4898_v57, %v3432_v18 }
0x11cc   :  { %v3443_v32 = vmul.f32 %v3430_v62, %v6431_v41 }
0x11cd   :  { %v3434_v35 = vmul.f32 0.5, %v3433_v10 }
0x11ce   :  { %v3448_v43 = vmul.f32 %v3445_v30, %v3443_v32 }
0x11cf   :  { %v3435_v13 = vsub.f32 1.5, %v3434_v35 }
0x11d0   :  { %v3453_v59 = vadd.f32 %v3450_v63, %v3448_v43 }
0x11d1   :  { %v3436_v45 = vmul.f32 %v4898_v57, %v3435_v13 }
0x11d2   :  { %v3457_v41 = vrot.slane %v3453_v59, 7 }
0x11d3   :  { %v3440_v25 = vsel %vm3439_vm1, %v4898_v57, %v3436_v45 }
0x11d4   :  { %v3444_v27 = vmul.f32 %v3440_v25, %v6438_v4  ;;  %v3460_v3 = vsel %vm321_vm4, %v3456_v29, %v3457_v41 }
0x11d5   :  { %v3465_v46 = vsel %vm105_vm15, 0.0, %v3460_v3 }
0x11d6   :  { %v3449_v61 = vmul.f32 %v3445_v30, %v3444_v27 }
0x11d8   :  { %v3454_v11 = vadd.f32 %v3450_v63, %v3449_v61 }
0x11da   :  { %v3458_v23 = vrot.slane %v3454_v11, 7 }
0x11dc   :  { %v3459_v15 = vsel %vm321_vm4, %v3457_v41, %v3458_v23  ;;  %v3462_v52 = vsel %vm321_vm4, %v3458_v23, %v3455_v33 }
0x11dd   :  { %v4468_v4 = vpack.i.bf16 %v3459_v15, %v3465_v46  ;;  %v3463_v36 = vsel %vm99_vm3, 0.0, %v3462_v52 }
0x11de   :  { %v4463_v54 = vpack.i.bf16 %v3461_v55, %v3463_v36 }
0x11df   :  { %4469 = vrot.lane.b32.xlu0 %v4468_v4, %s4968_s30 }
0x11e0   :  { %4464 = vrot.lane.b32.xlu1 %v4463_v54, %s4968_s30 }
0x1251   :  { %v4470_v31 = vpop.permute.xlu0 %4469 }
0x1252   :  { %v4465_v51 = vpop.permute.xlu1 %4464  ;;  %v4472_v5 = vunpack.i.h.bf16 %v4470_v31  ;;  %v4471_v44 = vunpack.i.l.bf16 %v4470_v31 }
0x1253   :  { %v4467_v24 = vunpack.i.h.bf16 %v4465_v51  ;;  %v4466_v2 = vunpack.i.l.bf16 %v4465_v51 }
0x1254   :  { %v3485_v42 = vsel %vm112_vm2, %v3453_v59, %v4471_v44  ;;  %v3486_v9 = vsel %vm112_vm2, %v3454_v11, %v4472_v5 }
0x1255   :  { %v3484_v56 = vsel %vm112_vm2, %v3452_v0, %v4467_v24  ;;  %v3483_v7 = vsel %vm112_vm2, %v3451_v40, %v4466_v2  ;;  %v3488_v16 = vpack.c.bf16 %v3486_v9, %v3485_v42 }
0x1256   :  { %v3487_v19 = vpack.c.bf16 %v3484_v56, %v3483_v7 }
0x1258   :  { %4282 = vmatmul.msk.bf16.vlgmr.msra.gmra.mxu1 %vm392_vm5, %v3487_v19 }
0x1268   :  { %4283 = vmatmul.msk.bf16.gmra.mxu1 %vm392_vm5, %v3488_v16 }
0x12d5   :  { %v3537_v8 = vpop.f32.mrf.mxu1 }
0x12d6   :  { %v3547_v21 = vmax.f32 %v3537_v8, 0.0  ;;  %v4310_v13 = vmul.f32 -1.442695, %v3537_v8 }
0x12d8   :  { %v3551_v26 = vmul.f32 %v3547_v21, %v3547_v21  ;;  %4899 = vpow2.f32 %v4310_v13 }
0x12dd   :  { %v3539_v14 = vpop.f32.mrf.mxu1 }
0x12de   :  { %v3548_v57 = vmax.f32 %v3539_v14, 0.0  ;;  %v4900_v63 = vpop.eup %4899  ;;  %v4311_v27 = vmul.f32 -1.442695, %v3539_v14 }
0x12df   :  { %v3627_v1 = vadd.f32 1.0, %v4900_v63 }
0x12e0   :  { %v3552_v39 = vmul.f32 %v3548_v57, %v3548_v57 }
0x12e1   :  { %4901 = vrcp.f32 %v3627_v1  ;;  %v3642_v11 = vand.u32 2147483648, %v3627_v1  ;;  %vm3636_vm3 = vweird.f32 %v3627_v1  ;;  %v3640_v33 = vand.u32 2147483647, %v3627_v1 }
0x12e2   :  { %v3555_v18 = vpack.c.bf16 %v3552_v39, %v3551_v26 }
0x12e3   :  { %v3643_v12 = vor.u32 1.1754944e-38, %v3642_v11  ;;  %vm3641_vm7 = vcmp.eq.f32.partialorder %v3640_v33, 8.507059e+37 }
0x12e4   :  { %4308 = vmatmul.msk.bf16.vlgmr.msra.gmra.mxu0 %vm392_vm5, %v3555_v18 }
0x12e5   :  { %v3542_v49 = vpop.f32.mrf.mxu1 }
0x12e6   :  { %v3549_v47 = vmax.f32 %v3542_v49, 0.0  ;;  %v4312_v3 = vmul.f32 -1.442695, %v3542_v49 }
0x12e7   :  { %v4902_v45 = vpop.eup %4901 }
0x12e8   :  { %v3553_v62 = vmul.f32 %v3549_v47, %v3549_v47  ;;  %v3632_v25 = vmul.f32 %v4902_v45, %v3627_v1  ;;  %vm3637_vm15 = vweird.f32 %v4902_v45 }
0x12e9   :  { %vm3638_vm4 = vmor %vm3636_vm3, %vm3637_vm15 }
0x12ea   :  { %v3633_v0 = vsub.f32 1.0, %v3632_v25 }
0x12ec   :  { %v3634_v40 = vmul.f32 %v4902_v45, %v3633_v0 }
0x12ed   :  { %v3544_v30 = vpop.f32.mrf.mxu1 }
0x12ee   :  { %v3550_v6 = vmax.f32 %v3544_v30, 0.0  ;;  %v4313_v59 = vmul.f32 -1.442695, %v3544_v30  ;;  %v3635_v29 = vadd.f32 %v4902_v45, %v3634_v40 }
0x12f0   :  { %v3554_v10 = vmul.f32 %v3550_v6, %v3550_v6  ;;  %4903 = vpow2.f32 %v4313_v59  ;;  %v3639_v15 = vsel %vm3638_vm4, %v4902_v45, %v3635_v29 }
0x12f1   :  { %4905 = vpow2.f32 %v4311_v27  ;;  %v3644_v52 = vsel %vm3641_vm7, %v3643_v12, %v3639_v15 }
0x12f2   :  { %v3556_v32 = vpack.c.bf16 %v3554_v10, %v3553_v62 }
0x12f4   :  { %4309 = vmatmul.msk.bf16.gmra.mxu0 %vm392_vm5, %v3556_v32 }
0x12f6   :  { %v4904_v41 = vpop.eup %4903 }
0x12f7   :  { %v3630_v61 = vadd.f32 1.0, %v4904_v41  ;;  %v4906_v23 = vpop.eup %4905 }
0x12f8   :  { %v3628_v46 = vadd.f32 1.0, %v4906_v23 }
0x12f9   :  { %4907 = vrcp.f32 %v3630_v61  ;;  %v3687_v31 = vand.u32 2147483648, %v3630_v61  ;;  %vm3681_vm12 = vweird.f32 %v3630_v61  ;;  %v3685_v5 = vand.u32 2147483647, %v3630_v61 }
0x12fa   :  { %4909 = vpow2.f32 %v4312_v3  ;;  %v3657_v26 = vand.u32 2147483648, %v3628_v46  ;;  %vm3651_vm6 = vweird.f32 %v3628_v46  ;;  %v3655_v39 = vand.u32 2147483647, %v3628_v46 }
0x12fb   :  { %4911 = vrcp.f32 %v3628_v46  ;;  %v3688_v16 = vor.u32 1.1754944e-38, %v3687_v31  ;;  %vm3686_vm11 = vcmp.eq.f32.partialorder %v3685_v5, 8.507059e+37  ;;  %v4391_v31 = vld [vmem:[%s6649_s10 + $0x18] sm:$0xff] }
0x12fc   :  { %v3658_v47 = vor.u32 1.1754944e-38, %v3657_v26  ;;  %vm3656_vm8 = vcmp.eq.f32.partialorder %v3655_v39, 8.507059e+37  ;;  %3865 = vmatpush.bf16.msra.mxu2 %v4391_v31 }
0x12ff   :  { %v4908_v36 = vpop.eup %4907 }
0x1300   :  { %v4910_v54 = vpop.eup %4909  ;;  %v3677_v60 = vmul.f32 %v4908_v36, %v3630_v61  ;;  %vm3682_vm10 = vweird.f32 %v4908_v36 }
0x1301   :  { %v3629_v48 = vadd.f32 1.0, %v4910_v54  ;;  %v4912_v51 = vpop.eup %4911  ;;  %vm3683_vm14 = vmor %vm3681_vm12, %vm3682_vm10 }
0x1302   :  { %v3678_v58 = vsub.f32 1.0, %v3677_v60  ;;  %v3647_v2 = vmul.f32 %v4912_v51, %v3628_v46  ;;  %vm3652_vm0 = vweird.f32 %v4912_v51 }
0x1303   :  { %4913 = vrcp.f32 %v3629_v48  ;;  %vm3653_vm13 = vmor %vm3651_vm6, %vm3652_vm0  ;;  %v3672_v32 = vand.u32 2147483648, %v3629_v48  ;;  %vm3666_vm1 = vweird.f32 %v3629_v48 }
0x1304   :  { %v3679_v24 = vmul.f32 %v4908_v36, %v3678_v58  ;;  %v3648_v7 = vsub.f32 1.0, %v3647_v2 }
0x1306   :  { %v3680_v56 = vadd.f32 %v4908_v36, %v3679_v24  ;;  %v3649_v42 = vmul.f32 %v4912_v51, %v3648_v7 }
0x1308   :  { %v3684_v44 = vsel %vm3683_vm14, %v4908_v36, %v3680_v56  ;;  %v3650_v14 = vadd.f32 %v4912_v51, %v3649_v42 }
0x1309   :  { %v4914_v19 = vpop.eup %4913  ;;  %v3689_v20 = vsel %vm3686_vm11, %v3688_v16, %v3684_v44 }
0x130a   :  { %v3662_v9 = vmul.f32 %v4914_v19, %v3629_v48  ;;  %v3654_v18 = vsel %vm3653_vm13, %v4912_v51, %v3650_v14  ;;  %vm3667_vm9 = vweird.f32 %v4914_v19 }
0x130b   :  { %v3659_v30 = vsel %vm3656_vm8, %v3658_v47, %v3654_v18  ;;  %vm3668_vm15 = vmor %vm3666_vm1, %vm3667_vm9 }
0x130c   :  { %v3663_v57 = vsub.f32 1.0, %v3662_v9 }
0x130e   :  { %v3664_v49 = vmul.f32 %v4914_v19, %v3663_v57 }
0x1310   :  { %v3665_v10 = vadd.f32 %v4914_v19, %v3664_v49 }
0x1361   :  { %v3605_v34 = vpop.f32.mrf.mxu0 }
0x1362   :  { %3695 = vrot.lane.b32.xlu2 %v3605_v34, %s4970_s25  ;;  %v3670_v34 = vand.u32 2147483647, %v3629_v48 }
0x1364   :  { %vm3671_vm3 = vcmp.eq.f32.partialorder %v3670_v34, 8.507059e+37 }
0x1369   :  { %v3607_v35 = vpop.f32.mrf.mxu0 }
0x136a   :  { %3697 = vrot.lane.b32.xlu0 %v3607_v35, %s4970_s25  ;;  %v3669_v35 = vsel %vm3668_vm15, %v4914_v19, %v3665_v10 }
0x1371   :  { %v3610_v43 = vpop.f32.mrf.mxu0 }
0x1372   :  { %3699 = vrot.lane.b32.xlu1 %v3610_v43, %s4970_s25  ;;  %v3673_v43 = vor.u32 1.1754944e-38, %v3672_v32 }
0x1379   :  { %v3612_v22 = vpop.f32.mrf.mxu0 }
0x137a   :  { %3701 = vrot.lane.b32.xlu2 %v3612_v22, %s4970_s25  ;;  %v3674_v22 = vsel %vm3671_vm3, %v3673_v43, %v3669_v35 }
0x13bc   :  { %v3696_v4 = vpop.permute.xlu2 %3695 }
0x13bd   :  { %v3707_v55 = vmul.f32 %v3696_v4, %v3644_v52 }
0x13bf   :  { %3715 = vrot.lane.b32.xlu0 %v3707_v55, %s4970_s25 }
0x13d4   :  { %v3702_v8 = vpop.permute.xlu2 %3701 }
0x13d5   :  { %v3710_v21 = vmul.f32 %v3702_v8, %v3689_v20  ;;  %v4390_v20 = vld [vmem:[%s6649_s10 + $0x10] sm:$0xff] }
0x13d6   :  { %3866 = vmatpush.bf16.msra.mxu2 %v4390_v20 }
0x13d7   :  { %3721 = vrot.lane.b32.xlu0 %v3710_v21, %s4970_s25 }
0x13dc   :  { %v3698_v6 = vpop.permute.xlu0 %3697 }
0x13dd   :  { %v3708_v62 = vmul.f32 %v3698_v6, %v3659_v30 }
0x13df   :  { %3717 = vrot.lane.b32.xlu1 %v3708_v62, %s4970_s25 }
0x13e4   :  { %v3700_v13 = vpop.permute.xlu1 %3699 }
0x13e5   :  { %v3709_v63 = vmul.f32 %v3700_v13, %v3674_v22 }
0x13e7   :  { %3719 = vrot.lane.b32.xlu2 %v3709_v63, %s4970_s25 }
0x1431   :  { %v3716_v1 = vpop.permute.xlu0 %3715 }
0x1432   :  { %v6519_v45 = vadd.f32 %v3716_v1, %v6396_v53 }
0x1434   :  { %v3731_v59 = vsel %vm112_vm2, %v6519_v45, 0.0 }
0x1435   :  { %3732 = vadd.xlane.f32.xlu1 %v3731_v59 }
0x1441   :  { %v3720_v25 = vpop.permute.xlu2 %3719 }
0x1442   :  { %v6524_v0 = vadd.f32 %v3720_v25, %v6406_v28 }
0x1444   :  { %v3737_v27 = vsel %vm112_vm2, %v6524_v0, 0.0 }
0x1445   :  { %3738 = vadd.xlane.f32.xlu0 %v3737_v27  ;;  %v3819_v27 = vperm.slane %v6468_v50, 4 }
0x1449   :  { %v3722_v41 = vpop.permute.xlu0 %3721 }
0x144a   :  { %v6529_v40 = vadd.f32 %v3722_v41, %v6413_v17 }
0x144c   :  { %v3740_v53 = vsel %vm112_vm2, %v6529_v40, 0.0 }
0x144d   :  { %3741 = vadd.xlane.f32.xlu1 %v3740_v53 }
0x1451   :  { %v3718_v61 = vpop.permute.xlu1 %3717 }
0x1452   :  { %v6534_v29 = vadd.f32 %v3718_v61, %v6401_v38 }
0x1454   :  { %v3734_v28 = vsel %vm112_vm2, %v6534_v29, 0.0 }
0x1455   :  { %3735 = vadd.xlane.f32.xlu2 %v3734_v28 }
0x14a8   :  { %v3733_v11 = vpop.xlane.xlu1 %3732 }
0x14a9   :  { %v3743_v3 = vmul.f32 %v3733_v11, %v5082_v37 }
0x14ab   :  { %v6540_v33 = vsub.f32 %v6519_v45, %v3743_v3  ;;  %v3824_v3 = vperm.slane %v6468_v50, 5 }
0x14ad   :  { %v3751_v17 = vmul.f32 %v6540_v33, %v6540_v33 }
0x14af   :  { %v3755_v23 = vsel %vm112_vm2, %v3751_v17, 0.0 }
0x14b0   :  { %3756 = vadd.xlane.f32.xlu2 %v3755_v23 }
0x14b8   :  { %v3739_v15 = vpop.xlane.xlu0 %3738 }
0x14b9   :  { %v3745_v38 = vmul.f32 %v3739_v15, %v5082_v37 }
0x14bb   :  { %v6547_v12 = vsub.f32 %v6524_v0, %v3745_v38 }
0x14bd   :  { %v3753_v46 = vmul.f32 %v6547_v12, %v6547_v12 }
0x14bf   :  { %v3761_v52 = vsel %vm112_vm2, %v3753_v46, 0.0 }
0x14c0   :  { %v3742_v4 = vpop.xlane.xlu1 %3741  ;;  %3762 = vadd.xlane.f32.xlu1 %v3761_v52 }
0x14c1   :  { %v3746_v55 = vmul.f32 %v3742_v4, %v5082_v37 }
0x14c3   :  { %v6554_v36 = vsub.f32 %v6529_v40, %v3746_v55 }
0x14c5   :  { %v3754_v54 = vmul.f32 %v6554_v36, %v6554_v36 }
0x14c7   :  { %v3764_v60 = vsel %vm112_vm2, %v3754_v54, 0.0 }
0x14c8   :  { %3765 = vadd.xlane.f32.xlu2 %v3764_v60  ;;  %v3736_v48 = vpop.xlane.xlu2 %3735 }
0x14c9   :  { %v3744_v58 = vmul.f32 %v3736_v48, %v5082_v37 }
0x14cb   :  { %v3748_v51 = vsub.f32 %v6534_v29, %v3744_v58 }
0x14cd   :  { %v3752_v24 = vmul.f32 %v3748_v51, %v3748_v51 }
0x14cf   :  { %v3758_v2 = vsel %vm112_vm2, %v3752_v24, 0.0 }
0x14d0   :  { %3759 = vadd.xlane.f32.xlu0 %v3758_v2 }
0x1523   :  { %v3757_v56 = vpop.xlane.xlu2 %3756 }
0x1524   :  { %v3767_v7 = vmul.f32 %v3757_v56, %v5082_v37 }
0x1526   :  { %v3771_v19 = vadd.f32 1e-06, %v3767_v7  ;;  %v4395_v7 = vld [vmem:[%s6651_s12 + $0x38] sm:$0xff] }
0x1527   :  { %3959 = vmatpush.bf16.msra.mxu3 %v4395_v7 }
0x1528   :  { %4915 = vrsqrt.f32 %v3771_v19  ;;  %vm3781_vm7 = vweird.f32 %v3771_v19 }
0x152e   :  { %v4916_v42 = vpop.eup %4915 }
0x152f   :  { %v3776_v8 = vmul.f32 %v4916_v42, %v3771_v19  ;;  %vm3782_vm4 = vweird.f32 %v4916_v42  ;;  %v4394_v19 = vld [vmem:[%s6651_s12 + $0x30] sm:$0xff] }
0x1530   :  { %vm3783_vm10 = vmor %vm3781_vm7, %vm3782_vm4  ;;  %3960 = vmatpush.bf16.msra.mxu3 %v4394_v19 }
0x1531   :  { %v3777_v57 = vmul.f32 %v4916_v42, %v3776_v8 }
0x1533   :  { %v3763_v5 = vpop.xlane.xlu1 %3762  ;;  %v3778_v49 = vmul.f32 0.5, %v3777_v57 }
0x1534   :  { %v3769_v16 = vmul.f32 %v3763_v5, %v5082_v37 }
0x1535   :  { %v3779_v30 = vsub.f32 1.5, %v3778_v49 }
0x1536   :  { %v3773_v14 = vadd.f32 1e-06, %v3769_v16 }
0x1537   :  { %v3780_v32 = vmul.f32 %v4916_v42, %v3779_v30 }
0x1538   :  { %vm3801_vm9 = vweird.f32 %v3773_v14 }
0x1539   :  { %v3784_v13 = vsel %vm3783_vm10, %v4916_v42, %v3780_v32 }
0x153a   :  { %v3815_v41 = vmul.f32 %v3784_v13, %v6540_v33 }
0x153b   :  { %v3766_v44 = vpop.xlane.xlu2 %3765 }
0x153c   :  { %v3770_v9 = vmul.f32 %v3766_v44, %v5082_v37  ;;  %v3820_v17 = vmul.f32 %v3819_v27, %v3815_v41  ;;  %v4392_v44 = vld [vmem:[%s6651_s12 + $0x20] sm:$0xff] }
0x153e   :  { %v3774_v21 = vadd.f32 1e-06, %v3770_v9  ;;  %v3825_v52 = vadd.f32 %v3824_v3, %v3820_v17 }
0x1540   :  { %4917 = vrsqrt.f32 %v3774_v21  ;;  %vm3811_vm13 = vweird.f32 %v3774_v21 }
0x1541   :  { %4919 = vrsqrt.f32 %v3773_v14 }
0x1543   :  { %v3760_v26 = vpop.xlane.xlu0 %3759 }
0x1544   :  { %v3768_v39 = vmul.f32 %v3760_v26, %v5082_v37 }
0x1546   :  { %v3772_v18 = vadd.f32 1e-06, %v3768_v39  ;;  %v4918_v47 = vpop.eup %4917 }
0x1547   :  { %v4920_v6 = vpop.eup %4919  ;;  %v3806_v62 = vmul.f32 %v4918_v47, %v3774_v21  ;;  %vm3812_vm0 = vweird.f32 %v4918_v47 }
0x1548   :  { %4921 = vrsqrt.f32 %v3772_v18  ;;  %v3796_v34 = vmul.f32 %v4920_v6, %v3773_v14  ;;  %vm3791_vm14 = vweird.f32 %v3772_v18  ;;  %vm3802_vm6 = vweird.f32 %v4920_v6  ;;  %vm3813_vm8 = vmor %vm3811_vm13, %vm3812_vm0 }
0x1549   :  { %v3807_v43 = vmul.f32 %v4918_v47, %v3806_v62  ;;  %vm3803_vm1 = vmor %vm3801_vm9, %vm3802_vm6 }
0x154a   :  { %v3797_v63 = vmul.f32 %v4920_v6, %v3796_v34 }
0x154b   :  { %v3808_v59 = vmul.f32 0.5, %v3807_v43 }
0x154c   :  { %v3798_v53 = vmul.f32 0.5, %v3797_v63 }
0x154d   :  { %v3809_v28 = vsub.f32 1.5, %v3808_v59 }
0x154e   :  { %v4922_v10 = vpop.eup %4921  ;;  %v3799_v15 = vsub.f32 1.5, %v3798_v53 }
0x154f   :  { %v3786_v35 = vmul.f32 %v4922_v10, %v3772_v18  ;;  %vm3792_vm12 = vweird.f32 %v4922_v10  ;;  %v3810_v46 = vmul.f32 %v4918_v47, %v3809_v28 }
0x1550   :  { %vm3793_vm11 = vmor %vm3791_vm14, %vm3792_vm12  ;;  %v3800_v55 = vmul.f32 %v4920_v6, %v3799_v15 }
0x1551   :  { %v3787_v22 = vmul.f32 %v4922_v10, %v3786_v35  ;;  %v3814_v54 = vsel %vm3813_vm8, %v4918_v47, %v3810_v46 }
0x1552   :  { %v3804_v60 = vsel %vm3803_vm1, %v4920_v6, %v3800_v55  ;;  %v3818_v50 = vmul.f32 %v3814_v54, %v6554_v36  ;;  %v4393_v36 = vld [vmem:[%s6651_s12 + $0x28] sm:$0xff] }
0x1553   :  { %v3788_v1 = vmul.f32 0.5, %v3787_v22  ;;  %v3817_v48 = vmul.f32 %v3804_v60, %v6547_v12  ;;  %v4475_v12 = vld [vmem:[%s6650_s11 + $0x1] ss:$0 sm:$0xff]  ;;  %3961 = vmatpush.bf16.msra.mxu3 %v4393_v36 }
0x1554   :  { %v3823_v58 = vmul.f32 %v3819_v27, %v3818_v50  ;;  %v4476_v60 = vld [vmem:[%s6652_s13 + $0x1] ss:$0 sm:$0xff] }
0x1555   :  { %v3789_v25 = vsub.f32 1.5, %v3788_v1 }
0x1556   :  { %v3828_v24 = vadd.f32 %v3824_v3, %v3823_v58 }
0x1557   :  { %v3790_v61 = vmul.f32 %v4922_v10, %v3789_v25  ;;  %3962 = vmatpush.bf16.msra.mxu3 %v4392_v44 }
0x1559   :  { %v3794_v11 = vsel %vm3793_vm11, %v4922_v10, %v3790_v61 }
0x155a   :  { %v3816_v23 = vmul.f32 %v3794_v11, %v3748_v51  ;;  %v3822_v51 = vmul.f32 %v3819_v27, %v3817_v48 }
0x155c   :  { %v3821_v38 = vmul.f32 %v3819_v27, %v3816_v23  ;;  %v3827_v2 = vadd.f32 %v3824_v3, %v3822_v51 }
0x155e   :  { %v3826_v4 = vadd.f32 %v3824_v3, %v3821_v38  ;;  %v3830_v56 = vpack.c.bf16 %v3828_v24, %v3827_v2 }
0x1560   :  { %v3829_v33 = vpack.c.bf16 %v3826_v4, %v3825_v52 }
0x1562   :  { %4327 = vmatmul.msk.bf16.vlgmr.msra.gmra.mxu2 %vm112_vm2, %v3829_v33 }
0x1572   :  { %4328 = vmatmul.msk.bf16.gmra.mxu2 %vm112_vm2, %v3830_v56 }
0x15e5   :  { %v3868_v31 = vpop.f32.mrf.mxu2 }
0x15e6   :  { %v3869_v5 = vadd.f32 %v4475_v12, %v3868_v31 }
0x15e8   :  { %v3882_v42 = vmul.f32 0.044715, %v3869_v5  ;;  %v3878_v1 = vmul.f32 0.5, %v3869_v5 }
0x15ea   :  { %v3886_v9 = vmul.f32 %v3882_v42, %v3869_v5 }
0x15ec   :  { %v3890_v16 = vmul.f32 %v3886_v9, %v3869_v5 }
0x15ed   :  { %v3870_v20 = vpop.f32.mrf.mxu2 }
0x15ee   :  { %v3894_v8 = vadd.f32 %v3890_v16, %v3869_v5  ;;  %v3871_v21 = vadd.f32 %v4475_v12, %v3870_v20 }
0x15f0   :  { %v3883_v14 = vmul.f32 0.044715, %v3871_v21  ;;  %v3898_v57 = vmul.f32 0.7978846, %v3894_v8  ;;  %v3879_v59 = vmul.f32 0.5, %v3871_v21 }
0x15f2   :  { %v3887_v26 = vmul.f32 %v3883_v14, %v3871_v21  ;;  %4923 = vtanh.f32 %v3898_v57 }
0x15f4   :  { %v3891_v39 = vmul.f32 %v3887_v26, %v3871_v21 }
0x15f5   :  { %v3873_v18 = vpop.f32.mrf.mxu2 }
0x15f6   :  { %v3895_v49 = vadd.f32 %v3891_v39, %v3871_v21  ;;  %v3874_v47 = vadd.f32 %v4475_v12, %v3873_v18 }
0x15f8   :  { %v3899_v30 = vmul.f32 0.7978846, %v3895_v49  ;;  %v3884_v6 = vmul.f32 0.044715, %v3874_v47  ;;  %v4924_v10 = vpop.eup %4923  ;;  %v3880_v46 = vmul.f32 0.5, %v3874_v47 }
0x15f9   :  { %v3906_v22 = vadd.f32 1.0, %v4924_v10 }
0x15fa   :  { %4925 = vtanh.f32 %v3899_v30  ;;  %v3888_v62 = vmul.f32 %v3884_v6, %v3874_v47 }
0x15fb   :  { %v3910_v53 = vmul.f32 %v3906_v22, %v3878_v1 }
0x15fc   :  { %v3892_v32 = vmul.f32 %v3888_v62, %v3874_v47 }
0x15fd   :  { %v3875_v34 = vpop.f32.mrf.mxu2 }
0x15fe   :  { %v3876_v35 = vadd.f32 %v4475_v12, %v3875_v34  ;;  %v3896_v43 = vadd.f32 %v3892_v32, %v3874_v47 }
0x1600   :  { %v4926_v13 = vpop.eup %4925  ;;  %v3885_v63 = vmul.f32 0.044715, %v3876_v35  ;;  %v3900_v41 = vmul.f32 0.7978846, %v3896_v43  ;;  %v3881_v52 = vmul.f32 0.5, %v3876_v35 }
0x1601   :  { %v3907_v25 = vadd.f32 1.0, %v4926_v13 }
0x1602   :  { %v3889_v27 = vmul.f32 %v3885_v63, %v3876_v35  ;;  %4927 = vtanh.f32 %v3900_v41 }
0x1603   :  { %v3911_v61 = vmul.f32 %v3907_v25, %v3879_v59 }
0x1604   :  { %v3893_v28 = vmul.f32 %v3889_v27, %v3876_v35 }
0x1605   :  { %v3914_v11 = vpack.c.bf16 %v3911_v61, %v3910_v53  ;;  %v3987_v61 = vld [vmem:[%s6642_s3] sm:$0x3]  ;;  %s4971_s3 = smov [#allocation2]  }
0x1606   :  { %v3897_v3 = vadd.f32 %v3893_v28, %v3876_v35  ;;  %s4095_s18 = sshll.u32 %s4971_s3, 4  ;;  %s4096_s18 = int_to_ptr.vmem [resolvable:$true] %s4095_s18 }
0x1607   :  { %4353 = vmatmul.msk.bf16.vlgmr.msra.gmra.mxu3 %vm392_vm5, %v3914_v11 }
0x1608   :  { %v3901_v17 = vmul.f32 0.7978846, %v3897_v3  ;;  %v4928_v23 = vpop.eup %4927 }
0x1609   :  { %v3908_v15 = vadd.f32 1.0, %v4928_v23 }
0x160a   :  { %4929 = vtanh.f32 %v3901_v17 }
0x160b   :  { %v3912_v55 = vmul.f32 %v3908_v15, %v3880_v46  ;;  %v4076_v15 = vperm.slane %v3987_v61, 0 }
0x1610   :  { %v4930_v38 = vpop.eup %4929 }
0x1611   :  { %v3909_v4 = vadd.f32 1.0, %v4930_v38 }
0x1613   :  { %v3913_v33 = vmul.f32 %v3909_v4, %v3881_v52  ;;  %v4081_v52 = vperm.slane %v3987_v61, 1 }
0x1615   :  { %v3915_v54 = vpack.c.bf16 %v3913_v33, %v3912_v55 }
0x1617   :  { %4354 = vmatmul.msk.bf16.gmra.mxu3 %vm392_vm5, %v3915_v54 }
0x168a   :  { %v3964_v50 = vpop.f32.mrf.mxu3 }
0x168b   :  { %v3974_v48 = vadd.f32 %v3964_v50, %v6519_v45 }
0x168d   :  { %v3983_v58 = vadd.f32 %v4476_v60, %v3974_v48 }
0x168f   :  { %v3988_v51 = vsel %vm112_vm2, %v3983_v58, 0.0 }
0x1690   :  { %3989 = vadd.xlane.f32.xlu0 %v3988_v51 }
0x1692   :  { %v3966_v24 = vpop.f32.mrf.mxu3 }
0x1693   :  { %v3975_v2 = vadd.f32 %v3966_v24, %v6534_v29 }
0x1695   :  { %v3984_v56 = vadd.f32 %v4476_v60, %v3975_v2 }
0x1697   :  { %v3991_v7 = vsel %vm112_vm2, %v3984_v56, 0.0 }
0x1698   :  { %3992 = vadd.xlane.f32.xlu1 %v3991_v7 }
0x169a   :  { %v3969_v19 = vpop.f32.mrf.mxu3 }
0x169b   :  { %v3976_v12 = vadd.f32 %v3969_v19, %v6524_v0 }
0x169d   :  { %v3985_v36 = vadd.f32 %v4476_v60, %v3976_v12 }
0x169f   :  { %v3994_v31 = vsel %vm112_vm2, %v3985_v36, 0.0 }
0x16a0   :  { %3995 = vadd.xlane.f32.xlu2 %v3994_v31 }
0x16a2   :  { %v3971_v5 = vpop.f32.mrf.mxu3 }
0x16a3   :  { %v3977_v45 = vadd.f32 %v3971_v5, %v6529_v40 }
0x16a5   :  { %v3986_v44 = vadd.f32 %v4476_v60, %v3977_v45 }
0x16a7   :  { %v3997_v42 = vsel %vm112_vm2, %v3986_v44, 0.0 }
0x16a8   :  { %3998 = vadd.xlane.f32.xlu0 %v3997_v42 }
0x1703   :  { %v3990_v9 = vpop.xlane.xlu0 %3989 }
0x1704   :  { %v4000_v29 = vmul.f32 %v3990_v9, %v5082_v37 }
0x1706   :  { %v4004_v16 = vsub.f32 %v3983_v58, %v4000_v29 }
0x1708   :  { %v4008_v20 = vmul.f32 %v4004_v16, %v4004_v16 }
0x170a   :  { %v4012_v8 = vsel %vm112_vm2, %v4008_v20, 0.0 }
0x170b   :  { %4013 = vadd.xlane.f32.xlu1 %v4012_v8  ;;  %v3993_v0 = vpop.xlane.xlu1 %3992 }
0x170c   :  { %v4001_v21 = vmul.f32 %v3993_v0, %v5082_v37 }
0x170e   :  { %v4005_v14 = vsub.f32 %v3984_v56, %v4001_v21 }
0x1710   :  { %v4009_v57 = vmul.f32 %v4005_v14, %v4005_v14 }
0x1712   :  { %v4015_v26 = vsel %vm112_vm2, %v4009_v57, 0.0 }
0x1713   :  { %4016 = vadd.xlane.f32.xlu2 %v4015_v26  ;;  %v3996_v40 = vpop.xlane.xlu2 %3995 }
0x1714   :  { %v4002_v39 = vmul.f32 %v3996_v40, %v5082_v37 }
0x1716   :  { %v6612_v18 = vsub.f32 %v3985_v36, %v4002_v39 }
0x1718   :  { %v4010_v49 = vmul.f32 %v6612_v18, %v6612_v18 }
0x171a   :  { %v4018_v47 = vsel %vm112_vm2, %v4010_v49, 0.0 }
0x171b   :  { %4019 = vadd.xlane.f32.xlu0 %v4018_v47  ;;  %v3999_v30 = vpop.xlane.xlu0 %3998 }
0x171c   :  { %v4003_v6 = vmul.f32 %v3999_v30, %v5082_v37 }
0x171e   :  { %v6618_v62 = vsub.f32 %v3986_v44, %v4003_v6 }
0x1720   :  { %v4011_v10 = vmul.f32 %v6618_v62, %v6618_v62 }
0x1722   :  { %v4021_v32 = vsel %vm112_vm2, %v4011_v10, 0.0 }
0x1723   :  { %4022 = vadd.xlane.f32.xlu1 %v4021_v32 }
0x177e   :  { %v4014_v34 = vpop.xlane.xlu1 %4013 }
0x177f   :  { %v4024_v35 = vmul.f32 %v4014_v34, %v5082_v37 }
0x1781   :  { %v4028_v43 = vadd.f32 1e-06, %v4024_v35 }
0x1783   :  { %4931 = vrsqrt.f32 %v4028_v43  ;;  %vm4038_vm15 = vweird.f32 %v4028_v43 }
0x1786   :  { %v4017_v22 = vpop.xlane.xlu2 %4016 }
0x1787   :  { %v4025_v13 = vmul.f32 %v4017_v22, %v5082_v37 }
0x1789   :  { %v4932_v63 = vpop.eup %4931  ;;  %v4029_v1 = vadd.f32 1e-06, %v4025_v13 }
0x178a   :  { %v4033_v59 = vmul.f32 %v4932_v63, %v4028_v43  ;;  %vm4039_vm5 = vweird.f32 %v4932_v63 }
0x178b   :  { %4933 = vrsqrt.f32 %v4029_v1  ;;  %vm4040_vm3 = vmor %vm4038_vm15, %vm4039_vm5  ;;  %vm4048_vm7 = vweird.f32 %v4029_v1 }
0x178c   :  { %v4034_v25 = vmul.f32 %v4932_v63, %v4033_v59 }
0x178e   :  { %v4035_v27 = vmul.f32 0.5, %v4034_v25  ;;  %v4020_v41 = vpop.xlane.xlu0 %4019 }
0x178f   :  { %v4026_v53 = vmul.f32 %v4020_v41, %v5082_v37 }
0x1790   :  { %v4036_v28 = vsub.f32 1.5, %v4035_v27 }
0x1791   :  { %v4934_v11 = vpop.eup %4933  ;;  %v4030_v3 = vadd.f32 1e-06, %v4026_v53 }
0x1792   :  { %v4037_v17 = vmul.f32 %v4932_v63, %v4036_v28  ;;  %v4043_v23 = vmul.f32 %v4934_v11, %v4029_v1  ;;  %vm4049_vm4 = vweird.f32 %v4934_v11 }
0x1793   :  { %4935 = vrsqrt.f32 %v4030_v3  ;;  %vm4050_vm10 = vmor %vm4048_vm7, %vm4049_vm4  ;;  %vm4058_vm14 = vweird.f32 %v4030_v3 }
0x1794   :  { %v4041_v38 = vsel %vm4040_vm3, %v4932_v63, %v4037_v17  ;;  %v4044_v46 = vmul.f32 %v4934_v11, %v4043_v23 }
0x1795   :  { %v4072_v4 = vmul.f32 %v4041_v38, %v4004_v16 }
0x1796   :  { %v4045_v55 = vmul.f32 0.5, %v4044_v46  ;;  %v4023_v33 = vpop.xlane.xlu1 %4022 }
0x1797   :  { %v4077_v54 = vmul.f32 %v4076_v15, %v4072_v4  ;;  %v4027_v60 = vmul.f32 %v4023_v33, %v5082_v37 }
0x1798   :  { %v4046_v50 = vsub.f32 1.5, %v4045_v55 }
0x1799   :  { %v4936_v48 = vpop.eup %4935  ;;  %v4082_v58 = vadd.f32 %v4081_v52, %v4077_v54  ;;  %v4031_v51 = vadd.f32 1e-06, %v4027_v60 }
0x179a   :  { %v4047_v24 = vmul.f32 %v4934_v11, %v4046_v50  ;;  %v4053_v2 = vmul.f32 %v4936_v48, %v4030_v3  ;;  %vm4059_vm12 = vweird.f32 %v4936_v48 }
0x179b   :  { %4086 = vst.msk [vmem:[#allocation2] sm:$0xff] %vm112_vm2, %v4082_v58  ;;  %4937 = vrsqrt.f32 %v4031_v51  ;;  %vm4060_vm11 = vmor %vm4058_vm14, %vm4059_vm12  ;;  %vm4068_vm6 = vweird.f32 %v4031_v51 }
0x179c   :  { %v4051_v56 = vsel %vm4050_vm10, %v4934_v11, %v4047_v24  ;;  %v4054_v7 = vmul.f32 %v4936_v48, %v4053_v2 }
0x179d   :  { %v4073_v19 = vmul.f32 %v4051_v56, %v4005_v14 }
0x179e   :  { %v4055_v12 = vmul.f32 0.5, %v4054_v7 }
0x179f   :  { %v4078_v36 = vmul.f32 %v4076_v15, %v4073_v19 }
0x17a0   :  { %v4056_v31 = vsub.f32 1.5, %v4055_v12 }
0x17a1   :  { %v4938_v37 = vpop.eup %4937  ;;  %v4083_v5 = vadd.f32 %v4081_v52, %v4078_v36 }
0x17a2   :  { %v4057_v45 = vmul.f32 %v4936_v48, %v4056_v31  ;;  %v4063_v44 = vmul.f32 %v4938_v37, %v4031_v51  ;;  %vm4069_vm0 = vweird.f32 %v4938_v37 }
0x17a3   :  { %4087 = vst.msk [vmem:[#allocation2 + $0x8] sm:$0xff] %vm112_vm2, %v4083_v5  ;;  %vm4070_vm13 = vmor %vm4068_vm6, %vm4069_vm0 }
0x17a4   :  { %v4061_v42 = vsel %vm4060_vm11, %v4936_v48, %v4057_v45  ;;  %v4064_v9 = vmul.f32 %v4938_v37, %v4063_v44 }
0x17a5   :  { %v4074_v29 = vmul.f32 %v4061_v42, %v6612_v18 }
0x17a6   :  { %v4065_v16 = vmul.f32 0.5, %v4064_v9 }
0x17a7   :  { %v4079_v20 = vmul.f32 %v4076_v15, %v4074_v29 }
0x17a8   :  { %v4066_v8 = vsub.f32 1.5, %v4065_v16 }
0x17a9   :  { %v4084_v0 = vadd.f32 %v4081_v52, %v4079_v20 }
0x17aa   :  { %v4067_v21 = vmul.f32 %v4938_v37, %v4066_v8 }
0x17ab   :  { %4089 = vst.msk [vmem:[#allocation2 + $0x10] sm:$0xff] %vm112_vm2, %v4084_v0 }
0x17ac   :  { %v4071_v14 = vsel %vm4070_vm13, %v4938_v37, %v4067_v21 }
0x17ad   :  { %v4075_v57 = vmul.f32 %v4071_v14, %v6618_v62 }
0x17af   :  { %v4080_v26 = vmul.f32 %v4076_v15, %v4075_v57 }
0x17b1   :  { %v4085_v40 = vadd.f32 %v4081_v52, %v4080_v26 }
0x17b3   :  { %4090 = vst.msk [vmem:[#allocation2 + $0x18] sm:$0xff] %vm112_vm2, %v4085_v40 }
0x17b4   :  { %4103 = dma.vmem_to_hbm [thread:$0]  %s4096_s18, 512, %s4098_s4, [#allocation3], %s4972_s8, %s4972_s8, %s4973_s21  }
0x17b5   :  { %4965 = dma.done.wait [#allocation3], 512  }
0x17b6   :  { %4966 = vsyncadd [#allocation3], 4294966784 }
0x17b7   :  { %4108 = vsyncpa [#allocation3], 1 }

</bundles_post_ra>
